<compile_context>
chip_gen: v7x
topology: tpu7x:2x2x1
jax: 0.10.0
libtpu: 0.0.40
codegen_flags: <defaults>
</compile_context>

<pallas_src>
import jax
import jax.numpy as jnp
from jax.experimental import pallas as pl
from jax.experimental.pallas import tpu as pltpu

# ----------------------------------------------------------------------------
# Geometry (24x24 mono input is implied by fc in_features = 128*3*3 = 1152).
# ----------------------------------------------------------------------------
H1 = W1 = 24
H2 = W2 = 12
H3 = W3 = 6
HO = WO = 3
C1, C2, C3 = 32, 64, 128
NCLS = 10
NPAD = 128                                   # lane-dense FC output width

WP1, WP2, WP3 = W1 + 2, W2 + 2, W3 + 2       # padded widths
HP1, HP2, HP3 = H1 + 2, H2 + 2, H3 + 2       # padded heights
R1 = (H1 - 1) * WP1 + W1                     # 622 rows of the conv-1 slab
R2 = (H2 - 1) * WP2 + W2                     # 166
R3 = (H3 - 1) * WP3 + W3                     # 46


# ----------------------------------------------------------------------------
# The single fused kernel (one grid step == one image).
# ----------------------------------------------------------------------------
def _net_kernel(x_ref, w1_ref, b1_ref, w2_ref, b2_ref, w3_ref, b3_ref,
                wfc_ref, bfc_ref, out_ref,
                y1_ref, xp2_ref, y2_ref, xp3_ref, y3_ref):
    f32 = jnp.float32

    # Zero the padded scratch activations: borders stay zero == conv zero pad.
    xp2_ref[...] = jnp.zeros(xp2_ref.shape, f32)
    xp3_ref[...] = jnp.zeros(xp3_ref.shape, f32)

    def pooled_row(y_ref, wp, wo_n, ho, bias):
        """One output row of 2x2 max-pool over a flat conv slab, + channel bias."""
        cands = [y_ref[pl.ds((2 * ho + di) * wp + dj, wo_n, stride=2), :]
                 for di in (0, 1) for dj in (0, 1)]
        m = jnp.maximum(jnp.maximum(cands[0], cands[1]),
                        jnp.maximum(cands[2], cands[3]))
        return m + bias

    # ---- stage 1: conv1 (Cin=1) as 9 VPU broadcast-FMAs, pool 2x2, relu ------
    x1 = x_ref[0]                          # (HP1*WP1, 1) zero-padded flat image
    w1 = w1_ref[...]                       # (9, C1)
    acc = None
    for t in range(9):
        dy, dx = divmod(t, 3)
        s0 = dy * WP1 + dx
        term = x1[s0:s0 + R1, :] * w1[t:t + 1, :]      # (R1,1)*(1,C1) -> (R1,C1)
        acc = term if acc is None else acc + term
    y1_ref[...] = acc

    b1 = b1_ref[...]
    for ho in range(H2):
        chunk = jnp.maximum(pooled_row(y1_ref, WP1, W2, ho, b1), 0.0)
        xp2_ref[pl.ds((ho + 1) * WP2 + 1, W2), :] = chunk

    # ---- stage 2: conv2 = 9 accumulating MXU matmuls, pool 2x2, relu ---------
    xp2 = xp2_ref[...]
    acc = None
    for t in range(9):
        dy, dx = divmod(t, 3)
        s0 = dy * WP2 + dx
        term = jnp.dot(xp2[s0:s0 + R2, :], w2_ref[t],
                       preferred_element_type=f32)
        acc = term if acc is None else acc + term
    y2_ref[...] = acc

    b2 = b2_ref[...]
    for ho in range(H3):
        chunk = jnp.maximum(pooled_row(y2_ref, WP2, W3, ho, b2), 0.0)
        xp3_ref[pl.ds((ho + 1) * WP3 + 1, W3), :] = chunk

    # ---- stage 3: conv3, pool 2x2 (no relu), FC folded in --------------------
    xp3 = xp3_ref[...]
    acc = None
    for t in range(9):
        dy, dx = divmod(t, 3)
        s0 = dy * WP3 + dx
        term = jnp.dot(xp3[s0:s0 + R3, :], w3_ref[t],
                       preferred_element_type=f32)
        acc = term if acc is None else acc + term
    y3_ref[...] = acc

    b3 = b3_ref[...]
    fc = bfc_ref[...]                      # (1, NPAD) accumulator, starts at bias
    for ho in range(HO):
        chunk = pooled_row(y3_ref, WP3, WO, ho, b3)    # (WO, C3)
        for wo in range(WO):
            s = ho * WO + wo
            fc = fc + jnp.dot(chunk[wo:wo + 1, :], wfc_ref[s],
                              preferred_element_type=f32)
    out_ref[0] = fc


# ----------------------------------------------------------------------------
# Wrapper: layout plumbing only (tiny, one-time weight reshapes + input pad).
# ----------------------------------------------------------------------------
def net_forward(x_nchw, params):
    B = x_nchw.shape[0]
    # Zero-padded, flattened (Hp*Wp, 1) image per batch element.
    xp1 = jnp.pad(x_nchw[:, 0], ((0, 0), (1, 1), (1, 1)))
    xp1 = xp1.reshape(B, HP1 * WP1, 1).astype(jnp.float32)

    w1 = params["w1"].reshape(9, C1)                 # tap index = dy*3 + dx
    w2 = params["w2"].reshape(9, C1, C2)
    w3 = params["w3"].reshape(9, C2, C3)
    b1 = params["b1"].reshape(1, C1)
    b2 = params["b2"].reshape(1, C2)
    b3 = params["b3"].reshape(1, C3)
    # FC weight: PyTorch flatten order is (c, h, w); the kernel's stage-3
    # activation rows are s = h*3 + w with channels on lanes, so permute to
    # (s, c, n) and zero-pad the class dim to 128 lanes (lane-dense store).
    wfc = params["fc_w"].reshape(C3, HO, WO, NCLS).transpose(1, 2, 0, 3)
    wfc = wfc.reshape(HO * WO, C3, NCLS)
    wfc = jnp.pad(wfc, ((0, 0), (0, 0), (0, NPAD - NCLS)))
    bfc = jnp.pad(params["fc_b"], (0, NPAD - NCLS)).reshape(1, NPAD)

    def const_spec(shape):
        n = len(shape)
        return pl.BlockSpec(shape, lambda i, n=n: (0,) * n)

    out = pl.pallas_call(
        _net_kernel,
        out_shape=jax.ShapeDtypeStruct((B, 1, NPAD), jnp.float32),
        grid=(B,),
        in_specs=[
            pl.BlockSpec((1, HP1 * WP1, 1), lambda i: (i, 0, 0)),
            const_spec((9, C1)), const_spec((1, C1)),
            const_spec((9, C1, C2)), const_spec((1, C2)),
            const_spec((9, C2, C3)), const_spec((1, C3)),
            const_spec((HO * WO, C3, NPAD)), const_spec((1, NPAD)),
        ],
        out_specs=pl.BlockSpec((1, 1, NPAD), lambda i: (i, 0, 0)),
        scratch_shapes=[
            pltpu.VMEM((R1, C1), jnp.float32),          # conv1 slab
            pltpu.VMEM((HP2 * WP2, C1), jnp.float32),   # padded stage-2 input
            pltpu.VMEM((R2, C2), jnp.float32),          # conv2 slab
            pltpu.VMEM((HP3 * WP3, C2), jnp.float32),   # padded stage-3 input
            pltpu.VMEM((R3, C3), jnp.float32),          # conv3 slab
        ],
        compiler_params=pltpu.CompilerParams(
            dimension_semantics=("parallel",)),
    )(xp1, w1, b1, w2, b2, w3, b3, wfc, bfc)
    return out.reshape(B, NPAD)[:, :NCLS]


# ----------------------------------------------------------------------------
# Pure-JAX reference (for correctness check).
# ----------------------------------------------------------------------------
def net_reference(x_nchw, params):
    x = jnp.transpose(x_nchw, (0, 2, 3, 1))

    def block(x, w, b, relu):
        y = jax.lax.conv_general_dilated(
            x, w, (1, 1), ((1, 1), (1, 1)),
            dimension_numbers=("NHWC", "HWIO", "NHWC")) + b
        y = jax.lax.reduce_window(y, -jnp.inf, jax.lax.max,
                                  (1, 2, 2, 1), (1, 2, 2, 1), "VALID")
        return jnp.maximum(y, 0.0) if relu else y

    x = block(x, params["w1"], params["b1"], True)
    x = block(x, params["w2"], params["b2"], True)
    x = block(x, params["w3"], params["b3"], False)
    B = x.shape[0]
    x = jnp.transpose(x, (0, 3, 1, 2)).reshape(B, -1)     # PyTorch (C,H,W) flatten
    return x @ params["fc_w"] + params["fc_b"]


# ----------------------------------------------------------------------------
# Deterministic parameter init (PyTorch-style uniform(+-1/sqrt(fan_in))).
# ----------------------------------------------------------------------------
def init_params(key):
    def uinit(k, shape, fan_in):
        bound = 1.0 / float(fan_in) ** 0.5
        return jax.random.uniform(k, shape, jnp.float32, -bound, bound)

    ks = jax.random.split(key, 8)
    return dict(
        w1=uinit(ks[0], (3, 3, 1, C1), 9),
        b1=uinit(ks[1], (C1,), 9),
        w2=uinit(ks[2], (3, 3, C1, C2), 9 * C1),
        b2=uinit(ks[3], (C2,), 9 * C1),
        w3=uinit(ks[4], (3, 3, C2, C3), 9 * C2),
        b3=uinit(ks[5], (C3,), 9 * C2),
        fc_w=uinit(ks[6], (C3 * HO * WO, NCLS), C3 * HO * WO),
        fc_b=uinit(ks[7], (NCLS,), C3 * HO * WO),
    )


if __name__ == "__main__":
    key = jax.random.PRNGKey(0)
    pkey, xkey = jax.random.split(key)
    params = init_params(pkey)
    # Input 24x24 mono is implied by fc in_features = 128*3*3 = 1152.
    x = jax.random.normal(xkey, (2, 1, 24, 24), jnp.float32)      # NCHW

    out = jax.jit(net_forward)(x, params)
    out = jax.block_until_ready(out)
    assert out.shape == (2, NCLS)

    ref = net_reference(x, params)
    if not bool(jnp.allclose(out, ref, rtol=2e-2, atol=2e-2)):
        raise AssertionError(
            f"mismatch vs reference, max abs err="
            f"{float(jnp.max(jnp.abs(out - ref)))}")
    print("KERNEL_OK")
</pallas_src>

<mosaic_0001>
module attributes {stable_mosaic.version = 11 : i64} {
  func.func @_net_kernel(%arg0: i32, %arg1: memref<1x676x1xf32, #tpu.memory_space<vmem>>, %arg2: memref<9x32xf32, #tpu.memory_space<vmem>>, %arg3: memref<1x32xf32, #tpu.memory_space<vmem>>, %arg4: memref<9x32x64xf32, #tpu.memory_space<vmem>>, %arg5: memref<1x64xf32, #tpu.memory_space<vmem>>, %arg6: memref<9x64x128xf32, #tpu.memory_space<vmem>>, %arg7: memref<1x128xf32, #tpu.memory_space<vmem>>, %arg8: memref<9x128x128xf32, #tpu.memory_space<vmem>>, %arg9: memref<1x128xf32, #tpu.memory_space<vmem>>, %arg10: memref<1x1x128xf32, #tpu.memory_space<vmem>>, %arg11: memref<622x32xf32, #tpu.memory_space<vmem>>, %arg12: memref<196x32xf32, #tpu.memory_space<vmem>>, %arg13: memref<166x64xf32, #tpu.memory_space<vmem>>, %arg14: memref<64x64xf32, #tpu.memory_space<vmem>>, %arg15: memref<46x128xf32, #tpu.memory_space<vmem>>) attributes {dimension_semantics = [#tpu.dimension_semantics<parallel>], iteration_bounds = array<i64: 2>, scalar_prefetch = 0 : i64, scratch_operands = 5 : i64, tpu.core_type = #tpu.core_type<tc>, window_params = [{transform_indices = @transform_0, window_bounds = array<i64: 1, 676, 1>}, {pipeline_mode = #tpu.pipeline_mode<synchronous>, transform_indices = @transform_1, window_bounds = array<i64: 9, 32>}, {pipeline_mode = #tpu.pipeline_mode<synchronous>, transform_indices = @transform_2, window_bounds = array<i64: 1, 32>}, {pipeline_mode = #tpu.pipeline_mode<synchronous>, transform_indices = @transform_3, window_bounds = array<i64: 9, 32, 64>}, {pipeline_mode = #tpu.pipeline_mode<synchronous>, transform_indices = @transform_4, window_bounds = array<i64: 1, 64>}, {pipeline_mode = #tpu.pipeline_mode<synchronous>, transform_indices = @transform_5, window_bounds = array<i64: 9, 64, 128>}, {pipeline_mode = #tpu.pipeline_mode<synchronous>, transform_indices = @transform_6, window_bounds = array<i64: 1, 128>}, {pipeline_mode = #tpu.pipeline_mode<synchronous>, transform_indices = @transform_7, window_bounds = array<i64: 9, 128, 128>}, {pipeline_mode = #tpu.pipeline_mode<synchronous>, transform_indices = @transform_8, window_bounds = array<i64: 1, 128>}, {transform_indices = @transform_9, window_bounds = array<i64: 1, 1, 128>}]} {
    %cst = arith.constant 0.000000e+00 : f32
    %0 = vector.broadcast %cst : f32 to vector<196x32xf32>
    %c0 = arith.constant 0 : index
    %c0_0 = arith.constant 0 : index
    %1 = vector.load %arg12[%c0, %c0_0] : memref<196x32xf32, #tpu.memory_space<vmem>>, vector<196x32xf32>
    tpu.vector_store %arg12[%c0, %c0_0], %0 {strides = array<i32>} : memref<196x32xf32, #tpu.memory_space<vmem>>, vector<196x32xf32>,
    %cst_1 = arith.constant 0.000000e+00 : f32
    %2 = vector.broadcast %cst_1 : f32 to vector<64x64xf32>
    %c0_2 = arith.constant 0 : index
    %c0_3 = arith.constant 0 : index
    %3 = vector.load %arg14[%c0_2, %c0_3] : memref<64x64xf32, #tpu.memory_space<vmem>>, vector<64x64xf32>
    tpu.vector_store %arg14[%c0_2, %c0_3], %2 {strides = array<i32>} : memref<64x64xf32, #tpu.memory_space<vmem>>, vector<64x64xf32>,
    %c0_4 = arith.constant 0 : index
    %c0_5 = arith.constant 0 : index
    %c0_6 = arith.constant 0 : index
    %4 = vector.load %arg1[%c0_4, %c0_5, %c0_6] : memref<1x676x1xf32, #tpu.memory_space<vmem>>, vector<1x676x1xf32>
    %5 = vector.shape_cast %4 : vector<1x676x1xf32> to vector<676x1xf32>
    %c0_7 = arith.constant 0 : index
    %c0_8 = arith.constant 0 : index
    %6 = vector.load %arg2[%c0_7, %c0_8] : memref<9x32xf32, #tpu.memory_space<vmem>>, vector<9x32xf32>
    %7 = vector.extract_strided_slice %5 {offsets = [0, 0], sizes = [622, 1], strides = [1, 1]} : vector<676x1xf32> to vector<622x1xf32>
    %8 = vector.extract_strided_slice %6 {offsets = [0, 0], sizes = [1, 32], strides = [1, 1]} : vector<9x32xf32> to vector<1x32xf32>
    %9 = vector.broadcast %7 : vector<622x1xf32> to vector<622x32xf32>
    %10 = vector.broadcast %8 : vector<1x32xf32> to vector<622x32xf32>
    %11 = arith.mulf %9, %10 : vector<622x32xf32>
    %12 = vector.extract_strided_slice %5 {offsets = [1, 0], sizes = [622, 1], strides = [1, 1]} : vector<676x1xf32> to vector<622x1xf32>
    %13 = vector.extract_strided_slice %6 {offsets = [1, 0], sizes = [1, 32], strides = [1, 1]} : vector<9x32xf32> to vector<1x32xf32>
    %14 = vector.broadcast %12 : vector<622x1xf32> to vector<622x32xf32>
    %15 = vector.broadcast %13 : vector<1x32xf32> to vector<622x32xf32>
    %16 = arith.mulf %14, %15 : vector<622x32xf32>
    %17 = arith.addf %11, %16 : vector<622x32xf32>
    %18 = vector.extract_strided_slice %5 {offsets = [2, 0], sizes = [622, 1], strides = [1, 1]} : vector<676x1xf32> to vector<622x1xf32>
    %19 = vector.extract_strided_slice %6 {offsets = [2, 0], sizes = [1, 32], strides = [1, 1]} : vector<9x32xf32> to vector<1x32xf32>
    %20 = vector.broadcast %18 : vector<622x1xf32> to vector<622x32xf32>
    %21 = vector.broadcast %19 : vector<1x32xf32> to vector<622x32xf32>
    %22 = arith.mulf %20, %21 : vector<622x32xf32>
    %23 = arith.addf %17, %22 : vector<622x32xf32>
    %24 = vector.extract_strided_slice %5 {offsets = [26, 0], sizes = [622, 1], strides = [1, 1]} : vector<676x1xf32> to vector<622x1xf32>
    %25 = vector.extract_strided_slice %6 {offsets = [3, 0], sizes = [1, 32], strides = [1, 1]} : vector<9x32xf32> to vector<1x32xf32>
    %26 = vector.broadcast %24 : vector<622x1xf32> to vector<622x32xf32>
    %27 = vector.broadcast %25 : vector<1x32xf32> to vector<622x32xf32>
    %28 = arith.mulf %26, %27 : vector<622x32xf32>
    %29 = arith.addf %23, %28 : vector<622x32xf32>
    %30 = vector.extract_strided_slice %5 {offsets = [27, 0], sizes = [622, 1], strides = [1, 1]} : vector<676x1xf32> to vector<622x1xf32>
    %31 = vector.extract_strided_slice %6 {offsets = [4, 0], sizes = [1, 32], strides = [1, 1]} : vector<9x32xf32> to vector<1x32xf32>
    %32 = vector.broadcast %30 : vector<622x1xf32> to vector<622x32xf32>
    %33 = vector.broadcast %31 : vector<1x32xf32> to vector<622x32xf32>
    %34 = arith.mulf %32, %33 : vector<622x32xf32>
    %35 = arith.addf %29, %34 : vector<622x32xf32>
    %36 = vector.extract_strided_slice %5 {offsets = [28, 0], sizes = [622, 1], strides = [1, 1]} : vector<676x1xf32> to vector<622x1xf32>
    %37 = vector.extract_strided_slice %6 {offsets = [5, 0], sizes = [1, 32], strides = [1, 1]} : vector<9x32xf32> to vector<1x32xf32>
    %38 = vector.broadcast %36 : vector<622x1xf32> to vector<622x32xf32>
    %39 = vector.broadcast %37 : vector<1x32xf32> to vector<622x32xf32>
    %40 = arith.mulf %38, %39 : vector<622x32xf32>
    %41 = arith.addf %35, %40 : vector<622x32xf32>
    %42 = vector.extract_strided_slice %5 {offsets = [52, 0], sizes = [622, 1], strides = [1, 1]} : vector<676x1xf32> to vector<622x1xf32>
    %43 = vector.extract_strided_slice %6 {offsets = [6, 0], sizes = [1, 32], strides = [1, 1]} : vector<9x32xf32> to vector<1x32xf32>
    %44 = vector.broadcast %42 : vector<622x1xf32> to vector<622x32xf32>
    %45 = vector.broadcast %43 : vector<1x32xf32> to vector<622x32xf32>
    %46 = arith.mulf %44, %45 : vector<622x32xf32>
    %47 = arith.addf %41, %46 : vector<622x32xf32>
    %48 = vector.extract_strided_slice %5 {offsets = [53, 0], sizes = [622, 1], strides = [1, 1]} : vector<676x1xf32> to vector<622x1xf32>
    %49 = vector.extract_strided_slice %6 {offsets = [7, 0], sizes = [1, 32], strides = [1, 1]} : vector<9x32xf32> to vector<1x32xf32>
    %50 = vector.broadcast %48 : vector<622x1xf32> to vector<622x32xf32>
    %51 = vector.broadcast %49 : vector<1x32xf32> to vector<622x32xf32>
    %52 = arith.mulf %50, %51 : vector<622x32xf32>
    %53 = arith.addf %47, %52 : vector<622x32xf32>
    %54 = vector.extract_strided_slice %5 {offsets = [54, 0], sizes = [622, 1], strides = [1, 1]} : vector<676x1xf32> to vector<622x1xf32>
    %55 = vector.extract_strided_slice %6 {offsets = [8, 0], sizes = [1, 32], strides = [1, 1]} : vector<9x32xf32> to vector<1x32xf32>
    %56 = vector.broadcast %54 : vector<622x1xf32> to vector<622x32xf32>
    %57 = vector.broadcast %55 : vector<1x32xf32> to vector<622x32xf32>
    %58 = arith.mulf %56, %57 : vector<622x32xf32>
    %59 = arith.addf %53, %58 : vector<622x32xf32>
    %c0_9 = arith.constant 0 : index
    %c0_10 = arith.constant 0 : index
    %60 = vector.load %arg11[%c0_9, %c0_10] : memref<622x32xf32, #tpu.memory_space<vmem>>, vector<622x32xf32>
    tpu.vector_store %arg11[%c0_9, %c0_10], %59 {strides = array<i32>} : memref<622x32xf32, #tpu.memory_space<vmem>>, vector<622x32xf32>,
    %c0_11 = arith.constant 0 : index
    %c0_12 = arith.constant 0 : index
    %61 = vector.load %arg3[%c0_11, %c0_12] : memref<1x32xf32, #tpu.memory_space<vmem>>, vector<1x32xf32>
    %c0_13 = arith.constant 0 : index
    %c0_14 = arith.constant 0 : index
    %62 = tpu.strided_load %arg11[%c0_13, %c0_14] {strides = array<i32: 2, 1>} : memref<622x32xf32, #tpu.memory_space<vmem>>, vector<12x32xf32>
    %c1 = arith.constant 1 : index
    %c0_15 = arith.constant 0 : index
    %63 = tpu.strided_load %arg11[%c1, %c0_15] {strides = array<i32: 2, 1>} : memref<622x32xf32, #tpu.memory_space<vmem>>, vector<12x32xf32>
    %c26 = arith.constant 26 : index
    %c0_16 = arith.constant 0 : index
    %64 = tpu.strided_load %arg11[%c26, %c0_16] {strides = array<i32: 2, 1>} : memref<622x32xf32, #tpu.memory_space<vmem>>, vector<12x32xf32>
    %c27 = arith.constant 27 : index
    %c0_17 = arith.constant 0 : index
    %65 = tpu.strided_load %arg11[%c27, %c0_17] {strides = array<i32: 2, 1>} : memref<622x32xf32, #tpu.memory_space<vmem>>, vector<12x32xf32>
    %66 = arith.maximumf %62, %63 : vector<12x32xf32>
    %67 = arith.maximumf %64, %65 : vector<12x32xf32>
    %68 = arith.maximumf %66, %67 : vector<12x32xf32>
    %69 = vector.broadcast %61 : vector<1x32xf32> to vector<12x32xf32>
    %70 = arith.addf %68, %69 : vector<12x32xf32>
    %cst_18 = arith.constant 0.000000e+00 : f32
    %71 = vector.broadcast %cst_18 : f32 to vector<12x32xf32>
    %72 = arith.maximumf %70, %71 : vector<12x32xf32>
    %c15 = arith.constant 15 : index
    %c0_19 = arith.constant 0 : index
    %73 = vector.load %arg12[%c15, %c0_19] : memref<196x32xf32, #tpu.memory_space<vmem>>, vector<12x32xf32>
    tpu.vector_store %arg12[%c15, %c0_19], %72 {strides = array<i32>} : memref<196x32xf32, #tpu.memory_space<vmem>>, vector<12x32xf32>,
    %c52 = arith.constant 52 : index
    %c0_20 = arith.constant 0 : index
    %74 = tpu.strided_load %arg11[%c52, %c0_20] {strides = array<i32: 2, 1>} : memref<622x32xf32, #tpu.memory_space<vmem>>, vector<12x32xf32>
    %c53 = arith.constant 53 : index
    %c0_21 = arith.constant 0 : index
    %75 = tpu.strided_load %arg11[%c53, %c0_21] {strides = array<i32: 2, 1>} : memref<622x32xf32, #tpu.memory_space<vmem>>, vector<12x32xf32>
    %c78 = arith.constant 78 : index
    %c0_22 = arith.constant 0 : index
    %76 = tpu.strided_load %arg11[%c78, %c0_22] {strides = array<i32: 2, 1>} : memref<622x32xf32, #tpu.memory_space<vmem>>, vector<12x32xf32>
    %c79 = arith.constant 79 : index
    %c0_23 = arith.constant 0 : index
    %77 = tpu.strided_load %arg11[%c79, %c0_23] {strides = array<i32: 2, 1>} : memref<622x32xf32, #tpu.memory_space<vmem>>, vector<12x32xf32>
    %78 = arith.maximumf %74, %75 : vector<12x32xf32>
    %79 = arith.maximumf %76, %77 : vector<12x32xf32>
    %80 = arith.maximumf %78, %79 : vector<12x32xf32>
    %81 = vector.broadcast %61 : vector<1x32xf32> to vector<12x32xf32>
    %82 = arith.addf %80, %81 : vector<12x32xf32>
    %cst_24 = arith.constant 0.000000e+00 : f32
    %83 = vector.broadcast %cst_24 : f32 to vector<12x32xf32>
    %84 = arith.maximumf %82, %83 : vector<12x32xf32>
    %c29 = arith.constant 29 : index
    %c0_25 = arith.constant 0 : index
    %85 = vector.load %arg12[%c29, %c0_25] : memref<196x32xf32, #tpu.memory_space<vmem>>, vector<12x32xf32>
    tpu.vector_store %arg12[%c29, %c0_25], %84 {strides = array<i32>} : memref<196x32xf32, #tpu.memory_space<vmem>>, vector<12x32xf32>,
    %c104 = arith.constant 104 : index
    %c0_26 = arith.constant 0 : index
    %86 = tpu.strided_load %arg11[%c104, %c0_26] {strides = array<i32: 2, 1>} : memref<622x32xf32, #tpu.memory_space<vmem>>, vector<12x32xf32>
    %c105 = arith.constant 105 : index
    %c0_27 = arith.constant 0 : index
    %87 = tpu.strided_load %arg11[%c105, %c0_27] {strides = array<i32: 2, 1>} : memref<622x32xf32, #tpu.memory_space<vmem>>, vector<12x32xf32>
    %c130 = arith.constant 130 : index
    %c0_28 = arith.constant 0 : index
    %88 = tpu.strided_load %arg11[%c130, %c0_28] {strides = array<i32: 2, 1>} : memref<622x32xf32, #tpu.memory_space<vmem>>, vector<12x32xf32>
    %c131 = arith.constant 131 : index
    %c0_29 = arith.constant 0 : index
    %89 = tpu.strided_load %arg11[%c131, %c0_29] {strides = array<i32: 2, 1>} : memref<622x32xf32, #tpu.memory_space<vmem>>, vector<12x32xf32>
    %90 = arith.maximumf %86, %87 : vector<12x32xf32>
    %91 = arith.maximumf %88, %89 : vector<12x32xf32>
    %92 = arith.maximumf %90, %91 : vector<12x32xf32>
    %93 = vector.broadcast %61 : vector<1x32xf32> to vector<12x32xf32>
    %94 = arith.addf %92, %93 : vector<12x32xf32>
    %cst_30 = arith.constant 0.000000e+00 : f32
    %95 = vector.broadcast %cst_30 : f32 to vector<12x32xf32>
    %96 = arith.maximumf %94, %95 : vector<12x32xf32>
    %c43 = arith.constant 43 : index
    %c0_31 = arith.constant 0 : index
    %97 = vector.load %arg12[%c43, %c0_31] : memref<196x32xf32, #tpu.memory_space<vmem>>, vector<12x32xf32>
    tpu.vector_store %arg12[%c43, %c0_31], %96 {strides = array<i32>} : memref<196x32xf32, #tpu.memory_space<vmem>>, vector<12x32xf32>,
    %c156 = arith.constant 156 : index
    %c0_32 = arith.constant 0 : index
    %98 = tpu.strided_load %arg11[%c156, %c0_32] {strides = array<i32: 2, 1>} : memref<622x32xf32, #tpu.memory_space<vmem>>, vector<12x32xf32>
    %c157 = arith.constant 157 : index
    %c0_33 = arith.constant 0 : index
    %99 = tpu.strided_load %arg11[%c157, %c0_33] {strides = array<i32: 2, 1>} : memref<622x32xf32, #tpu.memory_space<vmem>>, vector<12x32xf32>
    %c182 = arith.constant 182 : index
    %c0_34 = arith.constant 0 : index
    %100 = tpu.strided_load %arg11[%c182, %c0_34] {strides = array<i32: 2, 1>} : memref<622x32xf32, #tpu.memory_space<vmem>>, vector<12x32xf32>
    %c183 = arith.constant 183 : index
    %c0_35 = arith.constant 0 : index
    %101 = tpu.strided_load %arg11[%c183, %c0_35] {strides = array<i32: 2, 1>} : memref<622x32xf32, #tpu.memory_space<vmem>>, vector<12x32xf32>
    %102 = arith.maximumf %98, %99 : vector<12x32xf32>
    %103 = arith.maximumf %100, %101 : vector<12x32xf32>
    %104 = arith.maximumf %102, %103 : vector<12x32xf32>
    %105 = vector.broadcast %61 : vector<1x32xf32> to vector<12x32xf32>
    %106 = arith.addf %104, %105 : vector<12x32xf32>
    %cst_36 = arith.constant 0.000000e+00 : f32
    %107 = vector.broadcast %cst_36 : f32 to vector<12x32xf32>
    %108 = arith.maximumf %106, %107 : vector<12x32xf32>
    %c57 = arith.constant 57 : index
    %c0_37 = arith.constant 0 : index
    %109 = vector.load %arg12[%c57, %c0_37] : memref<196x32xf32, #tpu.memory_space<vmem>>, vector<12x32xf32>
    tpu.vector_store %arg12[%c57, %c0_37], %108 {strides = array<i32>} : memref<196x32xf32, #tpu.memory_space<vmem>>, vector<12x32xf32>,
    %c208 = arith.constant 208 : index
    %c0_38 = arith.constant 0 : index
    %110 = tpu.strided_load %arg11[%c208, %c0_38] {strides = array<i32: 2, 1>} : memref<622x32xf32, #tpu.memory_space<vmem>>, vector<12x32xf32>
    %c209 = arith.constant 209 : index
    %c0_39 = arith.constant 0 : index
    %111 = tpu.strided_load %arg11[%c209, %c0_39] {strides = array<i32: 2, 1>} : memref<622x32xf32, #tpu.memory_space<vmem>>, vector<12x32xf32>
    %c234 = arith.constant 234 : index
    %c0_40 = arith.constant 0 : index
    %112 = tpu.strided_load %arg11[%c234, %c0_40] {strides = array<i32: 2, 1>} : memref<622x32xf32, #tpu.memory_space<vmem>>, vector<12x32xf32>
    %c235 = arith.constant 235 : index
    %c0_41 = arith.constant 0 : index
    %113 = tpu.strided_load %arg11[%c235, %c0_41] {strides = array<i32: 2, 1>} : memref<622x32xf32, #tpu.memory_space<vmem>>, vector<12x32xf32>
    %114 = arith.maximumf %110, %111 : vector<12x32xf32>
    %115 = arith.maximumf %112, %113 : vector<12x32xf32>
    %116 = arith.maximumf %114, %115 : vector<12x32xf32>
    %117 = vector.broadcast %61 : vector<1x32xf32> to vector<12x32xf32>
    %118 = arith.addf %116, %117 : vector<12x32xf32>
    %cst_42 = arith.constant 0.000000e+00 : f32
    %119 = vector.broadcast %cst_42 : f32 to vector<12x32xf32>
    %120 = arith.maximumf %118, %119 : vector<12x32xf32>
    %c71 = arith.constant 71 : index
    %c0_43 = arith.constant 0 : index
    %121 = vector.load %arg12[%c71, %c0_43] : memref<196x32xf32, #tpu.memory_space<vmem>>, vector<12x32xf32>
    tpu.vector_store %arg12[%c71, %c0_43], %120 {strides = array<i32>} : memref<196x32xf32, #tpu.memory_space<vmem>>, vector<12x32xf32>,
    %c260 = arith.constant 260 : index
    %c0_44 = arith.constant 0 : index
    %122 = tpu.strided_load %arg11[%c260, %c0_44] {strides = array<i32: 2, 1>} : memref<622x32xf32, #tpu.memory_space<vmem>>, vector<12x32xf32>
    %c261 = arith.constant 261 : index
    %c0_45 = arith.constant 0 : index
    %123 = tpu.strided_load %arg11[%c261, %c0_45] {strides = array<i32: 2, 1>} : memref<622x32xf32, #tpu.memory_space<vmem>>, vector<12x32xf32>
    %c286 = arith.constant 286 : index
    %c0_46 = arith.constant 0 : index
    %124 = tpu.strided_load %arg11[%c286, %c0_46] {strides = array<i32: 2, 1>} : memref<622x32xf32, #tpu.memory_space<vmem>>, vector<12x32xf32>
    %c287 = arith.constant 287 : index
    %c0_47 = arith.constant 0 : index
    %125 = tpu.strided_load %arg11[%c287, %c0_47] {strides = array<i32: 2, 1>} : memref<622x32xf32, #tpu.memory_space<vmem>>, vector<12x32xf32>
    %126 = arith.maximumf %122, %123 : vector<12x32xf32>
    %127 = arith.maximumf %124, %125 : vector<12x32xf32>
    %128 = arith.maximumf %126, %127 : vector<12x32xf32>
    %129 = vector.broadcast %61 : vector<1x32xf32> to vector<12x32xf32>
    %130 = arith.addf %128, %129 : vector<12x32xf32>
    %cst_48 = arith.constant 0.000000e+00 : f32
    %131 = vector.broadcast %cst_48 : f32 to vector<12x32xf32>
    %132 = arith.maximumf %130, %131 : vector<12x32xf32>
    %c85 = arith.constant 85 : index
    %c0_49 = arith.constant 0 : index
    %133 = vector.load %arg12[%c85, %c0_49] : memref<196x32xf32, #tpu.memory_space<vmem>>, vector<12x32xf32>
    tpu.vector_store %arg12[%c85, %c0_49], %132 {strides = array<i32>} : memref<196x32xf32, #tpu.memory_space<vmem>>, vector<12x32xf32>,
    %c312 = arith.constant 312 : index
    %c0_50 = arith.constant 0 : index
    %134 = tpu.strided_load %arg11[%c312, %c0_50] {strides = array<i32: 2, 1>} : memref<622x32xf32, #tpu.memory_space<vmem>>, vector<12x32xf32>
    %c313 = arith.constant 313 : index
    %c0_51 = arith.constant 0 : index
    %135 = tpu.strided_load %arg11[%c313, %c0_51] {strides = array<i32: 2, 1>} : memref<622x32xf32, #tpu.memory_space<vmem>>, vector<12x32xf32>
    %c338 = arith.constant 338 : index
    %c0_52 = arith.constant 0 : index
    %136 = tpu.strided_load %arg11[%c338, %c0_52] {strides = array<i32: 2, 1>} : memref<622x32xf32, #tpu.memory_space<vmem>>, vector<12x32xf32>
    %c339 = arith.constant 339 : index
    %c0_53 = arith.constant 0 : index
    %137 = tpu.strided_load %arg11[%c339, %c0_53] {strides = array<i32: 2, 1>} : memref<622x32xf32, #tpu.memory_space<vmem>>, vector<12x32xf32>
    %138 = arith.maximumf %134, %135 : vector<12x32xf32>
    %139 = arith.maximumf %136, %137 : vector<12x32xf32>
    %140 = arith.maximumf %138, %139 : vector<12x32xf32>
    %141 = vector.broadcast %61 : vector<1x32xf32> to vector<12x32xf32>
    %142 = arith.addf %140, %141 : vector<12x32xf32>
    %cst_54 = arith.constant 0.000000e+00 : f32
    %143 = vector.broadcast %cst_54 : f32 to vector<12x32xf32>
    %144 = arith.maximumf %142, %143 : vector<12x32xf32>
    %c99 = arith.constant 99 : index
    %c0_55 = arith.constant 0 : index
    %145 = vector.load %arg12[%c99, %c0_55] : memref<196x32xf32, #tpu.memory_space<vmem>>, vector<12x32xf32>
    tpu.vector_store %arg12[%c99, %c0_55], %144 {strides = array<i32>} : memref<196x32xf32, #tpu.memory_space<vmem>>, vector<12x32xf32>,
    %c364 = arith.constant 364 : index
    %c0_56 = arith.constant 0 : index
    %146 = tpu.strided_load %arg11[%c364, %c0_56] {strides = array<i32: 2, 1>} : memref<622x32xf32, #tpu.memory_space<vmem>>, vector<12x32xf32>
    %c365 = arith.constant 365 : index
    %c0_57 = arith.constant 0 : index
    %147 = tpu.strided_load %arg11[%c365, %c0_57] {strides = array<i32: 2, 1>} : memref<622x32xf32, #tpu.memory_space<vmem>>, vector<12x32xf32>
    %c390 = arith.constant 390 : index
    %c0_58 = arith.constant 0 : index
    %148 = tpu.strided_load %arg11[%c390, %c0_58] {strides = array<i32: 2, 1>} : memref<622x32xf32, #tpu.memory_space<vmem>>, vector<12x32xf32>
    %c391 = arith.constant 391 : index
    %c0_59 = arith.constant 0 : index
    %149 = tpu.strided_load %arg11[%c391, %c0_59] {strides = array<i32: 2, 1>} : memref<622x32xf32, #tpu.memory_space<vmem>>, vector<12x32xf32>
    %150 = arith.maximumf %146, %147 : vector<12x32xf32>
    %151 = arith.maximumf %148, %149 : vector<12x32xf32>
    %152 = arith.maximumf %150, %151 : vector<12x32xf32>
    %153 = vector.broadcast %61 : vector<1x32xf32> to vector<12x32xf32>
    %154 = arith.addf %152, %153 : vector<12x32xf32>
    %cst_60 = arith.constant 0.000000e+00 : f32
    %155 = vector.broadcast %cst_60 : f32 to vector<12x32xf32>
    %156 = arith.maximumf %154, %155 : vector<12x32xf32>
    %c113 = arith.constant 113 : index
    %c0_61 = arith.constant 0 : index
    %157 = vector.load %arg12[%c113, %c0_61] : memref<196x32xf32, #tpu.memory_space<vmem>>, vector<12x32xf32>
    tpu.vector_store %arg12[%c113, %c0_61], %156 {strides = array<i32>} : memref<196x32xf32, #tpu.memory_space<vmem>>, vector<12x32xf32>,
    %c416 = arith.constant 416 : index
    %c0_62 = arith.constant 0 : index
    %158 = tpu.strided_load %arg11[%c416, %c0_62] {strides = array<i32: 2, 1>} : memref<622x32xf32, #tpu.memory_space<vmem>>, vector<12x32xf32>
    %c417 = arith.constant 417 : index
    %c0_63 = arith.constant 0 : index
    %159 = tpu.strided_load %arg11[%c417, %c0_63] {strides = array<i32: 2, 1>} : memref<622x32xf32, #tpu.memory_space<vmem>>, vector<12x32xf32>
    %c442 = arith.constant 442 : index
    %c0_64 = arith.constant 0 : index
    %160 = tpu.strided_load %arg11[%c442, %c0_64] {strides = array<i32: 2, 1>} : memref<622x32xf32, #tpu.memory_space<vmem>>, vector<12x32xf32>
    %c443 = arith.constant 443 : index
    %c0_65 = arith.constant 0 : index
    %161 = tpu.strided_load %arg11[%c443, %c0_65] {strides = array<i32: 2, 1>} : memref<622x32xf32, #tpu.memory_space<vmem>>, vector<12x32xf32>
    %162 = arith.maximumf %158, %159 : vector<12x32xf32>
    %163 = arith.maximumf %160, %161 : vector<12x32xf32>
    %164 = arith.maximumf %162, %163 : vector<12x32xf32>
    %165 = vector.broadcast %61 : vector<1x32xf32> to vector<12x32xf32>
    %166 = arith.addf %164, %165 : vector<12x32xf32>
    %cst_66 = arith.constant 0.000000e+00 : f32
    %167 = vector.broadcast %cst_66 : f32 to vector<12x32xf32>
    %168 = arith.maximumf %166, %167 : vector<12x32xf32>
    %c127 = arith.constant 127 : index
    %c0_67 = arith.constant 0 : index
    %169 = vector.load %arg12[%c127, %c0_67] : memref<196x32xf32, #tpu.memory_space<vmem>>, vector<12x32xf32>
    tpu.vector_store %arg12[%c127, %c0_67], %168 {strides = array<i32>} : memref<196x32xf32, #tpu.memory_space<vmem>>, vector<12x32xf32>,
    %c468 = arith.constant 468 : index
    %c0_68 = arith.constant 0 : index
    %170 = tpu.strided_load %arg11[%c468, %c0_68] {strides = array<i32: 2, 1>} : memref<622x32xf32, #tpu.memory_space<vmem>>, vector<12x32xf32>
    %c469 = arith.constant 469 : index
    %c0_69 = arith.constant 0 : index
    %171 = tpu.strided_load %arg11[%c469, %c0_69] {strides = array<i32: 2, 1>} : memref<622x32xf32, #tpu.memory_space<vmem>>, vector<12x32xf32>
    %c494 = arith.constant 494 : index
    %c0_70 = arith.constant 0 : index
    %172 = tpu.strided_load %arg11[%c494, %c0_70] {strides = array<i32: 2, 1>} : memref<622x32xf32, #tpu.memory_space<vmem>>, vector<12x32xf32>
    %c495 = arith.constant 495 : index
    %c0_71 = arith.constant 0 : index
    %173 = tpu.strided_load %arg11[%c495, %c0_71] {strides = array<i32: 2, 1>} : memref<622x32xf32, #tpu.memory_space<vmem>>, vector<12x32xf32>
    %174 = arith.maximumf %170, %171 : vector<12x32xf32>
    %175 = arith.maximumf %172, %173 : vector<12x32xf32>
    %176 = arith.maximumf %174, %175 : vector<12x32xf32>
    %177 = vector.broadcast %61 : vector<1x32xf32> to vector<12x32xf32>
    %178 = arith.addf %176, %177 : vector<12x32xf32>
    %cst_72 = arith.constant 0.000000e+00 : f32
    %179 = vector.broadcast %cst_72 : f32 to vector<12x32xf32>
    %180 = arith.maximumf %178, %179 : vector<12x32xf32>
    %c141 = arith.constant 141 : index
    %c0_73 = arith.constant 0 : index
    %181 = vector.load %arg12[%c141, %c0_73] : memref<196x32xf32, #tpu.memory_space<vmem>>, vector<12x32xf32>
    tpu.vector_store %arg12[%c141, %c0_73], %180 {strides = array<i32>} : memref<196x32xf32, #tpu.memory_space<vmem>>, vector<12x32xf32>,
    %c520 = arith.constant 520 : index
    %c0_74 = arith.constant 0 : index
    %182 = tpu.strided_load %arg11[%c520, %c0_74] {strides = array<i32: 2, 1>} : memref<622x32xf32, #tpu.memory_space<vmem>>, vector<12x32xf32>
    %c521 = arith.constant 521 : index
    %c0_75 = arith.constant 0 : index
    %183 = tpu.strided_load %arg11[%c521, %c0_75] {strides = array<i32: 2, 1>} : memref<622x32xf32, #tpu.memory_space<vmem>>, vector<12x32xf32>
    %c546 = arith.constant 546 : index
    %c0_76 = arith.constant 0 : index
    %184 = tpu.strided_load %arg11[%c546, %c0_76] {strides = array<i32: 2, 1>} : memref<622x32xf32, #tpu.memory_space<vmem>>, vector<12x32xf32>
    %c547 = arith.constant 547 : index
    %c0_77 = arith.constant 0 : index
    %185 = tpu.strided_load %arg11[%c547, %c0_77] {strides = array<i32: 2, 1>} : memref<622x32xf32, #tpu.memory_space<vmem>>, vector<12x32xf32>
    %186 = arith.maximumf %182, %183 : vector<12x32xf32>
    %187 = arith.maximumf %184, %185 : vector<12x32xf32>
    %188 = arith.maximumf %186, %187 : vector<12x32xf32>
    %189 = vector.broadcast %61 : vector<1x32xf32> to vector<12x32xf32>
    %190 = arith.addf %188, %189 : vector<12x32xf32>
    %cst_78 = arith.constant 0.000000e+00 : f32
    %191 = vector.broadcast %cst_78 : f32 to vector<12x32xf32>
    %192 = arith.maximumf %190, %191 : vector<12x32xf32>
    %c155 = arith.constant 155 : index
    %c0_79 = arith.constant 0 : index
    %193 = vector.load %arg12[%c155, %c0_79] : memref<196x32xf32, #tpu.memory_space<vmem>>, vector<12x32xf32>
    tpu.vector_store %arg12[%c155, %c0_79], %192 {strides = array<i32>} : memref<196x32xf32, #tpu.memory_space<vmem>>, vector<12x32xf32>,
    %c572 = arith.constant 572 : index
    %c0_80 = arith.constant 0 : index
    %194 = tpu.strided_load %arg11[%c572, %c0_80] {strides = array<i32: 2, 1>} : memref<622x32xf32, #tpu.memory_space<vmem>>, vector<12x32xf32>
    %c573 = arith.constant 573 : index
    %c0_81 = arith.constant 0 : index
    %195 = tpu.strided_load %arg11[%c573, %c0_81] {strides = array<i32: 2, 1>} : memref<622x32xf32, #tpu.memory_space<vmem>>, vector<12x32xf32>
    %c598 = arith.constant 598 : index
    %c0_82 = arith.constant 0 : index
    %196 = tpu.strided_load %arg11[%c598, %c0_82] {strides = array<i32: 2, 1>} : memref<622x32xf32, #tpu.memory_space<vmem>>, vector<12x32xf32>
    %c599 = arith.constant 599 : index
    %c0_83 = arith.constant 0 : index
    %197 = tpu.strided_load %arg11[%c599, %c0_83] {strides = array<i32: 2, 1>} : memref<622x32xf32, #tpu.memory_space<vmem>>, vector<12x32xf32>
    %198 = arith.maximumf %194, %195 : vector<12x32xf32>
    %199 = arith.maximumf %196, %197 : vector<12x32xf32>
    %200 = arith.maximumf %198, %199 : vector<12x32xf32>
    %201 = vector.broadcast %61 : vector<1x32xf32> to vector<12x32xf32>
    %202 = arith.addf %200, %201 : vector<12x32xf32>
    %cst_84 = arith.constant 0.000000e+00 : f32
    %203 = vector.broadcast %cst_84 : f32 to vector<12x32xf32>
    %204 = arith.maximumf %202, %203 : vector<12x32xf32>
    %c169 = arith.constant 169 : index
    %c0_85 = arith.constant 0 : index
    %205 = vector.load %arg12[%c169, %c0_85] : memref<196x32xf32, #tpu.memory_space<vmem>>, vector<12x32xf32>
    tpu.vector_store %arg12[%c169, %c0_85], %204 {strides = array<i32>} : memref<196x32xf32, #tpu.memory_space<vmem>>, vector<12x32xf32>,
    %c0_86 = arith.constant 0 : index
    %c0_87 = arith.constant 0 : index
    %206 = vector.load %arg12[%c0_86, %c0_87] : memref<196x32xf32, #tpu.memory_space<vmem>>, vector<196x32xf32>
    %207 = vector.extract_strided_slice %206 {offsets = [0, 0], sizes = [166, 32], strides = [1, 1]} : vector<196x32xf32> to vector<166x32xf32>
    %c0_88 = arith.constant 0 : index
    %c0_89 = arith.constant 0 : index
    %c0_90 = arith.constant 0 : index
    %208 = vector.load %arg4[%c0_88, %c0_89, %c0_90] : memref<9x32x64xf32, #tpu.memory_space<vmem>>, vector<1x32x64xf32>
    %209 = vector.shape_cast %208 : vector<1x32x64xf32> to vector<32x64xf32>
    %cst_91 = arith.constant dense<0.000000e+00> : vector<166x64xf32>
    %210 = tpu.matmul %207, %209, %cst_91 {dimension_numbers = #tpu.dot_dimension_numbers<[1], [0], [0], [1], [0, 0, 1, 1], [], []>} : vector<166x32xf32>, vector<32x64xf32>, vector<166x64xf32> -> vector<166x64xf32>
    %211 = vector.extract_strided_slice %206 {offsets = [1, 0], sizes = [166, 32], strides = [1, 1]} : vector<196x32xf32> to vector<166x32xf32>
    %c1_92 = arith.constant 1 : index
    %c0_93 = arith.constant 0 : index
    %c0_94 = arith.constant 0 : index
    %212 = vector.load %arg4[%c1_92, %c0_93, %c0_94] : memref<9x32x64xf32, #tpu.memory_space<vmem>>, vector<1x32x64xf32>
    %213 = vector.shape_cast %212 : vector<1x32x64xf32> to vector<32x64xf32>
    %cst_95 = arith.constant dense<0.000000e+00> : vector<166x64xf32>
    %214 = tpu.matmul %211, %213, %cst_95 {dimension_numbers = #tpu.dot_dimension_numbers<[1], [0], [0], [1], [0, 0, 1, 1], [], []>} : vector<166x32xf32>, vector<32x64xf32>, vector<166x64xf32> -> vector<166x64xf32>
    %215 = arith.addf %210, %214 : vector<166x64xf32>
    %216 = vector.extract_strided_slice %206 {offsets = [2, 0], sizes = [166, 32], strides = [1, 1]} : vector<196x32xf32> to vector<166x32xf32>
    %c2 = arith.constant 2 : index
    %c0_96 = arith.constant 0 : index
    %c0_97 = arith.constant 0 : index
    %217 = vector.load %arg4[%c2, %c0_96, %c0_97] : memref<9x32x64xf32, #tpu.memory_space<vmem>>, vector<1x32x64xf32>
    %218 = vector.shape_cast %217 : vector<1x32x64xf32> to vector<32x64xf32>
    %cst_98 = arith.constant dense<0.000000e+00> : vector<166x64xf32>
    %219 = tpu.matmul %216, %218, %cst_98 {dimension_numbers = #tpu.dot_dimension_numbers<[1], [0], [0], [1], [0, 0, 1, 1], [], []>} : vector<166x32xf32>, vector<32x64xf32>, vector<166x64xf32> -> vector<166x64xf32>
    %220 = arith.addf %215, %219 : vector<166x64xf32>
    %221 = vector.extract_strided_slice %206 {offsets = [14, 0], sizes = [166, 32], strides = [1, 1]} : vector<196x32xf32> to vector<166x32xf32>
    %c3 = arith.constant 3 : index
    %c0_99 = arith.constant 0 : index
    %c0_100 = arith.constant 0 : index
    %222 = vector.load %arg4[%c3, %c0_99, %c0_100] : memref<9x32x64xf32, #tpu.memory_space<vmem>>, vector<1x32x64xf32>
    %223 = vector.shape_cast %222 : vector<1x32x64xf32> to vector<32x64xf32>
    %cst_101 = arith.constant dense<0.000000e+00> : vector<166x64xf32>
    %224 = tpu.matmul %221, %223, %cst_101 {dimension_numbers = #tpu.dot_dimension_numbers<[1], [0], [0], [1], [0, 0, 1, 1], [], []>} : vector<166x32xf32>, vector<32x64xf32>, vector<166x64xf32> -> vector<166x64xf32>
    %225 = arith.addf %220, %224 : vector<166x64xf32>
    %226 = vector.extract_strided_slice %206 {offsets = [15, 0], sizes = [166, 32], strides = [1, 1]} : vector<196x32xf32> to vector<166x32xf32>
    %c4 = arith.constant 4 : index
    %c0_102 = arith.constant 0 : index
    %c0_103 = arith.constant 0 : index
    %227 = vector.load %arg4[%c4, %c0_102, %c0_103] : memref<9x32x64xf32, #tpu.memory_space<vmem>>, vector<1x32x64xf32>
    %228 = vector.shape_cast %227 : vector<1x32x64xf32> to vector<32x64xf32>
    %cst_104 = arith.constant dense<0.000000e+00> : vector<166x64xf32>
    %229 = tpu.matmul %226, %228, %cst_104 {dimension_numbers = #tpu.dot_dimension_numbers<[1], [0], [0], [1], [0, 0, 1, 1], [], []>} : vector<166x32xf32>, vector<32x64xf32>, vector<166x64xf32> -> vector<166x64xf32>
    %230 = arith.addf %225, %229 : vector<166x64xf32>
    %231 = vector.extract_strided_slice %206 {offsets = [16, 0], sizes = [166, 32], strides = [1, 1]} : vector<196x32xf32> to vector<166x32xf32>
    %c5 = arith.constant 5 : index
    %c0_105 = arith.constant 0 : index
    %c0_106 = arith.constant 0 : index
    %232 = vector.load %arg4[%c5, %c0_105, %c0_106] : memref<9x32x64xf32, #tpu.memory_space<vmem>>, vector<1x32x64xf32>
    %233 = vector.shape_cast %232 : vector<1x32x64xf32> to vector<32x64xf32>
    %cst_107 = arith.constant dense<0.000000e+00> : vector<166x64xf32>
    %234 = tpu.matmul %231, %233, %cst_107 {dimension_numbers = #tpu.dot_dimension_numbers<[1], [0], [0], [1], [0, 0, 1, 1], [], []>} : vector<166x32xf32>, vector<32x64xf32>, vector<166x64xf32> -> vector<166x64xf32>
    %235 = arith.addf %230, %234 : vector<166x64xf32>
    %236 = vector.extract_strided_slice %206 {offsets = [28, 0], sizes = [166, 32], strides = [1, 1]} : vector<196x32xf32> to vector<166x32xf32>
    %c6 = arith.constant 6 : index
    %c0_108 = arith.constant 0 : index
    %c0_109 = arith.constant 0 : index
    %237 = vector.load %arg4[%c6, %c0_108, %c0_109] : memref<9x32x64xf32, #tpu.memory_space<vmem>>, vector<1x32x64xf32>
    %238 = vector.shape_cast %237 : vector<1x32x64xf32> to vector<32x64xf32>
    %cst_110 = arith.constant dense<0.000000e+00> : vector<166x64xf32>
    %239 = tpu.matmul %236, %238, %cst_110 {dimension_numbers = #tpu.dot_dimension_numbers<[1], [0], [0], [1], [0, 0, 1, 1], [], []>} : vector<166x32xf32>, vector<32x64xf32>, vector<166x64xf32> -> vector<166x64xf32>
    %240 = arith.addf %235, %239 : vector<166x64xf32>
    %241 = vector.extract_strided_slice %206 {offsets = [29, 0], sizes = [166, 32], strides = [1, 1]} : vector<196x32xf32> to vector<166x32xf32>
    %c7 = arith.constant 7 : index
    %c0_111 = arith.constant 0 : index
    %c0_112 = arith.constant 0 : index
    %242 = vector.load %arg4[%c7, %c0_111, %c0_112] : memref<9x32x64xf32, #tpu.memory_space<vmem>>, vector<1x32x64xf32>
    %243 = vector.shape_cast %242 : vector<1x32x64xf32> to vector<32x64xf32>
    %cst_113 = arith.constant dense<0.000000e+00> : vector<166x64xf32>
    %244 = tpu.matmul %241, %243, %cst_113 {dimension_numbers = #tpu.dot_dimension_numbers<[1], [0], [0], [1], [0, 0, 1, 1], [], []>} : vector<166x32xf32>, vector<32x64xf32>, vector<166x64xf32> -> vector<166x64xf32>
    %245 = arith.addf %240, %244 : vector<166x64xf32>
    %246 = vector.extract_strided_slice %206 {offsets = [30, 0], sizes = [166, 32], strides = [1, 1]} : vector<196x32xf32> to vector<166x32xf32>
    %c8 = arith.constant 8 : index
    %c0_114 = arith.constant 0 : index
    %c0_115 = arith.constant 0 : index
    %247 = vector.load %arg4[%c8, %c0_114, %c0_115] : memref<9x32x64xf32, #tpu.memory_space<vmem>>, vector<1x32x64xf32>
    %248 = vector.shape_cast %247 : vector<1x32x64xf32> to vector<32x64xf32>
    %cst_116 = arith.constant dense<0.000000e+00> : vector<166x64xf32>
    %249 = tpu.matmul %246, %248, %cst_116 {dimension_numbers = #tpu.dot_dimension_numbers<[1], [0], [0], [1], [0, 0, 1, 1], [], []>} : vector<166x32xf32>, vector<32x64xf32>, vector<166x64xf32> -> vector<166x64xf32>
    %250 = arith.addf %245, %249 : vector<166x64xf32>
    %c0_117 = arith.constant 0 : index
    %c0_118 = arith.constant 0 : index
    %251 = vector.load %arg13[%c0_117, %c0_118] : memref<166x64xf32, #tpu.memory_space<vmem>>, vector<166x64xf32>
    tpu.vector_store %arg13[%c0_117, %c0_118], %250 {strides = array<i32>} : memref<166x64xf32, #tpu.memory_space<vmem>>, vector<166x64xf32>,
    %c0_119 = arith.constant 0 : index
    %c0_120 = arith.constant 0 : index
    %252 = vector.load %arg5[%c0_119, %c0_120] : memref<1x64xf32, #tpu.memory_space<vmem>>, vector<1x64xf32>
    %c0_121 = arith.constant 0 : index
    %c0_122 = arith.constant 0 : index
    %253 = tpu.strided_load %arg13[%c0_121, %c0_122] {strides = array<i32: 2, 1>} : memref<166x64xf32, #tpu.memory_space<vmem>>, vector<6x64xf32>
    %c1_123 = arith.constant 1 : index
    %c0_124 = arith.constant 0 : index
    %254 = tpu.strided_load %arg13[%c1_123, %c0_124] {strides = array<i32: 2, 1>} : memref<166x64xf32, #tpu.memory_space<vmem>>, vector<6x64xf32>
    %c14 = arith.constant 14 : index
    %c0_125 = arith.constant 0 : index
    %255 = tpu.strided_load %arg13[%c14, %c0_125] {strides = array<i32: 2, 1>} : memref<166x64xf32, #tpu.memory_space<vmem>>, vector<6x64xf32>
    %c15_126 = arith.constant 15 : index
    %c0_127 = arith.constant 0 : index
    %256 = tpu.strided_load %arg13[%c15_126, %c0_127] {strides = array<i32: 2, 1>} : memref<166x64xf32, #tpu.memory_space<vmem>>, vector<6x64xf32>
    %257 = arith.maximumf %253, %254 : vector<6x64xf32>
    %258 = arith.maximumf %255, %256 : vector<6x64xf32>
    %259 = arith.maximumf %257, %258 : vector<6x64xf32>
    %260 = vector.broadcast %252 : vector<1x64xf32> to vector<6x64xf32>
    %261 = arith.addf %259, %260 : vector<6x64xf32>
    %cst_128 = arith.constant 0.000000e+00 : f32
    %262 = vector.broadcast %cst_128 : f32 to vector<6x64xf32>
    %263 = arith.maximumf %261, %262 : vector<6x64xf32>
    %c9 = arith.constant 9 : index
    %c0_129 = arith.constant 0 : index
    %264 = vector.load %arg14[%c9, %c0_129] : memref<64x64xf32, #tpu.memory_space<vmem>>, vector<6x64xf32>
    tpu.vector_store %arg14[%c9, %c0_129], %263 {strides = array<i32>} : memref<64x64xf32, #tpu.memory_space<vmem>>, vector<6x64xf32>,
    %c28 = arith.constant 28 : index
    %c0_130 = arith.constant 0 : index
    %265 = tpu.strided_load %arg13[%c28, %c0_130] {strides = array<i32: 2, 1>} : memref<166x64xf32, #tpu.memory_space<vmem>>, vector<6x64xf32>
    %c29_131 = arith.constant 29 : index
    %c0_132 = arith.constant 0 : index
    %266 = tpu.strided_load %arg13[%c29_131, %c0_132] {strides = array<i32: 2, 1>} : memref<166x64xf32, #tpu.memory_space<vmem>>, vector<6x64xf32>
    %c42 = arith.constant 42 : index
    %c0_133 = arith.constant 0 : index
    %267 = tpu.strided_load %arg13[%c42, %c0_133] {strides = array<i32: 2, 1>} : memref<166x64xf32, #tpu.memory_space<vmem>>, vector<6x64xf32>
    %c43_134 = arith.constant 43 : index
    %c0_135 = arith.constant 0 : index
    %268 = tpu.strided_load %arg13[%c43_134, %c0_135] {strides = array<i32: 2, 1>} : memref<166x64xf32, #tpu.memory_space<vmem>>, vector<6x64xf32>
    %269 = arith.maximumf %265, %266 : vector<6x64xf32>
    %270 = arith.maximumf %267, %268 : vector<6x64xf32>
    %271 = arith.maximumf %269, %270 : vector<6x64xf32>
    %272 = vector.broadcast %252 : vector<1x64xf32> to vector<6x64xf32>
    %273 = arith.addf %271, %272 : vector<6x64xf32>
    %cst_136 = arith.constant 0.000000e+00 : f32
    %274 = vector.broadcast %cst_136 : f32 to vector<6x64xf32>
    %275 = arith.maximumf %273, %274 : vector<6x64xf32>
    %c17 = arith.constant 17 : index
    %c0_137 = arith.constant 0 : index
    %276 = vector.load %arg14[%c17, %c0_137] : memref<64x64xf32, #tpu.memory_space<vmem>>, vector<6x64xf32>
    tpu.vector_store %arg14[%c17, %c0_137], %275 {strides = array<i32>} : memref<64x64xf32, #tpu.memory_space<vmem>>, vector<6x64xf32>,
    %c56 = arith.constant 56 : index
    %c0_138 = arith.constant 0 : index
    %277 = tpu.strided_load %arg13[%c56, %c0_138] {strides = array<i32: 2, 1>} : memref<166x64xf32, #tpu.memory_space<vmem>>, vector<6x64xf32>
    %c57_139 = arith.constant 57 : index
    %c0_140 = arith.constant 0 : index
    %278 = tpu.strided_load %arg13[%c57_139, %c0_140] {strides = array<i32: 2, 1>} : memref<166x64xf32, #tpu.memory_space<vmem>>, vector<6x64xf32>
    %c70 = arith.constant 70 : index
    %c0_141 = arith.constant 0 : index
    %279 = tpu.strided_load %arg13[%c70, %c0_141] {strides = array<i32: 2, 1>} : memref<166x64xf32, #tpu.memory_space<vmem>>, vector<6x64xf32>
    %c71_142 = arith.constant 71 : index
    %c0_143 = arith.constant 0 : index
    %280 = tpu.strided_load %arg13[%c71_142, %c0_143] {strides = array<i32: 2, 1>} : memref<166x64xf32, #tpu.memory_space<vmem>>, vector<6x64xf32>
    %281 = arith.maximumf %277, %278 : vector<6x64xf32>
    %282 = arith.maximumf %279, %280 : vector<6x64xf32>
    %283 = arith.maximumf %281, %282 : vector<6x64xf32>
    %284 = vector.broadcast %252 : vector<1x64xf32> to vector<6x64xf32>
    %285 = arith.addf %283, %284 : vector<6x64xf32>
    %cst_144 = arith.constant 0.000000e+00 : f32
    %286 = vector.broadcast %cst_144 : f32 to vector<6x64xf32>
    %287 = arith.maximumf %285, %286 : vector<6x64xf32>
    %c25 = arith.constant 25 : index
    %c0_145 = arith.constant 0 : index
    %288 = vector.load %arg14[%c25, %c0_145] : memref<64x64xf32, #tpu.memory_space<vmem>>, vector<6x64xf32>
    tpu.vector_store %arg14[%c25, %c0_145], %287 {strides = array<i32>} : memref<64x64xf32, #tpu.memory_space<vmem>>, vector<6x64xf32>,
    %c84 = arith.constant 84 : index
    %c0_146 = arith.constant 0 : index
    %289 = tpu.strided_load %arg13[%c84, %c0_146] {strides = array<i32: 2, 1>} : memref<166x64xf32, #tpu.memory_space<vmem>>, vector<6x64xf32>
    %c85_147 = arith.constant 85 : index
    %c0_148 = arith.constant 0 : index
    %290 = tpu.strided_load %arg13[%c85_147, %c0_148] {strides = array<i32: 2, 1>} : memref<166x64xf32, #tpu.memory_space<vmem>>, vector<6x64xf32>
    %c98 = arith.constant 98 : index
    %c0_149 = arith.constant 0 : index
    %291 = tpu.strided_load %arg13[%c98, %c0_149] {strides = array<i32: 2, 1>} : memref<166x64xf32, #tpu.memory_space<vmem>>, vector<6x64xf32>
    %c99_150 = arith.constant 99 : index
    %c0_151 = arith.constant 0 : index
    %292 = tpu.strided_load %arg13[%c99_150, %c0_151] {strides = array<i32: 2, 1>} : memref<166x64xf32, #tpu.memory_space<vmem>>, vector<6x64xf32>
    %293 = arith.maximumf %289, %290 : vector<6x64xf32>
    %294 = arith.maximumf %291, %292 : vector<6x64xf32>
    %295 = arith.maximumf %293, %294 : vector<6x64xf32>
    %296 = vector.broadcast %252 : vector<1x64xf32> to vector<6x64xf32>
    %297 = arith.addf %295, %296 : vector<6x64xf32>
    %cst_152 = arith.constant 0.000000e+00 : f32
    %298 = vector.broadcast %cst_152 : f32 to vector<6x64xf32>
    %299 = arith.maximumf %297, %298 : vector<6x64xf32>
    %c33 = arith.constant 33 : index
    %c0_153 = arith.constant 0 : index
    %300 = vector.load %arg14[%c33, %c0_153] : memref<64x64xf32, #tpu.memory_space<vmem>>, vector<6x64xf32>
    tpu.vector_store %arg14[%c33, %c0_153], %299 {strides = array<i32>} : memref<64x64xf32, #tpu.memory_space<vmem>>, vector<6x64xf32>,
    %c112 = arith.constant 112 : index
    %c0_154 = arith.constant 0 : index
    %301 = tpu.strided_load %arg13[%c112, %c0_154] {strides = array<i32: 2, 1>} : memref<166x64xf32, #tpu.memory_space<vmem>>, vector<6x64xf32>
    %c113_155 = arith.constant 113 : index
    %c0_156 = arith.constant 0 : index
    %302 = tpu.strided_load %arg13[%c113_155, %c0_156] {strides = array<i32: 2, 1>} : memref<166x64xf32, #tpu.memory_space<vmem>>, vector<6x64xf32>
    %c126 = arith.constant 126 : index
    %c0_157 = arith.constant 0 : index
    %303 = tpu.strided_load %arg13[%c126, %c0_157] {strides = array<i32: 2, 1>} : memref<166x64xf32, #tpu.memory_space<vmem>>, vector<6x64xf32>
    %c127_158 = arith.constant 127 : index
    %c0_159 = arith.constant 0 : index
    %304 = tpu.strided_load %arg13[%c127_158, %c0_159] {strides = array<i32: 2, 1>} : memref<166x64xf32, #tpu.memory_space<vmem>>, vector<6x64xf32>
    %305 = arith.maximumf %301, %302 : vector<6x64xf32>
    %306 = arith.maximumf %303, %304 : vector<6x64xf32>
    %307 = arith.maximumf %305, %306 : vector<6x64xf32>
    %308 = vector.broadcast %252 : vector<1x64xf32> to vector<6x64xf32>
    %309 = arith.addf %307, %308 : vector<6x64xf32>
    %cst_160 = arith.constant 0.000000e+00 : f32
    %310 = vector.broadcast %cst_160 : f32 to vector<6x64xf32>
    %311 = arith.maximumf %309, %310 : vector<6x64xf32>
    %c41 = arith.constant 41 : index
    %c0_161 = arith.constant 0 : index
    %312 = vector.load %arg14[%c41, %c0_161] : memref<64x64xf32, #tpu.memory_space<vmem>>, vector<6x64xf32>
    tpu.vector_store %arg14[%c41, %c0_161], %311 {strides = array<i32>} : memref<64x64xf32, #tpu.memory_space<vmem>>, vector<6x64xf32>,
    %c140 = arith.constant 140 : index
    %c0_162 = arith.constant 0 : index
    %313 = tpu.strided_load %arg13[%c140, %c0_162] {strides = array<i32: 2, 1>} : memref<166x64xf32, #tpu.memory_space<vmem>>, vector<6x64xf32>
    %c141_163 = arith.constant 141 : index
    %c0_164 = arith.constant 0 : index
    %314 = tpu.strided_load %arg13[%c141_163, %c0_164] {strides = array<i32: 2, 1>} : memref<166x64xf32, #tpu.memory_space<vmem>>, vector<6x64xf32>
    %c154 = arith.constant 154 : index
    %c0_165 = arith.constant 0 : index
    %315 = tpu.strided_load %arg13[%c154, %c0_165] {strides = array<i32: 2, 1>} : memref<166x64xf32, #tpu.memory_space<vmem>>, vector<6x64xf32>
    %c155_166 = arith.constant 155 : index
    %c0_167 = arith.constant 0 : index
    %316 = tpu.strided_load %arg13[%c155_166, %c0_167] {strides = array<i32: 2, 1>} : memref<166x64xf32, #tpu.memory_space<vmem>>, vector<6x64xf32>
    %317 = arith.maximumf %313, %314 : vector<6x64xf32>
    %318 = arith.maximumf %315, %316 : vector<6x64xf32>
    %319 = arith.maximumf %317, %318 : vector<6x64xf32>
    %320 = vector.broadcast %252 : vector<1x64xf32> to vector<6x64xf32>
    %321 = arith.addf %319, %320 : vector<6x64xf32>
    %cst_168 = arith.constant 0.000000e+00 : f32
    %322 = vector.broadcast %cst_168 : f32 to vector<6x64xf32>
    %323 = arith.maximumf %321, %322 : vector<6x64xf32>
    %c49 = arith.constant 49 : index
    %c0_169 = arith.constant 0 : index
    %324 = vector.load %arg14[%c49, %c0_169] : memref<64x64xf32, #tpu.memory_space<vmem>>, vector<6x64xf32>
    tpu.vector_store %arg14[%c49, %c0_169], %323 {strides = array<i32>} : memref<64x64xf32, #tpu.memory_space<vmem>>, vector<6x64xf32>,
    %c0_170 = arith.constant 0 : index
    %c0_171 = arith.constant 0 : index
    %325 = vector.load %arg14[%c0_170, %c0_171] : memref<64x64xf32, #tpu.memory_space<vmem>>, vector<64x64xf32>
    %326 = vector.extract_strided_slice %325 {offsets = [0, 0], sizes = [46, 64], strides = [1, 1]} : vector<64x64xf32> to vector<46x64xf32>
    %c0_172 = arith.constant 0 : index
    %c0_173 = arith.constant 0 : index
    %c0_174 = arith.constant 0 : index
    %327 = vector.load %arg6[%c0_172, %c0_173, %c0_174] : memref<9x64x128xf32, #tpu.memory_space<vmem>>, vector<1x64x128xf32>
    %328 = vector.shape_cast %327 : vector<1x64x128xf32> to vector<64x128xf32>
    %cst_175 = arith.constant dense<0.000000e+00> : vector<46x128xf32>
    %329 = tpu.matmul %326, %328, %cst_175 {dimension_numbers = #tpu.dot_dimension_numbers<[1], [0], [0], [1], [0, 0, 1, 1], [], []>} : vector<46x64xf32>, vector<64x128xf32>, vector<46x128xf32> -> vector<46x128xf32>
    %330 = vector.extract_strided_slice %325 {offsets = [1, 0], sizes = [46, 64], strides = [1, 1]} : vector<64x64xf32> to vector<46x64xf32>
    %c1_176 = arith.constant 1 : index
    %c0_177 = arith.constant 0 : index
    %c0_178 = arith.constant 0 : index
    %331 = vector.load %arg6[%c1_176, %c0_177, %c0_178] : memref<9x64x128xf32, #tpu.memory_space<vmem>>, vector<1x64x128xf32>
    %332 = vector.shape_cast %331 : vector<1x64x128xf32> to vector<64x128xf32>
    %cst_179 = arith.constant dense<0.000000e+00> : vector<46x128xf32>
    %333 = tpu.matmul %330, %332, %cst_179 {dimension_numbers = #tpu.dot_dimension_numbers<[1], [0], [0], [1], [0, 0, 1, 1], [], []>} : vector<46x64xf32>, vector<64x128xf32>, vector<46x128xf32> -> vector<46x128xf32>
    %334 = arith.addf %329, %333 : vector<46x128xf32>
    %335 = vector.extract_strided_slice %325 {offsets = [2, 0], sizes = [46, 64], strides = [1, 1]} : vector<64x64xf32> to vector<46x64xf32>
    %c2_180 = arith.constant 2 : index
    %c0_181 = arith.constant 0 : index
    %c0_182 = arith.constant 0 : index
    %336 = vector.load %arg6[%c2_180, %c0_181, %c0_182] : memref<9x64x128xf32, #tpu.memory_space<vmem>>, vector<1x64x128xf32>
    %337 = vector.shape_cast %336 : vector<1x64x128xf32> to vector<64x128xf32>
    %cst_183 = arith.constant dense<0.000000e+00> : vector<46x128xf32>
    %338 = tpu.matmul %335, %337, %cst_183 {dimension_numbers = #tpu.dot_dimension_numbers<[1], [0], [0], [1], [0, 0, 1, 1], [], []>} : vector<46x64xf32>, vector<64x128xf32>, vector<46x128xf32> -> vector<46x128xf32>
    %339 = arith.addf %334, %338 : vector<46x128xf32>
    %340 = vector.extract_strided_slice %325 {offsets = [8, 0], sizes = [46, 64], strides = [1, 1]} : vector<64x64xf32> to vector<46x64xf32>
    %c3_184 = arith.constant 3 : index
    %c0_185 = arith.constant 0 : index
    %c0_186 = arith.constant 0 : index
    %341 = vector.load %arg6[%c3_184, %c0_185, %c0_186] : memref<9x64x128xf32, #tpu.memory_space<vmem>>, vector<1x64x128xf32>
    %342 = vector.shape_cast %341 : vector<1x64x128xf32> to vector<64x128xf32>
    %cst_187 = arith.constant dense<0.000000e+00> : vector<46x128xf32>
    %343 = tpu.matmul %340, %342, %cst_187 {dimension_numbers = #tpu.dot_dimension_numbers<[1], [0], [0], [1], [0, 0, 1, 1], [], []>} : vector<46x64xf32>, vector<64x128xf32>, vector<46x128xf32> -> vector<46x128xf32>
    %344 = arith.addf %339, %343 : vector<46x128xf32>
    %345 = vector.extract_strided_slice %325 {offsets = [9, 0], sizes = [46, 64], strides = [1, 1]} : vector<64x64xf32> to vector<46x64xf32>
    %c4_188 = arith.constant 4 : index
    %c0_189 = arith.constant 0 : index
    %c0_190 = arith.constant 0 : index
    %346 = vector.load %arg6[%c4_188, %c0_189, %c0_190] : memref<9x64x128xf32, #tpu.memory_space<vmem>>, vector<1x64x128xf32>
    %347 = vector.shape_cast %346 : vector<1x64x128xf32> to vector<64x128xf32>
    %cst_191 = arith.constant dense<0.000000e+00> : vector<46x128xf32>
    %348 = tpu.matmul %345, %347, %cst_191 {dimension_numbers = #tpu.dot_dimension_numbers<[1], [0], [0], [1], [0, 0, 1, 1], [], []>} : vector<46x64xf32>, vector<64x128xf32>, vector<46x128xf32> -> vector<46x128xf32>
    %349 = arith.addf %344, %348 : vector<46x128xf32>
    %350 = vector.extract_strided_slice %325 {offsets = [10, 0], sizes = [46, 64], strides = [1, 1]} : vector<64x64xf32> to vector<46x64xf32>
    %c5_192 = arith.constant 5 : index
    %c0_193 = arith.constant 0 : index
    %c0_194 = arith.constant 0 : index
    %351 = vector.load %arg6[%c5_192, %c0_193, %c0_194] : memref<9x64x128xf32, #tpu.memory_space<vmem>>, vector<1x64x128xf32>
    %352 = vector.shape_cast %351 : vector<1x64x128xf32> to vector<64x128xf32>
    %cst_195 = arith.constant dense<0.000000e+00> : vector<46x128xf32>
    %353 = tpu.matmul %350, %352, %cst_195 {dimension_numbers = #tpu.dot_dimension_numbers<[1], [0], [0], [1], [0, 0, 1, 1], [], []>} : vector<46x64xf32>, vector<64x128xf32>, vector<46x128xf32> -> vector<46x128xf32>
    %354 = arith.addf %349, %353 : vector<46x128xf32>
    %355 = vector.extract_strided_slice %325 {offsets = [16, 0], sizes = [46, 64], strides = [1, 1]} : vector<64x64xf32> to vector<46x64xf32>
    %c6_196 = arith.constant 6 : index
    %c0_197 = arith.constant 0 : index
    %c0_198 = arith.constant 0 : index
    %356 = vector.load %arg6[%c6_196, %c0_197, %c0_198] : memref<9x64x128xf32, #tpu.memory_space<vmem>>, vector<1x64x128xf32>
    %357 = vector.shape_cast %356 : vector<1x64x128xf32> to vector<64x128xf32>
    %cst_199 = arith.constant dense<0.000000e+00> : vector<46x128xf32>
    %358 = tpu.matmul %355, %357, %cst_199 {dimension_numbers = #tpu.dot_dimension_numbers<[1], [0], [0], [1], [0, 0, 1, 1], [], []>} : vector<46x64xf32>, vector<64x128xf32>, vector<46x128xf32> -> vector<46x128xf32>
    %359 = arith.addf %354, %358 : vector<46x128xf32>
    %360 = vector.extract_strided_slice %325 {offsets = [17, 0], sizes = [46, 64], strides = [1, 1]} : vector<64x64xf32> to vector<46x64xf32>
    %c7_200 = arith.constant 7 : index
    %c0_201 = arith.constant 0 : index
    %c0_202 = arith.constant 0 : index
    %361 = vector.load %arg6[%c7_200, %c0_201, %c0_202] : memref<9x64x128xf32, #tpu.memory_space<vmem>>, vector<1x64x128xf32>
    %362 = vector.shape_cast %361 : vector<1x64x128xf32> to vector<64x128xf32>
    %cst_203 = arith.constant dense<0.000000e+00> : vector<46x128xf32>
    %363 = tpu.matmul %360, %362, %cst_203 {dimension_numbers = #tpu.dot_dimension_numbers<[1], [0], [0], [1], [0, 0, 1, 1], [], []>} : vector<46x64xf32>, vector<64x128xf32>, vector<46x128xf32> -> vector<46x128xf32>
    %364 = arith.addf %359, %363 : vector<46x128xf32>
    %365 = vector.extract_strided_slice %325 {offsets = [18, 0], sizes = [46, 64], strides = [1, 1]} : vector<64x64xf32> to vector<46x64xf32>
    %c8_204 = arith.constant 8 : index
    %c0_205 = arith.constant 0 : index
    %c0_206 = arith.constant 0 : index
    %366 = vector.load %arg6[%c8_204, %c0_205, %c0_206] : memref<9x64x128xf32, #tpu.memory_space<vmem>>, vector<1x64x128xf32>
    %367 = vector.shape_cast %366 : vector<1x64x128xf32> to vector<64x128xf32>
    %cst_207 = arith.constant dense<0.000000e+00> : vector<46x128xf32>
    %368 = tpu.matmul %365, %367, %cst_207 {dimension_numbers = #tpu.dot_dimension_numbers<[1], [0], [0], [1], [0, 0, 1, 1], [], []>} : vector<46x64xf32>, vector<64x128xf32>, vector<46x128xf32> -> vector<46x128xf32>
    %369 = arith.addf %364, %368 : vector<46x128xf32>
    %c0_208 = arith.constant 0 : index
    %c0_209 = arith.constant 0 : index
    %370 = vector.load %arg15[%c0_208, %c0_209] : memref<46x128xf32, #tpu.memory_space<vmem>>, vector<46x128xf32>
    tpu.vector_store %arg15[%c0_208, %c0_209], %369 {strides = array<i32>} : memref<46x128xf32, #tpu.memory_space<vmem>>, vector<46x128xf32>,
    %c0_210 = arith.constant 0 : index
    %c0_211 = arith.constant 0 : index
    %371 = vector.load %arg7[%c0_210, %c0_211] : memref<1x128xf32, #tpu.memory_space<vmem>>, vector<1x128xf32>
    %c0_212 = arith.constant 0 : index
    %c0_213 = arith.constant 0 : index
    %372 = vector.load %arg9[%c0_212, %c0_213] : memref<1x128xf32, #tpu.memory_space<vmem>>, vector<1x128xf32>
    %c0_214 = arith.constant 0 : index
    %c0_215 = arith.constant 0 : index
    %373 = tpu.strided_load %arg15[%c0_214, %c0_215] {strides = array<i32: 2, 1>} : memref<46x128xf32, #tpu.memory_space<vmem>>, vector<3x128xf32>
    %c1_216 = arith.constant 1 : index
    %c0_217 = arith.constant 0 : index
    %374 = tpu.strided_load %arg15[%c1_216, %c0_217] {strides = array<i32: 2, 1>} : memref<46x128xf32, #tpu.memory_space<vmem>>, vector<3x128xf32>
    %c8_218 = arith.constant 8 : index
    %c0_219 = arith.constant 0 : index
    %375 = tpu.strided_load %arg15[%c8_218, %c0_219] {strides = array<i32: 2, 1>} : memref<46x128xf32, #tpu.memory_space<vmem>>, vector<3x128xf32>
    %c9_220 = arith.constant 9 : index
    %c0_221 = arith.constant 0 : index
    %376 = tpu.strided_load %arg15[%c9_220, %c0_221] {strides = array<i32: 2, 1>} : memref<46x128xf32, #tpu.memory_space<vmem>>, vector<3x128xf32>
    %377 = arith.maximumf %373, %374 : vector<3x128xf32>
    %378 = arith.maximumf %375, %376 : vector<3x128xf32>
    %379 = arith.maximumf %377, %378 : vector<3x128xf32>
    %380 = vector.broadcast %371 : vector<1x128xf32> to vector<3x128xf32>
    %381 = arith.addf %379, %380 : vector<3x128xf32>
    %382 = vector.extract_strided_slice %381 {offsets = [0, 0], sizes = [1, 128], strides = [1, 1]} : vector<3x128xf32> to vector<1x128xf32>
    %c0_222 = arith.constant 0 : index
    %c0_223 = arith.constant 0 : index
    %c0_224 = arith.constant 0 : index
    %383 = vector.load %arg8[%c0_222, %c0_223, %c0_224] : memref<9x128x128xf32, #tpu.memory_space<vmem>>, vector<1x128x128xf32>
    %384 = vector.shape_cast %383 : vector<1x128x128xf32> to vector<128x128xf32>
    %cst_225 = arith.constant dense<0.000000e+00> : vector<1x128xf32>
    %385 = tpu.matmul %382, %384, %cst_225 {dimension_numbers = #tpu.dot_dimension_numbers<[1], [0], [0], [1], [0, 0, 1, 1], [], []>} : vector<1x128xf32>, vector<128x128xf32>, vector<1x128xf32> -> vector<1x128xf32>
    %386 = arith.addf %372, %385 : vector<1x128xf32>
    %387 = vector.extract_strided_slice %381 {offsets = [1, 0], sizes = [1, 128], strides = [1, 1]} : vector<3x128xf32> to vector<1x128xf32>
    %c1_226 = arith.constant 1 : index
    %c0_227 = arith.constant 0 : index
    %c0_228 = arith.constant 0 : index
    %388 = vector.load %arg8[%c1_226, %c0_227, %c0_228] : memref<9x128x128xf32, #tpu.memory_space<vmem>>, vector<1x128x128xf32>
    %389 = vector.shape_cast %388 : vector<1x128x128xf32> to vector<128x128xf32>
    %cst_229 = arith.constant dense<0.000000e+00> : vector<1x128xf32>
    %390 = tpu.matmul %387, %389, %cst_229 {dimension_numbers = #tpu.dot_dimension_numbers<[1], [0], [0], [1], [0, 0, 1, 1], [], []>} : vector<1x128xf32>, vector<128x128xf32>, vector<1x128xf32> -> vector<1x128xf32>
    %391 = arith.addf %386, %390 : vector<1x128xf32>
    %392 = vector.extract_strided_slice %381 {offsets = [2, 0], sizes = [1, 128], strides = [1, 1]} : vector<3x128xf32> to vector<1x128xf32>
    %c2_230 = arith.constant 2 : index
    %c0_231 = arith.constant 0 : index
    %c0_232 = arith.constant 0 : index
    %393 = vector.load %arg8[%c2_230, %c0_231, %c0_232] : memref<9x128x128xf32, #tpu.memory_space<vmem>>, vector<1x128x128xf32>
    %394 = vector.shape_cast %393 : vector<1x128x128xf32> to vector<128x128xf32>
    %cst_233 = arith.constant dense<0.000000e+00> : vector<1x128xf32>
    %395 = tpu.matmul %392, %394, %cst_233 {dimension_numbers = #tpu.dot_dimension_numbers<[1], [0], [0], [1], [0, 0, 1, 1], [], []>} : vector<1x128xf32>, vector<128x128xf32>, vector<1x128xf32> -> vector<1x128xf32>
    %396 = arith.addf %391, %395 : vector<1x128xf32>
    %c16 = arith.constant 16 : index
    %c0_234 = arith.constant 0 : index
    %397 = tpu.strided_load %arg15[%c16, %c0_234] {strides = array<i32: 2, 1>} : memref<46x128xf32, #tpu.memory_space<vmem>>, vector<3x128xf32>
    %c17_235 = arith.constant 17 : index
    %c0_236 = arith.constant 0 : index
    %398 = tpu.strided_load %arg15[%c17_235, %c0_236] {strides = array<i32: 2, 1>} : memref<46x128xf32, #tpu.memory_space<vmem>>, vector<3x128xf32>
    %c24 = arith.constant 24 : index
    %c0_237 = arith.constant 0 : index
    %399 = tpu.strided_load %arg15[%c24, %c0_237] {strides = array<i32: 2, 1>} : memref<46x128xf32, #tpu.memory_space<vmem>>, vector<3x128xf32>
    %c25_238 = arith.constant 25 : index
    %c0_239 = arith.constant 0 : index
    %400 = tpu.strided_load %arg15[%c25_238, %c0_239] {strides = array<i32: 2, 1>} : memref<46x128xf32, #tpu.memory_space<vmem>>, vector<3x128xf32>
    %401 = arith.maximumf %397, %398 : vector<3x128xf32>
    %402 = arith.maximumf %399, %400 : vector<3x128xf32>
    %403 = arith.maximumf %401, %402 : vector<3x128xf32>
    %404 = vector.broadcast %371 : vector<1x128xf32> to vector<3x128xf32>
    %405 = arith.addf %403, %404 : vector<3x128xf32>
    %406 = vector.extract_strided_slice %405 {offsets = [0, 0], sizes = [1, 128], strides = [1, 1]} : vector<3x128xf32> to vector<1x128xf32>
    %c3_240 = arith.constant 3 : index
    %c0_241 = arith.constant 0 : index
    %c0_242 = arith.constant 0 : index
    %407 = vector.load %arg8[%c3_240, %c0_241, %c0_242] : memref<9x128x128xf32, #tpu.memory_space<vmem>>, vector<1x128x128xf32>
    %408 = vector.shape_cast %407 : vector<1x128x128xf32> to vector<128x128xf32>
    %cst_243 = arith.constant dense<0.000000e+00> : vector<1x128xf32>
    %409 = tpu.matmul %406, %408, %cst_243 {dimension_numbers = #tpu.dot_dimension_numbers<[1], [0], [0], [1], [0, 0, 1, 1], [], []>} : vector<1x128xf32>, vector<128x128xf32>, vector<1x128xf32> -> vector<1x128xf32>
    %410 = arith.addf %396, %409 : vector<1x128xf32>
    %411 = vector.extract_strided_slice %405 {offsets = [1, 0], sizes = [1, 128], strides = [1, 1]} : vector<3x128xf32> to vector<1x128xf32>
    %c4_244 = arith.constant 4 : index
    %c0_245 = arith.constant 0 : index
    %c0_246 = arith.constant 0 : index
    %412 = vector.load %arg8[%c4_244, %c0_245, %c0_246] : memref<9x128x128xf32, #tpu.memory_space<vmem>>, vector<1x128x128xf32>
    %413 = vector.shape_cast %412 : vector<1x128x128xf32> to vector<128x128xf32>
    %cst_247 = arith.constant dense<0.000000e+00> : vector<1x128xf32>
    %414 = tpu.matmul %411, %413, %cst_247 {dimension_numbers = #tpu.dot_dimension_numbers<[1], [0], [0], [1], [0, 0, 1, 1], [], []>} : vector<1x128xf32>, vector<128x128xf32>, vector<1x128xf32> -> vector<1x128xf32>
    %415 = arith.addf %410, %414 : vector<1x128xf32>
    %416 = vector.extract_strided_slice %405 {offsets = [2, 0], sizes = [1, 128], strides = [1, 1]} : vector<3x128xf32> to vector<1x128xf32>
    %c5_248 = arith.constant 5 : index
    %c0_249 = arith.constant 0 : index
    %c0_250 = arith.constant 0 : index
    %417 = vector.load %arg8[%c5_248, %c0_249, %c0_250] : memref<9x128x128xf32, #tpu.memory_space<vmem>>, vector<1x128x128xf32>
    %418 = vector.shape_cast %417 : vector<1x128x128xf32> to vector<128x128xf32>
    %cst_251 = arith.constant dense<0.000000e+00> : vector<1x128xf32>
    %419 = tpu.matmul %416, %418, %cst_251 {dimension_numbers = #tpu.dot_dimension_numbers<[1], [0], [0], [1], [0, 0, 1, 1], [], []>} : vector<1x128xf32>, vector<128x128xf32>, vector<1x128xf32> -> vector<1x128xf32>
    %420 = arith.addf %415, %419 : vector<1x128xf32>
    %c32 = arith.constant 32 : index
    %c0_252 = arith.constant 0 : index
    %421 = tpu.strided_load %arg15[%c32, %c0_252] {strides = array<i32: 2, 1>} : memref<46x128xf32, #tpu.memory_space<vmem>>, vector<3x128xf32>
    %c33_253 = arith.constant 33 : index
    %c0_254 = arith.constant 0 : index
    %422 = tpu.strided_load %arg15[%c33_253, %c0_254] {strides = array<i32: 2, 1>} : memref<46x128xf32, #tpu.memory_space<vmem>>, vector<3x128xf32>
    %c40 = arith.constant 40 : index
    %c0_255 = arith.constant 0 : index
    %423 = tpu.strided_load %arg15[%c40, %c0_255] {strides = array<i32: 2, 1>} : memref<46x128xf32, #tpu.memory_space<vmem>>, vector<3x128xf32>
    %c41_256 = arith.constant 41 : index
    %c0_257 = arith.constant 0 : index
    %424 = tpu.strided_load %arg15[%c41_256, %c0_257] {strides = array<i32: 2, 1>} : memref<46x128xf32, #tpu.memory_space<vmem>>, vector<3x128xf32>
    %425 = arith.maximumf %421, %422 : vector<3x128xf32>
    %426 = arith.maximumf %423, %424 : vector<3x128xf32>
    %427 = arith.maximumf %425, %426 : vector<3x128xf32>
    %428 = vector.broadcast %371 : vector<1x128xf32> to vector<3x128xf32>
    %429 = arith.addf %427, %428 : vector<3x128xf32>
    %430 = vector.extract_strided_slice %429 {offsets = [0, 0], sizes = [1, 128], strides = [1, 1]} : vector<3x128xf32> to vector<1x128xf32>
    %c6_258 = arith.constant 6 : index
    %c0_259 = arith.constant 0 : index
    %c0_260 = arith.constant 0 : index
    %431 = vector.load %arg8[%c6_258, %c0_259, %c0_260] : memref<9x128x128xf32, #tpu.memory_space<vmem>>, vector<1x128x128xf32>
    %432 = vector.shape_cast %431 : vector<1x128x128xf32> to vector<128x128xf32>
    %cst_261 = arith.constant dense<0.000000e+00> : vector<1x128xf32>
    %433 = tpu.matmul %430, %432, %cst_261 {dimension_numbers = #tpu.dot_dimension_numbers<[1], [0], [0], [1], [0, 0, 1, 1], [], []>} : vector<1x128xf32>, vector<128x128xf32>, vector<1x128xf32> -> vector<1x128xf32>
    %434 = arith.addf %420, %433 : vector<1x128xf32>
    %435 = vector.extract_strided_slice %429 {offsets = [1, 0], sizes = [1, 128], strides = [1, 1]} : vector<3x128xf32> to vector<1x128xf32>
    %c7_262 = arith.constant 7 : index
    %c0_263 = arith.constant 0 : index
    %c0_264 = arith.constant 0 : index
    %436 = vector.load %arg8[%c7_262, %c0_263, %c0_264] : memref<9x128x128xf32, #tpu.memory_space<vmem>>, vector<1x128x128xf32>
    %437 = vector.shape_cast %436 : vector<1x128x128xf32> to vector<128x128xf32>
    %cst_265 = arith.constant dense<0.000000e+00> : vector<1x128xf32>
    %438 = tpu.matmul %435, %437, %cst_265 {dimension_numbers = #tpu.dot_dimension_numbers<[1], [0], [0], [1], [0, 0, 1, 1], [], []>} : vector<1x128xf32>, vector<128x128xf32>, vector<1x128xf32> -> vector<1x128xf32>
    %439 = arith.addf %434, %438 : vector<1x128xf32>
    %440 = vector.extract_strided_slice %429 {offsets = [2, 0], sizes = [1, 128], strides = [1, 1]} : vector<3x128xf32> to vector<1x128xf32>
    %c8_266 = arith.constant 8 : index
    %c0_267 = arith.constant 0 : index
    %c0_268 = arith.constant 0 : index
    %441 = vector.load %arg8[%c8_266, %c0_267, %c0_268] : memref<9x128x128xf32, #tpu.memory_space<vmem>>, vector<1x128x128xf32>
    %442 = vector.shape_cast %441 : vector<1x128x128xf32> to vector<128x128xf32>
    %cst_269 = arith.constant dense<0.000000e+00> : vector<1x128xf32>
    %443 = tpu.matmul %440, %442, %cst_269 {dimension_numbers = #tpu.dot_dimension_numbers<[1], [0], [0], [1], [0, 0, 1, 1], [], []>} : vector<1x128xf32>, vector<128x128xf32>, vector<1x128xf32> -> vector<1x128xf32>
    %444 = arith.addf %439, %443 : vector<1x128xf32>
    %c0_270 = arith.constant 0 : index
    %c0_271 = arith.constant 0 : index
    %c0_272 = arith.constant 0 : index
    %445 = vector.load %arg10[%c0_270, %c0_271, %c0_272] : memref<1x1x128xf32, #tpu.memory_space<vmem>>, vector<1x1x128xf32>
    %446 = vector.shape_cast %445 : vector<1x1x128xf32> to vector<1x128xf32>
    %447 = vector.shape_cast %444 : vector<1x128xf32> to vector<1x1x128xf32>
    tpu.vector_store %arg10[%c0_270, %c0_271, %c0_272], %447 {strides = array<i32>} : memref<1x1x128xf32, #tpu.memory_space<vmem>>, vector<1x1x128xf32>,
    return
  }
  func.func @transform_0(%arg0: i32) -> (i32, i32, i32) {
    %c0_i32 = arith.constant 0 : i32
    %c0_i32_0 = arith.constant 0 : i32
    %c0_i32_1 = arith.constant 0 : i32
    return %arg0, %c0_i32, %c0_i32_0 : i32, i32, i32
  }
  func.func @transform_1(%arg0: i32) -> (i32, i32) {
    %c0_i32 = arith.constant 0 : i32
    %c0_i32_0 = arith.constant 0 : i32
    %c0_i32_1 = arith.constant 0 : i32
    return %c0_i32, %c0_i32_0 : i32, i32
  }
  func.func @transform_2(%arg0: i32) -> (i32, i32) {
    %c0_i32 = arith.constant 0 : i32
    %c0_i32_0 = arith.constant 0 : i32
    %c0_i32_1 = arith.constant 0 : i32
    return %c0_i32, %c0_i32_0 : i32, i32
  }
  func.func @transform_3(%arg0: i32) -> (i32, i32, i32) {
    %c0_i32 = arith.constant 0 : i32
    %c0_i32_0 = arith.constant 0 : i32
    %c0_i32_1 = arith.constant 0 : i32
    %c0_i32_2 = arith.constant 0 : i32
    return %c0_i32, %c0_i32_0, %c0_i32_1 : i32, i32, i32
  }
  func.func @transform_4(%arg0: i32) -> (i32, i32) {
    %c0_i32 = arith.constant 0 : i32
    %c0_i32_0 = arith.constant 0 : i32
    %c0_i32_1 = arith.constant 0 : i32
    return %c0_i32, %c0_i32_0 : i32, i32
  }
  func.func @transform_5(%arg0: i32) -> (i32, i32, i32) {
    %c0_i32 = arith.constant 0 : i32
    %c0_i32_0 = arith.constant 0 : i32
    %c0_i32_1 = arith.constant 0 : i32
    %c0_i32_2 = arith.constant 0 : i32
    return %c0_i32, %c0_i32_0, %c0_i32_1 : i32, i32, i32
  }
  func.func @transform_6(%arg0: i32) -> (i32, i32) {
    %c0_i32 = arith.constant 0 : i32
    %c0_i32_0 = arith.constant 0 : i32
    %c0_i32_1 = arith.constant 0 : i32
    return %c0_i32, %c0_i32_0 : i32, i32
  }
  func.func @transform_7(%arg0: i32) -> (i32, i32, i32) {
    %c0_i32 = arith.constant 0 : i32
    %c0_i32_0 = arith.constant 0 : i32
    %c0_i32_1 = arith.constant 0 : i32
    %c0_i32_2 = arith.constant 0 : i32
    return %c0_i32, %c0_i32_0, %c0_i32_1 : i32, i32, i32
  }
  func.func @transform_8(%arg0: i32) -> (i32, i32) {
    %c0_i32 = arith.constant 0 : i32
    %c0_i32_0 = arith.constant 0 : i32
    %c0_i32_1 = arith.constant 0 : i32
    return %c0_i32, %c0_i32_0 : i32, i32
  }
  func.func @transform_9(%arg0: i32) -> (i32, i32, i32) {
    %c0_i32 = arith.constant 0 : i32
    %c0_i32_0 = arith.constant 0 : i32
    %c0_i32_1 = arith.constant 0 : i32
    return %arg0, %c0_i32, %c0_i32_0 : i32, i32, i32
  }
}

</mosaic_0001>

<bundles_post_ra>
// kernel: net_forward.1
= control target key start
LH: loop header
LB: loop body
LE: loop exit
PB: predicated region body
PF: predicated region fallthrough
CT: control target
= control target key end

     0   :  { %14 = vsyncpa [#allocation8], 0  ;;  %s19948_s0 = inlined_call_operand.vmem [shape: f32[2,676,1], index: 0, kind: input, shape index: {}]   ;;  %s19949_s1 = inlined_call_operand.vmem [shape: f32[9,32], index: 1, kind: input, shape index: {}]   ;;  %s19950_s2 = inlined_call_operand.vmem [shape: f32[1,32], index: 2, kind: input, shape index: {}]   ;;  %s19951_s3 = inlined_call_operand.vmem [shape: f32[9,32,64], index: 3, kind: input, shape index: {}]   ;;  %s19952_s4 = inlined_call_operand.vmem [shape: f32[1,64], index: 4, kind: input, shape index: {}]   ;;  %s19953_s5 = inlined_call_operand.vmem [shape: f32[9,64,128], index: 5, kind: input, shape index: {}]   ;;  %s19954_s6 = inlined_call_operand.vmem [shape: f32[1,128], index: 6, kind: input, shape index: {}]   ;;  %s19955_s7 = inlined_call_operand.vmem [shape: f32[9,128,128], index: 7, kind: input, shape index: {}]   ;;  %s19956_s8 = inlined_call_operand.vmem [shape: f32[1,128], index: 8, kind: input, shape index: {}]   ;;  %s19957_s9 = inlined_call_operand.hbm [shape: f32[2,1,128], index: 9, kind: output, shape index: {}]  }
   0x1   :  { %16 = vsyncpa [#allocation8 + $0x1], 0  ;;  %s12772_s30 = smov 0   ;;  %s12774_s10 = smov 0  }
   0x2   :  { %s12776_s11 = smov 0   ;;  %s12778_s12 = smov 0  }
   0x3 LB: > { %s12793_s13 = sadd.s32 4294967295, %s12715_s12   ;;  %s9622_s14 = sadd.s32 4294967294, %s12715_s12   ;;  %s12715_s12 = sphi %s12778_s12, %s20719_s12   ;;  %s12711_s11 = sphi %s12776_s11, %s20718_s11   ;;  %s12707_s10 = sphi %s12774_s10, %s20717_s10   ;;  %s12703_s30 = sphi %s12772_s30, %s20716_s30  }
   0x4   : > { %s12797_s15 = sadd.s32 1, %s12715_s12   ;;  %s223_s16 = sadd.s32 1, %s12711_s11 }
   0x5   : > { %s220_s17 = ssub.s32 %s12715_s12, %s12797_s15  ;;  %p233_p0 = scmp.ne.s32.totalorder %s12711_s11, %s12707_s10 }
   0x6   : > { %p221_p1 = scmp.eq.s32.totalorder %s220_s17, 0  ;;  %p234_p2 = scmp.eq.s32.totalorder %s12793_s13, 1 }
   0x7   : > { %p239_p3 = scmp.ne.s32.totalorder %s12707_s10, %s12703_s30  ;;  %p240_p4 = scmp.eq.s32.totalorder %s9622_s14, 1 }
   0x8   : > { %s12808_s18 = scalar_select %p221_p1, %s12711_s11, %s223_s16  }
   0x9   : > { %p12810_p5 = por %p234_p2, %p233_p0  ;;  %p12814_p6 = por %p240_p4, %p239_p3 }
   0xa   : > { %p9625_p7 = scmp.ge.s32.totalorder %s12715_s12, 1  ;;  %p290_p8 = scmp.lt.s32.totalorder %s12715_s12, 3 }
   0xc   : > { %p291_p9 = pnand %p9625_p7, %p290_p8 }
   0xe   : > { %294 = sbr.rel (%p291_p9) target bundleno = 2518 (0x9d6), region = 56 }
  0x15   : > { %p325_p10 = scmp.lt.s32.totalorder %s12793_s13, 1  ;;  %v12717_v0 = vmov 0   ;;  %v843_v61 = vlaneseq  ;;  %vm1085_vm0 = vcmask 1046528   ;;  %vm1557_vm1 = vcmask 1045504   ;;  %s323_s28 = sand.u32 1, %s12707_s10  }
  0x16   : > { %12623 = vset.pattern.permute.xlu1 %v12717_v0  ;;  %12622 = vset.pattern.permute.xlu0 %v12717_v0  ;;  %vm2522_vm2 = vcmask 1044480   ;;  %vm2998_vm3 = vcmask 1043456   ;;  %vm3964_vm4 = vcmask 1042432   ;;  %vm4440_vm5 = vcmask 1041408   ;;  %s10098_s16 = sshll.u32 %s12793_s13, 4  ;;  %s324_s17 = scalar_lea.vmem [#allocation7], %s323_s28 }
  0x17   : > { %s326_s21 = scalar_select %p325_p10, %s12793_s13, 1  ;;  %v844_v0 = vshrl.u32 %v843_v61, 7  ;;  %vm330_vm6 = vcmask 261120   ;;  %vm12720_vm7 = vmmov 0   ;;  %vm355_vm8 = vcmask 257024  }
  0x18   : > { %vm4831_vm9 = vcmask 259072   ;;  %vm6262_vm10 = vcmask 1040384   ;;  %vm357_vm11 = vcmask 523264   ;;  %vm7527_vm12 = vcmask 521216   ;;  %s19906_s24 = scalar_lea.hbm %s19957_s9, %s10098_s16  ;;  %s12721_s13 = smov [#allocation7]  }
  0x19   : > { %s12578_s22 = smul.u32 680, %s326_s21  ;;  %s9567_s21 = sshll.u32 %s324_s17, 4  ;;  %s19908_s21 = int_to_ptr.vmem [resolvable:$true] %s9567_s21 }
  0x1a   : > { %s12653_s26 = scalar_lea.vmem %s19908_s21, 16  ;;  %s12657_s27 = sshll.u32 %s12721_s13, 4  ;;  %s12658_s27 = int_to_ptr.vmem [resolvable:$false] %s12657_s27 }
  0x1b   : > { %s12825_s25 = scalar_lea.vmem %s19948_s0, %s12578_s22  ;;  %p12654_p11 = scmp.ne.s32.totalorder %s19908_s21, %s12653_s26 }
  0x1c   : > { %v368_v1 = vld [vmem:[%s12825_s25 + $0x10] sm:$0xff]  ;;  %v366_v2 = vld [vmem:[%s12825_s25] sm:$0xff]  ;;  %v369_v3 = vld [vmem:[%s12825_s25 + $0x18] sm:$0xff]  ;;  %s12659_s29 = scalar_lea.vmem %s12658_s27, 32  ;;  %p12660_p0 = scmp.lt.s32.totalorder %s19908_s21, %s12658_s27 }
  0x1d   : > { %465 = vperm.xlu1 %12623, %v368_v1   ;;  %455 = vperm.xlu0 %12622, %v366_v2   ;;  %v367_v4 = vld [vmem:[%s12825_s25 + $0x8] sm:$0xff]  ;;  %v370_v6 = vld [vmem:[%s12825_s25 + $0x20] sm:$0xff]  ;;  %v373_v7 = vld [vmem:[%s12825_s25 + $0x38] sm:$0xff]  ;;  %p12655_p12 = pnand %p12654_p11, %p12810_p5  ;;  %p12661_p1 = scmp.lt.s32.totalorder %s12659_s29, %s12653_s26 }
  0x1e   : > { %v371_v5 = vld [vmem:[%s12825_s25 + $0x28] sm:$0xff]  ;;  %v372_v8 = vld [vmem:[%s12825_s25 + $0x30] sm:$0xff]  ;;  %v374_v10 = vld [vmem:[%s12825_s25 + $0x40] sm:$0xff] }
  0x1f   : > { %v375_v9 = vld [vmem:[%s12825_s25 + $0x48] sm:$0xff]  ;;  %v377_v11 = vld [vmem:[%s12825_s25 + $0x58] sm:$0xff]  ;;  %v376_v12 = vld [vmem:[%s12825_s25 + $0x50] sm:$0xff]  ;;  %p12656_p13 = pneg %p12655_p12  ;;  %p12662_p2 = por %p12661_p1, %p12660_p0 }
  0x20   : > { %v379_v13 = vld [vmem:[%s12825_s25 + $0x68] sm:$0xff]  ;;  %v378_v14 = vld [vmem:[%s12825_s25 + $0x60] sm:$0xff]  ;;  %v381_v15 = vld [vmem:[%s12825_s25 + $0x78] sm:$0xff] }
  0x21   : > { %470 = vperm.xlu1 %12623, %v369_v3   ;;  %460 = vperm.xlu0 %12622, %v367_v4   ;;  %v380_v16 = vld [vmem:[%s12825_s25 + $0x70] sm:$0xff]  ;;  %v383_v17 = vld [vmem:[%s12825_s25 + $0x88] sm:$0xff]  ;;  %v382_v18 = vld [vmem:[%s12825_s25 + $0x80] sm:$0xff]  ;;  %v927_v3 = vsub.s32 1, %v844_v0  ;;  %p12663_p3 = pnand %p12662_p2, %p12656_p13 }
  0x22   : > { %v385_v19 = vld [vmem:[%s12825_s25 + $0x98] sm:$0xff]  ;;  %v384_v20 = vld [vmem:[%s12825_s25 + $0x90] sm:$0xff]  ;;  %v387_v21 = vld [vmem:[%s12825_s25 + $0xa8] sm:$0xff] }
  0x23   : > { %v386_v22 = vld [vmem:[%s12825_s25 + $0xa0] sm:$0xff]  ;;  %v389_v23 = vld [vmem:[%s12825_s25 + $0xb8] sm:$0xff]  ;;  %v388_v24 = vld [vmem:[%s12825_s25 + $0xb0] sm:$0xff] }
  0x24   : > { %v391_v25 = vld [vmem:[%s12825_s25 + $0xc8] sm:$0xff]  ;;  %v390_v26 = vld [vmem:[%s12825_s25 + $0xc0] sm:$0xff]  ;;  %v393_v27 = vld [vmem:[%s12825_s25 + $0xd8] sm:$0xff] }
  0x25   : > { %480 = vperm.xlu1 %12623, %v371_v5   ;;  %475 = vperm.xlu0 %12622, %v370_v6   ;;  %v392_v28 = vld [vmem:[%s12825_s25 + $0xd0] sm:$0xff]  ;;  %v395_v29 = vld [vmem:[%s12825_s25 + $0xe8] sm:$0xff]  ;;  %v394_v30 = vld [vmem:[%s12825_s25 + $0xe0] sm:$0xff]  ;;  %v1399_v5 = vsub.s32 2, %v844_v0  ;;  %v845_v6 = vsub.s32 0, %v844_v0 }
  0x26   : > { %v397_v31 = vld [vmem:[%s12825_s25 + $0xf8] sm:$0xff]  ;;  %v396_v32 = vld [vmem:[%s12825_s25 + $0xf0] sm:$0xff]  ;;  %v399_v33 = vld [vmem:[%s12825_s25 + $0x108] sm:$0xff] }
  0x27   : > { %v398_v34 = vld [vmem:[%s12825_s25 + $0x100] sm:$0xff]  ;;  %v401_v35 = vld [vmem:[%s12825_s25 + $0x118] sm:$0xff]  ;;  %v400_v36 = vld [vmem:[%s12825_s25 + $0x110] sm:$0xff] }
  0x28   : > { %v403_v37 = vld [vmem:[%s12825_s25 + $0x128] sm:$0xff]  ;;  %v402_v38 = vld [vmem:[%s12825_s25 + $0x120] sm:$0xff]  ;;  %v405_v39 = vld [vmem:[%s12825_s25 + $0x138] sm:$0xff] }
  0x29   : > { %490 = vperm.xlu1 %12623, %v373_v7   ;;  %485 = vperm.xlu0 %12622, %v372_v8   ;;  %v404_v40 = vld [vmem:[%s12825_s25 + $0x130] sm:$0xff]  ;;  %v407_v41 = vld [vmem:[%s12825_s25 + $0x148] sm:$0xff]  ;;  %v406_v42 = vld [vmem:[%s12825_s25 + $0x140] sm:$0xff] }
  0x2a   : > { %v409_v43 = vld [vmem:[%s12825_s25 + $0x158] sm:$0xff]  ;;  %v408_v44 = vld [vmem:[%s12825_s25 + $0x150] sm:$0xff]  ;;  %v411_v45 = vld [vmem:[%s12825_s25 + $0x168] sm:$0xff] }
  0x2b   : > { %v410_v46 = vld [vmem:[%s12825_s25 + $0x160] sm:$0xff]  ;;  %v413_v47 = vld [vmem:[%s12825_s25 + $0x178] sm:$0xff]  ;;  %v412_v48 = vld [vmem:[%s12825_s25 + $0x170] sm:$0xff] }
  0x2c   : > { %v415_v49 = vld [vmem:[%s12825_s25 + $0x188] sm:$0xff]  ;;  %v414_v50 = vld [vmem:[%s12825_s25 + $0x180] sm:$0xff]  ;;  %v417_v51 = vld [vmem:[%s12825_s25 + $0x198] sm:$0xff] }
  0x2d   : > { %500 = vperm.xlu1 %12623, %v375_v9   ;;  %495 = vperm.xlu0 %12622, %v374_v10   ;;  %v416_v52 = vld [vmem:[%s12825_s25 + $0x190] sm:$0xff]  ;;  %v419_v53 = vld [vmem:[%s12825_s25 + $0x1a8] sm:$0xff]  ;;  %v418_v54 = vld [vmem:[%s12825_s25 + $0x1a0] sm:$0xff]  ;;  %v1886_v9 = vsub.s32 3, %v844_v0  ;;  %v2362_v10 = vsub.s32 4, %v844_v0 }
  0x2e   : > { %v421_v55 = vld [vmem:[%s12825_s25 + $0x1b8] sm:$0xff]  ;;  %v420_v56 = vld [vmem:[%s12825_s25 + $0x1b0] sm:$0xff]  ;;  %v423_v57 = vld [vmem:[%s12825_s25 + $0x1c8] sm:$0xff] }
  0x2f   : > { %v422_v58 = vld [vmem:[%s12825_s25 + $0x1c0] sm:$0xff]  ;;  %v425_v59 = vld [vmem:[%s12825_s25 + $0x1d8] sm:$0xff]  ;;  %v424_v60 = vld [vmem:[%s12825_s25 + $0x1d0] sm:$0xff] }
  0x30   : > { %v427_v62 = vld [vmem:[%s12825_s25 + $0x1e8] sm:$0xff]  ;;  %v426_v63 = vld [vmem:[%s12825_s25 + $0x1e0] sm:$0xff]  ;;  %v429_v1 = vld [vmem:[%s12825_s25 + $0x1f8] sm:$0xff] }
  0x31   : > { %510 = vperm.xlu1 %12623, %v377_v11   ;;  %505 = vperm.xlu0 %12622, %v376_v12   ;;  %v428_v2 = vld [vmem:[%s12825_s25 + $0x1f0] sm:$0xff]  ;;  %v451_v4 = vld [vmem:[%s19949_s1] sm:$0xff]  ;;  %v431_v7 = vld [vmem:[%s12825_s25 + $0x208] sm:$0xff] }
  0x32   : > { %v430_v8 = vld [vmem:[%s12825_s25 + $0x200] sm:$0xff]  ;;  %v12896_v11 = vrot.slane %v451_v4, %v927_v3 }
  0x35   : > { %520 = vperm.xlu1 %12623, %v379_v13   ;;  %515 = vperm.xlu0 %12622, %v378_v14   ;;  %v2838_v14 = vsub.s32 5, %v844_v0 }
  0x39   : > { %530 = vperm.xlu1 %12623, %v381_v15   ;;  %525 = vperm.xlu0 %12622, %v380_v16   ;;  %v3329_v15 = vsub.s32 6, %v844_v0  ;;  %v3804_v16 = vsub.s32 7, %v844_v0 }
  0x3d   : > { %540 = vperm.xlu1 %12623, %v383_v17   ;;  %535 = vperm.xlu0 %12622, %v382_v18   ;;  %v12898_v17 = vrot.slane %v451_v4, %v1399_v5  ;;  %v12900_v18 = vrot.slane %v451_v4, %v845_v6 }
  0x3f   : > { %20140 = vst [vmem:[#allocation10_spill] sm:$0xff] %v12898_v17 }
  0x41   : > { %550 = vperm.xlu1 %12623, %v385_v19   ;;  %545 = vperm.xlu0 %12622, %v384_v20   ;;  %v433_v20 = vld [vmem:[%s12825_s25 + $0x218] sm:$0xff] }
  0x45   : > { %560 = vperm.xlu1 %12623, %v387_v21   ;;  %555 = vperm.xlu0 %12622, %v386_v22   ;;  %v12904_v21 = vrot.slane %v451_v4, %v1886_v9  ;;  %v12906_v22 = vrot.slane %v451_v4, %v2362_v10 }
  0x49   : > { %570 = vperm.xlu1 %12623, %v389_v23   ;;  %565 = vperm.xlu0 %12622, %v388_v24   ;;  %v432_v23 = vld [vmem:[%s12825_s25 + $0x210] sm:$0xff] }
  0x4d   : > { %580 = vperm.xlu1 %12623, %v391_v25   ;;  %575 = vperm.xlu0 %12622, %v390_v26   ;;  %v12910_v25 = vrot.slane %v451_v4, %v2838_v14 }
  0x51   : > { %590 = vperm.xlu1 %12623, %v393_v27   ;;  %585 = vperm.xlu0 %12622, %v392_v28   ;;  %v12912_v28 = vrot.slane %v451_v4, %v3329_v15 }
  0x55   : > { %600 = vperm.xlu1 %12623, %v395_v29   ;;  %595 = vperm.xlu0 %12622, %v394_v30   ;;  %v12914_v29 = vrot.slane %v451_v4, %v3804_v16 }
  0x59   : > { %610 = vperm.xlu1 %12623, %v397_v31   ;;  %605 = vperm.xlu0 %12622, %v396_v32  }
  0x5d   : > { %620 = vperm.xlu1 %12623, %v399_v33   ;;  %615 = vperm.xlu0 %12622, %v398_v34  }
  0x61   : > { %630 = vperm.xlu1 %12623, %v401_v35   ;;  %625 = vperm.xlu0 %12622, %v400_v36  }
  0x65   : > { %640 = vperm.xlu1 %12623, %v403_v37   ;;  %635 = vperm.xlu0 %12622, %v402_v38   ;;  %v435_v38 = vld [vmem:[%s12825_s25 + $0x228] sm:$0xff] }
  0x69   : > { %650 = vperm.xlu1 %12623, %v405_v39   ;;  %645 = vperm.xlu0 %12622, %v404_v40  }
  0x6d   : > { %660 = vperm.xlu1 %12623, %v407_v41   ;;  %655 = vperm.xlu0 %12622, %v406_v42  }
  0x71   : > { %670 = vperm.xlu1 %12623, %v409_v43   ;;  %665 = vperm.xlu0 %12622, %v408_v44   ;;  %v434_v43 = vld [vmem:[%s12825_s25 + $0x220] sm:$0xff] }
  0x75   : > { %680 = vperm.xlu1 %12623, %v411_v45   ;;  %675 = vperm.xlu0 %12622, %v410_v46  }
  0x79   : > { %690 = vperm.xlu1 %12623, %v413_v47   ;;  %685 = vperm.xlu0 %12622, %v412_v48  }
  0x7d   : > { %700 = vperm.xlu1 %12623, %v415_v49   ;;  %695 = vperm.xlu0 %12622, %v414_v50  }
  0x81   : > { %710 = vperm.xlu1 %12623, %v417_v51   ;;  %705 = vperm.xlu0 %12622, %v416_v52  }
  0x85   : > { %720 = vperm.xlu1 %12623, %v419_v53   ;;  %715 = vperm.xlu0 %12622, %v418_v54  }
  0x89   : > { %730 = vperm.xlu1 %12623, %v421_v55   ;;  %725 = vperm.xlu0 %12622, %v420_v56  }
  0x8d   : > { %740 = vperm.xlu1 %12623, %v423_v57   ;;  %735 = vperm.xlu0 %12622, %v422_v58   ;;  %v437_v57 = vld [vmem:[%s12825_s25 + $0x238] sm:$0xff] }
  0x91   : > { %750 = vperm.xlu1 %12623, %v425_v59   ;;  %745 = vperm.xlu0 %12622, %v424_v60  }
  0x95   : > { %760 = vperm.xlu1 %12623, %v427_v62   ;;  %755 = vperm.xlu0 %12622, %v426_v63   ;;  %v436_v63 = vld [vmem:[%s12825_s25 + $0x230] sm:$0xff] }
  0x99   : > { %770 = vperm.xlu1 %12623, %v429_v1   ;;  %765 = vperm.xlu0 %12622, %v428_v2  }
  0x9c   : > { %v466_v12 = vpop.permute.xlu1 %465  ;;  %v456_v13 = vpop.permute.xlu0 %455 }
  0x9d   : > { %780 = vperm.xlu1 %12623, %v431_v7   ;;  %v931_v19 = vmul.f32 %v12896_v11, %v466_v12  ;;  %775 = vperm.xlu0 %12622, %v430_v8   ;;  %v929_v24 = vmul.f32 %v12896_v11, %v456_v13  ;;  %v1403_v30 = vmul.f32 %v12898_v17, %v466_v12 }
  0x9e   : > { %v1401_v31 = vmul.f32 %v12898_v17, %v456_v13  ;;  %v849_v34 = vmul.f32 %v12900_v18, %v466_v12  ;;  %v847_v36 = vmul.f32 %v12900_v18, %v456_v13  ;;  %v439_v13 = vld [vmem:[%s12825_s25 + $0x248] sm:$0xff] }
  0x9f   : > { %v1089_v35 = vrot.slane %v931_v19, 1  ;;  %v1086_v44 = vrot.slane %v929_v24, 1  ;;  %v1561_v49 = vrot.slane %v1403_v30, 2 }
  0xa0   : > { %v471_v26 = vpop.permute.xlu1 %470  ;;  %v461_v27 = vpop.permute.xlu0 %460  ;;  %v1558_v50 = vrot.slane %v1401_v31, 2 }
  0xa1   : > { %v12919_v32 = vmul.f32 %v12896_v11, %v471_v26  ;;  %v12922_v33 = vmul.f32 %v12898_v17, %v471_v26  ;;  %790 = vperm.xlu1 %12623, %v433_v20   ;;  %v930_v37 = vmul.f32 %v12896_v11, %v461_v27  ;;  %785 = vperm.xlu0 %12622, %v432_v23   ;;  %v438_v20 = vld [vmem:[%s12825_s25 + $0x240] sm:$0xff] }
  0xa2   : > { %v12930_v40 = vmul.f32 %v12904_v21, %v471_v26  ;;  %v12933_v41 = vmul.f32 %v12906_v22, %v471_v26  ;;  %v1402_v42 = vmul.f32 %v12898_v17, %v461_v27  ;;  %v12939_v46 = vmul.f32 %v12910_v25, %v471_v26 }
  0xa3   : > { %v1091_v39 = vrot.slane %v12919_v32, 1  ;;  %v1563_v45 = vrot.slane %v12922_v33, 2  ;;  %v1087_v47 = vrot.slane %v930_v37, 1  ;;  %v850_v51 = vmul.f32 %v12900_v18, %v471_v26 }
  0xa4   : > { %v481_v48 = vpop.permute.xlu1 %480  ;;  %v1559_v52 = vrot.slane %v1402_v42, 2  ;;  %v2044_v58 = vrot.slane %v12930_v40, 2  ;;  %v2523_v59 = vrot.slane %v12933_v41, 3  ;;  %v848_v60 = vmul.f32 %v12900_v18, %v461_v27  ;;  %v476_v62 = vpop.permute.xlu0 %475  ;;  %v441_v41 = vld [vmem:[%s12825_s25 + $0x258] sm:$0xff] }
  0xa5   : > { %800 = vperm.xlu1 %12623, %v435_v38   ;;  %v1092_v53 = vsel %vm1085_vm0, %v1089_v35, %v1091_v39  ;;  %v1088_v54 = vsel %vm1085_vm0, %v1086_v44, %v1087_v47  ;;  %v1090_v55 = vsel %vm1085_vm0, %v1087_v47, %v1089_v35  ;;  %v12946_v56 = vmul.f32 %v12896_v11, %v481_v48 }
  0xa6   : > { %795 = vperm.xlu0 %12622, %v434_v43   ;;  %v1319_v61 = vadd.f32 %v1088_v54, %v847_v36  ;;  %v1564_v0 = vsel %vm1557_vm1, %v1561_v49, %v1563_v45  ;;  %v2999_v1 = vrot.slane %v12939_v46, 4  ;;  %v12958_v2 = vmul.f32 %v12900_v18, %v481_v48 }
  0xa7   : > { %v12961_v3 = vmul.f32 %v12904_v21, %v481_v48  ;;  %v1321_v4 = vadd.f32 %v1092_v53, %v849_v34  ;;  %v1320_v5 = vadd.f32 %v1090_v55, %v848_v60  ;;  %v1560_v6 = vsel %vm1557_vm1, %v1558_v50, %v1559_v52 }
  0xa8   : > { %v12965_v7 = vmul.f32 %v12906_v22, %v481_v48  ;;  %v1562_v8 = vsel %vm1557_vm1, %v1559_v52, %v1561_v49  ;;  %v1095_v9 = vrot.slane %v12946_v56, 1  ;;  %v12970_v10 = vmul.f32 %v12898_v17, %v481_v48  ;;  %v491_v40 = vpop.permute.xlu1 %490 }
  0xa9   : > { %810 = vperm.xlu1 %12623, %v437_v57   ;;  %v933_v12 = vmul.f32 %v12896_v11, %v476_v62  ;;  %v1791_v14 = vadd.f32 %v1560_v6, %v1319_v61  ;;  %v12975_v15 = vmul.f32 %v12910_v25, %v481_v48  ;;  %v1405_v16 = vmul.f32 %v12898_v17, %v476_v62  ;;  %v440_v48 = vld [vmem:[%s12825_s25 + $0x250] sm:$0xff] }
  0xaa   : > { %805 = vperm.xlu0 %12622, %v436_v63   ;;  %v1889_v19 = vmul.f32 %v12904_v21, %v476_v62  ;;  %v2047_v23 = vrot.slane %v12961_v3, 2  ;;  %v2365_v26 = vmul.f32 %v12906_v22, %v476_v62  ;;  %v2841_v27 = vmul.f32 %v12910_v25, %v476_v62 }
  0xab   : > { %v1093_v24 = vrot.slane %v933_v12, 1  ;;  %v1792_v30 = vadd.f32 %v1562_v8, %v1320_v5  ;;  %v2526_v31 = vrot.slane %v12965_v7, 3  ;;  %v851_v32 = vmul.f32 %v12900_v18, %v476_v62  ;;  %v443_v62 = vld [vmem:[%s12825_s25 + $0x268] sm:$0xff] }
  0xac   : > { %v2045_v34 = vrot.slane %v1889_v19, 2  ;;  %v1565_v37 = vrot.slane %v1405_v16, 2  ;;  %v2524_v38 = vrot.slane %v2365_v26, 3  ;;  %v12990_v42 = vadd.f32 %v1564_v0, %v1321_v4 }
  0xad   : > { %820 = vperm.xlu1 %12623, %v439_v13   ;;  %v1094_v35 = vsel %vm1085_vm0, %v1091_v39, %v1093_v24  ;;  %v1096_v36 = vsel %vm1085_vm0, %v1093_v24, %v1095_v9  ;;  %v1567_v43 = vrot.slane %v12970_v10, 2  ;;  %v3002_v44 = vrot.slane %v12975_v15, 4  ;;  %v486_v13 = vpop.permute.xlu0 %485 }
  0xae   : > { %815 = vperm.xlu0 %12622, %v438_v20   ;;  %v1322_v47 = vadd.f32 %v1094_v35, %v850_v51  ;;  %v1323_v49 = vadd.f32 %v1096_v36, %v851_v32  ;;  %v2046_v39 = vsel %vm1557_vm1, %v2044_v58, %v2045_v34  ;;  %v2048_v50 = vsel %vm1557_vm1, %v2045_v34, %v2047_v23  ;;  %v444_v36 = vld [vmem:[%s12825_s25 + $0x270] sm:$0xff] }
  0xaf   : > { %v3000_v52 = vrot.slane %v2841_v27, 4  ;;  %v2277_v53 = vadd.f32 %v2046_v39, %v1791_v14  ;;  %v2278_v54 = vadd.f32 %v2048_v50, %v1792_v30  ;;  %v13000_v55 = vmul.f32 %v12896_v11, %v491_v40  ;;  %v445_v27 = vld [vmem:[%s12825_s25 + $0x278] sm:$0xff] }
  0xb0   : > { %v13003_v57 = vmul.f32 %v12898_v17, %v491_v40  ;;  %v1566_v51 = vsel %vm1557_vm1, %v1563_v45, %v1565_v37  ;;  %v2525_v58 = vsel %vm2522_vm2, %v2523_v59, %v2524_v38  ;;  %v2527_v60 = vsel %vm2522_vm2, %v2524_v38, %v2526_v31  ;;  %v13022_v45 = vld [vmem:[%s19949_s1 + $0x8] ss:$0 sm:$0xff]  ;;  %v442_v59 = vld [vmem:[%s12825_s25 + $0x260] sm:$0xff] }
  0xb1   : > { %830 = vperm.xlu1 %12623, %v441_v41   ;;  %v13013_v61 = vmul.f32 %v12900_v18, %v491_v40  ;;  %v1568_v63 = vsel %vm1557_vm1, %v1565_v37, %v1567_v43  ;;  %v1794_v0 = vadd.f32 %v1566_v51, %v1322_v47  ;;  %v2758_v4 = vadd.f32 %v2525_v58, %v2277_v53  ;;  %v447_v51 = vld [vmem:[%s12825_s25 + $0x288] sm:$0xff] }
  0xb2   : > { %825 = vperm.xlu0 %12622, %v440_v48   ;;  %v2759_v33 = vadd.f32 %v2527_v60, %v2278_v54  ;;  %v13025_v5 = vadd.f32 %v1568_v63, %v1323_v49  ;;  %v3001_v6 = vsel %vm2998_vm3, %v2999_v1, %v3000_v52  ;;  %v13031_v8 = vmul.f32 %v12904_v21, %v491_v40 }
  0xb3   : > { %v13034_v12 = vmul.f32 %v12906_v22, %v491_v40  ;;  %v3003_v14 = vsel %vm2998_vm3, %v3000_v52, %v3002_v44  ;;  %v1099_v16 = vrot.slane %v13000_v55, 1  ;;  %v1571_v19 = vrot.slane %v13003_v57, 2 }
  0xb4   : > { %v13042_v46 = vmul.f32 %v12910_v25, %v491_v40  ;;  %v3234_v1 = vadd.f32 %v3001_v6, %v2758_v4  ;;  %v13045_v20 = vmul.f32 %v12912_v28, %v491_v40  ;;  %v13048_v24 = vmul.f32 %v12914_v29, %v491_v40  ;;  %v446_v4 = vld [vmem:[%s12825_s25 + $0x280] sm:$0xff] }
  0xb5   : > { %840 = vperm.xlu1 %12623, %v443_v62   ;;  %v13051_v26 = vmul.f32 %v13022_v45, %v491_v40  ;;  %v13054_v30 = vadd.f32 %v3003_v14, %v2759_v33  ;;  %v935_v32 = vmul.f32 %v12896_v11, %v486_v13  ;;  %v1407_v34 = vmul.f32 %v12898_v17, %v486_v13 }
  0xb6   : > { %835 = vperm.xlu0 %12622, %v442_v59   ;;  %v1891_v35 = vmul.f32 %v12904_v21, %v486_v13  ;;  %v2051_v37 = vrot.slane %v13031_v8, 2  ;;  %v2530_v38 = vrot.slane %v13034_v12, 3  ;;  %v2367_v40 = vmul.f32 %v12906_v22, %v486_v13 }
  0xb7   : > { %v3331_v41 = vmul.f32 %v12912_v28, %v486_v13  ;;  %v3006_v47 = vrot.slane %v13042_v46, 4  ;;  %v1097_v48 = vrot.slane %v935_v32, 1  ;;  %v3806_v39 = vmul.f32 %v12914_v29, %v486_v13 }
  0xb8   : > { %v2049_v49 = vrot.slane %v1891_v35, 2  ;;  %v3490_v50 = vrot.slane %v13045_v20, 4  ;;  %v3966_v52 = vrot.slane %v13048_v24, 5  ;;  %v2528_v53 = vrot.slane %v2367_v40, 3  ;;  %v449_v40 = vld [vmem:[%s12825_s25 + $0x298] sm:$0xff] }
  0xb9   : > { %1876 = vperm.xlu1 %12623, %v445_v27   ;;  %v2843_v54 = vmul.f32 %v12910_v25, %v486_v13  ;;  %v1098_v58 = vsel %vm1085_vm0, %v1095_v9, %v1097_v48  ;;  %v1100_v60 = vsel %vm1085_vm0, %v1097_v48, %v1099_v16  ;;  %v1569_v62 = vrot.slane %v1407_v34, 2  ;;  %v501_v34 = vpop.permute.xlu1 %500 }
  0xba   : > { %1871 = vperm.xlu0 %12622, %v444_v36   ;;  %v3489_v63 = vrot.slane %v3331_v41, 4  ;;  %v853_v33 = vmul.f32 %v12900_v18, %v486_v13  ;;  %v2050_v59 = vsel %vm1557_vm1, %v2047_v23, %v2049_v49  ;;  %v2052_v56 = vsel %vm1557_vm1, %v2049_v49, %v2051_v37  ;;  %v448_v41 = vld [vmem:[%s12825_s25 + $0x290] sm:$0xff] }
  0xbb   : > { %v4282_v9 = vmul.f32 %v13022_v45, %v486_v13  ;;  %v4442_v6 = vrot.slane %v13051_v26, 6  ;;  %v2279_v14 = vadd.f32 %v2050_v59, %v12990_v42  ;;  %v2280_v27 = vadd.f32 %v2052_v56, %v1794_v0  ;;  %v450_v59 = vld [vmem:[%s12825_s25 + $0x2a0] sm:$0xf]  ;;  %s9555_s25 = scalar_lea.sflag [#allocation8], %s323_s28 }
  0xbc   : > { %v3965_v32 = vrot.slane %v3806_v39, 5  ;;  %v1324_v35 = vadd.f32 %v1098_v58, %v12958_v2  ;;  %v1325_v3 = vadd.f32 %v1100_v60, %v853_v33  ;;  %v2529_v23 = vsel %vm2522_vm2, %v2526_v31, %v2528_v53  ;;  %v496_v60 = vpop.permute.xlu0 %495 }
  0xbd   : > { %2357 = vperm.xlu1 %12623, %v447_v51   ;;  %v3004_v36 = vrot.slane %v2843_v54, 4  ;;  %v1570_v13 = vsel %vm1557_vm1, %v1567_v43, %v1569_v62  ;;  %v2531_v42 = vsel %vm2522_vm2, %v2528_v53, %v2530_v38  ;;  %v2760_v0 = vadd.f32 %v2529_v23, %v2279_v14 }
  0xbe   : > { %1881 = vperm.xlu0 %12622, %v446_v4   ;;  %v3491_v2 = vsel %vm2998_vm3, %v3489_v63, %v3490_v50  ;;  %v2761_v7 = vadd.f32 %v2531_v42, %v2280_v27  ;;  %v4441_v31 = vrot.slane %v4282_v9, 6  ;;  %v13103_v49 = vmul.f32 %v12896_v11, %v501_v34 }
  0xbf   : > { %v3724_v48 = vadd.f32 %v3491_v2, %v3234_v1  ;;  %v1572_v10 = vsel %vm1557_vm1, %v1569_v62, %v1571_v19  ;;  %v3967_v43 = vsel %vm3964_vm4, %v3965_v32, %v3966_v52  ;;  %v13112_v39 = vmul.f32 %v12898_v17, %v501_v34 }
  0xc0   : > { %v13115_v53 = vmul.f32 %v12904_v21, %v501_v34  ;;  %v1796_v1 = vadd.f32 %v1570_v13, %v1324_v35  ;;  %v13117_v54 = vadd.f32 %v1572_v10, %v1325_v3  ;;  %v13120_v58 = vmul.f32 %v12906_v22, %v501_v34 }
  0xc1   : > { %3319 = vperm.xlu1 %12623, %v449_v40   ;;  %v4200_v51 = vadd.f32 %v3967_v43, %v3724_v48  ;;  %v3005_v62 = vsel %vm2998_vm3, %v3002_v44, %v3004_v36  ;;  %v3007_v63 = vsel %vm2998_vm3, %v3004_v36, %v3006_v47  ;;  %v4443_v4 = vsel %vm4440_vm5, %v4441_v31, %v4442_v6 }
  0xc2   : > { %3314 = vperm.xlu0 %12622, %v448_v41   ;;  %v13132_v33 = vmul.f32 %v12900_v18, %v501_v34  ;;  %v3236_v56 = vadd.f32 %v3005_v62, %v2760_v0  ;;  %v13135_v9 = vadd.f32 %v3007_v63, %v2761_v7  ;;  %v1103_v15 = vrot.slane %v13103_v49, 1 }
  0xc3   : > { %v4676_v14 = vadd.f32 %v4443_v4, %v4200_v51  ;;  %v1575_v44 = vrot.slane %v13112_v39, 2  ;;  %v2055_v27 = vrot.slane %v13115_v53, 2  ;;  %v13141_v32 = vmul.f32 %v12910_v25, %v501_v34 }
  0xc4   : > { %v937_v35 = vmul.f32 %v12896_v11, %v496_v60  ;;  %v2534_v3 = vrot.slane %v13120_v58, 3  ;;  %v13147_v23 = vmul.f32 %v12912_v28, %v501_v34  ;;  %v1409_v36 = vmul.f32 %v12898_v17, %v496_v60 }
  0xc5   : > { %4754 = vst.msk [vmem:[#allocation2] sm:$0xff] %vm330_vm6, %v4676_v14  ;;  %v1893_v40 = vmul.f32 %v12904_v21, %v496_v60  ;;  %v13152_v13 = vmul.f32 %v12914_v29, %v501_v34  ;;  %v13155_v42 = vmul.f32 %v13022_v45, %v501_v34  ;;  %v2369_v2 = vmul.f32 %v12906_v22, %v496_v60 }
  0xc6   : > { %3324 = vperm.xlu0 %12622, %v450_v59   ;;  %v1101_v0 = vrot.slane %v937_v35, 1  ;;  %v855_v41 = vmul.f32 %v12900_v18, %v496_v60  ;;  %v2845_v48 = vmul.f32 %v12910_v25, %v496_v60  ;;  %v3333_v31 = vmul.f32 %v12912_v28, %v496_v60 }
  0xc7   : > { %v2053_v7 = vrot.slane %v1893_v40, 2  ;;  %v1573_v34 = vrot.slane %v1409_v36, 2  ;;  %v3808_v51 = vmul.f32 %v12914_v29, %v496_v60  ;;  %v3010_v62 = vrot.slane %v13141_v32, 4 }
  0xc8   : > { %v1102_v10 = vsel %vm1085_vm0, %v1099_v16, %v1101_v0  ;;  %v1104_v43 = vsel %vm1085_vm0, %v1101_v0, %v1103_v15  ;;  %v3494_v63 = vrot.slane %v13147_v23, 4  ;;  %v2532_v4 = vrot.slane %v2369_v2, 3 }
  0xc9   : > { %v4284_v59 = vmul.f32 %v13022_v45, %v496_v60  ;;  %v1326_v14 = vadd.f32 %v1102_v10, %v13013_v61  ;;  %v1327_v35 = vadd.f32 %v1104_v43, %v855_v41  ;;  %v2054_v55 = vsel %vm1557_vm1, %v2051_v37, %v2053_v7  ;;  %v511_v10 = vpop.permute.xlu1 %510 }
  0xca   : > { %v2056_v16 = vsel %vm1557_vm1, %v2053_v7, %v2055_v27  ;;  %v3970_v36 = vrot.slane %v13152_v13, 5  ;;  %v4446_v40 = vrot.slane %v13155_v42, 6  ;;  %v2281_v0 = vadd.f32 %v2054_v55, %v13025_v5 }
  0xcb   : > { %v2282_v2 = vadd.f32 %v2056_v16, %v1796_v1  ;;  %v1574_v61 = vsel %vm1557_vm1, %v1571_v19, %v1573_v34  ;;  %v3008_v60 = vrot.slane %v2845_v48, 4  ;;  %v3492_v41 = vrot.slane %v3333_v31, 4 }
  0xcc   : > { %v3968_v8 = vrot.slane %v3808_v51, 5  ;;  %v1576_v37 = vsel %vm1557_vm1, %v1573_v34, %v1575_v44  ;;  %v2533_v7 = vsel %vm2522_vm2, %v2530_v38, %v2532_v4  ;;  %v2535_v5 = vsel %vm2522_vm2, %v2532_v4, %v2534_v3 }
  0xcd   : > { %v4444_v1 = vrot.slane %v4284_v59, 6  ;;  %v13193_v57 = vadd.f32 %v1574_v61, %v1326_v14  ;;  %v13195_v19 = vadd.f32 %v1576_v37, %v1327_v35  ;;  %v3493_v48 = vsel %vm2998_vm3, %v3490_v50, %v3492_v41 }
  0xce   : > { %v3495_v12 = vsel %vm2998_vm3, %v3492_v41, %v3494_v63  ;;  %v2762_v31 = vadd.f32 %v2533_v7, %v2281_v0  ;;  %v2763_v38 = vadd.f32 %v2535_v5, %v2282_v2  ;;  %v3725_v43 = vadd.f32 %v3493_v48, %v13054_v30 }
  0xcf   : > { %v3726_v34 = vadd.f32 %v3495_v12, %v3236_v56  ;;  %v3969_v51 = vsel %vm3964_vm4, %v3966_v52, %v3968_v8  ;;  %v3971_v4 = vsel %vm3964_vm4, %v3968_v8, %v3970_v36  ;;  %v13211_v20 = vmul.f32 %v12896_v11, %v511_v10 }
  0xd0   : > { %v13214_v50 = vmul.f32 %v12898_v17, %v511_v10  ;;  %v3009_v59 = vsel %vm2998_vm3, %v3006_v47, %v3008_v60  ;;  %v4201_v30 = vadd.f32 %v3969_v51, %v3725_v43  ;;  %v4445_v24 = vsel %vm4440_vm5, %v4442_v6, %v4444_v1  ;;  %v506_v47 = vpop.permute.xlu0 %505 }
  0xd1   : > { %v4202_v56 = vadd.f32 %v3971_v4, %v3726_v34  ;;  %v4447_v52 = vsel %vm4440_vm5, %v4444_v1, %v4446_v40  ;;  %v13226_v14 = vmul.f32 %v12904_v21, %v511_v10  ;;  %v13229_v35 = vmul.f32 %v12906_v22, %v511_v10 }
  0xd2   : > { %v13232_v46 = vmul.f32 %v12910_v25, %v511_v10  ;;  %v3011_v26 = vsel %vm2998_vm3, %v3008_v60, %v3010_v62  ;;  %v4677_v55 = vadd.f32 %v4445_v24, %v4201_v30  ;;  %v13238_v16 = vmul.f32 %v12900_v18, %v511_v10 }
  0xd3   : > { %v4678_v6 = vadd.f32 %v4447_v52, %v4202_v56  ;;  %v3238_v0 = vadd.f32 %v3009_v59, %v2762_v31  ;;  %v13240_v2 = vadd.f32 %v3011_v26, %v2763_v38  ;;  %v1107_v61 = vrot.slane %v13211_v20, 1 }
  0xd4   : > { %v1579_v41 = vrot.slane %v13214_v50, 2  ;;  %4755 = vst.msk [vmem:[#allocation2 + $0x8] sm:$0xff] %vm330_vm6, %v4677_v55  ;;  %v13247_v8 = vmul.f32 %v12912_v28, %v511_v10  ;;  %v939_v60 = vmul.f32 %v12896_v11, %v506_v47  ;;  %v1411_v37 = vmul.f32 %v12898_v17, %v506_v47 }
  0xd5   : > { %4756 = vst.msk [vmem:[#allocation2 + $0x10] sm:$0xff] %vm330_vm6, %v4678_v6  ;;  %v1895_v7 = vmul.f32 %v12904_v21, %v506_v47  ;;  %v2059_v5 = vrot.slane %v13226_v14, 2  ;;  %v2538_v1 = vrot.slane %v13229_v35, 3  ;;  %v3014_v48 = vrot.slane %v13232_v46, 4 }
  0xd6   : > { %v2371_v12 = vmul.f32 %v12906_v22, %v506_v47  ;;  %v13257_v31 = vmul.f32 %v12914_v29, %v511_v10  ;;  %v1105_v38 = vrot.slane %v939_v60, 1  ;;  %v2847_v34 = vmul.f32 %v12910_v25, %v506_v47 }
  0xd7   : > { %v2057_v43 = vrot.slane %v1895_v7, 2  ;;  %v13261_v51 = vmul.f32 %v13022_v45, %v511_v10  ;;  %v857_v4 = vmul.f32 %v12900_v18, %v506_v47  ;;  %v1577_v59 = vrot.slane %v1411_v37, 2 }
  0xd8   : > { %v3335_v30 = vmul.f32 %v12912_v28, %v506_v47  ;;  %v1106_v56 = vsel %vm1085_vm0, %v1103_v15, %v1105_v38  ;;  %v1108_v24 = vsel %vm1085_vm0, %v1105_v38, %v1107_v61  ;;  %v2536_v52 = vrot.slane %v2371_v12, 3 }
  0xd9   : > { %v3810_v26 = vmul.f32 %v12914_v29, %v506_v47  ;;  %v1328_v55 = vadd.f32 %v1106_v56, %v13132_v33  ;;  %v1329_v10 = vadd.f32 %v1108_v24, %v857_v4  ;;  %v2058_v6 = vsel %vm1557_vm1, %v2055_v27, %v2057_v43  ;;  %v521_v56 = vpop.permute.xlu1 %520 }
  0xda   : > { %v2060_v49 = vsel %vm1557_vm1, %v2057_v43, %v2059_v5  ;;  %v3498_v15 = vrot.slane %v13247_v8, 4  ;;  %v2283_v60 = vadd.f32 %v2058_v6, %v13117_v54  ;;  %v3012_v37 = vrot.slane %v2847_v34, 4 }
  0xdb   : > { %v4286_v7 = vmul.f32 %v13022_v45, %v506_v47  ;;  %v3974_v12 = vrot.slane %v13257_v31, 5  ;;  %v4450_v33 = vrot.slane %v13261_v51, 6  ;;  %v1578_v53 = vsel %vm1557_vm1, %v1575_v44, %v1577_v59 }
  0xdc   : > { %v2284_v27 = vadd.f32 %v2060_v49, %v13193_v57  ;;  %v1580_v38 = vsel %vm1557_vm1, %v1577_v59, %v1579_v41  ;;  %v2537_v54 = vsel %vm2522_vm2, %v2534_v3, %v2536_v52  ;;  %v3496_v43 = vrot.slane %v3335_v30, 4 }
  0xdd   : > { %v3972_v47 = vrot.slane %v3810_v26, 5  ;;  %v1800_v34 = vadd.f32 %v1578_v53, %v1328_v55  ;;  %v13294_v4 = vadd.f32 %v1580_v38, %v1329_v10  ;;  %v2539_v39 = vsel %vm2522_vm2, %v2536_v52, %v2538_v1 }
  0xde   : > { %v2764_v44 = vadd.f32 %v2537_v54, %v2283_v60  ;;  %v3013_v57 = vsel %vm2998_vm3, %v3010_v62, %v3012_v37  ;;  %v3497_v58 = vsel %vm2998_vm3, %v3494_v63, %v3496_v43  ;;  %v3499_v3 = vsel %vm2998_vm3, %v3496_v43, %v3498_v15  ;;  %v516_v60 = vpop.permute.xlu0 %515 }
  0xdf   : > { %v4448_v59 = vrot.slane %v4286_v7, 6  ;;  %v2765_v30 = vadd.f32 %v2539_v39, %v2284_v27  ;;  %v3015_v24 = vsel %vm2998_vm3, %v3012_v37, %v3014_v48  ;;  %v3727_v52 = vadd.f32 %v3497_v58, %v13135_v9 }
  0xe0   : > { %v3728_v26 = vadd.f32 %v3499_v3, %v3238_v0  ;;  %v3973_v32 = vsel %vm3964_vm4, %v3970_v36, %v3972_v47  ;;  %v3975_v23 = vsel %vm3964_vm4, %v3972_v47, %v3974_v12  ;;  %v13319_v62 = vmul.f32 %v12896_v11, %v521_v56 }
  0xe1   : > { %v13322_v63 = vmul.f32 %v12898_v17, %v521_v56  ;;  %v3240_v55 = vadd.f32 %v3013_v57, %v2764_v44  ;;  %v4203_v10 = vadd.f32 %v3973_v32, %v3727_v52  ;;  %v13325_v9 = vmul.f32 %v12900_v18, %v521_v56 }
  0xe2   : > { %v4204_v6 = vadd.f32 %v3975_v23, %v3728_v26  ;;  %v4449_v13 = vsel %vm4440_vm5, %v4446_v40, %v4448_v59  ;;  %v4451_v36 = vsel %vm4440_vm5, %v4448_v59, %v4450_v33  ;;  %v13334_v0 = vmul.f32 %v12904_v21, %v521_v56 }
  0xe3   : > { %v13337_v49 = vmul.f32 %v12906_v22, %v521_v56  ;;  %v13339_v37 = vadd.f32 %v3015_v24, %v2765_v30  ;;  %v4679_v7 = vadd.f32 %v4449_v13, %v4203_v10  ;;  %v13342_v27 = vmul.f32 %v12910_v25, %v521_v56 }
  0xe4   : > { %v4680_v53 = vadd.f32 %v4451_v36, %v4204_v6  ;;  %v19958_v42 = vrot.slane %v13319_v62, 1  ;;  %v1583_v40 = vrot.slane %v13322_v63, 2  ;;  %v13347_v38 = vmul.f32 %v12912_v28, %v521_v56 }
  0xe5   : > { %v13350_v54 = vmul.f32 %v12914_v29, %v521_v56  ;;  %4757 = vst.msk [vmem:[#allocation2 + $0x18] sm:$0xff] %vm330_vm6, %v4679_v7  ;;  %v13355_v43 = vmul.f32 %v13022_v45, %v521_v56  ;;  %v941_v47 = vmul.f32 %v12896_v11, %v516_v60  ;;  %v1413_v39 = vmul.f32 %v12898_v17, %v516_v60 }
  0xe6   : > { %4758 = vst.msk [vmem:[#allocation2 + $0x20] sm:$0xff] %vm330_vm6, %v4680_v53  ;;  %v1897_v44 = vmul.f32 %v12904_v21, %v516_v60  ;;  %v2063_v57 = vrot.slane %v13334_v0, 2  ;;  %v2542_v58 = vrot.slane %v13337_v49, 3  ;;  %v2373_v3 = vmul.f32 %v12906_v22, %v516_v60 }
  0xe7   : > { %v3337_v59 = vmul.f32 %v12912_v28, %v516_v60  ;;  %v1109_v24 = vrot.slane %v941_v47, 1  ;;  %v3812_v56 = vmul.f32 %v12914_v29, %v516_v60  ;;  %v3502_v26 = vrot.slane %v13347_v38, 4 }
  0xe8   : > { %v2061_v52 = vrot.slane %v1897_v44, 2  ;;  %v3978_v32 = vrot.slane %v13350_v54, 5  ;;  %v1581_v23 = vrot.slane %v1413_v39, 2  ;;  %v2849_v10 = vmul.f32 %v12910_v25, %v516_v60 }
  0xe9   : > { %v4454_v6 = vrot.slane %v13355_v43, 6  ;;  %v1110_v13 = vsel %vm1085_vm0, %v1107_v61, %v1109_v24  ;;  %v2540_v36 = vrot.slane %v2373_v3, 3  ;;  %v3500_v7 = vrot.slane %v3337_v59, 4 }
  0xea   : > { %v859_v53 = vmul.f32 %v12900_v18, %v516_v60  ;;  %v1112_v47 = vsel %vm1085_vm0, %v1109_v24, %v19958_v42  ;;  %v2062_v39 = vsel %vm1557_vm1, %v2059_v5, %v2061_v52  ;;  %v2064_v44 = vsel %vm1557_vm1, %v2061_v52, %v2063_v57 }
  0xeb   : > { %v2285_v20 = vadd.f32 %v2062_v39, %v13195_v19  ;;  %v2286_v30 = vadd.f32 %v2064_v44, %v1800_v34  ;;  %v3976_v61 = vrot.slane %v3812_v56, 5  ;;  %v4288_v3 = vmul.f32 %v13022_v45, %v516_v60 }
  0xec   : > { %v1330_v59 = vadd.f32 %v1110_v13, %v13238_v16  ;;  %v1582_v24 = vsel %vm1557_vm1, %v1579_v41, %v1581_v23  ;;  %v1584_v14 = vsel %vm1557_vm1, %v1581_v23, %v1583_v40  ;;  %v3016_v5 = vrot.slane %v2849_v10, 4  ;;  %v531_v16 = vpop.permute.xlu1 %530 }
  0xed   : > { %v1331_v42 = vadd.f32 %v1112_v47, %v859_v53  ;;  %v2541_v19 = vsel %vm2522_vm2, %v2538_v1, %v2540_v36  ;;  %v3501_v34 = vsel %vm2998_vm3, %v3498_v15, %v3500_v7  ;;  %v3503_v50 = vsel %vm2998_vm3, %v3500_v7, %v3502_v26 }
  0xee   : > { %v2543_v41 = vsel %vm2522_vm2, %v2540_v36, %v2542_v58  ;;  %v2766_v60 = vadd.f32 %v2541_v19, %v2285_v20  ;;  %v3729_v52 = vadd.f32 %v3501_v34, %v13240_v2  ;;  %v3730_v56 = vadd.f32 %v3503_v50, %v3240_v55 }
  0xef   : > { %v2767_v35 = vadd.f32 %v2543_v41, %v2286_v30  ;;  %v3977_v8 = vsel %vm3964_vm4, %v3974_v12, %v3976_v61  ;;  %v3979_v1 = vsel %vm3964_vm4, %v3976_v61, %v3978_v32  ;;  %v4452_v15 = vrot.slane %v4288_v3, 6 }
  0xf0   : > { %v3017_v23 = vsel %vm2998_vm3, %v3014_v48, %v3016_v5  ;;  %v4205_v10 = vadd.f32 %v3977_v8, %v3729_v52  ;;  %v4206_v13 = vadd.f32 %v3979_v1, %v3730_v56  ;;  %v13415_v36 = vmul.f32 %v12896_v11, %v531_v16  ;;  %v526_v48 = vpop.permute.xlu0 %525 }
  0xf1   : > { %v4453_v2 = vsel %vm4440_vm5, %v4450_v33, %v4452_v15  ;;  %v4455_v31 = vsel %vm4440_vm5, %v4452_v15, %v4454_v6  ;;  %v13424_v12 = vmul.f32 %v12898_v17, %v531_v16  ;;  %v13427_v46 = vmul.f32 %v12904_v21, %v531_v16 }
  0xf2   : > { %v20141_v55 = vrot.slane %v13342_v27, 4  ;;  %v4681_v7 = vadd.f32 %v4453_v2, %v4205_v10  ;;  %v4682_v53 = vadd.f32 %v4455_v31, %v4206_v13  ;;  %v13433_v51 = vmul.f32 %v12906_v22, %v531_v16 }
  0xf3   : > { %v1802_v33 = vadd.f32 %v1582_v24, %v1330_v59  ;;  %v13435_v47 = vadd.f32 %v1584_v14, %v1331_v42  ;;  %v3242_v39 = vadd.f32 %v3017_v23, %v2766_v60  ;;  %v13442_v20 = vmul.f32 %v12900_v18, %v531_v16 }
  0xf4   : > { %v3019_v30 = vsel %vm2998_vm3, %v3016_v5, %v20141_v55  ;;  %4759 = vst.msk [vmem:[#allocation2 + $0x28] sm:$0xff] %vm330_vm6, %v4681_v7  ;;  %4760 = vst.msk [vmem:[#allocation2 + $0x30] sm:$0xff] %vm330_vm6, %v4682_v53  ;;  %v1115_v61 = vrot.slane %v13415_v36, 1  ;;  %v13446_v3 = vmul.f32 %v12910_v25, %v531_v16  ;;  %v943_v5 = vmul.f32 %v12896_v11, %v526_v48 }
  0xf5   : > { %v13437_v44 = vadd.f32 %v3019_v30, %v2767_v35  ;;  %v1587_v42 = vrot.slane %v13424_v12, 2  ;;  %v2067_v59 = vrot.slane %v13427_v46, 2  ;;  %v1415_v24 = vmul.f32 %v12898_v17, %v526_v48 }
  0xf6   : > { %v1899_v14 = vmul.f32 %v12904_v21, %v526_v48  ;;  %v2546_v19 = vrot.slane %v13433_v51, 3  ;;  %v13455_v34 = vmul.f32 %v12912_v28, %v531_v16  ;;  %v1113_v50 = vrot.slane %v943_v5, 1 }
  0xf7   : > { %v2375_v41 = vmul.f32 %v12906_v22, %v526_v48  ;;  %v13459_v60 = vmul.f32 %v12914_v29, %v531_v16  ;;  %v13462_v52 = vmul.f32 %v13022_v45, %v531_v16  ;;  %v861_v56 = vmul.f32 %v12900_v18, %v526_v48 }
  0xf8   : > { %v2065_v35 = vrot.slane %v1899_v14, 2  ;;  %v3022_v8 = vrot.slane %v13446_v3, 4  ;;  %v20142_v1 = vrot.slane %v13319_v62, 1  ;;  %v3339_v23 = vmul.f32 %v12912_v28, %v526_v48 }
  0xf9   : > { %v3814_v10 = vmul.f32 %v12914_v29, %v526_v48  ;;  %v1116_v13 = vsel %vm1085_vm0, %v1113_v50, %v1115_v61  ;;  %v1585_v2 = vrot.slane %v1415_v24, 2  ;;  %v2544_v16 = vrot.slane %v2375_v41, 3 }
  0xfa   : > { %v1114_v15 = vsel %vm1085_vm0, %v20142_v1, %v1113_v50  ;;  %v2851_v31 = vmul.f32 %v12910_v25, %v526_v48  ;;  %v3506_v55 = vrot.slane %v13455_v34, 4  ;;  %v2066_v62 = vsel %vm1557_vm1, %v2063_v57, %v2065_v35 }
  0xfb   : > { %v1332_v30 = vadd.f32 %v1114_v15, %v13325_v9  ;;  %v2068_v7 = vsel %vm1557_vm1, %v2065_v35, %v2067_v59  ;;  %v3982_v53 = vrot.slane %v13459_v60, 5  ;;  %v4458_v5 = vrot.slane %v13462_v52, 6 }
  0xfc   : > { %v2287_v24 = vadd.f32 %v2066_v62, %v13294_v4  ;;  %v2288_v14 = vadd.f32 %v2068_v7, %v1802_v33  ;;  %v1333_v50 = vadd.f32 %v1116_v13, %v861_v56  ;;  %v3504_v41 = vrot.slane %v3339_v23, 4  ;;  %v541_v4 = vpop.permute.xlu1 %540  ;;  %v536_v62 = vpop.permute.xlu0 %535 }
  0xfd   : > { %v3980_v1 = vrot.slane %v3814_v10, 5  ;;  %v4290_v9 = vmul.f32 %v13022_v45, %v526_v48  ;;  %v1586_v0 = vsel %vm1557_vm1, %v1583_v40, %v1585_v2  ;;  %v1588_v57 = vsel %vm1557_vm1, %v1585_v2, %v1587_v42 }
  0xfe   : > { %v2545_v35 = vsel %vm2522_vm2, %v2542_v58, %v2544_v16  ;;  %v3020_v15 = vrot.slane %v2851_v31, 4  ;;  %v1804_v33 = vadd.f32 %v1586_v0, %v1332_v30  ;;  %v2547_v56 = vsel %vm2522_vm2, %v2544_v16, %v2546_v19 }
  0xff   : > { %v3505_v63 = vsel %vm2998_vm3, %v3502_v26, %v3504_v41  ;;  %v3507_v40 = vsel %vm2998_vm3, %v3504_v41, %v3506_v55  ;;  %v2768_v48 = vadd.f32 %v2545_v35, %v2287_v24  ;;  %v2769_v23 = vadd.f32 %v2547_v56, %v2288_v14 }
 0x100   : > { %v3731_v49 = vadd.f32 %v3505_v63, %v13339_v37  ;;  %v3732_v58 = vadd.f32 %v3507_v40, %v3242_v39  ;;  %v3981_v10 = vsel %vm3964_vm4, %v3978_v32, %v3980_v1  ;;  %v3983_v13 = vsel %vm3964_vm4, %v3980_v1, %v3982_v53  ;;  %v546_v3 = vpop.permute.xlu0 %545 }
 0x101   : > { %v4456_v38 = vrot.slane %v4290_v9, 6  ;;  %v13513_v26 = vmul.f32 %v12896_v11, %v541_v4  ;;  %v20143_v2 = vrot.slane %v13342_v27, 4  ;;  %v3023_v37 = vsel %vm2998_vm3, %v3020_v15, %v3022_v8 }
 0x102   : > { %v4207_v39 = vadd.f32 %v3981_v10, %v3731_v49  ;;  %v4208_v54 = vadd.f32 %v3983_v13, %v3732_v58  ;;  %v13528_v30 = vmul.f32 %v12898_v17, %v541_v4  ;;  %v13531_v27 = vmul.f32 %v12904_v21, %v541_v4 }
 0x103   : > { %v3021_v16 = vsel %vm2998_vm3, %v20143_v2, %v3020_v15  ;;  %v4457_v32 = vsel %vm4440_vm5, %v4454_v6, %v4456_v38  ;;  %v4459_v31 = vsel %vm4440_vm5, %v4456_v38, %v4458_v5  ;;  %v13534_v14 = vmul.f32 %v12906_v22, %v541_v4 }
 0x104   : > { %v4683_v7 = vadd.f32 %v4457_v32, %v4207_v39  ;;  %v4684_v24 = vadd.f32 %v4459_v31, %v4208_v54  ;;  %v13537_v43 = vmul.f32 %v12910_v25, %v541_v4  ;;  %v13539_v6 = vadd.f32 %v1588_v57, %v1333_v50 }
 0x105   : > { %v3244_v41 = vadd.f32 %v3021_v16, %v2768_v48  ;;  %v13541_v1 = vadd.f32 %v3023_v37, %v2769_v23  ;;  %v13544_v9 = vmul.f32 %v12900_v18, %v541_v4  ;;  %v1119_v0 = vrot.slane %v13513_v26, 1 }
 0x106   : > { %4761 = vst.msk [vmem:[#allocation2 + $0x38] sm:$0xff] %vm330_vm6, %v4683_v7  ;;  %4762 = vst.msk [vmem:[#allocation2 + $0x40] sm:$0xff] %vm330_vm6, %v4684_v24  ;;  %v13550_v35 = vmul.f32 %v12912_v28, %v541_v4  ;;  %v945_v15 = vmul.f32 %v12896_v11, %v536_v62  ;;  %v1417_v50 = vmul.f32 %v12898_v17, %v536_v62  ;;  %v1591_v57 = vrot.slane %v13528_v30, 2 }
 0x107   : > { %v2071_v56 = vrot.slane %v13531_v27, 2  ;;  %v1901_v63 = vmul.f32 %v12904_v21, %v536_v62  ;;  %v2377_v40 = vmul.f32 %v12906_v22, %v536_v62  ;;  %v2550_v48 = vrot.slane %v13534_v14, 3 }
 0x108   : > { %v19960_v23 = vrot.slane %v13537_v43, 4  ;;  %v13561_v49 = vmul.f32 %v12914_v29, %v541_v4  ;;  %v1117_v58 = vrot.slane %v945_v15, 1  ;;  %v13564_v10 = vmul.f32 %v13022_v45, %v541_v4 }
 0x109   : > { %v1589_v13 = vrot.slane %v1417_v50, 2  ;;  %v2069_v38 = vrot.slane %v1901_v63, 2  ;;  %v3341_v2 = vmul.f32 %v12912_v28, %v536_v62  ;;  %v3510_v16 = vrot.slane %v13550_v35, 4 }
 0x10a   : > { %v1118_v37 = vsel %vm1085_vm0, %v1115_v61, %v1117_v58  ;;  %v2548_v39 = vrot.slane %v2377_v40, 3  ;;  %v3816_v54 = vmul.f32 %v12914_v29, %v536_v62  ;;  %v1120_v32 = vsel %vm1085_vm0, %v1117_v58, %v1119_v0 }
 0x10b   : > { %v2070_v4 = vsel %vm1557_vm1, %v2067_v59, %v2069_v38  ;;  %v2072_v31 = vsel %vm1557_vm1, %v2069_v38, %v2071_v56  ;;  %v2853_v7 = vmul.f32 %v12910_v25, %v536_v62  ;;  %v19961_v36 = vrot.slane %v13561_v49, 5 }
 0x10c   : > { %v863_v61 = vmul.f32 %v12900_v18, %v536_v62  ;;  %v2289_v24 = vadd.f32 %v2070_v4, %v13435_v47  ;;  %v2290_v15 = vadd.f32 %v2072_v31, %v1804_v33  ;;  %v19959_v50 = vrot.slane %v13564_v10, 6 }
 0x10d   : > { %v1334_v63 = vadd.f32 %v1118_v37, %v13442_v20  ;;  %v1590_v46 = vsel %vm1557_vm1, %v1587_v42, %v1589_v13  ;;  %v3508_v59 = vrot.slane %v3341_v2, 4  ;;  %v1592_v58 = vsel %vm1557_vm1, %v1589_v13, %v1591_v57  ;;  %v551_v2 = vpop.permute.xlu1 %550 }
 0x10e   : > { %v1335_v40 = vadd.f32 %v1120_v32, %v863_v61  ;;  %v2549_v38 = vsel %vm2522_vm2, %v2546_v19, %v2548_v39  ;;  %v3984_v47 = vrot.slane %v3816_v54, 5  ;;  %v2551_v33 = vsel %vm2522_vm2, %v2548_v39, %v2550_v48  ;;  %v13606_v54 = vld [vmem:[#allocation2 + $0x34] ss:$2 sm:$0xff]  ;;  %v13608_v32 = vld [vmem:[#allocation2 + $0x35] ss:$2 sm:$0xff] }
 0x10f   : > { %v3024_v20 = vrot.slane %v2853_v7, 4  ;;  %v3509_v12 = vsel %vm2998_vm3, %v3506_v55, %v3508_v59  ;;  %v3511_v42 = vsel %vm2998_vm3, %v3508_v59, %v3510_v16  ;;  %v2770_v13 = vadd.f32 %v2549_v38, %v2289_v24 }
 0x110   : > { %v2771_v37 = vadd.f32 %v2551_v33, %v2290_v15  ;;  %v3733_v51 = vadd.f32 %v3509_v12, %v13437_v44  ;;  %v3734_v19 = vadd.f32 %v3511_v42, %v3244_v41  ;;  %v1806_v39 = vadd.f32 %v1590_v46, %v1334_v63 }
 0x111   : > { %v3985_v34 = vsel %vm3964_vm4, %v3982_v53, %v3984_v47  ;;  %v3987_v55 = vsel %vm3964_vm4, %v3984_v47, %v19961_v36  ;;  %v4292_v4 = vmul.f32 %v13022_v45, %v536_v62  ;;  %v13617_v31 = vadd.f32 %v1592_v58, %v1335_v40 }
 0x112   : > { %v4209_v7 = vadd.f32 %v3985_v34, %v3733_v51  ;;  %v4210_v44 = vadd.f32 %v3987_v55, %v3734_v19  ;;  %v13620_v41 = vmul.f32 %v12896_v11, %v551_v2  ;;  %v3025_v61 = vsel %vm2998_vm3, %v3022_v8, %v3024_v20 }
 0x113   : > { %v3027_v60 = vsel %vm2998_vm3, %v3024_v20, %v19960_v23  ;;  %v4460_v53 = vrot.slane %v4292_v4, 6  ;;  %v13629_v24 = vmul.f32 %v12898_v17, %v551_v2  ;;  %v3246_v15 = vadd.f32 %v3025_v61, %v2770_v13 }
 0x114   : > { %v13633_v63 = vadd.f32 %v3027_v60, %v2771_v37  ;;  %v13636_v46 = vmul.f32 %v12904_v21, %v551_v2  ;;  %v13645_v40 = vmul.f32 %v12900_v18, %v551_v2  ;;  %v13648_v58 = vmul.f32 %v12906_v22, %v551_v2 }
 0x115   : > { %v4461_v8 = vsel %vm4440_vm5, %v4458_v5, %v4460_v53  ;;  %v4463_v59 = vsel %vm4440_vm5, %v4460_v53, %v19959_v50  ;;  %v1123_v33 = vrot.slane %v13620_v41, 1  ;;  %v13652_v20 = vmul.f32 %v12910_v25, %v551_v2 }
 0x116   : > { %v4685_v38 = vadd.f32 %v4461_v8, %v4209_v7  ;;  %v4686_v47 = vadd.f32 %v4463_v59, %v4210_v44  ;;  %v1595_v52 = vrot.slane %v13629_v24, 2  ;;  %v13656_v5 = vmul.f32 %v12912_v28, %v551_v2 }
 0x117   : > { %v13659_v12 = vmul.f32 %v12914_v29, %v551_v2  ;;  %v947_v42 = vmul.f32 %v12896_v11, %v546_v3  ;;  %v2075_v13 = vrot.slane %v13636_v46, 2  ;;  %v1419_v37 = vmul.f32 %v12898_v17, %v546_v3 }
 0x118   : > { %4763 = vst.msk [vmem:[#allocation2 + $0x48] sm:$0xff] %vm330_vm6, %v4685_v38  ;;  %4764 = vst.msk [vmem:[#allocation2 + $0x50] sm:$0xff] %vm330_vm6, %v4686_v47  ;;  %v1903_v51 = vmul.f32 %v12904_v21, %v546_v3  ;;  %v2379_v19 = vmul.f32 %v12906_v22, %v546_v3  ;;  %v2554_v34 = vrot.slane %v13648_v58, 3  ;;  %v3343_v4 = vmul.f32 %v12912_v28, %v546_v3 }
 0x119   : > { %v1121_v55 = vrot.slane %v947_v42, 1  ;;  %v3818_v7 = vmul.f32 %v12914_v29, %v546_v3  ;;  %v13673_v61 = vmul.f32 %v13022_v45, %v551_v2  ;;  %v2855_v53 = vmul.f32 %v12910_v25, %v546_v3 }
 0x11a   : > { %v2073_v60 = vrot.slane %v1903_v51, 2  ;;  %v3514_v8 = vrot.slane %v13656_v5, 4  ;;  %v1593_v38 = vrot.slane %v1419_v37, 2  ;;  %v3512_v47 = vrot.slane %v3343_v4, 4 }
 0x11b   : > { %v1122_v59 = vsel %vm1085_vm0, %v1119_v0, %v1121_v55  ;;  %v865_v62 = vmul.f32 %v12900_v18, %v546_v3  ;;  %v1124_v2 = vsel %vm1085_vm0, %v1121_v55, %v1123_v33  ;;  %v2552_v50 = vrot.slane %v2379_v19, 3 }
 0x11c   : > { %v1336_v51 = vadd.f32 %v1122_v59, %v13544_v9  ;;  %v2074_v44 = vsel %vm1557_vm1, %v2071_v56, %v2073_v60  ;;  %v2076_v26 = vsel %vm1557_vm1, %v2073_v60, %v2075_v13  ;;  %v3988_v0 = vrot.slane %v3818_v7, 5 }
 0x11d   : > { %v4466_v37 = vrot.slane %v13673_v61, 6  ;;  %v2291_v4 = vadd.f32 %v2074_v44, %v13539_v6  ;;  %v2292_v23 = vadd.f32 %v2076_v26, %v1806_v39  ;;  %v3028_v42 = vrot.slane %v2855_v53, 4  ;;  %v561_v39 = vpop.permute.xlu1 %560 }
 0x11e   : > { %v1337_v36 = vadd.f32 %v1124_v2, %v865_v62  ;;  %v1594_v9 = vsel %vm1557_vm1, %v1591_v57, %v1593_v38  ;;  %v1596_v27 = vsel %vm1557_vm1, %v1593_v38, %v1595_v52  ;;  %v3513_v56 = vsel %vm2998_vm3, %v3510_v16, %v3512_v47 }
 0x11f   : > { %v2553_v19 = vsel %vm2522_vm2, %v2550_v48, %v2552_v50  ;;  %v2555_v6 = vsel %vm2522_vm2, %v2552_v50, %v2554_v34  ;;  %v3515_v30 = vsel %vm2998_vm3, %v3512_v47, %v3514_v8  ;;  %v3735_v57 = vadd.f32 %v3513_v56, %v13541_v1  ;;  %v13713_v62 = vld [vmem:[#allocation2 + $0x44] ss:$2 sm:$0xf]  ;;  %v13715_v35 = vld [vmem:[#allocation2 + $0x45] ss:$2 sm:$0xf] }
 0x120   : > { %20144 = vst [vmem:[#allocation11_spill] sm:$0xff] %v13713_v62  ;;  %20145 = vst [vmem:[#allocation12_spill] sm:$0xff] %v13715_v35  ;;  %v13717_v16 = vadd.f32 %v1594_v9, %v1336_v51  ;;  %v3736_v14 = vadd.f32 %v3515_v30, %v3246_v15  ;;  %v20146_v48 = vrot.slane %v13561_v49, 5  ;;  %v4294_v50 = vmul.f32 %v13022_v45, %v546_v3  ;;  %v556_v9 = vpop.permute.xlu0 %555 }
 0x121   : > { %v2772_v7 = vadd.f32 %v2553_v19, %v2291_v4  ;;  %v2773_v44 = vadd.f32 %v2555_v6, %v2292_v23  ;;  %v20147_v60 = vrot.slane %v13659_v12, 5  ;;  %v13726_v59 = vadd.f32 %v1596_v27, %v1337_v36 }
 0x122   : > { %v3989_v55 = vsel %vm3964_vm4, %v20146_v48, %v3988_v0  ;;  %v4464_v47 = vrot.slane %v4294_v50, 6  ;;  %v13729_v2 = vmul.f32 %v12896_v11, %v561_v39  ;;  %v20148_v15 = vrot.slane %v13537_v43, 4 }
 0x123   : > { %v3991_v1 = vsel %vm3964_vm4, %v3988_v0, %v20147_v60  ;;  %v4211_v53 = vadd.f32 %v3989_v55, %v3735_v57  ;;  %v20149_v23 = vrot.slane %v13652_v20, 4  ;;  %v13740_v51 = vmul.f32 %v12898_v17, %v561_v39 }
 0x124   : > { %v4212_v38 = vadd.f32 %v3991_v1, %v3736_v14  ;;  %v3029_v45 = vsel %vm2998_vm3, %v20148_v15, %v3028_v42  ;;  %v20150_v36 = vrot.slane %v13564_v10, 6  ;;  %v4467_v0 = vsel %vm4440_vm5, %v4464_v47, %v4466_v37 }
 0x125   : > { %v3031_v3 = vsel %vm2998_vm3, %v3028_v42, %v20149_v23  ;;  %v13749_v4 = vmul.f32 %v12904_v21, %v561_v39  ;;  %v13752_v43 = vmul.f32 %v12906_v22, %v561_v39  ;;  %v3248_v27 = vadd.f32 %v3029_v45, %v2772_v7 }
 0x126   : > { %v4465_v26 = vsel %vm4440_vm5, %v20150_v36, %v4464_v47  ;;  %v13754_v42 = vadd.f32 %v3031_v3, %v2773_v44  ;;  %v4688_v19 = vadd.f32 %v4467_v0, %v4212_v38  ;;  %v13757_v10 = vmul.f32 %v12900_v18, %v561_v39  ;;  %v13782_v38 = vld [vmem:[%s19949_s1 + $0x8] ss:$0 sm:$0xff] }
 0x127   : > { %v4687_v56 = vadd.f32 %v4465_v26, %v4211_v53  ;;  %v1127_v6 = vrot.slane %v13729_v2, 1  ;;  %v13761_v30 = vmul.f32 %v12910_v25, %v561_v39  ;;  %v13764_v57 = vmul.f32 %v12912_v28, %v561_v39 }
 0x128   : > { %4766 = vst.msk [vmem:[#allocation2 + $0x60] sm:$0xff] %vm330_vm6, %v4688_v19  ;;  %v1599_v14 = vrot.slane %v13740_v51, 2  ;;  %v949_v48 = vmul.f32 %v12896_v11, %v556_v9  ;;  %v1421_v55 = vmul.f32 %v12898_v17, %v556_v9  ;;  %v1905_v50 = vmul.f32 %v12904_v21, %v556_v9 }
 0x129   : > { %4765 = vst.msk [vmem:[#allocation2 + $0x58] sm:$0xff] %vm330_vm6, %v4687_v56  ;;  %v2079_v7 = vrot.slane %v13749_v4, 2  ;;  %v2558_v44 = vrot.slane %v13752_v43, 3  ;;  %v2381_v60 = vmul.f32 %v12906_v22, %v556_v9  ;;  %v2857_v1 = vmul.f32 %v12910_v25, %v556_v9 }
 0x12a   : > { %v13777_v53 = vmul.f32 %v12914_v29, %v561_v39  ;;  %v13785_v47 = vmul.f32 %v13782_v38, %v561_v39  ;;  %v1125_v15 = vrot.slane %v949_v48, 1  ;;  %v2077_v45 = vrot.slane %v1905_v50, 2 }
 0x12b   : > { %v867_v23 = vmul.f32 %v12900_v18, %v556_v9  ;;  %v1597_v3 = vrot.slane %v1421_v55, 2  ;;  %v2556_v36 = vrot.slane %v2381_v60, 3  ;;  %v3345_v26 = vmul.f32 %v12912_v28, %v556_v9 }
 0x12c   : > { %v1126_v0 = vsel %vm1085_vm0, %v1123_v33, %v1125_v15  ;;  %v1128_v56 = vsel %vm1085_vm0, %v1125_v15, %v1127_v6  ;;  %v3032_v19 = vrot.slane %v2857_v1, 4  ;;  %v3820_v39 = vmul.f32 %v12914_v29, %v556_v9 }
 0x12d   : > { %v1338_v48 = vadd.f32 %v1126_v0, %v13645_v40  ;;  %v1339_v50 = vadd.f32 %v1128_v56, %v867_v23  ;;  %v2078_v55 = vsel %vm1557_vm1, %v2075_v13, %v2077_v45  ;;  %v2080_v41 = vsel %vm1557_vm1, %v2077_v45, %v2079_v7 }
 0x12e   : > { %v19965_v33 = vrot.slane %v13761_v30, 4  ;;  %v19964_v60 = vrot.slane %v13764_v57, 4  ;;  %v19963_v15 = vrot.slane %v13777_v53, 5  ;;  %v4296_v1 = vmul.f32 %v13782_v38, %v556_v9 }
 0x12f   : > { %v19962_v49 = vrot.slane %v13785_v47, 6  ;;  %v1598_v46 = vsel %vm1557_vm1, %v1595_v52, %v1597_v3  ;;  %v2293_v40 = vadd.f32 %v2078_v55, %v13617_v31  ;;  %v2294_v13 = vadd.f32 %v2080_v41, %v13717_v16  ;;  %v571_v55 = vpop.permute.xlu1 %570 }
 0x130   : > { %v1600_v45 = vsel %vm1557_vm1, %v1597_v3, %v1599_v14  ;;  %v2557_v23 = vsel %vm2522_vm2, %v2554_v34, %v2556_v36  ;;  %v2559_v9 = vsel %vm2522_vm2, %v2556_v36, %v2558_v44  ;;  %v3516_v0 = vrot.slane %v3345_v26, 4  ;;  %v13829_v3 = vld [vmem:[#allocation2 + $0x4e] ss:$2 sm:$0xff]  ;;  %v13831_v58 = vld [vmem:[#allocation2 + $0x4f] ss:$2 sm:$0xff] }
 0x131   : > { %v13822_v24 = vadd.f32 %v1598_v46, %v1338_v48  ;;  %v13824_v52 = vadd.f32 %v1600_v45, %v1339_v50  ;;  %v20151_v31 = vrot.slane %v13652_v20, 4  ;;  %v3992_v56 = vrot.slane %v3820_v39, 5  ;;  %v13843_v46 = vld [vmem:[#allocation2 + $0x5e] ss:$2 sm:$0xf] }
 0x132   : > { %v3035_v34 = vsel %vm2998_vm3, %v3032_v19, %v19965_v33  ;;  %v3517_v36 = vsel %vm2998_vm3, %v3514_v8, %v3516_v0  ;;  %v3519_v20 = vsel %vm2998_vm3, %v3516_v0, %v19964_v60  ;;  %v4468_v26 = vrot.slane %v4296_v1, 6  ;;  %v13845_v45 = vld [vmem:[#allocation2 + $0x5f] ss:$2 sm:$0xf] }
 0x133   : > { %v3033_v16 = vsel %vm2998_vm3, %v20151_v31, %v3032_v19  ;;  %v2774_v48 = vadd.f32 %v2557_v23, %v2293_v40  ;;  %v2775_v39 = vadd.f32 %v2559_v9, %v2294_v13  ;;  %v3737_v50 = vadd.f32 %v3517_v36, %v13633_v63  ;;  %20152 = vst [vmem:[#allocation13_spill] sm:$0xff] %v13845_v45 }
 0x134   : > { %v3738_v41 = vadd.f32 %v3519_v20, %v3248_v27  ;;  %v20153_v19 = vrot.slane %v13659_v12, 5  ;;  %v3995_v8 = vsel %vm3964_vm4, %v3992_v56, %v19963_v15  ;;  %v13854_v0 = vmul.f32 %v12896_v11, %v571_v55 }
 0x135   : > { %v13857_v1 = vmul.f32 %v12898_v17, %v571_v55  ;;  %v13862_v13 = vmul.f32 %v12900_v18, %v571_v55  ;;  %v4469_v12 = vsel %vm4440_vm5, %v4466_v37, %v4468_v26  ;;  %v4471_v23 = vsel %vm4440_vm5, %v4468_v26, %v19962_v49 }
 0x136   : > { %v3993_v5 = vsel %vm3964_vm4, %v20153_v19, %v3992_v56  ;;  %v4214_v40 = vadd.f32 %v3995_v8, %v3738_v41  ;;  %v13871_v9 = vmul.f32 %v12904_v21, %v571_v55  ;;  %v13874_v31 = vmul.f32 %v12906_v22, %v571_v55  ;;  %v566_v56 = vpop.permute.xlu0 %565 }
 0x137   : > { %v4213_v27 = vadd.f32 %v3993_v5, %v3737_v50  ;;  %v3250_v20 = vadd.f32 %v3033_v16, %v2774_v48  ;;  %v13878_v61 = vadd.f32 %v3035_v34, %v2775_v39  ;;  %v19966_v37 = vrot.slane %v13854_v0, 1 }
 0x138   : > { %v4690_v41 = vadd.f32 %v4471_v23, %v4214_v40  ;;  %v19971_v19 = vrot.slane %v13857_v1, 2  ;;  %v13883_v26 = vmul.f32 %v12910_v25, %v571_v55  ;;  %v13888_v5 = vmul.f32 %v12912_v28, %v571_v55 }
 0x139   : > { %v4689_v50 = vadd.f32 %v4469_v12, %v4213_v27  ;;  %v951_v16 = vmul.f32 %v12896_v11, %v566_v56  ;;  %v1423_v48 = vmul.f32 %v12898_v17, %v566_v56  ;;  %v1907_v34 = vmul.f32 %v12904_v21, %v566_v56 }
 0x13a   : > { %4768 = vst.msk [vmem:[#allocation2 + $0x70] sm:$0xff] %vm330_vm6, %v4690_v41  ;;  %v2083_v39 = vrot.slane %v13871_v9, 2  ;;  %v2383_v27 = vmul.f32 %v12906_v22, %v566_v56  ;;  %v2859_v40 = vmul.f32 %v12910_v25, %v566_v56  ;;  %v13898_v12 = vmul.f32 %v12914_v29, %v571_v55 }
 0x13b   : > { %4767 = vst.msk [vmem:[#allocation2 + $0x68] sm:$0xff] %vm330_vm6, %v4689_v50  ;;  %v13901_v23 = vmul.f32 %v13782_v38, %v571_v55  ;;  %v1129_v50 = vrot.slane %v951_v16, 1  ;;  %v2081_v41 = vrot.slane %v1907_v34, 2  ;;  %v869_v36 = vmul.f32 %v12900_v18, %v566_v56 }
 0x13c   : > { %v1601_v63 = vrot.slane %v1423_v48, 2  ;;  %v2560_v49 = vrot.slane %v2383_v27, 3  ;;  %v3347_v15 = vmul.f32 %v12912_v28, %v566_v56  ;;  %v3036_v8 = vrot.slane %v2859_v40, 4 }
 0x13d   : > { %v1130_v60 = vsel %vm1085_vm0, %v1127_v6, %v1129_v50  ;;  %v1132_v33 = vsel %vm1085_vm0, %v1129_v50, %v19966_v37  ;;  %v3822_v55 = vmul.f32 %v12914_v29, %v566_v56  ;;  %v2082_v48 = vsel %vm1557_vm1, %v2079_v7, %v2081_v41 }
 0x13e   : > { %v1340_v16 = vadd.f32 %v1130_v60, %v13757_v10  ;;  %v1341_v34 = vadd.f32 %v1132_v33, %v869_v36  ;;  %v2084_v2 = vsel %vm1557_vm1, %v2081_v41, %v2083_v39  ;;  %v19968_v6 = vrot.slane %v13883_v26, 4 }
 0x13f   : > { %v19970_v27 = vrot.slane %v13888_v5, 4  ;;  %v19969_v50 = vrot.slane %v13898_v12, 5  ;;  %v4298_v40 = vmul.f32 %v13782_v38, %v566_v56  ;;  %v19967_v37 = vrot.slane %v13901_v23, 6 }
 0x140   : > { %v1602_v4 = vsel %vm1557_vm1, %v1599_v14, %v1601_v63  ;;  %v2295_v10 = vadd.f32 %v2082_v48, %v13726_v59  ;;  %v2296_v7 = vadd.f32 %v2084_v2, %v13822_v24  ;;  %v1604_v33 = vsel %vm1557_vm1, %v1601_v63, %v19971_v19  ;;  %v581_v2 = vpop.permute.xlu1 %580 }
 0x141   : > { %v2561_v60 = vsel %vm2522_vm2, %v2558_v44, %v2560_v49  ;;  %v20154_v56 = vrot.slane %v13874_v31, 3  ;;  %v3520_v41 = vrot.slane %v3347_v15, 4  ;;  %v13938_v51 = vadd.f32 %v1602_v4, %v1340_v16 }
 0x142   : > { %v13940_v14 = vadd.f32 %v1604_v33, %v1341_v34  ;;  %v20155_v59 = vrot.slane %v13761_v30, 4  ;;  %v3996_v48 = vrot.slane %v3822_v55, 5  ;;  %v13945_v63 = vld [vmem:[#allocation2 + $0x68] ss:$2 sm:$0xff]  ;;  %v13947_v43 = vld [vmem:[#allocation2 + $0x69] ss:$2 sm:$0xff]  ;;  %v3039_v44 = vsel %vm2998_vm3, %v3036_v8, %v19968_v6 }
 0x143   : > { %v2563_v36 = vsel %vm2522_vm2, %v2560_v49, %v20154_v56  ;;  %20156 = vst [vmem:[#allocation14_spill] sm:$0xff] %v13945_v63  ;;  %20157 = vst [vmem:[#allocation15_spill] sm:$0xff] %v13947_v43  ;;  %v20158_v49 = vrot.slane %v13764_v57, 4  ;;  %v3523_v30 = vsel %vm2998_vm3, %v3520_v41, %v19970_v27  ;;  %v4472_v16 = vrot.slane %v4298_v40, 6 }
 0x144   : > { %v3037_v24 = vsel %vm2998_vm3, %v20155_v59, %v3036_v8  ;;  %v2776_v34 = vadd.f32 %v2561_v60, %v2295_v10  ;;  %v2777_v55 = vadd.f32 %v2563_v36, %v2296_v7  ;;  %v3740_v33 = vadd.f32 %v3523_v30, %v3250_v20 }
 0x145   : > { %v3521_v15 = vsel %vm2998_vm3, %v20158_v49, %v3520_v41  ;;  %v20159_v56 = vrot.slane %v13777_v53, 5  ;;  %v3999_v57 = vsel %vm3964_vm4, %v3996_v48, %v19969_v50  ;;  %v13966_v8 = vmul.f32 %v12896_v11, %v581_v2 }
 0x146   : > { %v3739_v4 = vadd.f32 %v3521_v15, %v13754_v42  ;;  %v13969_v49 = vmul.f32 %v12898_v17, %v581_v2  ;;  %v4216_v42 = vadd.f32 %v3999_v57, %v3740_v33  ;;  %v13974_v20 = vmul.f32 %v12900_v18, %v581_v2 }
 0x147   : > { %v3997_v59 = vsel %vm3964_vm4, %v20159_v56, %v3996_v48  ;;  %v20160_v53 = vrot.slane %v13785_v47, 6  ;;  %v4475_v60 = vsel %vm4440_vm5, %v4472_v16, %v19967_v37  ;;  %v13983_v36 = vmul.f32 %v12904_v21, %v581_v2  ;;  %v576_v48 = vpop.permute.xlu0 %575 }
 0x148   : > { %v4215_v10 = vadd.f32 %v3997_v59, %v3739_v4  ;;  %v13986_v41 = vmul.f32 %v12906_v22, %v581_v2  ;;  %v4692_v30 = vadd.f32 %v4475_v60, %v4216_v42  ;;  %v13989_v4 = vmul.f32 %v12910_v25, %v581_v2 }
 0x149   : > { %v4473_v7 = vsel %vm4440_vm5, %v20160_v53, %v4472_v16  ;;  %v13992_v47 = vmul.f32 %v12912_v28, %v581_v2  ;;  %v3252_v33 = vadd.f32 %v3037_v24, %v2776_v34  ;;  %v13994_v56 = vadd.f32 %v3039_v44, %v2777_v55 }
 0x14a   : > { %v4691_v15 = vadd.f32 %v4473_v7, %v4215_v10  ;;  %v19973_v16 = vrot.slane %v13966_v8, 1  ;;  %4770 = vst.msk [vmem:[#allocation2 + $0x80] sm:$0xff] %vm330_vm6, %v4692_v30  ;;  %v14001_v57 = vmul.f32 %v12914_v29, %v581_v2  ;;  %v953_v10 = vmul.f32 %v12896_v11, %v576_v48 }
 0x14b   : > { %v1425_v42 = vmul.f32 %v12898_v17, %v576_v48  ;;  %v1909_v53 = vmul.f32 %v12904_v21, %v576_v48  ;;  %v19972_v24 = vrot.slane %v13983_v36, 2  ;;  %v2385_v34 = vmul.f32 %v12906_v22, %v576_v48 }
 0x14c   : > { %4769 = vst.msk [vmem:[#allocation2 + $0x78] sm:$0xff] %vm330_vm6, %v4691_v15  ;;  %v3349_v55 = vmul.f32 %v12912_v28, %v576_v48  ;;  %v1133_v15 = vrot.slane %v953_v10, 1  ;;  %v14013_v40 = vmul.f32 %v13782_v38, %v581_v2  ;;  %v871_v37 = vmul.f32 %v12900_v18, %v576_v48 }
 0x14d   : > { %v2085_v30 = vrot.slane %v1909_v53, 2  ;;  %v1605_v6 = vrot.slane %v1425_v42, 2  ;;  %v2861_v50 = vmul.f32 %v12910_v25, %v576_v48  ;;  %v20161_v44 = vrot.slane %v13854_v0, 1 }
 0x14e   : > { %v1136_v7 = vsel %vm1085_vm0, %v1133_v15, %v19973_v16  ;;  %v2564_v59 = vrot.slane %v2385_v34, 3  ;;  %v3524_v60 = vrot.slane %v3349_v55, 4  ;;  %v3824_v42 = vmul.f32 %v12914_v29, %v576_v48 }
 0x14f   : > { %v1134_v27 = vsel %vm1085_vm0, %v20161_v44, %v1133_v15  ;;  %v2086_v2 = vsel %vm1557_vm1, %v2083_v39, %v2085_v30  ;;  %v2088_v10 = vsel %vm1557_vm1, %v2085_v30, %v19972_v24  ;;  %v4300_v0 = vmul.f32 %v13782_v38, %v576_v48 }
 0x150   : > { %v19975_v53 = vrot.slane %v14001_v57, 5  ;;  %v1342_v44 = vadd.f32 %v1134_v27, %v13862_v13  ;;  %v1343_v19 = vadd.f32 %v1136_v7, %v871_v37  ;;  %v2297_v34 = vadd.f32 %v2086_v2, %v13824_v52  ;;  %v591_v7 = vpop.permute.xlu1 %590 }
 0x151   : > { %v19974_v55 = vrot.slane %v14013_v40, 6  ;;  %v20162_v9 = vrot.slane %v13857_v1, 2  ;;  %v2298_v15 = vadd.f32 %v2088_v10, %v13938_v51  ;;  %v3040_v30 = vrot.slane %v2861_v50, 4 }
 0x152   : > { %v20163_v24 = vrot.slane %v13969_v49, 2  ;;  %v20164_v16 = vrot.slane %v13874_v31, 3  ;;  %v20165_v37 = vrot.slane %v13888_v5, 4  ;;  %v20166_v27 = vrot.slane %v13992_v47, 4 }
 0x153   : > { %v1606_v39 = vsel %vm1557_vm1, %v20162_v9, %v1605_v6  ;;  %v4000_v2 = vrot.slane %v3824_v42, 5  ;;  %v4476_v10 = vrot.slane %v4300_v0, 6  ;;  %v20167_v31 = vrot.slane %v13986_v41, 3 }
 0x154   : > { %v1608_v48 = vsel %vm1557_vm1, %v1605_v6, %v20163_v24  ;;  %v2565_v13 = vsel %vm2522_vm2, %v20164_v16, %v2564_v59  ;;  %v3525_v52 = vsel %vm2998_vm3, %v20165_v37, %v3524_v60  ;;  %v3527_v1 = vsel %vm2998_vm3, %v3524_v60, %v20166_v27 }
 0x155   : > { %v3741_v51 = vadd.f32 %v3525_v52, %v13878_v61  ;;  %v3742_v50 = vadd.f32 %v3527_v1, %v3252_v33  ;;  %v14052_v9 = vadd.f32 %v1606_v39, %v1342_v44  ;;  %v14054_v6 = vadd.f32 %v1608_v48, %v1343_v19 }
 0x156   : > { %v2567_v5 = vsel %vm2522_vm2, %v2564_v59, %v20167_v31  ;;  %v2778_v16 = vadd.f32 %v2565_v13, %v2297_v34  ;;  %v20168_v37 = vrot.slane %v13898_v12, 5  ;;  %v4003_v61 = vsel %vm3964_vm4, %v4000_v2, %v19975_v53  ;;  %v586_v13 = vpop.permute.xlu0 %585 }
 0x157   : > { %v2779_v24 = vadd.f32 %v2567_v5, %v2298_v15  ;;  %v14066_v33 = vmul.f32 %v12896_v11, %v591_v7  ;;  %v20169_v19 = vrot.slane %v13883_v26, 4  ;;  %v4218_v44 = vadd.f32 %v4003_v61, %v3742_v50 }
 0x158   : > { %v4001_v60 = vsel %vm3964_vm4, %v20168_v37, %v4000_v2  ;;  %v14072_v59 = vmul.f32 %v12898_v17, %v591_v7  ;;  %v20170_v12 = vrot.slane %v13989_v4, 4  ;;  %v20171_v39 = vrot.slane %v13901_v23, 6 }
 0x159   : > { %v3041_v42 = vsel %vm2998_vm3, %v20169_v19, %v3040_v30  ;;  %v4217_v0 = vadd.f32 %v4001_v60, %v3741_v51  ;;  %v4479_v48 = vsel %vm4440_vm5, %v4476_v10, %v19974_v55  ;;  %v14084_v26 = vmul.f32 %v12904_v21, %v591_v7 }
 0x15a   : > { %v3043_v34 = vsel %vm2998_vm3, %v3040_v30, %v20170_v12  ;;  %v4477_v15 = vsel %vm4440_vm5, %v20171_v39, %v4476_v10  ;;  %v3254_v52 = vadd.f32 %v3041_v42, %v2778_v16  ;;  %v4694_v1 = vadd.f32 %v4479_v48, %v4218_v44 }
 0x15b   : > { %v4693_v27 = vadd.f32 %v4477_v15, %v4217_v0  ;;  %v14087_v51 = vmul.f32 %v12906_v22, %v591_v7  ;;  %v14089_v50 = vadd.f32 %v3043_v34, %v2779_v24  ;;  %v14092_v23 = vmul.f32 %v12900_v18, %v591_v7 }
 0x15c   : > { %v19976_v30 = vrot.slane %v14066_v33, 1  ;;  %v14096_v2 = vmul.f32 %v12910_v25, %v591_v7  ;;  %4772 = vst.msk [vmem:[#allocation2 + $0x90] sm:$0xff] %vm330_vm6, %v4694_v1  ;;  %v19977_v10 = vrot.slane %v14072_v59, 2  ;;  %v14102_v31 = vmul.f32 %v12912_v28, %v591_v7 }
 0x15d   : > { %4771 = vst.msk [vmem:[#allocation2 + $0x88] sm:$0xff] %vm330_vm6, %v4693_v27  ;;  %v14105_v5 = vmul.f32 %v12914_v29, %v591_v7  ;;  %v955_v16 = vmul.f32 %v12896_v11, %v586_v13  ;;  %v19978_v24 = vrot.slane %v14084_v26, 2  ;;  %v1427_v37 = vmul.f32 %v12898_v17, %v586_v13 }
 0x15e   : > { %v1911_v60 = vmul.f32 %v12904_v21, %v586_v13  ;;  %v2387_v61 = vmul.f32 %v12906_v22, %v586_v13  ;;  %v3351_v0 = vmul.f32 %v12912_v28, %v586_v13  ;;  %v3826_v44 = vmul.f32 %v12914_v29, %v586_v13 }
 0x15f   : > { %v1137_v42 = vrot.slane %v955_v16, 1  ;;  %v14116_v12 = vmul.f32 %v13782_v38, %v591_v7  ;;  %v1609_v34 = vrot.slane %v1427_v37, 2  ;;  %v14119_v15 = vmul.f32 %v12910_v25, %v586_v13 }
 0x160   : > { %v2089_v39 = vrot.slane %v1911_v60, 2  ;;  %v20172_v48 = vrot.slane %v13966_v8, 1  ;;  %v2568_v16 = vrot.slane %v2387_v61, 3  ;;  %v3528_v55 = vrot.slane %v3351_v0, 4 }
 0x161   : > { %v1140_v1 = vsel %vm1085_vm0, %v1137_v42, %v19976_v30  ;;  %v873_v60 = vmul.f32 %v12900_v18, %v586_v13  ;;  %v20173_v8 = vrot.slane %v13983_v36, 2  ;;  %v4004_v61 = vrot.slane %v3826_v44, 5 }
 0x162   : > { %v1138_v27 = vsel %vm1085_vm0, %v20172_v48, %v1137_v42  ;;  %v2092_v42 = vsel %vm1557_vm1, %v2089_v39, %v19978_v24  ;;  %v20174_v7 = vrot.slane %v13969_v49, 2  ;;  %v1612_v36 = vsel %vm1557_vm1, %v1609_v34, %v19977_v10 }
 0x163   : > { %v1344_v19 = vadd.f32 %v1138_v27, %v13974_v20  ;;  %v2090_v48 = vsel %vm1557_vm1, %v20173_v8, %v2089_v39  ;;  %v1345_v30 = vadd.f32 %v1140_v1, %v873_v60  ;;  %v20175_v27 = vrot.slane %v13986_v41, 3 }
 0x164   : > { %v2299_v53 = vadd.f32 %v2090_v48, %v13940_v14  ;;  %v1610_v20 = vsel %vm1557_vm1, %v20174_v7, %v1609_v34  ;;  %v20176_v44 = vrot.slane %v13992_v47, 4  ;;  %v9629_v14 = vld [vmem:[%s19951_s3 + $0x20] sm:$0xff]  ;;  %v2300_v49 = vadd.f32 %v2092_v42, %v14052_v9  ;;  %v9630_v47 = vld [vmem:[%s19951_s3 + $0x28] sm:$0xff] }
 0x165   : > { %v2569_v39 = vsel %vm2522_vm2, %v20175_v27, %v2568_v16  ;;  %v20177_v7 = vrot.slane %v14087_v51, 3  ;;  %v20178_v34 = vrot.slane %v14102_v31, 4  ;;  %v9675_v48 = vld [vmem:[%s19951_s3 + $0x40] sm:$0xff]  ;;  %v9676_v9 = vld [vmem:[%s19951_s3 + $0x48] sm:$0xff]  ;;  %v14173_v42 = vadd.f32 %v1610_v20, %v1344_v19 }
 0x166   : > { %v3529_v1 = vsel %vm2998_vm3, %v20176_v44, %v3528_v55  ;;  %v20179_v27 = vrot.slane %v14001_v57, 5  ;;  %v14179_v44 = vpop.permute.xlu1 %600  ;;  %v19982_v37 = vmov 0.0|0.0   ;;  %v11785_v57 = vpack.c.bf16 %v9630_v47, %v9629_v14  ;;  %v14186_v19 = vld [vmem:[#allocation2 + $0x82] ss:$2 sm:$0xff] }
 0x167   : > { %v2571_v60 = vsel %vm2522_vm2, %v2568_v16, %v20177_v7  ;;  %v3531_v41 = vsel %vm2998_vm3, %v3528_v55, %v20178_v34  ;;  %v3743_v8 = vadd.f32 %v3529_v1, %v13994_v56  ;;  %v4302_v56 = vmul.f32 %v13782_v38, %v586_v13  ;;  %11784 = vmatprep.subr.bf16.mxu1 %v19982_v37  ;;  %v14188_v13 = vld [vmem:[#allocation2 + $0x83] ss:$2 sm:$0xff] }
 0x168   : > { %v3744_v16 = vadd.f32 %v3531_v41, %v3254_v52  ;;  %v4005_v55 = vsel %vm3964_vm4, %v20179_v27, %v4004_v61  ;;  %v2780_v1 = vadd.f32 %v2569_v39, %v2299_v53  ;;  %v20180_v7 = vrot.slane %v14105_v5, 5  ;;  %11796 = vmatprep.subr.bf16.mxu0 %v19982_v37  ;;  %20181 = vst [vmem:[#allocation16_spill] sm:$0xff] %v14186_v19 }
 0x169   : > { %v4219_v10 = vadd.f32 %v4005_v55, %v3743_v8  ;;  %v4480_v0 = vrot.slane %v4302_v56, 6  ;;  %v11797_v52 = vpack.c.bf16 %v9676_v9, %v9675_v48  ;;  %20182 = vst [vmem:[#allocation17_spill] sm:$0xff] %v14188_v13  ;;  %v14190_v20 = vadd.f32 %v1612_v36, %v1345_v30  ;;  %11786 = vmatpush3.bf16.msra.mxu1 %v11785_v57 }
 0x16a   : > { %v4007_v34 = vsel %vm3964_vm4, %v4004_v61, %v20180_v7  ;;  %v2781_v53 = vadd.f32 %v2571_v60, %v2300_v49  ;;  %v20183_v39 = vrot.slane %v14119_v15, 4  ;;  %v20184_v61 = vrot.slane %v13989_v4, 4  ;;  %v14211_v4 = vpop.permute.xlu0 %595  ;;  %11787 = vmatprep.subr.bf16.mxu1 %v19982_v37 }
 0x16b   : > { %v4220_v24 = vadd.f32 %v4007_v34, %v3744_v16  ;;  %v14199_v8 = vmul.f32 %v12896_v11, %v14179_v44  ;;  %v20185_v14 = vrot.slane %v14013_v40, 6  ;;  %v20186_v48 = vrot.slane %v14116_v12, 6  ;;  %11798 = vmatpush3.bf16.msra.mxu0 %v11797_v52 }
 0x16c   : > { %v3045_v41 = vsel %vm2998_vm3, %v20184_v61, %v20183_v39  ;;  %v14209_v36 = vmul.f32 %v12898_v17, %v14179_v44  ;;  %v14215_v9 = vmul.f32 %v12904_v21, %v14179_v44  ;;  %11799 = vmatprep.subr.bf16.mxu0 %v19982_v37  ;;  %v19979_v40 = vmov 0.0  }
 0x16d   : > { %v4481_v47 = vsel %vm4440_vm5, %v20185_v14, %v4480_v0  ;;  %v4483_v30 = vsel %vm4440_vm5, %v4480_v0, %v20186_v48  ;;  %331 = vst.msk [vmem:[#allocation3] sm:$0xff] %vm330_vm6, %v19979_v40  ;;  %332 = vst.msk [vmem:[#allocation3 + $0x8] sm:$0xff] %vm330_vm6, %v19979_v40  ;;  %v20188_v0 = vmov %v20183_v39  ;;  %v3256_v27 = vadd.f32 %v3045_v41, %v2780_v1 }
 0x16e   : > { %v4695_v49 = vadd.f32 %v4481_v47, %v4219_v10  ;;  %v4696_v60 = vadd.f32 %v4483_v30, %v4220_v24  ;;  %333 = vst.msk [vmem:[#allocation3 + $0x10] sm:$0xff] %vm330_vm6, %v19979_v40  ;;  %334 = vst.msk [vmem:[#allocation3 + $0x18] sm:$0xff] %vm330_vm6, %v19979_v40  ;;  %v20187_v24 = vrot.slane %v14096_v2, 4  ;;  %v14276_v55 = vmul.f32 %v12906_v22, %v14179_v44  ;;  %v9677_v47 = vld [vmem:[%s19951_s3 + $0x50] sm:$0xff] }
 0x16f   : > { %335 = vst.msk [vmem:[#allocation3 + $0x20] sm:$0xff] %vm330_vm6, %v19979_v40  ;;  %336 = vst.msk [vmem:[#allocation3 + $0x28] sm:$0xff] %vm330_vm6, %v19979_v40  ;;  %v14284_v7 = vmul.f32 %v12900_v18, %v14179_v44  ;;  %v19981_v34 = vrot.slane %v14199_v8, 1  ;;  %v957_v15 = vmul.f32 %v12896_v11, %v14211_v4  ;;  %v14291_v1 = vmul.f32 %v12910_v25, %v14179_v44 }
 0x170   : > { %337 = vst.msk [vmem:[#allocation3 + $0x30] sm:$0xff] %vm330_vm6, %v19979_v40  ;;  %338 = vst.msk [vmem:[#allocation3 + $0x38] sm:$0xff] %vm330_vm6, %v19979_v40  ;;  %v3047_v16 = vsel %vm2998_vm3, %v20188_v0, %v20187_v24  ;;  %v14295_v57 = vmul.f32 %v12912_v28, %v14179_v44  ;;  %v1429_v52 = vmul.f32 %v12898_v17, %v14211_v4  ;;  %v19984_v61 = vrot.slane %v14215_v9, 2 }
 0x171   : > { %339 = vst.msk [vmem:[#allocation3 + $0x40] sm:$0xff] %vm330_vm6, %v19979_v40  ;;  %340 = vst.msk [vmem:[#allocation3 + $0x48] sm:$0xff] %vm330_vm6, %v19979_v40  ;;  %v14278_v56 = vadd.f32 %v3047_v16, %v2781_v53  ;;  %v1913_v53 = vmul.f32 %v12904_v21, %v14211_v4  ;;  %v14305_v41 = vmul.f32 %v12914_v29, %v14179_v44  ;;  %v1141_v14 = vrot.slane %v957_v15, 1 }
 0x172   : > { %341 = vst.msk [vmem:[#allocation3 + $0x50] sm:$0xff] %vm330_vm6, %v19979_v40  ;;  %342 = vst.msk [vmem:[#allocation3 + $0x58] sm:$0xff] %vm330_vm6, %v19979_v40  ;;  %v14310_v48 = vmul.f32 %v13782_v38, %v14179_v44  ;;  %v3353_v16 = vmul.f32 %v12912_v28, %v14211_v4  ;;  %v3828_v15 = vmul.f32 %v12914_v29, %v14211_v4  ;;  %v20191_v13 = vrot.slane %v14072_v59, 2  ;;  %v611_v59 = vpop.permute.xlu1 %610 }
 0x173   : > { %343 = vst.msk [vmem:[#allocation3 + $0x60] sm:$0xff] %vm330_vm6, %v19979_v40  ;;  %344 = vst.msk [vmem:[#allocation3 + $0x68] sm:$0xff] %vm330_vm6, %v19979_v40  ;;  %v2093_v30 = vrot.slane %v1913_v53, 2  ;;  %v1144_v0 = vsel %vm1085_vm0, %v1141_v14, %v19981_v34  ;;  %v875_v10 = vmul.f32 %v12900_v18, %v14211_v4  ;;  %v2865_v37 = vmul.f32 %v12910_v25, %v14211_v4 }
 0x174   : > { %345 = vst.msk [vmem:[#allocation3 + $0x70] sm:$0xff] %vm330_vm6, %v19979_v40  ;;  %346 = vst.msk [vmem:[#allocation3 + $0x78] sm:$0xff] %vm330_vm6, %v19979_v40  ;;  %v3532_v39 = vrot.slane %v3353_v16, 4  ;;  %v4008_v43 = vrot.slane %v3828_v15, 5  ;;  %v4304_v63 = vmul.f32 %v13782_v38, %v14211_v4  ;;  %v20197_v16 = vrot.slane %v14105_v5, 5 }
 0x175   : > { %347 = vst.msk [vmem:[#allocation3 + $0x80] sm:$0xff] %vm330_vm6, %v19979_v40  ;;  %348 = vst.msk [vmem:[#allocation3 + $0x88] sm:$0xff] %vm330_vm6, %v19979_v40  ;;  %v2096_v44 = vsel %vm1557_vm1, %v2093_v30, %v19984_v61  ;;  %v20200_v5 = vrot.slane %v14096_v2, 4 }
 0x176   : > { %349 = vst.msk [vmem:[#allocation3 + $0x90] sm:$0xff] %vm330_vm6, %v19979_v40  ;;  %350 = vst.msk [vmem:[#allocation3 + $0x98] sm:$0xff] %vm330_vm6, %v19979_v40  ;;  %v2302_v35 = vadd.f32 %v2096_v44, %v14173_v42  ;;  %v4009_v15 = vsel %vm3964_vm4, %v20197_v16, %v4008_v43 }
 0x177   : > { %351 = vst.msk [vmem:[#allocation3 + $0xa0] sm:$0xff] %vm330_vm6, %v19979_v40  ;;  %352 = vst.msk [vmem:[#allocation3 + $0xa8] sm:$0xff] %vm330_vm6, %v19979_v40 }
 0x178   : > { %353 = vst.msk [vmem:[#allocation3 + $0xb0] sm:$0xff] %vm330_vm6, %v19979_v40  ;;  %354 = vst.msk [vmem:[#allocation3 + $0xb8] sm:$0xff] %vm330_vm6, %v19979_v40  ;;  %v20190_v40 = vrot.slane %v14084_v26, 2  ;;  %v9678_v26 = vld [vmem:[%s19951_s3 + $0x58] sm:$0xff] }
 0x179   : > { %4773 = vst.msk [vmem:[#allocation2 + $0x98] sm:$0xff] %vm330_vm6, %v4695_v49  ;;  %4774 = vst.msk [vmem:[#allocation2 + $0xa0] sm:$0xff] %vm330_vm6, %v4696_v60  ;;  %v2389_v49 = vmul.f32 %v12906_v22, %v14211_v4  ;;  %v20189_v60 = vrot.slane %v14066_v33, 1  ;;  %v1613_v33 = vrot.slane %v1429_v52, 2  ;;  %v9632_v52 = vld [vmem:[%s19951_s3 + $0x38] sm:$0xff]  ;;  %v11800_v45 = vpack.c.bf16 %v9678_v26, %v9677_v47 }
 0x17a   : > { %v2094_v34 = vsel %vm1557_vm1, %v20190_v40, %v2093_v30  ;;  %v1347_v30 = vadd.f32 %v1144_v0, %v875_v10  ;;  %v20192_v40 = vrot.slane %v14209_v36, 2  ;;  %v3048_v10 = vrot.slane %v2865_v37, 4 }
 0x17b   : > { %v1142_v24 = vsel %vm1085_vm0, %v20189_v60, %v1141_v14  ;;  %v9631_v60 = vld [vmem:[%s19951_s3 + $0x30] sm:$0xff]  ;;  %v2572_v61 = vrot.slane %v2389_v49, 3  ;;  %v2301_v53 = vadd.f32 %v2094_v34, %v14054_v6  ;;  %v1614_v19 = vsel %vm1557_vm1, %v20191_v13, %v1613_v33  ;;  %11801 = vmatpush3.bf16.msra.mxu0 %v11800_v45 }
 0x17c   : > { %v1346_v14 = vadd.f32 %v1142_v24, %v14092_v23  ;;  %v11788_v62 = vpack.c.bf16 %v9632_v52, %v9631_v60  ;;  %v1616_v23 = vsel %vm1557_vm1, %v1613_v33, %v20192_v40  ;;  %v20193_v6 = vrot.slane %v14102_v31, 4 }
 0x17d   : > { %v20194_v49 = vrot.slane %v14295_v57, 4  ;;  %v20195_v13 = vrot.slane %v14087_v51, 3  ;;  %v20196_v47 = vrot.slane %v14276_v55, 3  ;;  %v4484_v51 = vrot.slane %v4304_v63, 6 }
 0x17e   : > { %v3533_v34 = vsel %vm2998_vm3, %v20193_v6, %v3532_v39  ;;  %11789 = vmatpush3.bf16.msra.mxu1 %v11788_v62  ;;  %v20199_v33 = vmov 0.0|0.0   ;;  %v1818_v62 = vadd.f32 %v1614_v19, %v1346_v14  ;;  %v20202_v45 = vrot.slane %v14310_v48, 6 }
 0x17f   : > { %v3535_v4 = vsel %vm2998_vm3, %v3532_v39, %v20194_v49  ;;  %v2573_v42 = vsel %vm2522_vm2, %v20195_v13, %v2572_v61  ;;  %v2575_v24 = vsel %vm2522_vm2, %v2572_v61, %v20196_v47  ;;  %v3745_v0 = vadd.f32 %v3533_v34, %v14089_v50  ;;  %11790 = vmatprep.subr.bf16.mxu1 %v20199_v33 }
 0x180   : > { %v3746_v37 = vadd.f32 %v3535_v4, %v3256_v27  ;;  %v2782_v31 = vadd.f32 %v2573_v42, %v2301_v53  ;;  %v20198_v39 = vrot.slane %v14305_v41, 5  ;;  %v2783_v60 = vadd.f32 %v2575_v24, %v2302_v35  ;;  %11802 = vmatprep.subr.bf16.mxu0 %v20199_v33  ;;  %v4836_v33 = vld [vmem:[#allocation2 + $0x10] ss:$2 sm:$0xf] }
 0x181   : > { %v4221_v52 = vadd.f32 %v4009_v15, %v3745_v0  ;;  %v14382_v50 = vmul.f32 %v12896_v11, %v611_v59  ;;  %v3049_v27 = vsel %vm2998_vm3, %v20200_v5, %v3048_v10  ;;  %v20201_v53 = vrot.slane %v14116_v12, 6 }
 0x182   : > { %v4011_v44 = vsel %vm3964_vm4, %v4008_v43, %v20198_v39  ;;  %v4487_v35 = vsel %vm4440_vm5, %v4484_v51, %v20202_v45  ;;  %v606_v43 = vpop.permute.xlu0 %605  ;;  %v14395_v6 = vmul.f32 %v12898_v17, %v611_v59  ;;  %v14398_v19 = vmul.f32 %v12904_v21, %v611_v59 }
 0x183   : > { %v4222_v61 = vadd.f32 %v4011_v44, %v3746_v37  ;;  %v4485_v63 = vsel %vm4440_vm5, %v20201_v53, %v4484_v51  ;;  %v14400_v2 = vadd.f32 %v1616_v23, %v1347_v30  ;;  %v20203_v14 = vrot.slane %v14291_v1, 4  ;;  %v4838_v53 = vld [vmem:[#allocation2 + $0x1] ss:$2 sm:$0xff] }
 0x184   : > { %v4697_v26 = vadd.f32 %v4485_v63, %v4221_v52  ;;  %v3258_v34 = vadd.f32 %v3049_v27, %v2782_v31  ;;  %v14406_v49 = vmul.f32 %v12906_v22, %v611_v59  ;;  %v14413_v13 = vmul.f32 %v12900_v18, %v611_v59 }
 0x185   : > { %v4698_v40 = vadd.f32 %v4487_v35, %v4222_v61  ;;  %v3051_v12 = vsel %vm2998_vm3, %v3048_v10, %v20203_v14  ;;  %v19992_v30 = vrot.slane %v14382_v50, 1  ;;  %v959_v23 = vmul.f32 %v12896_v11, %v606_v43 }
 0x186   : > { %v14408_v4 = vadd.f32 %v3051_v12, %v2783_v60  ;;  %4775 = vst.msk [vmem:[#allocation2 + $0xa8] sm:$0xff] %vm330_vm6, %v4697_v26  ;;  %v14418_v42 = vmul.f32 %v12910_v25, %v611_v59  ;;  %v14421_v10 = vmul.f32 %v12912_v28, %v611_v59  ;;  %v1431_v47 = vmul.f32 %v12898_v17, %v606_v43  ;;  %v4842_v12 = vld [vmem:[#allocation2 + $0x1a] ss:$2 sm:$0xff] }
 0x187   : > { %4776 = vst.msk [vmem:[#allocation2 + $0xb0] sm:$0xff] %vm330_vm6, %v4698_v40  ;;  %v1915_v24 = vmul.f32 %v12904_v21, %v606_v43  ;;  %v19994_v0 = vrot.slane %v14395_v6, 2  ;;  %v19993_v37 = vrot.slane %v14398_v19, 2  ;;  %v1145_v31 = vrot.slane %v959_v23, 1  ;;  %v4846_v23 = vld [vmem:[#allocation2 + $0x1b] ss:$2 sm:$0xff] }
 0x188   : > { %v2391_v16 = vmul.f32 %v12906_v22, %v606_v43  ;;  %v19996_v15 = vrot.slane %v14406_v49, 3  ;;  %v14430_v39 = vmul.f32 %v12914_v29, %v611_v59  ;;  %v14433_v44 = vmul.f32 %v13782_v38, %v611_v59 }
 0x189   : > { %v2097_v51 = vrot.slane %v1915_v24, 2  ;;  %v877_v60 = vmul.f32 %v12900_v18, %v606_v43  ;;  %v20204_v52 = vrot.slane %v14199_v8, 1  ;;  %v1148_v5 = vsel %vm1085_vm0, %v1145_v31, %v19992_v30  ;;  %v4834_v30 = vld [vmem:[#allocation2] ss:$2 sm:$0xff] }
 0x18a   : > { %v1617_v27 = vrot.slane %v1431_v47, 2  ;;  %v19995_v63 = vrot.slane %v14421_v10, 4  ;;  %v2576_v45 = vrot.slane %v2391_v16, 3  ;;  %v3355_v59 = vmul.f32 %v12912_v28, %v606_v43 }
 0x18b   : > { %v1146_v61 = vsel %vm1085_vm0, %v20204_v52, %v1145_v31  ;;  %v20205_v26 = vrot.slane %v14215_v9, 2  ;;  %v2867_v40 = vmul.f32 %v12910_v25, %v606_v43  ;;  %v3830_v14 = vmul.f32 %v12914_v29, %v606_v43 }
 0x18c   : > { %v1348_v35 = vadd.f32 %v1146_v61, %v14284_v7  ;;  %v1349_v31 = vadd.f32 %v1148_v5, %v877_v60  ;;  %v2100_v16 = vsel %vm1557_vm1, %v2097_v51, %v19993_v37  ;;  %v20206_v7 = vrot.slane %v14209_v36, 2 }
 0x18d   : > { %v2098_v8 = vsel %vm1557_vm1, %v20205_v26, %v2097_v51  ;;  %v1620_v52 = vsel %vm1557_vm1, %v1617_v27, %v19994_v0  ;;  %v4306_v26 = vmul.f32 %v13782_v38, %v606_v43  ;;  %v20207_v60 = vrot.slane %v14276_v55, 3 }
 0x18e   : > { %v1618_v9 = vsel %vm1557_vm1, %v20206_v7, %v1617_v27  ;;  %v2303_v61 = vadd.f32 %v2098_v8, %v14190_v20  ;;  %v2579_v36 = vsel %vm2522_vm2, %v2576_v45, %v19996_v15  ;;  %v3536_v51 = vrot.slane %v3355_v59, 4 }
 0x18f   : > { %v2577_v5 = vsel %vm2522_vm2, %v20207_v60, %v2576_v45  ;;  %v4851_v7 = vmax.f32 %v4842_v12, %v4846_v23  ;;  %v14470_v37 = vadd.f32 %v1618_v9, %v1348_v35  ;;  %v2304_v24 = vadd.f32 %v2100_v16, %v1818_v62  ;;  %v14484_v62 = vld [vmem:[%s19950_s2] ss:$0 sm:$0xff] }
 0x190   : > { %v3052_v27 = vrot.slane %v2867_v40, 4  ;;  %v4012_v0 = vrot.slane %v3830_v14, 5  ;;  %v20208_v20 = vrot.slane %v14295_v57, 4  ;;  %v3539_v55 = vsel %vm2998_vm3, %v3536_v51, %v19995_v63  ;;  %v14492_v23 = vld [vmem:[#allocation2 + $0x9c] ss:$2 sm:$0xff] }
 0x191   : > { %v4488_v8 = vrot.slane %v4306_v26, 6  ;;  %v4849_v60 = vmax.f32 %v4834_v30, %v4838_v53  ;;  %v14478_v47 = vadd.f32 %v1620_v52, %v1349_v31  ;;  %v2784_v45 = vadd.f32 %v2577_v5, %v2303_v61  ;;  %v621_v53 = vpop.permute.xlu1 %620  ;;  %20211 = vst [vmem:[#allocation18_spill] sm:$0xff] %v14492_v23  ;;  %v14494_v31 = vld [vmem:[#allocation2 + $0x9d] ss:$2 sm:$0xff] }
 0x192   : > { %v3537_v43 = vsel %vm2998_vm3, %v20208_v20, %v3536_v51  ;;  %v3748_v35 = vadd.f32 %v3539_v55, %v3258_v34  ;;  %v20209_v57 = vrot.slane %v14305_v41, 5  ;;  %v20210_v14 = vrot.slane %v14430_v39, 5  ;;  %20212 = vst [vmem:[#allocation19_spill] sm:$0xff] %v14494_v31 }
 0x193   : > { %v3747_v59 = vadd.f32 %v3537_v43, %v14278_v56  ;;  %v4853_v30 = vmax.f32 %v4849_v60, %v4851_v7  ;;  %v2785_v56 = vadd.f32 %v2579_v36, %v2304_v24  ;;  %v20213_v9 = vmov 0.0   ;;  %v14510_v36 = vld [vmem:[#allocation3] sm:$0xff]  ;;  %v616_v43 = vpop.permute.xlu0 %615 }
 0x194   : > { %v4013_v40 = vsel %vm3964_vm4, %v20209_v57, %v4012_v0  ;;  %v4015_v12 = vsel %vm3964_vm4, %v4012_v0, %v20210_v14  ;;  %10613 = vmatprep.mubr.msk.f32.mxu1 %vm12720_vm7, %v20213_v9  ;;  %10755 = vmatprep.mubr.msk.f32.mxu0 %vm12720_vm7, %v20213_v9  ;;  %v20214_v41 = vrot.slane %v14291_v1, 4  ;;  %v20215_v52 = vrot.slane %v14310_v48, 6  ;;  %356 = vst.msk [vmem:[#allocation3 + $0xc0] sm:$0xf] %vm355_vm8, %v20213_v9 }
 0x195   : > { %v4223_v34 = vadd.f32 %v4013_v40, %v3747_v59  ;;  %v4224_v16 = vadd.f32 %v4015_v12, %v3748_v35  ;;  %v20216_v26 = vrot.slane %v14433_v44, 6  ;;  %v4861_v5 = vadd.f32 %v14484_v62, %v4853_v30  ;;  %358 = vst.msk [vmem:[#allocation5] sm:$0xff] %vm357_vm11, %v20213_v9  ;;  %359 = vst.msk [vmem:[#allocation5 + $0x8] sm:$0xff] %vm357_vm11, %v20213_v9 }
 0x196   : > { %v3053_v0 = vsel %vm2998_vm3, %v20214_v41, %v3052_v27  ;;  %v4489_v61 = vsel %vm4440_vm5, %v20215_v52, %v4488_v8  ;;  %v14513_v20 = vmul.f32 %v12896_v11, %v621_v53  ;;  %v14516_v1 = vmul.f32 %v12898_v17, %v621_v53  ;;  %360 = vst.msk [vmem:[#allocation5 + $0x10] sm:$0xff] %vm357_vm11, %v20213_v9 }
 0x197   : > { %v4491_v24 = vsel %vm4440_vm5, %v4488_v8, %v20216_v26  ;;  %v4699_v51 = vadd.f32 %v4489_v61, %v4223_v34  ;;  %v20217_v55 = vrot.slane %v14418_v42, 4  ;;  %v14523_v60 = vadd.f32 %v3053_v0, %v2784_v45  ;;  %361 = vst.msk [vmem:[#allocation5 + $0x18] sm:$0xff] %vm357_vm11, %v20213_v9  ;;  %362 = vst.msk [vmem:[#allocation5 + $0x20] sm:$0xff] %vm357_vm11, %v20213_v9 }
 0x198   : > { %v4700_v7 = vadd.f32 %v4491_v24, %v4224_v16  ;;  %v4863_v59 = vmax.f32 %v4861_v5, 0.0  ;;  %v5230_v57 = vrot.slane %v14510_v36, 1  ;;  %v5700_v40 = vrot.slane %v14510_v36, 2  ;;  %363 = vst.msk [vmem:[#allocation5 + $0x28] sm:$0xff] %vm357_vm11, %v20213_v9  ;;  %364 = vst.msk [vmem:[#allocation5 + $0x30] sm:$0xff] %vm357_vm11, %v20213_v9 }
 0x199   : > { %v3055_v8 = vsel %vm2998_vm3, %v3052_v27, %v20217_v55  ;;  %4777 = vst.msk [vmem:[#allocation2 + $0xb8] sm:$0xff] %vm330_vm6, %v4699_v51  ;;  %v14532_v14 = vmul.f32 %v12904_v21, %v621_v53  ;;  %v14536_v27 = vmul.f32 %v12900_v18, %v621_v53  ;;  %v14539_v45 = vmul.f32 %v12906_v22, %v621_v53 }
 0x19a   : > { %v14525_v35 = vadd.f32 %v3055_v8, %v2785_v56  ;;  %4778 = vst.msk [vmem:[#allocation2 + $0xc0] sm:$0xff] %vm330_vm6, %v4700_v7  ;;  %4865 = vst.msk [vmem:[#allocation3 + $0xf] sm:$0xff] %vm330_vm6, %v4863_v59  ;;  %v14542_v12 = vmul.f32 %v12910_v25, %v621_v53  ;;  %v961_v30 = vmul.f32 %v12896_v11, %v616_v43  ;;  %v19997_v56 = vrot.slane %v14513_v20, 1 }
 0x19b   : > { %v1433_v16 = vmul.f32 %v12898_v17, %v616_v43  ;;  %v1917_v41 = vmul.f32 %v12904_v21, %v616_v43  ;;  %v14550_v0 = vmul.f32 %v12912_v28, %v621_v53  ;;  %v14553_v52 = vmul.f32 %v12914_v29, %v621_v53  ;;  %365 = vst.msk [vmem:[#allocation5 + $0x38] sm:$0xff] %vm357_vm11, %v20213_v9 }
 0x19c   : > { %v14556_v61 = vmul.f32 %v13782_v38, %v621_v53  ;;  %v1149_v26 = vrot.slane %v961_v30, 1  ;;  %v20000_v24 = vrot.slane %v14532_v14, 2  ;;  %v2393_v36 = vmul.f32 %v12906_v22, %v616_v43 }
 0x19d   : > { %v2101_v5 = vrot.slane %v1917_v41, 2  ;;  %v14561_v51 = vmul.f32 %v12910_v25, %v616_v43  ;;  %v20218_v8 = vrot.slane %v14382_v50, 1  ;;  %v1621_v48 = vrot.slane %v1433_v16, 2 }
 0x19e   : > { %v879_v38 = vmul.f32 %v12900_v18, %v616_v43  ;;  %v1152_v53 = vsel %vm1085_vm0, %v1149_v26, %v19997_v56  ;;  %v3357_v30 = vmul.f32 %v12912_v28, %v616_v43  ;;  %v3832_v41 = vmul.f32 %v12914_v29, %v616_v43 }
 0x19f   : > { %v1150_v59 = vsel %vm1085_vm0, %v20218_v8, %v1149_v26  ;;  %v20219_v50 = vrot.slane %v14398_v19, 2  ;;  %v2104_v26 = vsel %vm1557_vm1, %v2101_v5, %v20000_v24  ;;  %v2580_v56 = vrot.slane %v2393_v36, 3  ;;  %v4840_v24 = vld [vmem:[#allocation2 + $0x11] ss:$2 sm:$0xf] }
 0x1a0   : > { %v1350_v15 = vadd.f32 %v1150_v59, %v14413_v13  ;;  %v3056_v34 = vrot.slane %v14561_v51, 4  ;;  %v1351_v55 = vadd.f32 %v1152_v53, %v879_v38  ;;  %v20220_v19 = vrot.slane %v14395_v6, 2  ;;  %v14606_v53 = vld [vmem:[%s19949_s1 + $0x8] ss:$0 sm:$0xff] }
 0x1a1   : > { %v2102_v16 = vsel %vm1557_vm1, %v20219_v50, %v2101_v5  ;;  %v14580_v8 = vld [vmem:[#allocation3 + $0x8] sm:$0xff]  ;;  %v20221_v31 = vrot.slane %v14516_v1, 2  ;;  %v3540_v5 = vrot.slane %v3357_v30, 4  ;;  %v4016_v36 = vrot.slane %v3832_v41, 5 }
 0x1a2   : > { %v20002_v63 = vrot.slane %v14580_v8, 1  ;;  %v20001_v7 = vrot.slane %v14580_v8, 2  ;;  %v1622_v50 = vsel %vm1557_vm1, %v20220_v19, %v1621_v48  ;;  %v2305_v59 = vadd.f32 %v2102_v16, %v14400_v2 }
 0x1a3   : > { %v1624_v13 = vsel %vm1557_vm1, %v1621_v48, %v20221_v31  ;;  %v2306_v38 = vadd.f32 %v2104_v26, %v14470_v37  ;;  %v4308_v2 = vmul.f32 %v14606_v53, %v616_v43  ;;  %v4844_v31 = vld [vmem:[#allocation2 + $0x2a] ss:$2 sm:$0xf]  ;;  %v4848_v48 = vld [vmem:[#allocation2 + $0x2b] ss:$2 sm:$0xf] }
 0x1a4   : > { %v5232_v51 = vsel %vm1085_vm0, %v5230_v57, %v20002_v63  ;;  %v5702_v6 = vsel %vm1557_vm1, %v5700_v40, %v20001_v7  ;;  %v20222_v57 = vrot.slane %v14406_v49, 3  ;;  %v20223_v40 = vrot.slane %v14421_v10, 4  ;;  %v14632_v10 = vpop.permute.xlu1 %630 }
 0x1a5   : > { %10614 = vmatmul.mubr.msk.f32.vlgmr.msra.gmra.mrb[0].mxu1 %vm330_vm6, %v5232_v51  ;;  %10756 = vmatmul.mubr.msk.f32.vlgmr.msra.gmra.mrb[0].mxu0 %vm330_vm6, %v5702_v6  ;;  %v20224_v41 = vrot.slane %v14550_v0, 4  ;;  %v20225_v43 = vrot.slane %v14539_v45, 3  ;;  %v20226_v49 = vrot.slane %v14430_v39, 5  ;;  %v4852_v39 = vmax.f32 %v4844_v31, %v4848_v48 }
 0x1a6   : > { %v2581_v30 = vsel %vm2522_vm2, %v20222_v57, %v2580_v56  ;;  %v3541_v37 = vsel %vm2998_vm3, %v20223_v40, %v3540_v5  ;;  %10616 = vmatprep.mubr.msk.f32.mxu1 %vm12720_vm7, %v20213_v9  ;;  %v4492_v57 = vrot.slane %v4308_v2, 6  ;;  %10758 = vmatprep.mubr.msk.f32.mxu0 %vm12720_vm7, %v20213_v9  ;;  %v14641_v40 = vld [vmem:[#allocation2 + $0xb7] ss:$2 sm:$0xff]  ;;  %v1822_v48 = vadd.f32 %v1622_v50, %v1350_v15 }
 0x1a7   : > { %v3543_v16 = vsel %vm2998_vm3, %v3540_v5, %v20224_v41  ;;  %v2583_v26 = vsel %vm2522_vm2, %v2580_v56, %v20225_v43  ;;  %v3749_v19 = vadd.f32 %v3541_v37, %v14408_v4  ;;  %v4017_v6 = vsel %vm3964_vm4, %v20226_v49, %v4016_v36  ;;  %20228 = vst [vmem:[#allocation20_spill] sm:$0xff] %v14641_v40 }
 0x1a8   : > { %v3750_v51 = vadd.f32 %v3543_v16, %v14523_v60  ;;  %v20227_v5 = vrot.slane %v14553_v52, 5  ;;  %v4850_v4 = vmax.f32 %v4836_v33, %v4840_v24  ;;  %v14639_v60 = vld [vmem:[#allocation2 + $0xb6] ss:$2 sm:$0xff]  ;;  %v2786_v37 = vadd.f32 %v2581_v30, %v2305_v59 }
 0x1a9   : > { %v2787_v41 = vadd.f32 %v2583_v26, %v2306_v38  ;;  %v4225_v16 = vadd.f32 %v4017_v6, %v3749_v19  ;;  %v20229_v49 = vrot.slane %v14433_v44, 6  ;;  %v14651_v33 = vmul.f32 %v12896_v11, %v14632_v10 }
 0x1aa   : > { %v4019_v56 = vsel %vm3964_vm4, %v4016_v36, %v20227_v5  ;;  %v20230_v36 = vrot.slane %v14556_v61, 6  ;;  %v4854_v5 = vmax.f32 %v4850_v4, %v4852_v39  ;;  %v14655_v59 = vmul.f32 %v12898_v17, %v14632_v10 }
 0x1ab   : > { %v4226_v43 = vadd.f32 %v4019_v56, %v3750_v51  ;;  %v4493_v7 = vsel %vm4440_vm5, %v20229_v49, %v4492_v57  ;;  %v14659_v44 = vmul.f32 %v12904_v21, %v14632_v10  ;;  %v20231_v30 = vrot.slane %v14418_v42, 4 }
 0x1ac   : > { %v4495_v2 = vsel %vm4440_vm5, %v4492_v57, %v20230_v36  ;;  %v4701_v24 = vadd.f32 %v4493_v7, %v4225_v16  ;;  %v4862_v19 = vadd.f32 %v14484_v62, %v4854_v5  ;;  %v626_v7 = vpop.permute.xlu0 %625  ;;  %v14667_v51 = vadd.f32 %v1624_v13, %v1351_v55 }
 0x1ad   : > { %v4702_v31 = vadd.f32 %v4495_v2, %v4226_v43  ;;  %v3057_v26 = vsel %vm2998_vm3, %v20231_v30, %v3056_v34  ;;  %v20232_v6 = vrot.slane %v14542_v12, 4  ;;  %v14676_v15 = vmul.f32 %v12906_v22, %v14632_v10 }
 0x1ae   : > { %v3262_v57 = vadd.f32 %v3057_v26, %v2786_v37  ;;  %4779 = vst.msk [vmem:[#allocation2 + $0xc8] sm:$0xff] %vm330_vm6, %v4701_v24  ;;  %v4864_v50 = vmax.f32 %v4862_v19, 0.0  ;;  %v20005_v4 = vrot.slane %v14651_v33, 1  ;;  %v14683_v55 = vmul.f32 %v12910_v25, %v14632_v10 }
 0x1af   : > { %v3059_v56 = vsel %vm2998_vm3, %v3056_v34, %v20232_v6  ;;  %4780 = vst.msk [vmem:[#allocation2 + $0xd0] sm:$0xff] %vm330_vm6, %v4702_v31  ;;  %v14689_v39 = vmul.f32 %v12912_v28, %v14632_v10  ;;  %v963_v37 = vmul.f32 %v12896_v11, %v626_v7  ;;  %v1435_v16 = vmul.f32 %v12898_v17, %v626_v7 }
 0x1b0   : > { %v14678_v42 = vadd.f32 %v3059_v56, %v2787_v41  ;;  %4866 = vst.msk [vmem:[#allocation3 + $0x17] sm:$0xf] %vm355_vm8, %v4864_v50  ;;  %v14695_v41 = vmul.f32 %v12914_v29, %v14632_v10  ;;  %v1919_v43 = vmul.f32 %v12904_v21, %v626_v7  ;;  %v2395_v49 = vmul.f32 %v12906_v22, %v626_v7 }
 0x1b1   : > { %v14703_v2 = vmul.f32 %v14606_v53, %v14632_v10  ;;  %v1153_v5 = vrot.slane %v963_v37, 1  ;;  %v3359_v24 = vmul.f32 %v12912_v28, %v626_v7  ;;  %v2871_v26 = vmul.f32 %v12910_v25, %v626_v7 }
 0x1b2   : > { %v2105_v30 = vrot.slane %v1919_v43, 2  ;;  %v3834_v19 = vmul.f32 %v12914_v29, %v626_v7  ;;  %v881_v6 = vmul.f32 %v12900_v18, %v626_v7  ;;  %v20233_v56 = vrot.slane %v14513_v20, 1 }
 0x1b3   : > { %v1625_v38 = vrot.slane %v1435_v16, 2  ;;  %v3544_v34 = vrot.slane %v3359_v24, 4  ;;  %v1156_v43 = vsel %vm1085_vm0, %v1153_v5, %v20005_v4  ;;  %v2584_v31 = vrot.slane %v2395_v49, 3 }
 0x1b4   : > { %v1154_v50 = vsel %vm1085_vm0, %v20233_v56, %v1153_v5  ;;  %v20234_v13 = vrot.slane %v14532_v14, 2  ;;  %v20235_v20 = vrot.slane %v14659_v44, 2  ;;  %v4310_v24 = vmul.f32 %v14606_v53, %v626_v7 }
 0x1b5   : > { %v1352_v56 = vadd.f32 %v1154_v50, %v14536_v27  ;;  %v3060_v63 = vrot.slane %v2871_v26, 4  ;;  %v4020_v40 = vrot.slane %v3834_v19, 5  ;;  %v1353_v49 = vadd.f32 %v1156_v43, %v881_v6  ;;  %v641_v6 = vpop.permute.xlu1 %640 }
 0x1b6   : > { %v2106_v23 = vsel %vm1557_vm1, %v20234_v13, %v2105_v30  ;;  %v2108_v16 = vsel %vm1557_vm1, %v2105_v30, %v20235_v20  ;;  %v20236_v4 = vrot.slane %v14516_v1, 2  ;;  %v20237_v36 = vrot.slane %v14550_v0, 4 }
 0x1b7   : > { %v2307_v37 = vadd.f32 %v2106_v23, %v14478_v47  ;;  %v14728_v5 = vld [vmem:[#allocation3 + $0x10] sm:$0xff]  ;;  %v2308_v13 = vadd.f32 %v2108_v16, %v1822_v48  ;;  %v20238_v47 = vrot.slane %v14539_v45, 3  ;;  %v20239_v26 = vrot.slane %v14689_v39, 4 }
 0x1b8   : > { %v1626_v14 = vsel %vm1557_vm1, %v20236_v4, %v1625_v38  ;;  %v3545_v30 = vsel %vm2998_vm3, %v20237_v36, %v3544_v34  ;;  %v20007_v7 = vrot.slane %v14728_v5, 1  ;;  %v20006_v27 = vrot.slane %v14728_v5, 2 }
 0x1b9   : > { %v2585_v23 = vsel %vm2522_vm2, %v20238_v47, %v2584_v31  ;;  %v3547_v19 = vsel %vm2998_vm3, %v3544_v34, %v20239_v26  ;;  %v20240_v1 = vrot.slane %v14676_v15, 3  ;;  %v3751_v0 = vadd.f32 %v3545_v30, %v14525_v35 }
 0x1ba   : > { %v2788_v4 = vadd.f32 %v2585_v23, %v2307_v37  ;;  %v3752_v36 = vadd.f32 %v3547_v19, %v3262_v57  ;;  %v20241_v50 = vrot.slane %v14580_v8, 1  ;;  %v20242_v43 = vrot.slane %v14580_v8, 2 }
 0x1bb   : > { %v2587_v48 = vsel %vm2522_vm2, %v2584_v31, %v20240_v1  ;;  %v20243_v20 = vrot.slane %v14553_v52, 5  ;;  %v20244_v35 = vrot.slane %v14695_v41, 5  ;;  %v4496_v47 = vrot.slane %v4310_v24, 6 }
 0x1bc   : > { %v5234_v45 = vsel %vm1085_vm0, %v20241_v50, %v20007_v7  ;;  %v5704_v34 = vsel %vm1557_vm1, %v20242_v43, %v20006_v27  ;;  %v2789_v37 = vadd.f32 %v2587_v48, %v2308_v13  ;;  %v882_v8 = vmul.f32 %v12900_v18, %v14632_v10 }
 0x1bd   : > { %v4021_v31 = vsel %vm3964_vm4, %v20243_v20, %v4020_v40  ;;  %v4023_v57 = vsel %vm3964_vm4, %v4020_v40, %v20244_v35  ;;  %10617 = vmatmul.mubr.msk.f32.gmra.mrb[2].mxu1 %vm330_vm6, %v5234_v45  ;;  %10759 = vmatmul.mubr.msk.f32.gmra.mrb[2].mxu0 %vm330_vm6, %v5704_v34  ;;  %v20245_v23 = vrot.slane %v14655_v59, 2  ;;  %v1824_v26 = vadd.f32 %v1626_v14, %v1352_v56  ;;  %v636_v14 = vpop.permute.xlu0 %635 }
 0x1be   : > { %v4227_v16 = vadd.f32 %v4021_v31, %v3751_v0  ;;  %v4228_v30 = vadd.f32 %v4023_v57, %v3752_v36  ;;  %v14772_v19 = vmul.f32 %v12896_v11, %v641_v6  ;;  %10619 = vmatprep.mubr.msk.f32.mxu1 %vm12720_vm7, %v20213_v9  ;;  %v20246_v40 = vrot.slane %v14542_v12, 4  ;;  %10761 = vmatprep.mubr.msk.f32.mxu0 %vm12720_vm7, %v20213_v9 }
 0x1bf   : > { %v1628_v52 = vsel %vm1557_vm1, %v1625_v38, %v20245_v23  ;;  %v20247_v24 = vrot.slane %v14683_v55, 4  ;;  %v20248_v10 = vrot.slane %v14556_v61, 6  ;;  %v20249_v38 = vrot.slane %v14703_v2, 6 }
 0x1c0   : > { %v3061_v13 = vsel %vm2998_vm3, %v20246_v40, %v3060_v63  ;;  %v14791_v36 = vmul.f32 %v12898_v17, %v641_v6  ;;  %v14794_v50 = vmul.f32 %v12904_v21, %v641_v6  ;;  %v14801_v43 = vmul.f32 %v12900_v18, %v641_v6 }
 0x1c1   : > { %v3063_v1 = vsel %vm2998_vm3, %v3060_v63, %v20247_v24  ;;  %v4497_v48 = vsel %vm4440_vm5, %v20248_v10, %v4496_v47  ;;  %v4499_v56 = vsel %vm4440_vm5, %v4496_v47, %v20249_v38  ;;  %v14796_v63 = vadd.f32 %v1628_v52, %v1353_v49 }
 0x1c2   : > { %v4703_v0 = vadd.f32 %v4497_v48, %v4227_v16  ;;  %v4704_v12 = vadd.f32 %v4499_v56, %v4228_v30  ;;  %v3264_v61 = vadd.f32 %v3061_v13, %v2788_v4  ;;  %v14798_v45 = vadd.f32 %v3063_v1, %v2789_v37 }
 0x1c3   : > { %v20008_v34 = vrot.slane %v14772_v19, 1  ;;  %v14807_v20 = vmul.f32 %v12906_v22, %v641_v6  ;;  %v14810_v31 = vmul.f32 %v12910_v25, %v641_v6  ;;  %v965_v49 = vmul.f32 %v12896_v11, %v636_v14 }
 0x1c4   : > { %4781 = vst.msk [vmem:[#allocation2 + $0xd8] sm:$0xff] %vm330_vm6, %v4703_v0  ;;  %4782 = vst.msk [vmem:[#allocation2 + $0xe0] sm:$0xff] %vm330_vm6, %v4704_v12  ;;  %v14814_v4 = vmul.f32 %v12912_v28, %v641_v6  ;;  %v1437_v35 = vmul.f32 %v12898_v17, %v636_v14  ;;  %v1921_v57 = vmul.f32 %v12904_v21, %v636_v14  ;;  %v1631_v16 = vrot.slane %v14791_v36, 2 }
 0x1c5   : > { %v2397_v37 = vmul.f32 %v12906_v22, %v636_v14  ;;  %v20009_v30 = vrot.slane %v14794_v50, 2  ;;  %v1157_v47 = vrot.slane %v965_v49, 1  ;;  %v3361_v23 = vmul.f32 %v12912_v28, %v636_v14 }
 0x1c6   : > { %v14823_v52 = vmul.f32 %v12914_v29, %v641_v6  ;;  %v14826_v40 = vmul.f32 %v14606_v53, %v641_v6  ;;  %v2109_v13 = vrot.slane %v1921_v57, 2  ;;  %v2873_v24 = vmul.f32 %v12910_v25, %v636_v14 }
 0x1c7   : > { %v20250_v1 = vrot.slane %v14651_v33, 1  ;;  %v1160_v48 = vsel %vm1085_vm0, %v1157_v47, %v20008_v34  ;;  %v1629_v38 = vrot.slane %v1437_v35, 2  ;;  %v3548_v56 = vrot.slane %v3361_v23, 4 }
 0x1c8   : > { %v883_v6 = vmul.f32 %v12900_v18, %v636_v14  ;;  %v2588_v49 = vrot.slane %v2397_v37, 3  ;;  %v20251_v27 = vrot.slane %v14659_v44, 2  ;;  %v3836_v35 = vmul.f32 %v12914_v29, %v636_v14 }
 0x1c9   : > { %v1158_v10 = vsel %vm1085_vm0, %v20250_v1, %v1157_v47  ;;  %v2112_v1 = vsel %vm1557_vm1, %v2109_v13, %v20009_v30  ;;  %v20010_v47 = vrot.slane %v14823_v52, 5  ;;  %v20252_v37 = vrot.slane %v14655_v59, 2 }
 0x1ca   : > { %v2110_v33 = vsel %vm1557_vm1, %v20251_v27, %v2109_v13  ;;  %v1354_v7 = vadd.f32 %v1158_v10, %v882_v8  ;;  %v1355_v34 = vadd.f32 %v1160_v48, %v883_v6  ;;  %v3064_v0 = vrot.slane %v2873_v24, 4 }
 0x1cb   : > { %v1630_v57 = vsel %vm1557_vm1, %v20252_v37, %v1629_v38  ;;  %v2309_v44 = vadd.f32 %v2110_v33, %v14667_v51  ;;  %v20253_v27 = vrot.slane %v14689_v39, 4  ;;  %v1632_v13 = vsel %vm1557_vm1, %v1629_v38, %v1631_v16 }
 0x1cc   : > { %v2310_v30 = vadd.f32 %v2112_v1, %v1824_v26  ;;  %v20254_v23 = vrot.slane %v14676_v15, 3  ;;  %v20255_v59 = vrot.slane %v14814_v4, 4  ;;  %v4024_v48 = vrot.slane %v3836_v35, 5 }
 0x1cd   : > { %v3549_v12 = vsel %vm2998_vm3, %v20253_v27, %v3548_v56  ;;  %v4312_v39 = vmul.f32 %v14606_v53, %v636_v14  ;;  %v14866_v6 = vadd.f32 %v1630_v57, %v1354_v7  ;;  %v14868_v33 = vadd.f32 %v1632_v13, %v1355_v34 }
 0x1ce   : > { %v2589_v8 = vsel %vm2522_vm2, %v20254_v23, %v2588_v49  ;;  %v3551_v10 = vsel %vm2998_vm3, %v3548_v56, %v20255_v59  ;;  %v3753_v51 = vadd.f32 %v3549_v12, %v14678_v42  ;;  %v20256_v26 = vrot.slane %v14807_v20, 3  ;;  %v651_v42 = vpop.permute.xlu1 %650  ;;  %v14881_v12 = vld [vmem:[#allocation2 + $0xe0] ss:$2 sm:$0xf] }
 0x1cf   : > { %v3754_v24 = vadd.f32 %v3551_v10, %v3264_v61  ;;  %v20257_v38 = vmax.f32 %v13829_v3, %v13831_v58  ;;  %v20258_v56 = vmax.f32 %v13606_v54, %v13608_v32  ;;  %v14879_v61 = vld [vmem:[#allocation2 + $0xd0] ss:$2 sm:$0xff]  ;;  %20259 = vst [vmem:[#allocation21_spill] sm:$0xff] %v14881_v12  ;;  %v2790_v7 = vadd.f32 %v2589_v8, %v2309_v44  ;;  %v14889_v3 = vld [vmem:[#allocation2 + $0xd1] ss:$2 sm:$0xff] }
 0x1d0   : > { %v2591_v15 = vsel %vm2522_vm2, %v2588_v49, %v20256_v26  ;;  %v20260_v14 = vrot.slane %v14695_v41, 5  ;;  %v4027_v49 = vsel %vm3964_vm4, %v4024_v48, %v20010_v47  ;;  %v4500_v57 = vrot.slane %v4312_v39, 6  ;;  %20261 = vst [vmem:[#allocation22_spill] sm:$0xff] %v14889_v3  ;;  %v14891_v58 = vld [vmem:[#allocation2 + $0xe1] ss:$2 sm:$0xf] }
 0x1d1   : > { %v4887_v1 = vmax.f32 %v20258_v56, %v20257_v38  ;;  %20262 = vst [vmem:[#allocation23_spill] sm:$0xff] %v14891_v58  ;;  %v2791_v54 = vadd.f32 %v2591_v15, %v2310_v30  ;;  %v4230_v35 = vadd.f32 %v4027_v49, %v3754_v24  ;;  %v20263_v37 = vrot.slane %v14683_v55, 4  ;;  %v646_v30 = vpop.permute.xlu0 %645 }
 0x1d2   : > { %v4025_v34 = vsel %vm3964_vm4, %v20260_v14, %v4024_v48  ;;  %v20264_v44 = vrot.slane %v14703_v2, 6  ;;  %v20265_v13 = vrot.slane %v14826_v40, 6  ;;  %v14904_v59 = vmul.f32 %v12896_v11, %v651_v42 }
 0x1d3   : > { %v4229_v32 = vadd.f32 %v4025_v34, %v3753_v51  ;;  %v4889_v23 = vadd.f32 %v14484_v62, %v4887_v1  ;;  %v3065_v41 = vsel %vm2998_vm3, %v20263_v37, %v3064_v0  ;;  %v14907_v48 = vmul.f32 %v12904_v21, %v651_v42 }
 0x1d4   : > { %v4501_v27 = vsel %vm4440_vm5, %v20264_v44, %v4500_v57  ;;  %v4503_v8 = vsel %vm4440_vm5, %v4500_v57, %v20265_v13  ;;  %v20266_v39 = vrot.slane %v14810_v31, 4  ;;  %v14917_v15 = vmul.f32 %v12898_v17, %v651_v42 }
 0x1d5   : > { %v4705_v10 = vadd.f32 %v4501_v27, %v4229_v32  ;;  %v4706_v51 = vadd.f32 %v4503_v8, %v4230_v35  ;;  %v4891_v24 = vmax.f32 %v4889_v23, 0.0  ;;  %v3266_v38 = vadd.f32 %v3065_v41, %v2790_v7 }
 0x1d6   : > { %v3067_v26 = vsel %vm2998_vm3, %v3064_v0, %v20266_v39  ;;  %v14925_v1 = vmul.f32 %v12906_v22, %v651_v42  ;;  %v967_v14 = vmul.f32 %v12896_v11, %v646_v30  ;;  %v14929_v34 = vmul.f32 %v12900_v18, %v651_v42 }
 0x1d7   : > { %v14919_v56 = vadd.f32 %v3067_v26, %v2791_v54  ;;  %4783 = vst.msk [vmem:[#allocation2 + $0xe8] sm:$0xff] %vm330_vm6, %v4705_v10  ;;  %4784 = vst.msk [vmem:[#allocation2 + $0xf0] sm:$0xff] %vm330_vm6, %v4706_v51  ;;  %v14932_v0 = vmul.f32 %v12910_v25, %v651_v42  ;;  %v14935_v7 = vmul.f32 %v12912_v28, %v651_v42  ;;  %v20011_v57 = vrot.slane %v14904_v59, 1 }
 0x1d8   : > { %4893 = vst.msk [vmem:[#allocation3 + $0x1d] sm:$0xff] %vm330_vm6, %v4891_v24  ;;  %v1439_v49 = vmul.f32 %v12898_v17, %v646_v30  ;;  %v20012_v54 = vrot.slane %v14907_v48, 2  ;;  %v1161_v32 = vrot.slane %v967_v14, 1  ;;  %v1923_v35 = vmul.f32 %v12904_v21, %v646_v30 }
 0x1d9   : > { %v1635_v23 = vrot.slane %v14917_v15, 2  ;;  %v14943_v37 = vmul.f32 %v12914_v29, %v651_v42  ;;  %v14946_v41 = vmul.f32 %v14606_v53, %v651_v42  ;;  %v2399_v44 = vmul.f32 %v12906_v22, %v646_v30 }
 0x1da   : > { %v2594_v27 = vrot.slane %v14925_v1, 3  ;;  %v885_v13 = vmul.f32 %v12900_v18, %v646_v30  ;;  %v20267_v8 = vrot.slane %v14772_v19, 1  ;;  %v2113_v51 = vrot.slane %v1923_v35, 2 }
 0x1db   : > { %v1633_v26 = vrot.slane %v1439_v49, 2  ;;  %v3363_v14 = vmul.f32 %v12912_v28, %v646_v30  ;;  %v1164_v42 = vsel %vm1085_vm0, %v1161_v32, %v20011_v57  ;;  %v20268_v2 = vrot.slane %v14794_v50, 2 }
 0x1dc   : > { %v1162_v10 = vsel %vm1085_vm0, %v20267_v8, %v1161_v32  ;;  %v2116_v19 = vsel %vm1557_vm1, %v2113_v51, %v20012_v54  ;;  %v3838_v35 = vmul.f32 %v12914_v29, %v646_v30  ;;  %v2592_v47 = vrot.slane %v2399_v44, 3 }
 0x1dd   : > { %v2114_v55 = vsel %vm1557_vm1, %v20268_v2, %v2113_v51  ;;  %v1356_v24 = vadd.f32 %v1162_v10, %v14801_v43  ;;  %v2875_v39 = vmul.f32 %v12910_v25, %v646_v30  ;;  %v20013_v2 = vrot.slane %v14946_v41, 6 }
 0x1de   : > { %v2311_v57 = vadd.f32 %v2114_v55, %v14796_v63  ;;  %v1357_v51 = vadd.f32 %v1164_v42, %v885_v13  ;;  %v1634_v54 = vsel %vm1557_vm1, %v1631_v16, %v1633_v26  ;;  %v1636_v43 = vsel %vm1557_vm1, %v1633_v26, %v1635_v23 }
 0x1df   : > { %v14967_v8 = vld [vmem:[#allocation3 + $0x18] sm:$0xff]  ;;  %v2312_v44 = vadd.f32 %v2116_v19, %v14866_v6  ;;  %v20269_v10 = vrot.slane %v14728_v5, 1  ;;  %v20270_v63 = vrot.slane %v14728_v5, 2  ;;  %v3552_v55 = vrot.slane %v3363_v14, 4 }
 0x1e0   : > { %v20015_v32 = vrot.slane %v14967_v8, 1  ;;  %v20014_v50 = vrot.slane %v14967_v8, 2  ;;  %v4028_v16 = vrot.slane %v3838_v35, 5  ;;  %v14995_v13 = vadd.f32 %v1634_v54, %v1356_v24 }
 0x1e1   : > { %v20271_v6 = vrot.slane %v14807_v20, 3  ;;  %v3068_v42 = vrot.slane %v2875_v39, 4  ;;  %v4314_v19 = vmul.f32 %v14606_v53, %v646_v30  ;;  %v2595_v5 = vsel %vm2522_vm2, %v2592_v47, %v2594_v27  ;;  %v661_v20 = vpop.permute.xlu1 %660 }
 0x1e2   : > { %v5236_v49 = vsel %vm1085_vm0, %v20269_v10, %v20015_v32  ;;  %v5706_v36 = vsel %vm1557_vm1, %v20270_v63, %v20014_v50  ;;  %v20272_v14 = vrot.slane %v14814_v4, 4  ;;  %v20277_v63 = vld [vmem:[#allocation12_spill] sm:$0xff] }
 0x1e3   : > { %10620 = vmatmul.mubr.msk.f32.gmra.mrb[4].mxu1 %vm330_vm6, %v5236_v49  ;;  %10762 = vmatmul.mubr.msk.f32.gmra.mrb[4].mxu0 %vm330_vm6, %v5706_v36  ;;  %v2593_v26 = vsel %vm2522_vm2, %v20271_v6, %v2592_v47  ;;  %v20273_v49 = vrot.slane %v14935_v7, 4  ;;  %v4504_v39 = vrot.slane %v4314_v19, 6  ;;  %v20274_v47 = vld [vmem:[#allocation13_spill] sm:$0xff] }
 0x1e4   : > { %v2792_v10 = vadd.f32 %v2593_v26, %v2311_v57  ;;  %v3553_v35 = vsel %vm2998_vm3, %v20272_v14, %v3552_v55  ;;  %10622 = vmatprep.mubr.msk.f32.mxu1 %vm12720_vm7, %v20213_v9  ;;  %10764 = vmatprep.mubr.msk.f32.mxu0 %vm12720_vm7, %v20213_v9  ;;  %v20275_v4 = vmax.f32 %v13843_v46, %v20274_v47  ;;  %v20276_v57 = vld [vmem:[#allocation11_spill] sm:$0xff]  ;;  %v20279_v14 = vrot.slane %v14823_v52, 5 }
 0x1e5   : > { %v3555_v54 = vsel %vm2998_vm3, %v3552_v55, %v20273_v49  ;;  %v3755_v24 = vadd.f32 %v3553_v35, %v14798_v45  ;;  %v20278_v36 = vmax.f32 %v20276_v57, %v20277_v63  ;;  %v15021_v26 = vadd.f32 %v1636_v43, %v1357_v51 }
 0x1e6   : > { %v3756_v30 = vadd.f32 %v3555_v54, %v3266_v38  ;;  %v2793_v55 = vadd.f32 %v2595_v5, %v2312_v44  ;;  %v4029_v49 = vsel %vm3964_vm4, %v20279_v14, %v4028_v16  ;;  %v20280_v45 = vrot.slane %v14943_v37, 5 }
 0x1e7   : > { %v4888_v6 = vmax.f32 %v20278_v36, %v20275_v4  ;;  %v4231_v19 = vadd.f32 %v4029_v49, %v3755_v24  ;;  %v15030_v54 = vmul.f32 %v12896_v11, %v661_v20  ;;  %v15033_v46 = vmul.f32 %v12898_v17, %v661_v20  ;;  %v656_v24 = vpop.permute.xlu0 %655 }
 0x1e8   : > { %v4031_v38 = vsel %vm3964_vm4, %v4028_v16, %v20280_v45  ;;  %v20281_v51 = vrot.slane %v14810_v31, 4  ;;  %v20282_v52 = vrot.slane %v14826_v40, 6  ;;  %v4507_v16 = vsel %vm4440_vm5, %v4504_v39, %v20013_v2 }
 0x1e9   : > { %v4232_v35 = vadd.f32 %v4031_v38, %v3756_v30  ;;  %v4890_v5 = vadd.f32 %v14484_v62, %v4888_v6  ;;  %v20283_v30 = vrot.slane %v14932_v0, 4  ;;  %v15053_v36 = vmul.f32 %v12904_v21, %v661_v20 }
 0x1ea   : > { %v3069_v43 = vsel %vm2998_vm3, %v20281_v51, %v3068_v42  ;;  %v4505_v44 = vsel %vm4440_vm5, %v20282_v52, %v4504_v39  ;;  %v15056_v14 = vmul.f32 %v12906_v22, %v661_v20  ;;  %v15061_v62 = vmul.f32 %v12900_v18, %v661_v20 }
 0x1eb   : > { %v3071_v47 = vsel %vm2998_vm3, %v3068_v42, %v20283_v30  ;;  %v15048_v4 = vadd.f32 %v3069_v43, %v2792_v10  ;;  %v4707_v31 = vadd.f32 %v4505_v44, %v4231_v19  ;;  %v4708_v57 = vadd.f32 %v4507_v16, %v4232_v35 }
 0x1ec   : > { %v15050_v63 = vadd.f32 %v3071_v47, %v2793_v55  ;;  %v4892_v40 = vmax.f32 %v4890_v5, 0.0  ;;  %v20016_v42 = vrot.slane %v15030_v54, 1  ;;  %v20019_v10 = vrot.slane %v15033_v46, 2 }
 0x1ed   : > { %4785 = vst.msk [vmem:[#allocation2 + $0xf8] sm:$0xff] %vm330_vm6, %v4707_v31  ;;  %4786 = vst.msk [vmem:[#allocation2 + $0x100] sm:$0xff] %vm330_vm6, %v4708_v57  ;;  %v969_v39 = vmul.f32 %v12896_v11, %v656_v24  ;;  %v15068_v6 = vmul.f32 %v12910_v25, %v661_v20  ;;  %v15071_v55 = vmul.f32 %v12912_v28, %v661_v20  ;;  %v20017_v43 = vrot.slane %v15053_v36, 2 }
 0x1ee   : > { %4894 = vst.msk [vmem:[#allocation3 + $0x25] sm:$0xf] %vm355_vm8, %v4892_v40  ;;  %v15074_v49 = vmul.f32 %v12914_v29, %v661_v20  ;;  %v1441_v45 = vmul.f32 %v12898_v17, %v656_v24  ;;  %v15078_v38 = vmul.f32 %v14606_v53, %v661_v20  ;;  %v1925_v35 = vmul.f32 %v12904_v21, %v656_v24 }
 0x1ef   : > { %v1165_v19 = vrot.slane %v969_v39, 1  ;;  %v2401_v51 = vmul.f32 %v12906_v22, %v656_v24  ;;  %v20018_v52 = vrot.slane %v15056_v14, 3  ;;  %v887_v44 = vmul.f32 %v12900_v18, %v656_v24 }
 0x1f0   : > { %v1637_v16 = vrot.slane %v1441_v45, 2  ;;  %v20284_v5 = vrot.slane %v14904_v59, 1  ;;  %v2117_v47 = vrot.slane %v1925_v35, 2  ;;  %v20022_v57 = vrot.slane %v15068_v6, 4 }
 0x1f1   : > { %v1168_v20 = vsel %vm1085_vm0, %v1165_v19, %v20016_v42  ;;  %v2596_v31 = vrot.slane %v2401_v51, 3  ;;  %v20024_v40 = vrot.slane %v15071_v55, 4  ;;  %v20023_v39 = vrot.slane %v15074_v49, 5 }
 0x1f2   : > { %v1166_v30 = vsel %vm1085_vm0, %v20284_v5, %v1165_v19  ;;  %v1359_v50 = vadd.f32 %v1168_v20, %v887_v44  ;;  %v20285_v59 = vrot.slane %v14907_v48, 2  ;;  %v3365_v32 = vmul.f32 %v12912_v28, %v656_v24 }
 0x1f3   : > { %v1358_v2 = vadd.f32 %v1166_v30, %v14929_v34  ;;  %v2120_v19 = vsel %vm1557_vm1, %v2117_v47, %v20017_v43  ;;  %v2877_v35 = vmul.f32 %v12910_v25, %v656_v24  ;;  %v3840_v51 = vmul.f32 %v12914_v29, %v656_v24  ;;  %v15106_v34 = vpop.permute.xlu1 %670 }
 0x1f4   : > { %v2118_v5 = vsel %vm1557_vm1, %v20285_v59, %v2117_v47  ;;  %v4316_v42 = vmul.f32 %v14606_v53, %v656_v24  ;;  %v1638_v48 = vsel %vm1557_vm1, %v1635_v23, %v1637_v16  ;;  %v1640_v44 = vsel %vm1557_vm1, %v1637_v16, %v20019_v10  ;;  %v15127_v23 = vld [vmem:[#allocation2 + $0xfa] ss:$2 sm:$0xf] }
 0x1f5   : > { %v15108_v30 = vld [vmem:[#allocation3 + $0x20] sm:$0xff]  ;;  %v2597_v20 = vsel %vm2522_vm2, %v2594_v27, %v2596_v31  ;;  %v2599_v24 = vsel %vm2522_vm2, %v2596_v31, %v20018_v52  ;;  %v15124_v43 = vadd.f32 %v1638_v48, %v1358_v2  ;;  %v2313_v15 = vadd.f32 %v2118_v5, %v14868_v33  ;;  %20286 = vst [vmem:[#allocation13_spill] sm:$0xff] %v15127_v23 }
 0x1f6   : > { %v20021_v47 = vrot.slane %v15108_v30, 1  ;;  %v20020_v59 = vrot.slane %v15108_v30, 2  ;;  %v15129_v45 = vadd.f32 %v1640_v44, %v1359_v50  ;;  %v2314_v1 = vadd.f32 %v2120_v19, %v14995_v13  ;;  %v15136_v31 = vld [vmem:[#allocation2 + $0xea] ss:$2 sm:$0xff]  ;;  %v15138_v52 = vld [vmem:[#allocation2 + $0xeb] ss:$2 sm:$0xff] }
 0x1f7   : > { %v3556_v16 = vrot.slane %v3365_v32, 4  ;;  %v15134_v27 = vmul.f32 %v12900_v18, %v15106_v34  ;;  %v20287_v2 = vrot.slane %v14967_v8, 1  ;;  %v20288_v50 = vrot.slane %v14967_v8, 2  ;;  %v15150_v19 = vld [vmem:[#allocation2 + $0xfb] ss:$2 sm:$0xf] }
 0x1f8   : > { %v3072_v13 = vrot.slane %v2877_v35, 4  ;;  %v4032_v5 = vrot.slane %v3840_v51, 5  ;;  %20289 = vst [vmem:[#allocation11_spill] sm:$0xff] %v15150_v19  ;;  %v20290_v48 = vrot.slane %v14935_v7, 4  ;;  %v4508_v10 = vrot.slane %v4316_v42, 6 }
 0x1f9   : > { %v5238_v33 = vsel %vm1085_vm0, %v20287_v2, %v20021_v47  ;;  %v5708_v32 = vsel %vm1557_vm1, %v20288_v50, %v20020_v59  ;;  %v15159_v2 = vmul.f32 %v12896_v11, %v15106_v34  ;;  %v15163_v8 = vmul.f32 %v12898_v17, %v15106_v34 }
 0x1fa   : > { %10623 = vmatmul.mubr.msk.f32.gmra.mrb[6].mxu1 %vm330_vm6, %v5238_v33  ;;  %10765 = vmatmul.mubr.msk.f32.gmra.mrb[6].mxu0 %vm330_vm6, %v5708_v32  ;;  %v3557_v44 = vsel %vm2998_vm3, %v20290_v48, %v3556_v16  ;;  %v2794_v35 = vadd.f32 %v2597_v20, %v2313_v15  ;;  %v3559_v51 = vsel %vm2998_vm3, %v3556_v16, %v20024_v40  ;;  %v20291_v20 = vrot.slane %v14943_v37, 5 }
 0x1fb   : > { %v3757_v33 = vadd.f32 %v3557_v44, %v14919_v56  ;;  %v15171_v7 = vmul.f32 %v12904_v21, %v15106_v34  ;;  %10625 = vmatprep.mubr.msk.f32.mxu1 %vm12720_vm7, %v20213_v9  ;;  %v2795_v50 = vadd.f32 %v2599_v24, %v2314_v1  ;;  %v3758_v32 = vadd.f32 %v3559_v51, %v15048_v4  ;;  %v666_v56 = vpop.permute.xlu0 %665 }
 0x1fc   : > { %v4033_v15 = vsel %vm3964_vm4, %v20291_v20, %v4032_v5  ;;  %10767 = vmatprep.mubr.msk.f32.mxu0 %vm12720_vm7, %v20213_v9  ;;  %v20292_v16 = vrot.slane %v14932_v0, 4  ;;  %v4035_v24 = vsel %vm3964_vm4, %v4032_v5, %v20023_v39  ;;  %v3075_v37 = vsel %vm2998_vm3, %v3072_v13, %v20022_v57 }
 0x1fd   : > { %v4233_v1 = vadd.f32 %v4033_v15, %v3757_v33  ;;  %v4234_v4 = vadd.f32 %v4035_v24, %v3758_v32  ;;  %v20293_v44 = vrot.slane %v14946_v41, 6  ;;  %v20026_v20 = vrot.slane %v15159_v2, 1 }
 0x1fe   : > { %v3073_v48 = vsel %vm2998_vm3, %v20292_v16, %v3072_v13  ;;  %v20294_v16 = vrot.slane %v15078_v38, 6  ;;  %v15203_v5 = vmul.f32 %v12906_v22, %v15106_v34  ;;  %v15205_v33 = vadd.f32 %v3075_v37, %v2795_v50 }
 0x1ff   : > { %v4509_v51 = vsel %vm4440_vm5, %v20293_v44, %v4508_v10  ;;  %v3270_v0 = vadd.f32 %v3073_v48, %v2794_v35  ;;  %v15209_v41 = vmul.f32 %v12910_v25, %v15106_v34  ;;  %v15213_v32 = vmul.f32 %v12912_v28, %v15106_v34 }
 0x200   : > { %v4511_v42 = vsel %vm4440_vm5, %v4508_v10, %v20294_v16  ;;  %v4709_v59 = vadd.f32 %v4509_v51, %v4233_v1  ;;  %v20027_v35 = vrot.slane %v15171_v7, 2  ;;  %v971_v15 = vmul.f32 %v12896_v11, %v666_v56 }
 0x201   : > { %v4710_v13 = vadd.f32 %v4511_v42, %v4234_v4  ;;  %v1443_v50 = vmul.f32 %v12898_v17, %v666_v56  ;;  %v15223_v42 = vmul.f32 %v12914_v29, %v15106_v34  ;;  %v1927_v48 = vmul.f32 %v12904_v21, %v666_v56 }
 0x202   : > { %4787 = vst.msk [vmem:[#allocation2 + $0x108] sm:$0xff] %vm330_vm6, %v4709_v59  ;;  %v2403_v24 = vmul.f32 %v12906_v22, %v666_v56  ;;  %v3367_v59 = vmul.f32 %v12912_v28, %v666_v56  ;;  %v15231_v37 = vmul.f32 %v14606_v53, %v15106_v34  ;;  %v889_v4 = vmul.f32 %v12900_v18, %v666_v56 }
 0x203   : > { %4788 = vst.msk [vmem:[#allocation2 + $0x110] sm:$0xff] %vm330_vm6, %v4710_v13  ;;  %v1169_v44 = vrot.slane %v971_v15, 1  ;;  %v2121_v13 = vrot.slane %v1927_v48, 2  ;;  %v2879_v47 = vmul.f32 %v12910_v25, %v666_v56  ;;  %v20295_v57 = vrot.slane %v15030_v54, 1 }
 0x204   : > { %v1641_v34 = vrot.slane %v1443_v50, 2  ;;  %v3560_v40 = vrot.slane %v3367_v59, 4  ;;  %v20296_v10 = vrot.slane %v15053_v36, 2  ;;  %v2600_v51 = vrot.slane %v2403_v24, 3 }
 0x205   : > { %v1170_v39 = vsel %vm1085_vm0, %v20295_v57, %v1169_v44  ;;  %v1172_v1 = vsel %vm1085_vm0, %v1169_v44, %v20026_v20  ;;  %v2124_v48 = vsel %vm1557_vm1, %v2121_v13, %v20027_v35  ;;  %v3842_v16 = vmul.f32 %v12914_v29, %v666_v56 }
 0x206   : > { %v2122_v15 = vsel %vm1557_vm1, %v20296_v10, %v2121_v13  ;;  %v20029_v54 = vrot.slane %v15223_v42, 5  ;;  %v1360_v57 = vadd.f32 %v1170_v39, %v15061_v62  ;;  %v1361_v58 = vadd.f32 %v1172_v1, %v889_v4  ;;  %v681_v4 = vpop.permute.xlu1 %680 }
 0x207   : > { %v4318_v44 = vmul.f32 %v14606_v53, %v666_v56  ;;  %v20028_v50 = vrot.slane %v15231_v37, 6  ;;  %v2315_v36 = vadd.f32 %v2122_v15, %v15021_v26  ;;  %v2316_v10 = vadd.f32 %v2124_v48, %v15124_v43 }
 0x208   : > { %v3076_v59 = vrot.slane %v2879_v47, 4  ;;  %v20297_v20 = vrot.slane %v15033_v46, 2  ;;  %v20298_v13 = vrot.slane %v15163_v8, 2  ;;  %v20299_v62 = vrot.slane %v15071_v55, 4 }
 0x209   : > { %v20300_v56 = vrot.slane %v15213_v32, 4  ;;  %v20301_v26 = vrot.slane %v15056_v14, 3  ;;  %v20302_v55 = vrot.slane %v15203_v5, 3  ;;  %v20303_v14 = vrot.slane %v15074_v49, 5 }
 0x20a   : > { %v1642_v24 = vsel %vm1557_vm1, %v20297_v20, %v1641_v34  ;;  %v1644_v35 = vsel %vm1557_vm1, %v1641_v34, %v20298_v13  ;;  %v3561_v39 = vsel %vm2998_vm3, %v20299_v62, %v3560_v40  ;;  %v4036_v20 = vrot.slane %v3842_v16, 5  ;;  %v15287_v16 = vld [vmem:[#allocation2 + $0x105] ss:$2 sm:$0xff]  ;;  %v691_v12 = vpop.permute.xlu1 %690 }
 0x20b   : > { %v3563_v1 = vsel %vm2998_vm3, %v3560_v40, %v20300_v56  ;;  %v2601_v43 = vsel %vm2522_vm2, %v20301_v26, %v2600_v51  ;;  %v3759_v46 = vadd.f32 %v3561_v39, %v15050_v63  ;;  %v15272_v15 = vadd.f32 %v1642_v24, %v1360_v57  ;;  %20305 = vst [vmem:[#allocation24_spill] sm:$0xff] %v15287_v16 }
 0x20c   : > { %v3760_v47 = vadd.f32 %v3563_v1, %v3270_v0  ;;  %v15274_v34 = vadd.f32 %v1644_v35, %v1361_v58  ;;  %v2603_v48 = vsel %vm2522_vm2, %v2600_v51, %v20302_v55  ;;  %v4512_v13 = vrot.slane %v4318_v44, 6  ;;  %v15285_v0 = vld [vmem:[#allocation2 + $0x104] ss:$2 sm:$0xff]  ;;  %v676_v1 = vpop.permute.xlu0 %675 }
 0x20d   : > { %v2796_v62 = vadd.f32 %v2601_v43, %v2315_v36  ;;  %v2797_v40 = vadd.f32 %v2603_v48, %v2316_v10  ;;  %v4037_v56 = vsel %vm3964_vm4, %v20303_v14, %v4036_v20  ;;  %v4039_v63 = vsel %vm3964_vm4, %v4036_v20, %v20029_v54  ;;  %20304 = vst [vmem:[#allocation12_spill] sm:$0xff] %v15285_v0 }
 0x20e   : > { %v4235_v58 = vadd.f32 %v4037_v56, %v3759_v46  ;;  %v4236_v35 = vadd.f32 %v4039_v63, %v3760_v47  ;;  %v15290_v57 = vmul.f32 %v12896_v11, %v681_v4  ;;  %v15293_v51 = vmul.f32 %v12898_v17, %v681_v4 }
 0x20f   : > { %v20306_v49 = vrot.slane %v15068_v6, 4  ;;  %v20307_v36 = vrot.slane %v15078_v38, 6  ;;  %v4515_v24 = vsel %vm4440_vm5, %v4512_v13, %v20028_v50  ;;  %v15305_v39 = vmul.f32 %v12904_v21, %v681_v4 }
 0x210   : > { %v20308_v26 = vrot.slane %v15209_v41, 4  ;;  %v4712_v6 = vadd.f32 %v4515_v24, %v4236_v35  ;;  %v15311_v47 = vmul.f32 %v12906_v22, %v681_v4  ;;  %v15318_v48 = vmul.f32 %v12910_v25, %v681_v4 }
 0x211   : > { %v3077_v44 = vsel %vm2998_vm3, %v20306_v49, %v3076_v59  ;;  %v4513_v10 = vsel %vm4440_vm5, %v20307_v36, %v4512_v13  ;;  %v20030_v13 = vrot.slane %v15290_v57, 1  ;;  %v973_v56 = vmul.f32 %v12896_v11, %v676_v1 }
 0x212   : > { %v3079_v43 = vsel %vm2998_vm3, %v3076_v59, %v20308_v26  ;;  %v4711_v46 = vadd.f32 %v4513_v10, %v4235_v58  ;;  %v3272_v20 = vadd.f32 %v3077_v44, %v2796_v62  ;;  %4790 = vst.msk [vmem:[#allocation2 + $0x120] sm:$0xff] %vm330_vm6, %v4712_v6  ;;  %v15323_v59 = vmul.f32 %v12900_v18, %v681_v4 }
 0x213   : > { %v15315_v55 = vadd.f32 %v3079_v43, %v2797_v40  ;;  %v20033_v62 = vrot.slane %v15305_v39, 2  ;;  %v15330_v40 = vmul.f32 %v12912_v28, %v681_v4  ;;  %v1445_v63 = vmul.f32 %v12898_v17, %v676_v1 }
 0x214   : > { %4789 = vst.msk [vmem:[#allocation2 + $0x118] sm:$0xff] %vm330_vm6, %v4711_v46  ;;  %v1929_v58 = vmul.f32 %v12904_v21, %v676_v1  ;;  %v15336_v49 = vmul.f32 %v12914_v29, %v681_v4  ;;  %v1173_v44 = vrot.slane %v973_v56, 1  ;;  %v2405_v36 = vmul.f32 %v12906_v22, %v676_v1 }
 0x215   : > { %v15341_v24 = vmul.f32 %v14606_v53, %v681_v4  ;;  %v2881_v43 = vmul.f32 %v12910_v25, %v676_v1  ;;  %v20309_v46 = vrot.slane %v15159_v2, 1  ;;  %v1645_v50 = vrot.slane %v1445_v63, 2 }
 0x216   : > { %v2125_v26 = vrot.slane %v1929_v58, 2  ;;  %v1176_v38 = vsel %vm1085_vm0, %v1173_v44, %v20030_v13  ;;  %v3369_v56 = vmul.f32 %v12912_v28, %v676_v1  ;;  %v891_v10 = vmul.f32 %v12900_v18, %v676_v1 }
 0x217   : > { %v1174_v6 = vsel %vm1085_vm0, %v20309_v46, %v1173_v44  ;;  %v2604_v4 = vrot.slane %v2405_v36, 3  ;;  %v3844_v58 = vmul.f32 %v12914_v29, %v676_v1  ;;  %v20310_v2 = vrot.slane %v15171_v7, 2 }
 0x218   : > { %v2128_v44 = vsel %vm1557_vm1, %v2125_v26, %v20033_v62  ;;  %v4320_v63 = vmul.f32 %v14606_v53, %v676_v1  ;;  %v1362_v54 = vadd.f32 %v1174_v6, %v15134_v27  ;;  %v1363_v14 = vadd.f32 %v1176_v38, %v891_v10 }
 0x219   : > { %v2126_v46 = vsel %vm1557_vm1, %v20310_v2, %v2125_v26  ;;  %v3080_v36 = vrot.slane %v2881_v43, 4  ;;  %v20312_v35 = vrot.slane %v15163_v8, 2  ;;  %v20313_v2 = vrot.slane %v15293_v51, 2 }
 0x21a   : > { %v2317_v26 = vadd.f32 %v2126_v46, %v15129_v45  ;;  %v3564_v62 = vrot.slane %v3369_v56, 4  ;;  %v2318_v1 = vadd.f32 %v2128_v44, %v15272_v15  ;;  %v20315_v27 = vrot.slane %v15203_v5, 3  ;;  %v20319_v46 = vld [vmem:[#allocation16_spill] sm:$0xff]  ;;  %v20320_v15 = vld [vmem:[#allocation17_spill] sm:$0xff]  ;;  %v20322_v5 = vld [vmem:[#allocation14_spill] sm:$0xff] }
 0x21b   : > { %v15364_v16 = vld [vmem:[#allocation2 + $0x114] ss:$2 sm:$0xf]  ;;  %v1646_v7 = vsel %vm1557_vm1, %v20312_v35, %v1645_v50  ;;  %v1648_v0 = vsel %vm1557_vm1, %v1645_v50, %v20313_v2  ;;  %v15373_v53 = vld [vmem:[#allocation2 + $0x115] ss:$2 sm:$0xf]  ;;  %v20321_v44 = vmax.f32 %v20319_v46, %v20320_v15 }
 0x21c   : > { %20311 = vst [vmem:[#allocation25_spill] sm:$0xff] %v15364_v16  ;;  %20314 = vst [vmem:[#allocation26_spill] sm:$0xff] %v15373_v53  ;;  %v2605_v38 = vsel %vm2522_vm2, %v20315_v27, %v2604_v4  ;;  %v20316_v10 = vrot.slane %v15311_v47, 3  ;;  %v4040_v35 = vrot.slane %v3844_v58, 5  ;;  %v20317_v43 = vrot.slane %v15213_v32, 4  ;;  %v20323_v2 = vld [vmem:[#allocation15_spill] sm:$0xff] }
 0x21d   : > { %v20318_v45 = vrot.slane %v15330_v40, 4  ;;  %v4516_v56 = vrot.slane %v4320_v63, 6  ;;  %v20324_v27 = vmax.f32 %v20322_v5, %v20323_v2  ;;  %v15394_v19 = vadd.f32 %v1646_v7, %v1362_v54  ;;  %v686_v5 = vpop.permute.xlu0 %685  ;;  %v4906_v53 = vld [vmem:[#allocation2 + $0x92] ss:$2 sm:$0xf] }
 0x21e   : > { %v2607_v8 = vsel %vm2522_vm2, %v2604_v4, %v20316_v10  ;;  %v3565_v50 = vsel %vm2998_vm3, %v20317_v43, %v3564_v62  ;;  %v15396_v4 = vadd.f32 %v1648_v0, %v1363_v14  ;;  %v20325_v63 = vrot.slane %v15223_v42, 5  ;;  %v15410_v0 = vld [vmem:[%s19950_s2] ss:$0 sm:$0xff] }
 0x21f   : > { %v3567_v6 = vsel %vm2998_vm3, %v3564_v62, %v20318_v45  ;;  %v4915_v13 = vmax.f32 %v20324_v27, %v20321_v44  ;;  %v3761_v32 = vadd.f32 %v3565_v50, %v15205_v33  ;;  %v2798_v62 = vadd.f32 %v2605_v38, %v2317_v26 }
 0x220   : > { %v3762_v58 = vadd.f32 %v3567_v6, %v3272_v20  ;;  %v4041_v43 = vsel %vm3964_vm4, %v20325_v63, %v4040_v35  ;;  %v20326_v45 = vrot.slane %v15336_v49, 5  ;;  %v15414_v20 = vmul.f32 %v12896_v11, %v691_v12 }
 0x221   : > { %v4237_v15 = vadd.f32 %v4041_v43, %v3761_v32  ;;  %v4917_v33 = vadd.f32 %v15410_v0, %v4915_v13  ;;  %v2799_v14 = vadd.f32 %v2607_v8, %v2318_v1  ;;  %v20327_v42 = vrot.slane %v15231_v37, 6 }
 0x222   : > { %v4043_v46 = vsel %vm3964_vm4, %v4040_v35, %v20326_v45  ;;  %v20328_v26 = vrot.slane %v15341_v24, 6  ;;  %v15423_v35 = vmul.f32 %v12898_v17, %v691_v12  ;;  %v15426_v13 = vmul.f32 %v12904_v21, %v691_v12 }
 0x223   : > { %v4238_v54 = vadd.f32 %v4043_v46, %v3762_v58  ;;  %v4517_v7 = vsel %vm4440_vm5, %v20327_v42, %v4516_v56  ;;  %v4919_v44 = vmax.f32 %v4917_v33, 0.0  ;;  %v20329_v1 = vrot.slane %v15209_v41, 4 }
 0x224   : > { %v4519_v38 = vsel %vm4440_vm5, %v4516_v56, %v20328_v26  ;;  %v4713_v50 = vadd.f32 %v4517_v7, %v4237_v15  ;;  %v20330_v8 = vrot.slane %v15318_v48, 4  ;;  %v15435_v56 = vmul.f32 %v12900_v18, %v691_v12  ;;  %v15467_v7 = vld [vmem:[%s19949_s1 + $0x8] ss:$0 sm:$0xff]  ;;  %v4902_v15 = vld [vmem:[#allocation2 + $0x79] ss:$2 sm:$0xf] }
 0x225   : > { %v4714_v6 = vadd.f32 %v4519_v38, %v4238_v54  ;;  %v3081_v37 = vsel %vm2998_vm3, %v20329_v1, %v3080_v36  ;;  %v15438_v27 = vmul.f32 %v12906_v22, %v691_v12  ;;  %4921 = vst.msk [vmem:[#allocation3 + $0x2b] sm:$0xff] %vm330_vm6, %v4919_v44  ;;  %v20036_v41 = vrot.slane %v15414_v20, 1 }
 0x226   : > { %v3083_v2 = vsel %vm2998_vm3, %v3080_v36, %v20330_v8  ;;  %v15440_v32 = vadd.f32 %v3081_v37, %v2798_v62  ;;  %4791 = vst.msk [vmem:[#allocation2 + $0x128] sm:$0xff] %vm330_vm6, %v4713_v50  ;;  %v15447_v58 = vmul.f32 %v12910_v25, %v691_v12  ;;  %v15450_v36 = vmul.f32 %v12912_v28, %v691_v12 }
 0x227   : > { %4792 = vst.msk [vmem:[#allocation2 + $0x130] sm:$0xff] %vm330_vm6, %v4714_v6  ;;  %v15453_v63 = vmul.f32 %v12914_v29, %v691_v12  ;;  %v975_v62 = vmul.f32 %v12896_v11, %v686_v5  ;;  %v1447_v43 = vmul.f32 %v12898_v17, %v686_v5  ;;  %v1931_v45 = vmul.f32 %v12904_v21, %v686_v5 }
 0x228   : > { %v15458_v46 = vadd.f32 %v3083_v2, %v2799_v14  ;;  %v20037_v54 = vrot.slane %v15426_v13, 2  ;;  %v2407_v33 = vmul.f32 %v12906_v22, %v686_v5  ;;  %v15470_v26 = vmul.f32 %v15467_v7, %v691_v12 }
 0x229   : > { %v1177_v38 = vrot.slane %v975_v62, 1  ;;  %v2129_v50 = vrot.slane %v1931_v45, 2  ;;  %v893_v6 = vmul.f32 %v12900_v18, %v686_v5  ;;  %v1649_v44 = vrot.slane %v1447_v43, 2 }
 0x22a   : > { %v15475_v1 = vmul.f32 %v12910_v25, %v686_v5  ;;  %v20331_v2 = vrot.slane %v15290_v57, 1  ;;  %v20332_v62 = vrot.slane %v15305_v39, 2  ;;  %v2608_v14 = vrot.slane %v2407_v33, 3 }
 0x22b   : > { %v1180_v12 = vsel %vm1085_vm0, %v1177_v38, %v20036_v41  ;;  %v2132_v43 = vsel %vm1557_vm1, %v2129_v50, %v20037_v54  ;;  %v3371_v37 = vmul.f32 %v12912_v28, %v686_v5  ;;  %v4322_v33 = vmul.f32 %v15467_v7, %v686_v5  ;;  %v4898_v54 = vld [vmem:[#allocation2 + $0x78] ss:$2 sm:$0xf] }
 0x22c   : > { %v1178_v10 = vsel %vm1085_vm0, %v20331_v2, %v1177_v38  ;;  %v2130_v45 = vsel %vm1557_vm1, %v20332_v62, %v2129_v50  ;;  %v15492_v8 = vld [vmem:[#allocation3 + $0x28] sm:$0xff]  ;;  %v1365_v42 = vadd.f32 %v1180_v12, %v893_v6  ;;  %v3846_v38 = vmul.f32 %v12914_v29, %v686_v5 }
 0x22d   : > { %v1364_v2 = vadd.f32 %v1178_v10, %v15323_v59  ;;  %v20042_v39 = vrot.slane %v15492_v8, 1  ;;  %v20333_v62 = vrot.slane %v15293_v51, 2  ;;  %v3084_v50 = vrot.slane %v15475_v1, 4  ;;  %v15509_v51 = vld [vmem:[#allocation2 + $0x11e] ss:$2 sm:$0xff] }
 0x22e   : > { %v20334_v59 = vrot.slane %v15423_v35, 2  ;;  %v2319_v6 = vadd.f32 %v2130_v45, %v15274_v34  ;;  %v2320_v12 = vadd.f32 %v2132_v43, %v15394_v19  ;;  %v20336_v5 = vrot.slane %v15108_v30, 1  ;;  %v4910_v19 = vld [vmem:[#allocation2 + $0x93] ss:$2 sm:$0xf] }
 0x22f   : > { %v1650_v41 = vsel %vm1557_vm1, %v20333_v62, %v1649_v44  ;;  %v15511_v62 = vld [vmem:[#allocation2 + $0x11f] ss:$2 sm:$0xff]  ;;  %v20337_v57 = vrot.slane %v15311_v47, 3  ;;  %v3568_v45 = vrot.slane %v3371_v37, 4  ;;  %v20339_v43 = vrot.slane %v15492_v8, 2 }
 0x230   : > { %v1652_v10 = vsel %vm1557_vm1, %v1649_v44, %v20334_v59  ;;  %20335 = vst [vmem:[#allocation16_spill] sm:$0xff] %v15511_v62  ;;  %v5240_v1 = vsel %vm1085_vm0, %v20336_v5, %v20042_v39  ;;  %v20338_v44 = vrot.slane %v15438_v27, 3  ;;  %v20340_v59 = vrot.slane %v15108_v30, 2 }
 0x231   : > { %v2609_v16 = vsel %vm2522_vm2, %v20337_v57, %v2608_v14  ;;  %10626 = vmatmul.mubr.msk.f32.gmra.mrb[8].mxu1 %vm330_vm6, %v5240_v1  ;;  %v15530_v3 = vadd.f32 %v1650_v41, %v1364_v2  ;;  %v15532_v5 = vadd.f32 %v1652_v10, %v1365_v42  ;;  %v4044_v47 = vrot.slane %v3846_v38, 5  ;;  %v701_v2 = vpop.permute.xlu1 %700 }
 0x232   : > { %v2611_v34 = vsel %vm2522_vm2, %v2608_v14, %v20338_v44  ;;  %v5710_v23 = vsel %vm1557_vm1, %v20340_v59, %v20339_v43  ;;  %10628 = vmatprep.mubr.msk.f32.mxu1 %vm12720_vm7, %v20213_v9  ;;  %v20341_v14 = vrot.slane %v15318_v48, 4  ;;  %v20342_v57 = vrot.slane %v15330_v40, 4 }
 0x233   : > { %10768 = vmatmul.mubr.msk.f32.gmra.mrb[8].mxu0 %vm330_vm6, %v5710_v23  ;;  %v20343_v1 = vrot.slane %v15450_v36, 4  ;;  %v4520_v42 = vrot.slane %v4322_v33, 6  ;;  %v2800_v38 = vadd.f32 %v2609_v16, %v2319_v6  ;;  %v20344_v40 = vrot.slane %v15336_v49, 5 }
 0x234   : > { %v3085_v37 = vsel %vm2998_vm3, %v20341_v14, %v3084_v50  ;;  %v3569_v30 = vsel %vm2998_vm3, %v20342_v57, %v3568_v45  ;;  %10770 = vmatprep.mubr.msk.f32.mxu0 %vm12720_vm7, %v20213_v9  ;;  %v20345_v43 = vrot.slane %v15453_v63, 5  ;;  %v4914_v59 = vmax.f32 %v4906_v53, %v4910_v19  ;;  %v15558_v14 = vld [vmem:[#allocation2 + $0x12e] ss:$2 sm:$0xf] }
 0x235   : > { %v3571_v41 = vsel %vm2998_vm3, %v3568_v45, %v20343_v1  ;;  %v3763_v48 = vadd.f32 %v3569_v30, %v15315_v55  ;;  %v4045_v44 = vsel %vm3964_vm4, %v20344_v40, %v4044_v47  ;;  %v4912_v45 = vmax.f32 %v4898_v54, %v4902_v15  ;;  %20346 = vst [vmem:[#allocation17_spill] sm:$0xff] %v15558_v14  ;;  %v15560_v57 = vld [vmem:[#allocation2 + $0x12f] ss:$2 sm:$0xf] }
 0x236   : > { %v3764_v10 = vadd.f32 %v3571_v41, %v15440_v32  ;;  %v4047_v33 = vsel %vm3964_vm4, %v4044_v47, %v20345_v43  ;;  %20347 = vst [vmem:[#allocation14_spill] sm:$0xff] %v15560_v57  ;;  %v2801_v1 = vadd.f32 %v2611_v34, %v2320_v12  ;;  %v15563_v55 = vmul.f32 %v12896_v11, %v701_v2  ;;  %v696_v41 = vpop.permute.xlu0 %695 }
 0x237   : > { %v4239_v16 = vadd.f32 %v4045_v44, %v3763_v48  ;;  %v20348_v49 = vrot.slane %v15341_v24, 6  ;;  %v20349_v30 = vrot.slane %v15470_v26, 6  ;;  %v4916_v15 = vmax.f32 %v4912_v45, %v4914_v59 }
 0x238   : > { %v4240_v6 = vadd.f32 %v4047_v33, %v3764_v10  ;;  %v15572_v53 = vmul.f32 %v12898_v17, %v701_v2  ;;  %v15575_v12 = vmul.f32 %v12904_v21, %v701_v2  ;;  %v15578_v34 = vmul.f32 %v12906_v22, %v701_v2 }
 0x239   : > { %v4521_v32 = vsel %vm4440_vm5, %v20348_v49, %v4520_v42  ;;  %v4523_v47 = vsel %vm4440_vm5, %v4520_v42, %v20349_v30  ;;  %v20350_v48 = vrot.slane %v15447_v58, 4  ;;  %v4918_v10 = vadd.f32 %v15410_v0, %v4916_v15 }
 0x23a   : > { %v4715_v54 = vadd.f32 %v4521_v32, %v4239_v16  ;;  %v4716_v19 = vadd.f32 %v4523_v47, %v4240_v6  ;;  %v15587_v40 = vmul.f32 %v12910_v25, %v701_v2  ;;  %v3276_v44 = vadd.f32 %v3085_v37, %v2800_v38 }
 0x23b   : > { %v3087_v42 = vsel %vm2998_vm3, %v3084_v50, %v20350_v48  ;;  %v15594_v33 = vmul.f32 %v12900_v18, %v701_v2  ;;  %v20044_v45 = vrot.slane %v15563_v55, 1  ;;  %v4920_v59 = vmax.f32 %v4918_v10, 0.0 }
 0x23c   : > { %v15589_v43 = vadd.f32 %v3087_v42, %v2801_v1  ;;  %4793 = vst.msk [vmem:[#allocation2 + $0x138] sm:$0xff] %vm330_vm6, %v4715_v54  ;;  %4794 = vst.msk [vmem:[#allocation2 + $0x140] sm:$0xff] %vm330_vm6, %v4716_v19  ;;  %v15598_v50 = vmul.f32 %v12912_v28, %v701_v2  ;;  %v977_v16 = vmul.f32 %v12896_v11, %v696_v41  ;;  %v20050_v37 = vrot.slane %v15572_v53, 2 }
 0x23d   : > { %v1449_v6 = vmul.f32 %v12898_v17, %v696_v41  ;;  %v20043_v38 = vrot.slane %v15575_v12, 2  ;;  %v1933_v49 = vmul.f32 %v12904_v21, %v696_v41  ;;  %4922 = vst.msk [vmem:[#allocation3 + $0x33] sm:$0xf] %vm355_vm8, %v4920_v59  ;;  %v15609_v30 = vmul.f32 %v12914_v29, %v701_v2 }
 0x23e   : > { %v15612_v47 = vmul.f32 %v15467_v7, %v701_v2  ;;  %v1181_v15 = vrot.slane %v977_v16, 1  ;;  %v2409_v48 = vmul.f32 %v12906_v22, %v696_v41  ;;  %v3373_v42 = vmul.f32 %v12912_v28, %v696_v41 }
 0x23f   : > { %v1653_v54 = vrot.slane %v1449_v6, 2  ;;  %v2133_v19 = vrot.slane %v1933_v49, 2  ;;  %v895_v24 = vmul.f32 %v12900_v18, %v696_v41  ;;  %v20351_v59 = vrot.slane %v15414_v20, 1 }
 0x240   : > { %v2885_v32 = vmul.f32 %v12910_v25, %v696_v41  ;;  %v1184_v2 = vsel %vm1085_vm0, %v1181_v15, %v20044_v45  ;;  %v20352_v6 = vrot.slane %v15426_v13, 2  ;;  %v20355_v13 = vrot.slane %v15423_v35, 2 }
 0x241   : > { %v1182_v23 = vsel %vm1085_vm0, %v20351_v59, %v1181_v15  ;;  %v2136_v39 = vsel %vm1557_vm1, %v2133_v19, %v20043_v38  ;;  %v3848_v15 = vmul.f32 %v12914_v29, %v696_v41  ;;  %v3572_v38 = vrot.slane %v3373_v42, 4 }
 0x242   : > { %v1366_v16 = vadd.f32 %v1182_v23, %v15435_v56  ;;  %v2134_v49 = vsel %vm1557_vm1, %v20352_v6, %v2133_v19  ;;  %v4324_v56 = vmul.f32 %v15467_v7, %v696_v41  ;;  %v1654_v23 = vsel %vm1557_vm1, %v20355_v13, %v1653_v54 }
 0x243   : > { %v15632_v1 = vld [vmem:[#allocation2 + $0x138] ss:$2 sm:$0xff]  ;;  %v15634_v20 = vld [vmem:[#allocation2 + $0x139] ss:$2 sm:$0xff]  ;;  %v1656_v19 = vsel %vm1557_vm1, %v1653_v54, %v20050_v37  ;;  %v2612_v6 = vrot.slane %v2409_v48, 3  ;;  %v1367_v45 = vadd.f32 %v1184_v2, %v895_v24  ;;  %v2321_v57 = vadd.f32 %v2134_v49, %v15396_v4  ;;  %v711_v48 = vpop.permute.xlu1 %710 }
 0x244   : > { %20353 = vst [vmem:[#allocation15_spill] sm:$0xff] %v15632_v1  ;;  %20354 = vst [vmem:[#allocation27_spill] sm:$0xff] %v15634_v20  ;;  %v2322_v59 = vadd.f32 %v2136_v39, %v15530_v3  ;;  %v3088_v10 = vrot.slane %v2885_v32, 4  ;;  %v15650_v41 = vld [vmem:[#allocation3 + $0x30] sm:$0xff]  ;;  %v15652_v35 = vadd.f32 %v1654_v23, %v1366_v16  ;;  %v20356_v13 = vrot.slane %v15450_v36, 4 }
 0x245   : > { %v20357_v54 = vrot.slane %v15598_v50, 4  ;;  %v20049_v4 = vrot.slane %v15650_v41, 1  ;;  %v20048_v3 = vrot.slane %v15650_v41, 2  ;;  %v20358_v42 = vrot.slane %v15438_v27, 3 }
 0x246   : > { %v3573_v62 = vsel %vm2998_vm3, %v20356_v13, %v3572_v38  ;;  %v20359_v36 = vrot.slane %v15578_v34, 3  ;;  %v4048_v49 = vrot.slane %v3848_v15, 5  ;;  %v4524_v23 = vrot.slane %v4324_v56, 6  ;;  %v4930_v1 = vld [vmem:[#allocation2 + $0xad] ss:$2 sm:$0xf] }
 0x247   : > { %v3575_v24 = vsel %vm2998_vm3, %v3572_v38, %v20357_v54  ;;  %v3765_v39 = vadd.f32 %v3573_v62, %v15458_v46  ;;  %v2613_v2 = vsel %vm2522_vm2, %v20358_v42, %v2612_v6  ;;  %v20360_v38 = vrot.slane %v15492_v8, 1 }
 0x248   : > { %v3766_v32 = vadd.f32 %v3575_v24, %v3276_v44  ;;  %v2615_v16 = vsel %vm2522_vm2, %v2612_v6, %v20359_v36  ;;  %v20361_v46 = vrot.slane %v15492_v8, 2  ;;  %v2802_v62 = vadd.f32 %v2613_v2, %v2321_v57 }
 0x249   : > { %v5242_v13 = vsel %vm1085_vm0, %v20360_v38, %v20049_v4  ;;  %v2803_v44 = vadd.f32 %v2615_v16, %v2322_v59  ;;  %v20362_v15 = vrot.slane %v15453_v63, 5  ;;  %v20363_v6 = vrot.slane %v15609_v30, 5 }
 0x24a   : > { %v5712_v27 = vsel %vm1557_vm1, %v20361_v46, %v20048_v3  ;;  %10629 = vmatmul.mubr.msk.f32.gmra.mrb[10].mxu1 %vm330_vm6, %v5242_v13  ;;  %v15688_v24 = vmul.f32 %v12896_v11, %v711_v48  ;;  %v15690_v8 = vadd.f32 %v1656_v19, %v1367_v45  ;;  %v20364_v63 = vrot.slane %v15447_v58, 4  ;;  %v706_v13 = vpop.permute.xlu0 %705 }
 0x24b   : > { %10771 = vmatmul.mubr.msk.f32.gmra.mrb[10].mxu0 %vm330_vm6, %v5712_v27  ;;  %v4049_v56 = vsel %vm3964_vm4, %v20362_v15, %v4048_v49  ;;  %v4051_v54 = vsel %vm3964_vm4, %v4048_v49, %v20363_v6  ;;  %10631 = vmatprep.mubr.msk.f32.mxu1 %vm12720_vm7, %v20213_v9  ;;  %v20365_v2 = vrot.slane %v15587_v40, 4  ;;  %v20366_v16 = vrot.slane %v15470_v26, 6 }
 0x24c   : > { %v4241_v42 = vadd.f32 %v4049_v56, %v3765_v39  ;;  %v4242_v57 = vadd.f32 %v4051_v54, %v3766_v32  ;;  %10773 = vmatprep.mubr.msk.f32.mxu0 %vm12720_vm7, %v20213_v9  ;;  %v3089_v59 = vsel %vm2998_vm3, %v20364_v63, %v3088_v10  ;;  %v20367_v19 = vrot.slane %v15612_v47, 6 }
 0x24d   : > { %v3091_v36 = vsel %vm2998_vm3, %v3088_v10, %v20365_v2  ;;  %v4525_v45 = vsel %vm4440_vm5, %v20366_v16, %v4524_v23  ;;  %v15709_v38 = vmul.f32 %v12898_v17, %v711_v48  ;;  %v15712_v58 = vmul.f32 %v12904_v21, %v711_v48 }
 0x24e   : > { %v4527_v39 = vsel %vm4440_vm5, %v4524_v23, %v20367_v19  ;;  %v4717_v32 = vadd.f32 %v4525_v45, %v4241_v42  ;;  %v3278_v46 = vadd.f32 %v3089_v59, %v2802_v62  ;;  %v15714_v27 = vadd.f32 %v3091_v36, %v2803_v44 }
 0x24f   : > { %v4718_v49 = vadd.f32 %v4527_v39, %v4242_v57  ;;  %v15717_v26 = vmul.f32 %v12900_v18, %v711_v48  ;;  %v20051_v10 = vrot.slane %v15688_v24, 1  ;;  %v15723_v23 = vmul.f32 %v12906_v22, %v711_v48 }
 0x250   : > { %4795 = vst.msk [vmem:[#allocation2 + $0x148] sm:$0xff] %vm330_vm6, %v4717_v32  ;;  %v15726_v15 = vmul.f32 %v12910_v25, %v711_v48  ;;  %v15729_v56 = vmul.f32 %v12912_v28, %v711_v48  ;;  %v15732_v62 = vmul.f32 %v12914_v29, %v711_v48  ;;  %v979_v44 = vmul.f32 %v12896_v11, %v706_v13 }
 0x251   : > { %4796 = vst.msk [vmem:[#allocation2 + $0x150] sm:$0xff] %vm330_vm6, %v4718_v49  ;;  %v1451_v6 = vmul.f32 %v12898_v17, %v706_v13  ;;  %v1935_v54 = vmul.f32 %v12904_v21, %v706_v13  ;;  %v2411_v42 = vmul.f32 %v12906_v22, %v706_v13  ;;  %v20052_v63 = vrot.slane %v15712_v58, 2 }
 0x252   : > { %v15741_v59 = vmul.f32 %v15467_v7, %v711_v48  ;;  %v3375_v2 = vmul.f32 %v12912_v28, %v706_v13  ;;  %v1185_v36 = vrot.slane %v979_v44, 1  ;;  %v2887_v45 = vmul.f32 %v12910_v25, %v706_v13 }
 0x253   : > { %v2137_v16 = vrot.slane %v1935_v54, 2  ;;  %v3850_v19 = vmul.f32 %v12914_v29, %v706_v13  ;;  %v1657_v14 = vrot.slane %v1451_v6, 2  ;;  %v897_v48 = vmul.f32 %v12900_v18, %v706_v13 }
 0x254   : > { %v2616_v4 = vrot.slane %v2411_v42, 3  ;;  %v3576_v57 = vrot.slane %v3375_v2, 4  ;;  %v20368_v44 = vrot.slane %v15563_v55, 1  ;;  %v1188_v37 = vsel %vm1085_vm0, %v1185_v36, %v20051_v10 }
 0x255   : > { %v20369_v39 = vrot.slane %v15575_v12, 2  ;;  %v2140_v6 = vsel %vm1557_vm1, %v2137_v16, %v20052_v63  ;;  %v3092_v42 = vrot.slane %v2887_v45, 4  ;;  %v4052_v2 = vrot.slane %v3850_v19, 5 }
 0x256   : > { %v1186_v54 = vsel %vm1085_vm0, %v20368_v44, %v1185_v36  ;;  %v4326_v55 = vmul.f32 %v15467_v7, %v706_v13  ;;  %v20370_v44 = vrot.slane %v15572_v53, 2  ;;  %v20371_v36 = vrot.slane %v15709_v38, 2 }
 0x257   : > { %v2138_v32 = vsel %vm1557_vm1, %v20369_v39, %v2137_v16  ;;  %v2324_v10 = vadd.f32 %v2140_v6, %v15652_v35  ;;  %v1368_v16 = vadd.f32 %v1186_v54, %v15594_v33  ;;  %v1369_v63 = vadd.f32 %v1188_v37, %v897_v48  ;;  %v721_v37 = vpop.permute.xlu1 %720 }
 0x258   : > { %v1658_v49 = vsel %vm1557_vm1, %v20370_v44, %v1657_v14  ;;  %v1660_v12 = vsel %vm1557_vm1, %v1657_v14, %v20371_v36  ;;  %v2323_v39 = vadd.f32 %v2138_v32, %v15532_v5  ;;  %v20372_v45 = vrot.slane %v15598_v50, 4  ;;  %v20380_v36 = vld [vmem:[#allocation18_spill] sm:$0xff] }
 0x259   : > { %v20373_v13 = vrot.slane %v15729_v56, 4  ;;  %v20374_v44 = vrot.slane %v15578_v34, 3  ;;  %v20375_v14 = vrot.slane %v15723_v23, 3  ;;  %v20376_v50 = vrot.slane %v15609_v30, 5  ;;  %v20378_v34 = vld [vmem:[#allocation20_spill] sm:$0xff] }
 0x25a   : > { %v3577_v19 = vsel %vm2998_vm3, %v20372_v45, %v3576_v57  ;;  %v20377_v48 = vrot.slane %v15732_v62, 5  ;;  %v4528_v54 = vrot.slane %v4326_v55, 6  ;;  %v20379_v6 = vmax.f32 %v14639_v60, %v20378_v34  ;;  %v20381_v45 = vld [vmem:[#allocation19_spill] sm:$0xff] }
 0x25b   : > { %v3579_v53 = vsel %vm2998_vm3, %v3576_v57, %v20373_v13  ;;  %v2617_v3 = vsel %vm2522_vm2, %v20374_v44, %v2616_v4  ;;  %v2619_v5 = vsel %vm2522_vm2, %v2616_v4, %v20375_v14  ;;  %v3767_v35 = vadd.f32 %v3577_v19, %v15589_v43 }
 0x25c   : > { %v3768_v33 = vadd.f32 %v3579_v53, %v3278_v46  ;;  %v4053_v32 = vsel %vm3964_vm4, %v20376_v50, %v4052_v2  ;;  %v4055_v57 = vsel %vm3964_vm4, %v4052_v2, %v20377_v48  ;;  %v20382_v13 = vmax.f32 %v20380_v36, %v20381_v45 }
 0x25d   : > { %v2804_v44 = vadd.f32 %v2617_v3, %v2323_v39  ;;  %v2805_v43 = vadd.f32 %v2619_v5, %v2324_v10  ;;  %v4243_v46 = vadd.f32 %v4053_v32, %v3767_v35  ;;  %v20383_v30 = vrot.slane %v15612_v47, 6  ;;  %v716_v10 = vpop.permute.xlu0 %715 }
 0x25e   : > { %v4943_v4 = vmax.f32 %v20382_v13, %v20379_v6  ;;  %v4244_v19 = vadd.f32 %v4055_v57, %v3768_v33  ;;  %v20384_v14 = vrot.slane %v15741_v59, 6  ;;  %v15807_v60 = vmul.f32 %v12896_v11, %v721_v37 }
 0x25f   : > { %v4529_v53 = vsel %vm4440_vm5, %v20383_v30, %v4528_v54  ;;  %v1840_v50 = vadd.f32 %v1658_v49, %v1368_v16  ;;  %v15810_v3 = vmul.f32 %v12904_v21, %v721_v37  ;;  %v15812_v39 = vadd.f32 %v1660_v12, %v1369_v63 }
 0x260   : > { %v4531_v2 = vsel %vm4440_vm5, %v4528_v54, %v20384_v14  ;;  %v4945_v55 = vadd.f32 %v15410_v0, %v4943_v4  ;;  %v4719_v48 = vadd.f32 %v4529_v53, %v4243_v46  ;;  %v20385_v47 = vrot.slane %v15587_v40, 4 }
 0x261   : > { %v4720_v34 = vadd.f32 %v4531_v2, %v4244_v19  ;;  %v20386_v35 = vrot.slane %v15726_v15, 4  ;;  %v15825_v49 = vmul.f32 %v12898_v17, %v721_v37  ;;  %v15828_v63 = vmul.f32 %v12906_v22, %v721_v37 }
 0x262   : > { %v3093_v5 = vsel %vm2998_vm3, %v20385_v47, %v3092_v42  ;;  %v4947_v32 = vmax.f32 %v4945_v55, 0.0  ;;  %4797 = vst.msk [vmem:[#allocation2 + $0x158] sm:$0xff] %vm330_vm6, %v4719_v48  ;;  %v15831_v40 = vmul.f32 %v12910_v25, %v721_v37  ;;  %v20053_v16 = vrot.slane %v15807_v60, 1 }
 0x263   : > { %v3095_v33 = vsel %vm2998_vm3, %v3092_v42, %v20386_v35  ;;  %v15820_v57 = vadd.f32 %v3093_v5, %v2804_v44  ;;  %4798 = vst.msk [vmem:[#allocation2 + $0x160] sm:$0xff] %vm330_vm6, %v4720_v34  ;;  %v15837_v42 = vmul.f32 %v12900_v18, %v721_v37  ;;  %v981_v54 = vmul.f32 %v12896_v11, %v716_v10 }
 0x264   : > { %v15833_v12 = vadd.f32 %v3095_v33, %v2805_v43  ;;  %4949 = vst.msk [vmem:[#allocation3 + $0x39] sm:$0xff] %vm330_vm6, %v4947_v32  ;;  %v20054_v6 = vrot.slane %v15810_v3, 2  ;;  %v15843_v36 = vmul.f32 %v12912_v28, %v721_v37  ;;  %v15846_v45 = vmul.f32 %v12914_v29, %v721_v37 }
 0x265   : > { %v1453_v13 = vmul.f32 %v12898_v17, %v716_v10  ;;  %v15850_v4 = vmul.f32 %v15467_v7, %v721_v37  ;;  %v1189_v44 = vrot.slane %v981_v54, 1  ;;  %v1937_v43 = vmul.f32 %v12904_v21, %v716_v10 }
 0x266   : > { %v2413_v46 = vmul.f32 %v12906_v22, %v716_v10  ;;  %v20058_v19 = vrot.slane %v15825_v49, 2  ;;  %v899_v14 = vmul.f32 %v12900_v18, %v716_v10  ;;  %v20387_v2 = vrot.slane %v15688_v24, 1 }
 0x267   : > { %v1192_v37 = vsel %vm1085_vm0, %v1189_v44, %v20053_v16  ;;  %v1661_v48 = vrot.slane %v1453_v13, 2  ;;  %v2141_v34 = vrot.slane %v1937_v43, 2  ;;  %v3377_v35 = vmul.f32 %v12912_v28, %v716_v10 }
 0x268   : > { %v1190_v55 = vsel %vm1085_vm0, %v20387_v2, %v1189_v44  ;;  %v3852_v33 = vmul.f32 %v12914_v29, %v716_v10  ;;  %v20388_v24 = vrot.slane %v15712_v58, 2  ;;  %v2620_v13 = vrot.slane %v2413_v46, 3 }
 0x269   : > { %v2144_v44 = vsel %vm1557_vm1, %v2141_v34, %v20054_v6  ;;  %v1370_v2 = vadd.f32 %v1190_v55, %v15717_v26  ;;  %v1371_v16 = vadd.f32 %v1192_v37, %v899_v14  ;;  %v2889_v53 = vmul.f32 %v12910_v25, %v716_v10 }
 0x26a   : > { %v2142_v54 = vsel %vm1557_vm1, %v20388_v24, %v2141_v34  ;;  %v4328_v5 = vmul.f32 %v15467_v7, %v716_v10  ;;  %v15880_v47 = vld [vmem:[#allocation2 + $0x152] ss:$2 sm:$0xff]  ;;  %v15882_v32 = vld [vmem:[#allocation2 + $0x153] ss:$2 sm:$0xff]  ;;  %v20390_v34 = vrot.slane %v15709_v38, 2  ;;  %v1664_v26 = vsel %vm1557_vm1, %v1661_v48, %v20058_v19 }
 0x26b   : > { %v15875_v43 = vld [vmem:[#allocation3 + $0x38] sm:$0xff]  ;;  %20389 = vst [vmem:[#allocation20_spill] sm:$0xff] %v15882_v32  ;;  %v2325_v14 = vadd.f32 %v2142_v54, %v15690_v8  ;;  %v2326_v55 = vadd.f32 %v2144_v44, %v1840_v50  ;;  %v3580_v10 = vrot.slane %v3377_v35, 4  ;;  %v4056_v37 = vrot.slane %v3852_v33, 5 }
 0x26c   : > { %v20057_v58 = vrot.slane %v15875_v43, 1  ;;  %v20056_v24 = vrot.slane %v15875_v43, 2  ;;  %v1662_v46 = vsel %vm1557_vm1, %v20390_v34, %v1661_v48  ;;  %v20391_v6 = vrot.slane %v15650_v41, 1 }
 0x26d   : > { %v20392_v38 = vrot.slane %v15650_v41, 2  ;;  %v20393_v20 = vrot.slane %v15723_v23, 3  ;;  %v20394_v8 = vrot.slane %v15828_v63, 3  ;;  %v20395_v41 = vrot.slane %v15729_v56, 4  ;;  %v731_v23 = vpop.permute.xlu1 %730 }
 0x26e   : > { %v5244_v30 = vsel %vm1085_vm0, %v20391_v6, %v20057_v58  ;;  %v3096_v6 = vrot.slane %v2889_v53, 4  ;;  %v4532_v54 = vrot.slane %v4328_v5, 6  ;;  %v15916_v44 = vadd.f32 %v1662_v46, %v1370_v2 }
 0x26f   : > { %v5714_v34 = vsel %vm1557_vm1, %v20392_v38, %v20056_v24  ;;  %v2621_v48 = vsel %vm2522_vm2, %v20393_v20, %v2620_v13  ;;  %v2623_v50 = vsel %vm2522_vm2, %v2620_v13, %v20394_v8  ;;  %10632 = vmatmul.mubr.msk.f32.gmra.mrb[12].mxu1 %vm330_vm6, %v5244_v30  ;;  %v3581_v33 = vsel %vm2998_vm3, %v20395_v41, %v3580_v10 }
 0x270   : > { %10774 = vmatmul.mubr.msk.f32.gmra.mrb[12].mxu0 %vm330_vm6, %v5714_v34  ;;  %v15918_v20 = vadd.f32 %v1664_v26, %v1371_v16  ;;  %v20396_v13 = vrot.slane %v15843_v36, 4  ;;  %v3769_v8 = vadd.f32 %v3581_v33, %v15714_v27  ;;  %10634 = vmatprep.mubr.msk.f32.mxu1 %vm12720_vm7, %v20213_v9  ;;  %v2806_v30 = vadd.f32 %v2621_v48, %v2325_v14 }
 0x271   : > { %v2807_v53 = vadd.f32 %v2623_v50, %v2326_v55  ;;  %v20397_v5 = vrot.slane %v15732_v62, 5  ;;  %10776 = vmatprep.mubr.msk.f32.mxu0 %vm12720_vm7, %v20213_v9  ;;  %v20398_v16 = vrot.slane %v15846_v45, 5  ;;  %v15936_v27 = vmul.f32 %v12896_v11, %v731_v23 }
 0x272   : > { %v3583_v38 = vsel %vm2998_vm3, %v3580_v10, %v20396_v13  ;;  %v15939_v14 = vmul.f32 %v12898_v17, %v731_v23  ;;  %v20400_v10 = vrot.slane %v15741_v59, 6  ;;  %v20401_v48 = vrot.slane %v15850_v4, 6  ;;  %v726_v13 = vpop.permute.xlu0 %725 }
 0x273   : > { %v3770_v56 = vadd.f32 %v3583_v38, %v15820_v57  ;;  %v4057_v2 = vsel %vm3964_vm4, %v20397_v5, %v4056_v37  ;;  %v4059_v46 = vsel %vm3964_vm4, %v4056_v37, %v20398_v16  ;;  %v20399_v57 = vrot.slane %v15726_v15, 4 }
 0x274   : > { %v4245_v26 = vadd.f32 %v4057_v2, %v3769_v8  ;;  %v4533_v34 = vsel %vm4440_vm5, %v20400_v10, %v4532_v54  ;;  %v4535_v37 = vsel %vm4440_vm5, %v4532_v54, %v20401_v48  ;;  %v15951_v41 = vmul.f32 %v12904_v21, %v731_v23 }
 0x275   : > { %v3097_v62 = vsel %vm2998_vm3, %v20399_v57, %v3096_v6  ;;  %v4246_v55 = vadd.f32 %v4059_v46, %v3770_v56  ;;  %v15954_v33 = vmul.f32 %v12906_v22, %v731_v23  ;;  %v15957_v15 = vmul.f32 %v12910_v25, %v731_v23 }
 0x276   : > { %v4721_v50 = vadd.f32 %v4533_v34, %v4245_v26  ;;  %v20402_v38 = vrot.slane %v15831_v40, 4  ;;  %v3282_v8 = vadd.f32 %v3097_v62, %v2806_v30  ;;  %v15963_v5 = vmul.f32 %v12912_v28, %v731_v23 }
 0x277   : > { %v4722_v56 = vadd.f32 %v4535_v37, %v4246_v55  ;;  %v15969_v2 = vmul.f32 %v12900_v18, %v731_v23  ;;  %v20060_v16 = vrot.slane %v15936_v27, 1  ;;  %v1455_v30 = vmul.f32 %v12898_v17, %v726_v13 }
 0x278   : > { %v3099_v59 = vsel %vm2998_vm3, %v3096_v6, %v20402_v38  ;;  %4799 = vst.msk [vmem:[#allocation2 + $0x168] sm:$0xff] %vm330_vm6, %v4721_v50  ;;  %v983_v6 = vmul.f32 %v12896_v11, %v726_v13  ;;  %v1939_v26 = vmul.f32 %v12904_v21, %v726_v13  ;;  %v20059_v57 = vrot.slane %v15951_v41, 2 }
 0x279   : > { %v15965_v54 = vadd.f32 %v3099_v59, %v2807_v53  ;;  %4800 = vst.msk [vmem:[#allocation2 + $0x170] sm:$0xff] %vm330_vm6, %v4722_v56  ;;  %v2415_v53 = vmul.f32 %v12906_v22, %v726_v13  ;;  %v3379_v10 = vmul.f32 %v12912_v28, %v726_v13  ;;  %v15984_v48 = vmul.f32 %v12914_v29, %v731_v23 }
 0x27a   : > { %v1193_v37 = vrot.slane %v983_v6, 1  ;;  %v2145_v50 = vrot.slane %v1939_v26, 2  ;;  %v15987_v38 = vmul.f32 %v15467_v7, %v731_v23  ;;  %v901_v59 = vmul.f32 %v12900_v18, %v726_v13 }
 0x27b   : > { %v1665_v56 = vrot.slane %v1455_v30, 2  ;;  %v2891_v35 = vmul.f32 %v12910_v25, %v726_v13  ;;  %v20403_v24 = vrot.slane %v15807_v60, 1  ;;  %v2624_v62 = vrot.slane %v2415_v53, 3 }
 0x27c   : > { %v1196_v55 = vsel %vm1085_vm0, %v1193_v37, %v20060_v16  ;;  %v3584_v34 = vrot.slane %v3379_v10, 4  ;;  %v20404_v6 = vrot.slane %v15810_v3, 2  ;;  %v2148_v30 = vsel %vm1557_vm1, %v2145_v50, %v20059_v57 }
 0x27d   : > { %v1194_v58 = vsel %vm1085_vm0, %v20403_v24, %v1193_v37  ;;  %v3854_v26 = vmul.f32 %v12914_v29, %v726_v13  ;;  %v4330_v60 = vmul.f32 %v15467_v7, %v726_v13  ;;  %v20062_v24 = vrot.slane %v15984_v48, 5 }
 0x27e   : > { %v2146_v23 = vsel %vm1557_vm1, %v20404_v6, %v2145_v50  ;;  %v1372_v46 = vadd.f32 %v1194_v58, %v15837_v42  ;;  %v1373_v19 = vadd.f32 %v1196_v55, %v901_v59  ;;  %v20061_v10 = vrot.slane %v15987_v38, 6  ;;  %v741_v59 = vpop.permute.xlu1 %740 }
 0x27f   : > { %v2327_v53 = vadd.f32 %v2146_v23, %v15812_v39  ;;  %v20405_v3 = vrot.slane %v15825_v49, 2  ;;  %v2328_v6 = vadd.f32 %v2148_v30, %v15916_v44  ;;  %v3100_v50 = vrot.slane %v2891_v35, 4 }
 0x280   : > { %v20406_v57 = vrot.slane %v15939_v14, 2  ;;  %v20407_v16 = vrot.slane %v15828_v63, 3  ;;  %v20408_v58 = vrot.slane %v15843_v36, 4  ;;  %v20409_v55 = vrot.slane %v15963_v5, 4 }
 0x281   : > { %v1666_v37 = vsel %vm1557_vm1, %v20405_v3, %v1665_v56  ;;  %v4060_v23 = vrot.slane %v3854_v26, 5  ;;  %v4536_v30 = vrot.slane %v4330_v60, 6  ;;  %v20410_v63 = vrot.slane %v15954_v33, 3 }
 0x282   : > { %v1668_v13 = vsel %vm1557_vm1, %v1665_v56, %v20406_v57  ;;  %v2625_v42 = vsel %vm2522_vm2, %v20407_v16, %v2624_v62  ;;  %v3585_v39 = vsel %vm2998_vm3, %v20408_v58, %v3584_v34  ;;  %v3587_v49 = vsel %vm2998_vm3, %v3584_v34, %v20409_v55 }
 0x283   : > { %v3771_v44 = vadd.f32 %v3585_v39, %v15833_v12  ;;  %v3772_v35 = vadd.f32 %v3587_v49, %v3282_v8  ;;  %v16026_v3 = vadd.f32 %v1666_v37, %v1372_v46  ;;  %v16028_v57 = vadd.f32 %v1668_v13, %v1373_v19 }
 0x284   : > { %v2627_v36 = vsel %vm2522_vm2, %v2624_v62, %v20410_v63  ;;  %v2808_v16 = vadd.f32 %v2625_v42, %v2327_v53  ;;  %v20411_v58 = vrot.slane %v15846_v45, 5  ;;  %v4063_v12 = vsel %vm3964_vm4, %v4060_v23, %v20062_v24  ;;  %v736_v42 = vpop.permute.xlu0 %735 }
 0x285   : > { %v2809_v56 = vadd.f32 %v2627_v36, %v2328_v6  ;;  %v16040_v8 = vmul.f32 %v12896_v11, %v741_v59  ;;  %v20412_v19 = vrot.slane %v15831_v40, 4  ;;  %v4248_v60 = vadd.f32 %v4063_v12, %v3772_v35 }
 0x286   : > { %v4061_v34 = vsel %vm3964_vm4, %v20411_v58, %v4060_v23  ;;  %v16046_v62 = vmul.f32 %v12898_v17, %v741_v59  ;;  %v20413_v45 = vrot.slane %v15957_v15, 4  ;;  %v20414_v37 = vrot.slane %v15850_v4, 6 }
 0x287   : > { %v3101_v46 = vsel %vm2998_vm3, %v20412_v19, %v3100_v50  ;;  %v4247_v26 = vadd.f32 %v4061_v34, %v3771_v44  ;;  %v4539_v13 = vsel %vm4440_vm5, %v4536_v30, %v20061_v10  ;;  %v16058_v40 = vmul.f32 %v12904_v21, %v741_v59 }
 0x288   : > { %v3103_v53 = vsel %vm2998_vm3, %v3100_v50, %v20413_v45  ;;  %v4537_v6 = vsel %vm4440_vm5, %v20414_v37, %v4536_v30  ;;  %v3284_v39 = vadd.f32 %v3101_v46, %v2808_v16  ;;  %v4724_v49 = vadd.f32 %v4539_v13, %v4248_v60  ;;  %v4926_v30 = vld [vmem:[#allocation2 + $0xac] ss:$2 sm:$0xf] }
 0x289   : > { %v4723_v55 = vadd.f32 %v4537_v6, %v4247_v26  ;;  %v16061_v44 = vmul.f32 %v12906_v22, %v741_v59  ;;  %v16063_v35 = vadd.f32 %v3103_v53, %v2809_v56  ;;  %v16066_v4 = vmul.f32 %v12900_v18, %v741_v59 }
 0x28a   : > { %v20063_v50 = vrot.slane %v16040_v8, 1  ;;  %v16070_v23 = vmul.f32 %v12910_v25, %v741_v59  ;;  %4802 = vst.msk [vmem:[#allocation2 + $0x180] sm:$0xff] %vm330_vm6, %v4724_v49  ;;  %v16076_v63 = vmul.f32 %v12912_v28, %v741_v59  ;;  %v16079_v36 = vmul.f32 %v12914_v29, %v741_v59 }
 0x28b   : > { %4801 = vst.msk [vmem:[#allocation2 + $0x178] sm:$0xff] %vm330_vm6, %v4723_v55  ;;  %v985_v16 = vmul.f32 %v12896_v11, %v736_v42  ;;  %v20065_v56 = vrot.slane %v16058_v40, 2  ;;  %v1457_v58 = vmul.f32 %v12898_v17, %v736_v42  ;;  %v1941_v34 = vmul.f32 %v12904_v21, %v736_v42 }
 0x28c   : > { %v2417_v12 = vmul.f32 %v12906_v22, %v736_v42  ;;  %v3381_v26 = vmul.f32 %v12912_v28, %v736_v42  ;;  %v3856_v60 = vmul.f32 %v12914_v29, %v736_v42  ;;  %v16090_v45 = vmul.f32 %v15467_v7, %v741_v59 }
 0x28d   : > { %v1197_v46 = vrot.slane %v985_v16, 1  ;;  %v1669_v53 = vrot.slane %v1457_v58, 2  ;;  %v2149_v37 = vrot.slane %v1941_v34, 2  ;;  %v2893_v6 = vmul.f32 %v12910_v25, %v736_v42 }
 0x28e   : > { %v20415_v13 = vrot.slane %v15936_v27, 1  ;;  %v2628_v16 = vrot.slane %v2417_v12, 3  ;;  %v3588_v10 = vrot.slane %v3381_v26, 4  ;;  %v903_v58 = vmul.f32 %v12900_v18, %v736_v42 }
 0x28f   : > { %v1200_v49 = vsel %vm1085_vm0, %v1197_v46, %v20063_v50  ;;  %v20416_v27 = vrot.slane %v15951_v41, 2  ;;  %v4064_v12 = vrot.slane %v3856_v60, 5  ;;  %v20417_v24 = vrot.slane %v15939_v14, 2 }
 0x290   : > { %v1198_v55 = vsel %vm1085_vm0, %v20415_v13, %v1197_v46  ;;  %v2152_v46 = vsel %vm1557_vm1, %v2149_v37, %v20065_v56  ;;  %v1375_v50 = vadd.f32 %v1200_v49, %v903_v58  ;;  %v3104_v19 = vrot.slane %v2893_v6, 4  ;;  %v4938_v6 = vld [vmem:[#allocation2 + $0xc7] ss:$2 sm:$0xf] }
 0x291   : > { %v1374_v34 = vadd.f32 %v1198_v55, %v15969_v2  ;;  %v2150_v13 = vsel %vm1557_vm1, %v20416_v27, %v2149_v37  ;;  %v1670_v59 = vsel %vm1557_vm1, %v20417_v24, %v1669_v53  ;;  %v20418_v2 = vrot.slane %v16046_v62, 2  ;;  %v4934_v24 = vld [vmem:[#allocation2 + $0xc6] ss:$2 sm:$0xf] }
 0x292   : > { %v20419_v55 = vrot.slane %v15954_v33, 3  ;;  %v20420_v60 = vrot.slane %v16061_v44, 3  ;;  %v20421_v49 = vrot.slane %v15963_v5, 4  ;;  %v2329_v58 = vadd.f32 %v2150_v13, %v15918_v20 }
 0x293   : > { %v1672_v41 = vsel %vm1557_vm1, %v1669_v53, %v20418_v2  ;;  %v2330_v56 = vadd.f32 %v2152_v46, %v16026_v3  ;;  %v20422_v53 = vrot.slane %v16076_v63, 4  ;;  %v20424_v20 = vrot.slane %v16079_v36, 5 }
 0x294   : > { %v2629_v27 = vsel %vm2522_vm2, %v20419_v55, %v2628_v16  ;;  %v2631_v37 = vsel %vm2522_vm2, %v2628_v16, %v20420_v60  ;;  %v3589_v14 = vsel %vm2998_vm3, %v20421_v49, %v3588_v10  ;;  %v16132_v55 = vadd.f32 %v1670_v59, %v1374_v34  ;;  %v751_v49 = vpop.permute.xlu1 %750 }
 0x295   : > { %v3591_v33 = vsel %vm2998_vm3, %v3588_v10, %v20422_v53  ;;  %v3773_v2 = vadd.f32 %v3589_v14, %v15965_v54  ;;  %v20423_v16 = vrot.slane %v15984_v48, 5  ;;  %v4332_v60 = vmul.f32 %v15467_v7, %v736_v42  ;;  %v20426_v48 = vld [vmem:[#allocation22_spill] sm:$0xff] }
 0x296   : > { %v3774_v26 = vadd.f32 %v3591_v33, %v3284_v39  ;;  %v16138_v32 = vadd.f32 %v1672_v41, %v1375_v50  ;;  %v4067_v3 = vsel %vm3964_vm4, %v4064_v12, %v20424_v20  ;;  %v4940_v10 = vmax.f32 %v4926_v30, %v4930_v1  ;;  %v16149_v42 = vld [vmem:[#allocation2 + $0x16c] ss:$2 sm:$0xff]  ;;  %v16151_v50 = vld [vmem:[#allocation2 + $0x16d] ss:$2 sm:$0xff] }
 0x297   : > { %v4065_v5 = vsel %vm3964_vm4, %v20423_v16, %v4064_v12  ;;  %v4540_v54 = vrot.slane %v4332_v60, 6  ;;  %v4942_v59 = vmax.f32 %v4934_v24, %v4938_v6  ;;  %v20425_v39 = vmax.f32 %v15136_v31, %v15138_v52 }
 0x298   : > { %v4249_v13 = vadd.f32 %v4065_v5, %v3773_v2  ;;  %v4250_v46 = vadd.f32 %v4067_v3, %v3774_v26  ;;  %v20427_v34 = vmax.f32 %v14879_v61, %v20426_v48  ;;  %v2810_v41 = vadd.f32 %v2629_v27, %v2329_v58  ;;  %v746_v58 = vpop.permute.xlu0 %745 }
 0x299   : > { %v2811_v53 = vadd.f32 %v2631_v37, %v2330_v56  ;;  %v20428_v12 = vrot.slane %v15957_v15, 4  ;;  %v16157_v30 = vmul.f32 %v12896_v11, %v751_v49  ;;  %v20429_v26 = vrot.slane %v15987_v38, 6 }
 0x29a   : > { %v4971_v14 = vmax.f32 %v20427_v34, %v20425_v39  ;;  %v20430_v61 = vrot.slane %v16090_v45, 6  ;;  %v4944_v24 = vmax.f32 %v4940_v10, %v4942_v59  ;;  %v16167_v15 = vmul.f32 %v12898_v17, %v751_v49 }
 0x29b   : > { %v3105_v1 = vsel %vm2998_vm3, %v20428_v12, %v3104_v19  ;;  %v4541_v52 = vsel %vm4440_vm5, %v20429_v26, %v4540_v54  ;;  %v16170_v37 = vmul.f32 %v12904_v21, %v751_v49  ;;  %v20431_v33 = vrot.slane %v16070_v23, 4 }
 0x29c   : > { %v4543_v31 = vsel %vm4440_vm5, %v4540_v54, %v20430_v61  ;;  %v4973_v6 = vadd.f32 %v15410_v0, %v4971_v14  ;;  %v4725_v27 = vadd.f32 %v4541_v52, %v4249_v13  ;;  %v4946_v16 = vadd.f32 %v15410_v0, %v4944_v24 }
 0x29d   : > { %v4726_v56 = vadd.f32 %v4543_v31, %v4250_v46  ;;  %v3107_v2 = vsel %vm2998_vm3, %v3104_v19, %v20431_v33  ;;  %v16178_v60 = vadd.f32 %v3105_v1, %v2810_v41  ;;  %v16185_v3 = vmul.f32 %v12906_v22, %v751_v49 }
 0x29e   : > { %v4975_v5 = vmax.f32 %v4973_v6, 0.0  ;;  %v16180_v20 = vadd.f32 %v3107_v2, %v2811_v53  ;;  %4803 = vst.msk [vmem:[#allocation2 + $0x188] sm:$0xff] %vm330_vm6, %v4725_v27  ;;  %v16188_v13 = vmul.f32 %v12910_v25, %v751_v49  ;;  %v4948_v10 = vmax.f32 %v4946_v16, 0.0 }
 0x29f   : > { %4804 = vst.msk [vmem:[#allocation2 + $0x190] sm:$0xff] %vm330_vm6, %v4726_v56  ;;  %v16192_v0 = vmul.f32 %v12900_v18, %v751_v49  ;;  %v20067_v19 = vrot.slane %v16157_v30, 1  ;;  %v987_v46 = vmul.f32 %v12896_v11, %v746_v58  ;;  %v1675_v54 = vrot.slane %v16167_v15, 2 }
 0x2a0   : > { %4977 = vst.msk [vmem:[#allocation3 + $0x47] sm:$0xff] %vm330_vm6, %v4975_v5  ;;  %v20068_v59 = vrot.slane %v16170_v37, 2  ;;  %v16199_v39 = vmul.f32 %v12912_v28, %v751_v49  ;;  %v16202_v48 = vmul.f32 %v12914_v29, %v751_v49  ;;  %v1459_v14 = vmul.f32 %v12898_v17, %v746_v58 }
 0x2a1   : > { %4950 = vst.msk [vmem:[#allocation3 + $0x41] sm:$0xf] %vm355_vm8, %v4948_v10  ;;  %v1201_v34 = vrot.slane %v987_v46, 1  ;;  %v1943_v41 = vmul.f32 %v12904_v21, %v746_v58  ;;  %v2419_v53 = vmul.f32 %v12906_v22, %v746_v58  ;;  %v20074_v12 = vrot.slane %v16185_v3, 3 }
 0x2a2   : > { %v16211_v26 = vmul.f32 %v15467_v7, %v751_v49  ;;  %v905_v52 = vmul.f32 %v12900_v18, %v746_v58  ;;  %v20432_v61 = vrot.slane %v16040_v8, 1  ;;  %v1673_v24 = vrot.slane %v1459_v14, 2 }
 0x2a3   : > { %v2153_v6 = vrot.slane %v1943_v41, 2  ;;  %v2895_v27 = vmul.f32 %v12910_v25, %v746_v58  ;;  %v20071_v56 = vrot.slane %v16199_v39, 4  ;;  %v1204_v33 = vsel %vm1085_vm0, %v1201_v34, %v20067_v19 }
 0x2a4   : > { %v1202_v31 = vsel %vm1085_vm0, %v20432_v61, %v1201_v34  ;;  %v3383_v2 = vmul.f32 %v12912_v28, %v746_v58  ;;  %v3858_v49 = vmul.f32 %v12914_v29, %v746_v58  ;;  %v20433_v10 = vrot.slane %v16058_v40, 2 }
 0x2a5   : > { %v1376_v8 = vadd.f32 %v1202_v31, %v16066_v4  ;;  %v2156_v14 = vsel %vm1557_vm1, %v2153_v6, %v20068_v59  ;;  %v2632_v41 = vrot.slane %v2419_v53, 3  ;;  %v20070_v34 = vrot.slane %v16202_v48, 5 }
 0x2a6   : > { %v16224_v16 = vld [vmem:[#allocation2 + $0x186] ss:$2 sm:$0xff]  ;;  %v16226_v5 = vld [vmem:[#allocation2 + $0x187] ss:$2 sm:$0xff]  ;;  %v2154_v46 = vsel %vm1557_vm1, %v20433_v10, %v2153_v6  ;;  %v20069_v61 = vrot.slane %v16211_v26, 6  ;;  %v4334_v19 = vmul.f32 %v15467_v7, %v746_v58  ;;  %v1377_v1 = vadd.f32 %v1204_v33, %v905_v52 }
 0x2a7   : > { %v2331_v38 = vadd.f32 %v2154_v46, %v16028_v57  ;;  %v20434_v4 = vrot.slane %v16046_v62, 2  ;;  %v1676_v31 = vsel %vm1557_vm1, %v1673_v24, %v1675_v54  ;;  %v3108_v10 = vrot.slane %v2895_v27, 4 }
 0x2a8   : > { %v16247_v6 = vld [vmem:[#allocation3 + $0x40] sm:$0xff]  ;;  %v2332_v59 = vadd.f32 %v2156_v14, %v16132_v55  ;;  %v3592_v57 = vrot.slane %v3383_v2, 4  ;;  %v4068_v46 = vrot.slane %v3858_v49, 5  ;;  %v20435_v52 = vrot.slane %v16061_v44, 3 }
 0x2a9   : > { %v1674_v40 = vsel %vm1557_vm1, %v20434_v4, %v1673_v24  ;;  %v20073_v7 = vrot.slane %v16247_v6, 1  ;;  %v20072_v62 = vrot.slane %v16247_v6, 2  ;;  %v2635_v27 = vsel %vm2522_vm2, %v2632_v41, %v20074_v12 }
 0x2aa   : > { %v16252_v58 = vadd.f32 %v1674_v40, %v1376_v8  ;;  %v2633_v24 = vsel %vm2522_vm2, %v20435_v52, %v2632_v41  ;;  %v20436_v4 = vrot.slane %v16076_v63, 4  ;;  %v4544_v2 = vrot.slane %v4334_v19, 6  ;;  %v761_v41 = vpop.permute.xlu1 %760 }
 0x2ab   : > { %v2812_v33 = vadd.f32 %v2633_v24, %v2331_v38  ;;  %v20437_v49 = vrot.slane %v15875_v43, 1  ;;  %v20438_v44 = vrot.slane %v15875_v43, 2  ;;  %v3595_v38 = vsel %vm2998_vm3, %v3592_v57, %v20071_v56 }
 0x2ac   : > { %v3593_v55 = vsel %vm2998_vm3, %v20436_v4, %v3592_v57  ;;  %v2813_v19 = vadd.f32 %v2635_v27, %v2332_v59  ;;  %v3776_v40 = vadd.f32 %v3595_v38, %v16178_v60  ;;  %v20439_v52 = vrot.slane %v16079_v36, 5  ;;  %v20441_v57 = vld [vmem:[#allocation11_spill] sm:$0xff]  ;;  %v20443_v27 = vld [vmem:[#allocation21_spill] sm:$0xff] }
 0x2ad   : > { %v5246_v8 = vsel %vm1085_vm0, %v20437_v49, %v20073_v7  ;;  %v5716_v14 = vsel %vm1557_vm1, %v20438_v44, %v20072_v62  ;;  %v3775_v63 = vadd.f32 %v3593_v55, %v16063_v35  ;;  %v4071_v24 = vsel %vm3964_vm4, %v4068_v46, %v20070_v34  ;;  %v20440_v35 = vld [vmem:[#allocation13_spill] sm:$0xff]  ;;  %v20444_v60 = vld [vmem:[#allocation23_spill] sm:$0xff] }
 0x2ae   : > { %10635 = vmatmul.mubr.msk.f32.gmra.mrb[14].mxu1 %vm330_vm6, %v5246_v8  ;;  %10777 = vmatmul.mubr.msk.f32.gmra.mrb[14].mxu0 %vm330_vm6, %v5716_v14  ;;  %v4069_v43 = vsel %vm3964_vm4, %v20439_v52, %v4068_v46  ;;  %v20442_v59 = vmax.f32 %v20440_v35, %v20441_v57  ;;  %v20445_v55 = vmax.f32 %v20443_v27, %v20444_v60  ;;  %v20446_v49 = vrot.slane %v16070_v23, 4  ;;  %v16314_v23 = vld [vmem:[%s19950_s2] ss:$0 sm:$0xff] }
 0x2af   : > { %v4251_v4 = vadd.f32 %v4069_v43, %v3775_v63  ;;  %10637 = vmatprep.mubr.msk.f32.mxu1 %vm12720_vm7, %v20213_v9  ;;  %10779 = vmatprep.mubr.msk.f32.mxu0 %vm12720_vm7, %v20213_v9  ;;  %v4252_v44 = vadd.f32 %v4071_v24, %v3776_v40  ;;  %v20447_v46 = vrot.slane %v16090_v45, 6  ;;  %v16303_v38 = vmul.f32 %v12896_v11, %v761_v41 }
 0x2b0   : > { %v4972_v36 = vmax.f32 %v20445_v55, %v20442_v59  ;;  %v3109_v8 = vsel %vm2998_vm3, %v20446_v49, %v3108_v10  ;;  %v20448_v63 = vrot.slane %v16188_v13, 4  ;;  %v4547_v43 = vsel %vm4440_vm5, %v4544_v2, %v20069_v61  ;;  %v756_v59 = vpop.permute.xlu0 %755 }
 0x2b1   : > { %v4545_v14 = vsel %vm4440_vm5, %v20447_v46, %v4544_v2  ;;  %v4728_v40 = vadd.f32 %v4547_v43, %v4252_v44  ;;  %v16318_v24 = vmul.f32 %v12898_v17, %v761_v41  ;;  %v16321_v57 = vmul.f32 %v12904_v21, %v761_v41 }
 0x2b2   : > { %v3111_v52 = vsel %vm2998_vm3, %v3108_v10, %v20448_v63  ;;  %v4727_v35 = vadd.f32 %v4545_v14, %v4251_v4  ;;  %v4974_v45 = vadd.f32 %v16314_v23, %v4972_v36  ;;  %v16324_v10 = vmul.f32 %v12906_v22, %v761_v41 }
 0x2b3   : > { %v16326_v2 = vadd.f32 %v1676_v31, %v1377_v1  ;;  %v16328_v4 = vadd.f32 %v3109_v8, %v2812_v33  ;;  %v16330_v27 = vadd.f32 %v3111_v52, %v2813_v19  ;;  %4806 = vst.msk [vmem:[#allocation2 + $0x1a0] sm:$0xff] %vm330_vm6, %v4728_v40  ;;  %v16335_v55 = vmul.f32 %v12900_v18, %v761_v41  ;;  %v16358_v52 = vld [vmem:[%s19949_s1 + $0x8] ss:$0 sm:$0xff] }
 0x2b4   : > { %4805 = vst.msk [vmem:[#allocation2 + $0x198] sm:$0xff] %vm330_vm6, %v4727_v35  ;;  %v4976_v60 = vmax.f32 %v4974_v45, 0.0  ;;  %v20076_v36 = vrot.slane %v16303_v38, 1  ;;  %v16339_v49 = vmul.f32 %v12910_v25, %v761_v41  ;;  %v16342_v1 = vmul.f32 %v12912_v28, %v761_v41 }
 0x2b5   : > { %v16346_v31 = vmul.f32 %v12914_v29, %v761_v41  ;;  %v989_v33 = vmul.f32 %v12896_v11, %v756_v59  ;;  %v1461_v19 = vmul.f32 %v12898_v17, %v756_v59  ;;  %v1945_v8 = vmul.f32 %v12904_v21, %v756_v59 }
 0x2b6   : > { %4978 = vst.msk [vmem:[#allocation3 + $0x4f] sm:$0xf] %vm355_vm8, %v4976_v60  ;;  %v20077_v44 = vrot.slane %v16318_v24, 2  ;;  %v20075_v46 = vrot.slane %v16321_v57, 2  ;;  %v2421_v63 = vmul.f32 %v12906_v22, %v756_v59  ;;  %v16361_v43 = vmul.f32 %v16358_v52, %v761_v41 }
 0x2b7   : > { %v1205_v35 = vrot.slane %v989_v33, 1  ;;  %v2157_v45 = vrot.slane %v1945_v8, 2  ;;  %v2897_v40 = vmul.f32 %v12910_v25, %v756_v59  ;;  %v907_v61 = vmul.f32 %v12900_v18, %v756_v59 }
 0x2b8   : > { %v1677_v34 = vrot.slane %v1461_v19, 2  ;;  %v20449_v62 = vrot.slane %v16157_v30, 1  ;;  %v2636_v33 = vrot.slane %v2421_v63, 3  ;;  %v20450_v8 = vrot.slane %v16170_v37, 2  ;;  %v9700_v37 = vld [vmem:[%s19951_s3 + $0x60] sm:$0xff]  ;;  %v9701_v63 = vld [vmem:[%s19951_s3 + $0x68] sm:$0xff] }
 0x2b9   : > { %v1208_v41 = vsel %vm1085_vm0, %v1205_v35, %v20076_v36  ;;  %v2160_v53 = vsel %vm1557_vm1, %v2157_v45, %v20075_v46  ;;  %v3385_v19 = vmul.f32 %v12912_v28, %v756_v59  ;;  %v3860_v56 = vmul.f32 %v12914_v29, %v756_v59 }
 0x2ba   : > { %v1206_v7 = vsel %vm1085_vm0, %v20449_v62, %v1205_v35  ;;  %v2158_v60 = vsel %vm1557_vm1, %v20450_v8, %v2157_v45  ;;  %v1379_v14 = vadd.f32 %v1208_v41, %v907_v61  ;;  %v3112_v12 = vrot.slane %v2897_v40, 4 }
 0x2bb   : > { %v1378_v62 = vadd.f32 %v1206_v7, %v16192_v0  ;;  %v1678_v45 = vsel %vm1557_vm1, %v1675_v54, %v1677_v34  ;;  %v1680_v0 = vsel %vm1557_vm1, %v1677_v34, %v20077_v44  ;;  %v2333_v61 = vadd.f32 %v2158_v60, %v16138_v32  ;;  %v771_v60 = vpop.permute.xlu1 %770 }
 0x2bc   : > { %v4336_v7 = vmul.f32 %v16358_v52, %v756_v59  ;;  %v2334_v8 = vadd.f32 %v2160_v53, %v16252_v58  ;;  %v20451_v46 = vrot.slane %v16185_v3, 3  ;;  %v20452_v54 = vrot.slane %v16324_v10, 3 }
 0x2bd   : > { %v16390_v35 = vld [vmem:[#allocation3 + $0x48] sm:$0xff]  ;;  %v3596_v30 = vrot.slane %v3385_v19, 4  ;;  %v4072_v34 = vrot.slane %v3860_v56, 5  ;;  %v11803_v44 = vpack.c.bf16 %v9701_v63, %v9700_v37  ;;  %v20453_v32 = vrot.slane %v16247_v6, 1 }
 0x2be   : > { %v20079_v40 = vrot.slane %v16390_v35, 1  ;;  %v20078_v41 = vrot.slane %v16390_v35, 2  ;;  %v2637_v15 = vsel %vm2522_vm2, %v20451_v46, %v2636_v33  ;;  %v2639_v36 = vsel %vm2522_vm2, %v2636_v33, %v20452_v54 }
 0x2bf   : > { %v20454_v53 = vrot.slane %v16247_v6, 2  ;;  %v16419_v58 = vadd.f32 %v1678_v45, %v1378_v62  ;;  %v16421_v46 = vadd.f32 %v1680_v0, %v1379_v14  ;;  %v20455_v56 = vrot.slane %v16188_v13, 4  ;;  %11804 = vmatpush3.bf16.msra.mxu0 %v11803_v44 }
 0x2c0   : > { %v5248_v59 = vsel %vm1085_vm0, %v20453_v32, %v20079_v40  ;;  %v20456_v19 = vrot.slane %v16199_v39, 4  ;;  %v20457_v6 = vrot.slane %v16342_v1, 4  ;;  %v4548_v63 = vrot.slane %v4336_v7, 6 }
 0x2c1   : > { %v5718_v3 = vsel %vm1557_vm1, %v20454_v53, %v20078_v41  ;;  %10638 = vmatmul.mubr.msk.f32.gmra.mrb[16].mxu1 %vm330_vm6, %v5248_v59  ;;  %v3113_v33 = vsel %vm2998_vm3, %v20455_v56, %v3112_v12  ;;  %v2814_v14 = vadd.f32 %v2637_v15, %v2333_v61  ;;  %v2815_v45 = vadd.f32 %v2639_v36, %v2334_v8 }
 0x2c2   : > { %10780 = vmatmul.mubr.msk.f32.gmra.mrb[16].mxu0 %vm330_vm6, %v5718_v3  ;;  %v3597_v37 = vsel %vm2998_vm3, %v20456_v19, %v3596_v30  ;;  %v3599_v62 = vsel %vm2998_vm3, %v3596_v30, %v20457_v6  ;;  %v20458_v13 = vrot.slane %v16202_v48, 5  ;;  %v20459_v39 = vrot.slane %v16346_v31, 5  ;;  %10640 = vmatprep.mubr.msk.f32.mxu1 %vm12720_vm7, %v20213_v9  ;;  %v766_v3 = vpop.permute.xlu0 %765 }
 0x2c3   : > { %v3777_v0 = vadd.f32 %v3597_v37, %v16180_v20  ;;  %v3778_v54 = vadd.f32 %v3599_v62, %v16328_v4  ;;  %v16443_v53 = vmul.f32 %v12896_v11, %v771_v60  ;;  %v16446_v30 = vmul.f32 %v12898_v17, %v771_v60  ;;  %10782 = vmatprep.mubr.msk.f32.mxu0 %vm12720_vm7, %v20213_v9 }
 0x2c4   : > { %v4073_v32 = vsel %vm3964_vm4, %v20458_v13, %v4072_v34  ;;  %v4075_v59 = vsel %vm3964_vm4, %v4072_v34, %v20459_v39  ;;  %v20460_v20 = vrot.slane %v16339_v49, 4  ;;  %v16454_v44 = vmul.f32 %v12904_v21, %v771_v60 }
 0x2c5   : > { %v4253_v48 = vadd.f32 %v4073_v32, %v3777_v0  ;;  %v4254_v36 = vadd.f32 %v4075_v59, %v3778_v54  ;;  %v20461_v61 = vrot.slane %v16211_v26, 6  ;;  %v20462_v8 = vrot.slane %v16361_v43, 6 }
 0x2c6   : > { %v3115_v4 = vsel %vm2998_vm3, %v3112_v12, %v20460_v20  ;;  %v16465_v34 = vmul.f32 %v12906_v22, %v771_v60  ;;  %v16468_v12 = vmul.f32 %v12910_v25, %v771_v60  ;;  %v20463_v56 = vmov 0.0|0.0  }
 0x2c7   : > { %v4549_v7 = vsel %vm4440_vm5, %v20461_v61, %v4548_v63  ;;  %v4551_v15 = vsel %vm4440_vm5, %v4548_v63, %v20462_v8  ;;  %11805 = vmatprep.subr.bf16.mxu0 %v20463_v56  ;;  %v3290_v19 = vadd.f32 %v3113_v33, %v2814_v14  ;;  %v16471_v37 = vadd.f32 %v3115_v4, %v2815_v45 }
 0x2c8   : > { %v4729_v6 = vadd.f32 %v4549_v7, %v4253_v48  ;;  %v4730_v26 = vadd.f32 %v4551_v15, %v4254_v36  ;;  %v16474_v62 = vmul.f32 %v12900_v18, %v771_v60  ;;  %v20080_v0 = vrot.slane %v16443_v53, 1 }
 0x2c9   : > { %v20082_v63 = vrot.slane %v16446_v30, 2  ;;  %v16479_v54 = vmul.f32 %v12912_v28, %v771_v60  ;;  %v20081_v33 = vrot.slane %v16454_v44, 2  ;;  %v991_v14 = vmul.f32 %v12896_v11, %v766_v3 }
 0x2ca   : > { %4807 = vst.msk [vmem:[#allocation2 + $0x1a8] sm:$0xff] %vm330_vm6, %v4729_v6  ;;  %4808 = vst.msk [vmem:[#allocation2 + $0x1b0] sm:$0xff] %vm330_vm6, %v4730_v26  ;;  %v1463_v45 = vmul.f32 %v12898_v17, %v766_v3  ;;  %v1947_v13 = vmul.f32 %v12904_v21, %v766_v3  ;;  %v2423_v59 = vmul.f32 %v12906_v22, %v766_v3  ;;  %v20464_v26 = vrot.slane %v16303_v38, 1 }
 0x2cb   : > { %v2899_v20 = vmul.f32 %v12910_v25, %v766_v3  ;;  %v16492_v4 = vmul.f32 %v12914_v29, %v771_v60  ;;  %v16495_v48 = vmul.f32 %v16358_v52, %v771_v60  ;;  %v1209_v36 = vrot.slane %v991_v14, 1 }
 0x2cc   : > { %v2161_v61 = vrot.slane %v1947_v13, 2  ;;  %v909_v7 = vmul.f32 %v12900_v18, %v766_v3  ;;  %v1681_v8 = vrot.slane %v1463_v45, 2  ;;  %v2640_v15 = vrot.slane %v2423_v59, 3 }
 0x2cd   : > { %v3387_v6 = vmul.f32 %v12912_v28, %v766_v3  ;;  %v1210_v41 = vsel %vm1085_vm0, %v20464_v26, %v1209_v36  ;;  %v1212_v40 = vsel %vm1085_vm0, %v1209_v36, %v20080_v0  ;;  %v3116_v39 = vrot.slane %v2899_v20, 4  ;;  %v20471_v36 = vld [vmem:[#allocation12_spill] sm:$0xff] }
 0x2ce   : > { %v3862_v60 = vmul.f32 %v12914_v29, %v766_v3  ;;  %v1380_v14 = vadd.f32 %v1210_v41, %v16335_v55  ;;  %v1381_v13 = vadd.f32 %v1212_v40, %v909_v7  ;;  %v20465_v32 = vrot.slane %v16321_v57, 2  ;;  %v20472_v26 = vld [vmem:[#allocation24_spill] sm:$0xff] }
 0x2cf   : > { %v2164_v38 = vsel %vm1557_vm1, %v2161_v61, %v20081_v33  ;;  %v4338_v20 = vmul.f32 %v16358_v52, %v766_v3  ;;  %v20466_v0 = vrot.slane %v16318_v24, 2  ;;  %v1684_v57 = vsel %vm1557_vm1, %v1681_v8, %v20082_v63  ;;  %v20469_v24 = vld [vmem:[#allocation16_spill] sm:$0xff] }
 0x2d0   : > { %v2162_v45 = vsel %vm1557_vm1, %v20465_v32, %v2161_v61  ;;  %v2336_v41 = vadd.f32 %v2164_v38, %v16419_v58  ;;  %v20467_v32 = vrot.slane %v16324_v10, 3  ;;  %v20468_v7 = vrot.slane %v16465_v34, 3 }
 0x2d1   : > { %v1682_v55 = vsel %vm1557_vm1, %v20466_v0, %v1681_v8  ;;  %v2335_v40 = vadd.f32 %v2162_v45, %v16326_v2  ;;  %v3600_v33 = vrot.slane %v3387_v6, 4  ;;  %v20470_v0 = vmax.f32 %v15509_v51, %v20469_v24  ;;  %v16537_v63 = vld [vmem:[#allocation2 + $0x1a0] ss:$2 sm:$0xff]  ;;  %v16539_v2 = vld [vmem:[#allocation2 + $0x1a1] ss:$2 sm:$0xff] }
 0x2d2   : > { %v2641_v61 = vsel %vm2522_vm2, %v20467_v32, %v2640_v15  ;;  %v2643_v3 = vsel %vm2522_vm2, %v2640_v15, %v20468_v7  ;;  %v20473_v59 = vmax.f32 %v20471_v36, %v20472_v26  ;;  %20474 = vst [vmem:[#allocation18_spill] sm:$0xff] %v16537_v63  ;;  %20475 = vst [vmem:[#allocation19_spill] sm:$0xff] %v16539_v2  ;;  %v20476_v45 = vrot.slane %v16339_v49, 4  ;;  %v16559_v49 = vld [vmem:[#allocation2 + $0x1b1] ss:$2 sm:$0xf] }
 0x2d3   : > { %v16541_v58 = vadd.f32 %v1682_v55, %v1380_v14  ;;  %v16543_v10 = vadd.f32 %v1684_v57, %v1381_v13  ;;  %v4076_v6 = vrot.slane %v3862_v60, 5  ;;  %v20477_v38 = vrot.slane %v16468_v12, 4  ;;  %v781_v13 = vpop.permute.xlu1 %780  ;;  %v16557_v57 = vld [vmem:[#allocation2 + $0x1b0] ss:$2 sm:$0xf]  ;;  %20481 = vst [vmem:[#allocation13_spill] sm:$0xff] %v16559_v49 }
 0x2d4   : > { %v4999_v8 = vmax.f32 %v20473_v59, %v20470_v0  ;;  %v3117_v15 = vsel %vm2998_vm3, %v20476_v45, %v3116_v39  ;;  %v20478_v26 = vrot.slane %v16342_v1, 4  ;;  %v20479_v36 = vrot.slane %v16479_v54, 4  ;;  %20480 = vst [vmem:[#allocation22_spill] sm:$0xff] %v16557_v57 }
 0x2d5   : > { %v3119_v51 = vsel %vm2998_vm3, %v3116_v39, %v20477_v38  ;;  %v4552_v55 = vrot.slane %v4338_v20, 6  ;;  %v2816_v32 = vadd.f32 %v2641_v61, %v2335_v40  ;;  %v2817_v60 = vadd.f32 %v2643_v3, %v2336_v41 }
 0x2d6   : > { %v3601_v59 = vsel %vm2998_vm3, %v20478_v26, %v3600_v33  ;;  %v3603_v14 = vsel %vm2998_vm3, %v3600_v33, %v20479_v36  ;;  %v20482_v39 = vrot.slane %v16346_v31, 5  ;;  %v20483_v33 = vrot.slane %v16492_v4, 5 }
 0x2d7   : > { %v3779_v7 = vadd.f32 %v3601_v59, %v16330_v27  ;;  %v3780_v24 = vadd.f32 %v3603_v14, %v3290_v19  ;;  %v5001_v45 = vadd.f32 %v16314_v23, %v4999_v8  ;;  %v16572_v40 = vmul.f32 %v12896_v11, %v781_v13 }
 0x2d8   : > { %v4077_v0 = vsel %vm3964_vm4, %v20482_v39, %v4076_v6  ;;  %v4079_v20 = vsel %vm3964_vm4, %v4076_v6, %v20483_v33  ;;  %v16575_v27 = vmul.f32 %v12898_v17, %v781_v13  ;;  %v20484_v31 = vrot.slane %v16361_v43, 6  ;;  %v776_v6 = vpop.permute.xlu0 %775 }
 0x2d9   : > { %v4255_v38 = vadd.f32 %v4077_v0, %v3779_v7  ;;  %v4256_v26 = vadd.f32 %v4079_v20, %v3780_v24  ;;  %v20485_v61 = vrot.slane %v16495_v48, 6  ;;  %v5003_v8 = vmax.f32 %v5001_v45, 0.0 }
 0x2da   : > { %v4553_v41 = vsel %vm4440_vm5, %v20484_v31, %v4552_v55  ;;  %v16586_v14 = vmul.f32 %v12904_v21, %v781_v13  ;;  %v16589_v7 = vmul.f32 %v12906_v22, %v781_v13  ;;  %v16591_v24 = vadd.f32 %v3117_v15, %v2816_v32 }
 0x2db   : > { %v4555_v3 = vsel %vm4440_vm5, %v4552_v55, %v20485_v61  ;;  %v4731_v59 = vadd.f32 %v4553_v41, %v4255_v38  ;;  %v16593_v39 = vadd.f32 %v3119_v51, %v2817_v60  ;;  %5005 = vst.msk [vmem:[#allocation3 + $0x55] sm:$0xff] %vm330_vm6, %v5003_v8  ;;  %v16597_v43 = vmul.f32 %v12900_v18, %v781_v13 }
 0x2dc   : > { %v4732_v36 = vadd.f32 %v4555_v3, %v4256_v26  ;;  %v16600_v55 = vmul.f32 %v12910_v25, %v781_v13  ;;  %v20084_v0 = vrot.slane %v16572_v40, 1  ;;  %v16607_v15 = vmul.f32 %v12912_v28, %v781_v13 }
 0x2dd   : > { %4809 = vst.msk [vmem:[#allocation2 + $0x1b8] sm:$0xff] %vm330_vm6, %v4731_v59  ;;  %v993_v51 = vmul.f32 %v12896_v11, %v776_v6  ;;  %v16611_v32 = vmul.f32 %v12914_v29, %v781_v13  ;;  %v1465_v60 = vmul.f32 %v12898_v17, %v776_v6  ;;  %v1949_v20 = vmul.f32 %v12904_v21, %v776_v6 }
 0x2de   : > { %4810 = vst.msk [vmem:[#allocation2 + $0x1c0] sm:$0xff] %vm330_vm6, %v4732_v36  ;;  %v2425_v45 = vmul.f32 %v12906_v22, %v776_v6  ;;  %v2901_v41 = vmul.f32 %v12910_v25, %v776_v6  ;;  %v16621_v3 = vmul.f32 %v16358_v52, %v781_v13  ;;  %v911_v36 = vmul.f32 %v12900_v18, %v776_v6 }
 0x2df   : > { %v1213_v31 = vrot.slane %v993_v51, 1  ;;  %v1685_v8 = vrot.slane %v1465_v60, 2  ;;  %v2165_v59 = vrot.slane %v1949_v20, 2  ;;  %v20486_v19 = vrot.slane %v16443_v53, 1 }
 0x2e0   : > { %v2644_v51 = vrot.slane %v2425_v45, 3  ;;  %v3389_v13 = vmul.f32 %v12912_v28, %v776_v6  ;;  %v3864_v60 = vmul.f32 %v12914_v29, %v776_v6  ;;  %v20487_v53 = vrot.slane %v16454_v44, 2 }
 0x2e1   : > { %v1214_v1 = vsel %vm1085_vm0, %v20486_v19, %v1213_v31  ;;  %v1216_v26 = vsel %vm1085_vm0, %v1213_v31, %v20084_v0  ;;  %v20488_v49 = vrot.slane %v16586_v14, 2  ;;  %v3120_v31 = vrot.slane %v2901_v41, 4 }
 0x2e2   : > { %v16634_v20 = vld [vmem:[#allocation3 + $0x50] sm:$0xff]  ;;  %v1382_v38 = vadd.f32 %v1214_v1, %v16474_v62  ;;  %v2166_v19 = vsel %vm1557_vm1, %v20487_v53, %v2165_v59  ;;  %v1383_v33 = vadd.f32 %v1216_v26, %v911_v36  ;;  %v20489_v57 = vrot.slane %v16446_v30, 2 }
 0x2e3   : > { %v2168_v45 = vsel %vm1557_vm1, %v2165_v59, %v20488_v49  ;;  %v20089_v0 = vrot.slane %v16634_v20, 1  ;;  %v20088_v61 = vrot.slane %v16634_v20, 2  ;;  %v20490_v62 = vrot.slane %v16575_v27, 2 }
 0x2e4   : > { %v1686_v2 = vsel %vm1557_vm1, %v20489_v57, %v1685_v8  ;;  %v2337_v1 = vadd.f32 %v2166_v19, %v16421_v46  ;;  %v2338_v53 = vadd.f32 %v2168_v45, %v16541_v58  ;;  %v20491_v49 = vrot.slane %v16465_v34, 3 }
 0x2e5   : > { %v1688_v44 = vsel %vm1557_vm1, %v1685_v8, %v20490_v62  ;;  %v20492_v26 = vrot.slane %v16390_v35, 1  ;;  %v20493_v57 = vrot.slane %v16390_v35, 2  ;;  %v3604_v59 = vrot.slane %v3389_v13, 4 }
 0x2e6   : > { %v2645_v41 = vsel %vm2522_vm2, %v20491_v49, %v2644_v51  ;;  %v4080_v46 = vrot.slane %v3864_v60, 5  ;;  %v20087_v34 = vrot.slane %v16621_v3, 6  ;;  %v16669_v58 = vadd.f32 %v1686_v2, %v1382_v38  ;;  %v791_v38 = vpop.permute.xlu1 %790 }
 0x2e7   : > { %v5250_v30 = vsel %vm1085_vm0, %v20492_v26, %v20089_v0  ;;  %v5720_v8 = vsel %vm1557_vm1, %v20493_v57, %v20088_v61  ;;  %v20494_v36 = vrot.slane %v16589_v7, 3  ;;  %v4340_v45 = vmul.f32 %v16358_v52, %v776_v6 }
 0x2e8   : > { %10641 = vmatmul.mubr.msk.f32.gmra.mrb[18].mxu1 %vm330_vm6, %v5250_v30  ;;  %10783 = vmatmul.mubr.msk.f32.gmra.mrb[18].mxu0 %vm330_vm6, %v5720_v8  ;;  %v16675_v62 = vadd.f32 %v1688_v44, %v1383_v33  ;;  %v20495_v35 = vrot.slane %v16468_v12, 4  ;;  %v20496_v60 = vrot.slane %v16479_v54, 4  ;;  %v20497_v26 = vrot.slane %v16607_v15, 4 }
 0x2e9   : > { %v2647_v19 = vsel %vm2522_vm2, %v2644_v51, %v20494_v36  ;;  %10643 = vmatprep.mubr.msk.f32.mxu1 %vm12720_vm7, %v20213_v9  ;;  %v2818_v51 = vadd.f32 %v2645_v41, %v2337_v1  ;;  %10785 = vmatprep.mubr.msk.f32.mxu0 %vm12720_vm7, %v20213_v9  ;;  %v20498_v54 = vrot.slane %v16492_v4, 5  ;;  %v20499_v30 = vrot.slane %v16611_v32, 5  ;;  %v20501_v36 = vld [vmem:[#allocation14_spill] sm:$0xff] }
 0x2ea   : > { %v3121_v13 = vsel %vm2998_vm3, %v20495_v35, %v3120_v31  ;;  %v3605_v49 = vsel %vm2998_vm3, %v20496_v60, %v3604_v59  ;;  %v3607_v2 = vsel %vm2998_vm3, %v3604_v59, %v20497_v26  ;;  %v2819_v6 = vadd.f32 %v2647_v19, %v2338_v53  ;;  %v20500_v59 = vld [vmem:[#allocation17_spill] sm:$0xff]  ;;  %v20504_v41 = vld [vmem:[#allocation26_spill] sm:$0xff] }
 0x2eb   : > { %v3781_v33 = vadd.f32 %v3605_v49, %v16471_v37  ;;  %v3782_v12 = vadd.f32 %v3607_v2, %v16591_v24  ;;  %v4081_v44 = vsel %vm3964_vm4, %v20498_v54, %v4080_v46  ;;  %v4083_v57 = vsel %vm3964_vm4, %v4080_v46, %v20499_v30  ;;  %v20503_v53 = vld [vmem:[#allocation25_spill] sm:$0xff] }
 0x2ec   : > { %v4556_v8 = vrot.slane %v4340_v45, 6  ;;  %v20502_v1 = vmax.f32 %v20500_v59, %v20501_v36  ;;  %v20505_v37 = vmax.f32 %v20503_v53, %v20504_v41  ;;  %v16705_v60 = vmul.f32 %v12896_v11, %v791_v38 }
 0x2ed   : > { %v4257_v24 = vadd.f32 %v4081_v44, %v3781_v33  ;;  %v4258_v35 = vadd.f32 %v4083_v57, %v3782_v12  ;;  %v16708_v4 = vmul.f32 %v12898_v17, %v791_v38  ;;  %v20506_v49 = vrot.slane %v16495_v48, 6  ;;  %v16720_v33 = vpop.permute.xlu0 %785 }
 0x2ee   : > { %v5000_v19 = vmax.f32 %v20505_v37, %v20502_v1  ;;  %v4559_v45 = vsel %vm4440_vm5, %v4556_v8, %v20087_v34  ;;  %v16718_v2 = vmul.f32 %v12904_v21, %v791_v38  ;;  %v20507_v12 = vrot.slane %v16600_v55, 4 }
 0x2ef   : > { %v4557_v46 = vsel %vm4440_vm5, %v20506_v49, %v4556_v8  ;;  %v16725_v44 = vadd.f32 %v3121_v13, %v2818_v51  ;;  %v4734_v30 = vadd.f32 %v4559_v45, %v4258_v35  ;;  %v16730_v8 = vmul.f32 %v12900_v18, %v791_v38 }
 0x2f0   : > { %v5002_v26 = vadd.f32 %v16314_v23, %v5000_v19  ;;  %v3123_v54 = vsel %vm2998_vm3, %v3120_v31, %v20507_v12  ;;  %v4733_v48 = vadd.f32 %v4557_v46, %v4257_v24  ;;  %v16733_v36 = vmul.f32 %v12906_v22, %v791_v38 }
 0x2f1   : > { %v16727_v57 = vadd.f32 %v3123_v54, %v2819_v6  ;;  %4812 = vst.msk [vmem:[#allocation2 + $0x1d0] sm:$0xff] %vm330_vm6, %v4734_v30  ;;  %v20090_v1 = vrot.slane %v16705_v60, 1  ;;  %v20092_v31 = vrot.slane %v16708_v4, 2  ;;  %v16740_v13 = vmul.f32 %v12910_v25, %v791_v38 }
 0x2f2   : > { %v5004_v59 = vmax.f32 %v5002_v26, 0.0  ;;  %4811 = vst.msk [vmem:[#allocation2 + $0x1c8] sm:$0xff] %vm330_vm6, %v4733_v48  ;;  %v995_v51 = vmul.f32 %v12896_v11, %v16720_v33  ;;  %v20091_v6 = vrot.slane %v16718_v2, 2  ;;  %v16747_v53 = vmul.f32 %v12912_v28, %v791_v38 }
 0x2f3   : > { %v16750_v41 = vmul.f32 %v12914_v29, %v791_v38  ;;  %v1467_v37 = vmul.f32 %v12898_v17, %v16720_v33  ;;  %v16755_v19 = vmul.f32 %v16358_v52, %v791_v38  ;;  %v913_v24 = vmul.f32 %v12900_v18, %v16720_v33 }
 0x2f4   : > { %5006 = vst.msk [vmem:[#allocation3 + $0x5d] sm:$0xf] %vm355_vm8, %v5004_v59  ;;  %v1217_v35 = vrot.slane %v995_v51, 1  ;;  %v1951_v49 = vmul.f32 %v12904_v21, %v16720_v33  ;;  %v20096_v46 = vrot.slane %v16733_v36, 3  ;;  %v2427_v26 = vmul.f32 %v12906_v22, %v16720_v33 }
 0x2f5   : > { %v1689_v45 = vrot.slane %v1467_v37, 2  ;;  %v2903_v12 = vmul.f32 %v12910_v25, %v16720_v33  ;;  %v20508_v38 = vrot.slane %v16572_v40, 1  ;;  %v3391_v34 = vmul.f32 %v12912_v28, %v16720_v33 }
 0x2f6   : > { %v1220_v30 = vsel %vm1085_vm0, %v1217_v35, %v20090_v1  ;;  %v2169_v59 = vrot.slane %v1951_v49, 2  ;;  %v3866_v61 = vmul.f32 %v12914_v29, %v16720_v33  ;;  %v20509_v0 = vrot.slane %v16586_v14, 2 }
 0x2f7   : > { %v1218_v48 = vsel %vm1085_vm0, %v20508_v38, %v1217_v35  ;;  %v1385_v37 = vadd.f32 %v1220_v30, %v913_v24  ;;  %v2648_v54 = vrot.slane %v2427_v26, 3  ;;  %v3124_v35 = vrot.slane %v2903_v12, 4 }
 0x2f8   : > { %v1384_v51 = vadd.f32 %v1218_v48, %v16597_v43  ;;  %v2170_v40 = vsel %vm1557_vm1, %v20509_v0, %v2169_v59  ;;  %v2172_v38 = vsel %vm1557_vm1, %v2169_v59, %v20091_v6  ;;  %v20511_v48 = vrot.slane %v16575_v27, 2 }
 0x2f9   : > { %v16784_v49 = vld [vmem:[#allocation2 + $0x1ba] ss:$2 sm:$0xff]  ;;  %v1692_v14 = vsel %vm1557_vm1, %v1689_v45, %v20092_v31  ;;  %v16794_v0 = vld [vmem:[#allocation2 + $0x1ca] ss:$2 sm:$0xf]  ;;  %v2339_v6 = vadd.f32 %v2170_v40, %v16543_v10  ;;  %v2340_v27 = vadd.f32 %v2172_v38, %v16669_v58  ;;  %v20515_v31 = vrot.slane %v16589_v7, 3 }
 0x2fa   : > { %20510 = vst [vmem:[#allocation11_spill] sm:$0xff] %v16784_v49  ;;  %v1690_v30 = vsel %vm1557_vm1, %v20511_v48, %v1689_v45  ;;  %20512 = vst [vmem:[#allocation21_spill] sm:$0xff] %v16794_v0  ;;  %v16796_v1 = vld [vmem:[#allocation2 + $0x1bb] ss:$2 sm:$0xff]  ;;  %v16802_v59 = vadd.f32 %v1692_v14, %v1385_v37  ;;  %v20516_v37 = vrot.slane %v16600_v55, 4  ;;  %v20517_v58 = vrot.slane %v16740_v13, 4 }
 0x2fb   : > { %20513 = vst [vmem:[#allocation23_spill] sm:$0xff] %v16796_v1  ;;  %v16798_v26 = vld [vmem:[#allocation3 + $0x58] sm:$0xff]  ;;  %v16800_v12 = vadd.f32 %v1690_v30, %v1384_v51  ;;  %v2649_v43 = vsel %vm2522_vm2, %v20515_v31, %v2648_v54  ;;  %v2651_v51 = vsel %vm2522_vm2, %v2648_v54, %v20096_v46  ;;  %v3608_v38 = vrot.slane %v3391_v34, 4  ;;  %v801_v34 = vpop.permute.xlu1 %800 }
 0x2fc   : > { %v16806_v24 = vld [vmem:[#allocation2 + $0x1cb] ss:$2 sm:$0xf]  ;;  %v20094_v48 = vrot.slane %v16798_v26, 1  ;;  %v20093_v45 = vrot.slane %v16798_v26, 2  ;;  %v3125_v10 = vsel %vm2998_vm3, %v20516_v37, %v3124_v35  ;;  %v3127_v40 = vsel %vm2998_vm3, %v3124_v35, %v20517_v58 }
 0x2fd   : > { %20514 = vst [vmem:[#allocation16_spill] sm:$0xff] %v16806_v24  ;;  %v4084_v30 = vrot.slane %v3866_v61, 5  ;;  %v20518_v7 = vrot.slane %v16634_v20, 1  ;;  %v20519_v55 = vrot.slane %v16634_v20, 2  ;;  %v4342_v35 = vmul.f32 %v16358_v52, %v16720_v33 }
 0x2fe   : > { %v20095_v37 = vrot.slane %v16755_v19, 6  ;;  %v2820_v58 = vadd.f32 %v2649_v43, %v2339_v6  ;;  %v2821_v14 = vadd.f32 %v2651_v51, %v2340_v27  ;;  %v20522_v61 = vrot.slane %v16611_v32, 5 }
 0x2ff   : > { %v5252_v31 = vsel %vm1085_vm0, %v20518_v7, %v20094_v48  ;;  %v5722_v54 = vsel %vm1557_vm1, %v20519_v55, %v20093_v45  ;;  %v20520_v7 = vrot.slane %v16607_v15, 4  ;;  %v20521_v55 = vrot.slane %v16747_v53, 4  ;;  %v811_v63 = vpop.permute.xlu1 %810 }
 0x300   : > { %10644 = vmatmul.mubr.msk.f32.gmra.mrb[20].mxu1 %vm330_vm6, %v5252_v31  ;;  %10786 = vmatmul.mubr.msk.f32.gmra.mrb[20].mxu0 %vm330_vm6, %v5722_v54  ;;  %v4085_v31 = vsel %vm3964_vm4, %v20522_v61, %v4084_v30  ;;  %v4560_v43 = vrot.slane %v4342_v35, 6  ;;  %v16855_v15 = vmul.f32 %v12896_v11, %v801_v34  ;;  %v16858_v27 = vmul.f32 %v12898_v17, %v801_v34 }
 0x301   : > { %v3609_v20 = vsel %vm2998_vm3, %v20520_v7, %v3608_v38  ;;  %v3611_v33 = vsel %vm2998_vm3, %v3608_v38, %v20521_v55  ;;  %10646 = vmatprep.mubr.msk.f32.mxu1 %vm12720_vm7, %v20213_v9  ;;  %10788 = vmatprep.mubr.msk.f32.mxu0 %vm12720_vm7, %v20213_v9  ;;  %v16866_v38 = vmul.f32 %v12904_v21, %v801_v34  ;;  %v20524_v35 = vrot.slane %v16621_v3, 6  ;;  %v796_v55 = vpop.permute.xlu0 %795 }
 0x302   : > { %v3783_v45 = vadd.f32 %v3609_v20, %v16593_v39  ;;  %v3784_v6 = vadd.f32 %v3611_v33, %v16725_v44  ;;  %v20523_v39 = vrot.slane %v16750_v41, 5  ;;  %v16869_v44 = vmul.f32 %v12906_v22, %v801_v34 }
 0x303   : > { %v4561_v61 = vsel %vm4440_vm5, %v20524_v35, %v4560_v43  ;;  %v16875_v7 = vmul.f32 %v12900_v18, %v801_v34  ;;  %v16878_v20 = vmul.f32 %v12910_v25, %v801_v34  ;;  %v4563_v33 = vsel %vm4440_vm5, %v4560_v43, %v20095_v37 }
 0x304   : > { %v4087_v32 = vsel %vm3964_vm4, %v4084_v30, %v20523_v39  ;;  %v4259_v51 = vadd.f32 %v4085_v31, %v3783_v45  ;;  %v3296_v30 = vadd.f32 %v3125_v10, %v2820_v58  ;;  %v16880_v45 = vadd.f32 %v3127_v40, %v2821_v14 }
 0x305   : > { %v4260_v54 = vadd.f32 %v4087_v32, %v3784_v6  ;;  %v20100_v3 = vrot.slane %v16855_v15, 1  ;;  %v16888_v32 = vmul.f32 %v12912_v28, %v801_v34  ;;  %v997_v40 = vmul.f32 %v12896_v11, %v796_v55 }
 0x306   : > { %v4735_v31 = vadd.f32 %v4561_v61, %v4259_v51  ;;  %v1469_v14 = vmul.f32 %v12898_v17, %v796_v55  ;;  %v16898_v43 = vmul.f32 %v12914_v29, %v801_v34  ;;  %v1953_v51 = vmul.f32 %v12904_v21, %v796_v55 }
 0x307   : > { %v4736_v6 = vadd.f32 %v4563_v33, %v4260_v54  ;;  %v2429_v54 = vmul.f32 %v12906_v22, %v796_v55  ;;  %v16904_v33 = vmul.f32 %v16358_v52, %v801_v34  ;;  %v1221_v48 = vrot.slane %v997_v40, 1 }
 0x308   : > { %4813 = vst.msk [vmem:[#allocation2 + $0x1d8] sm:$0xff] %vm330_vm6, %v4735_v31  ;;  %v915_v31 = vmul.f32 %v12900_v18, %v796_v55  ;;  %v1693_v37 = vrot.slane %v1469_v14, 2  ;;  %v2173_v10 = vrot.slane %v1953_v51, 2  ;;  %v3393_v58 = vmul.f32 %v12912_v28, %v796_v55 }
 0x309   : > { %4814 = vst.msk [vmem:[#allocation2 + $0x1e0] sm:$0xff] %vm330_vm6, %v4736_v6  ;;  %v2905_v6 = vmul.f32 %v12910_v25, %v796_v55  ;;  %v20525_v46 = vrot.slane %v16705_v60, 1  ;;  %v1224_v61 = vsel %vm1085_vm0, %v1221_v48, %v20100_v3  ;;  %v2652_v35 = vrot.slane %v2429_v54, 3 }
 0x30a   : > { %v3868_v34 = vmul.f32 %v12914_v29, %v796_v55  ;;  %v1387_v40 = vadd.f32 %v1224_v61, %v915_v31  ;;  %v20526_v14 = vrot.slane %v16718_v2, 2  ;;  %v20527_v0 = vrot.slane %v16866_v38, 2 }
 0x30b   : > { %v1222_v39 = vsel %vm1085_vm0, %v20525_v46, %v1221_v48  ;;  %v20528_v3 = vrot.slane %v16708_v4, 2  ;;  %v20529_v2 = vrot.slane %v16858_v27, 2  ;;  %v3128_v61 = vrot.slane %v2905_v6, 4 }
 0x30c   : > { %v1386_v24 = vadd.f32 %v1222_v39, %v16730_v8  ;;  %v2174_v51 = vsel %vm1557_vm1, %v20526_v14, %v2173_v10  ;;  %v2176_v60 = vsel %vm1557_vm1, %v2173_v10, %v20527_v0  ;;  %v3612_v31 = vrot.slane %v3393_v58, 4 }
 0x30d   : > { %v2341_v48 = vadd.f32 %v2174_v51, %v16675_v62  ;;  %v2342_v54 = vadd.f32 %v2176_v60, %v16800_v12  ;;  %v1694_v8 = vsel %vm1557_vm1, %v20528_v3, %v1693_v37  ;;  %v1696_v39 = vsel %vm1557_vm1, %v1693_v37, %v20529_v2 }
 0x30e   : > { %v20532_v10 = vrot.slane %v16733_v36, 3  ;;  %v20533_v12 = vrot.slane %v16869_v44, 3  ;;  %v4088_v51 = vrot.slane %v3868_v34, 5  ;;  %v4344_v3 = vmul.f32 %v16358_v52, %v796_v55 }
 0x30f   : > { %v16944_v60 = vadd.f32 %v1694_v8, %v1386_v24  ;;  %v16946_v37 = vadd.f32 %v1696_v39, %v1387_v40  ;;  %v20534_v6 = vrot.slane %v16747_v53, 4  ;;  %v20535_v46 = vrot.slane %v16888_v32, 4 }
 0x310   : > { %v16933_v14 = vld [vmem:[#allocation2 + $0x1d4] ss:$2 sm:$0xff]  ;;  %v16935_v0 = vld [vmem:[#allocation2 + $0x1d5] ss:$2 sm:$0xff]  ;;  %v2653_v62 = vsel %vm2522_vm2, %v20532_v10, %v2652_v35  ;;  %v2655_v4 = vsel %vm2522_vm2, %v2652_v35, %v20533_v12  ;;  %v20536_v24 = vrot.slane %v16740_v13, 4  ;;  %v20537_v53 = vrot.slane %v16750_v41, 5 }
 0x311   : > { %20530 = vst [vmem:[#allocation12_spill] sm:$0xff] %v16933_v14  ;;  %20531 = vst [vmem:[#allocation24_spill] sm:$0xff] %v16935_v0  ;;  %v2822_v58 = vadd.f32 %v2653_v62, %v2341_v48  ;;  %v3613_v2 = vsel %vm2998_vm3, %v20534_v6, %v3612_v31  ;;  %v2823_v10 = vadd.f32 %v2655_v4, %v2342_v54  ;;  %v4564_v8 = vrot.slane %v4344_v3, 6 }
 0x312   : > { %v3615_v35 = vsel %vm2998_vm3, %v3612_v31, %v20535_v46  ;;  %v3785_v55 = vadd.f32 %v3613_v2, %v16727_v57  ;;  %v3129_v34 = vsel %vm2998_vm3, %v20536_v24, %v3128_v61  ;;  %v4089_v48 = vsel %vm3964_vm4, %v20537_v53, %v4088_v51 }
 0x313   : > { %v3786_v40 = vadd.f32 %v3615_v35, %v3296_v30  ;;  %v20538_v39 = vrot.slane %v16898_v43, 5  ;;  %v16967_v12 = vmul.f32 %v12896_v11, %v811_v63  ;;  %v16970_v57 = vmul.f32 %v12898_v17, %v811_v63 }
 0x314   : > { %v4261_v62 = vadd.f32 %v4089_v48, %v3785_v55  ;;  %v20539_v13 = vrot.slane %v16878_v20, 4  ;;  %v20540_v41 = vrot.slane %v16755_v19, 6  ;;  %v16979_v4 = vmul.f32 %v12904_v21, %v811_v63  ;;  %v806_v55 = vpop.permute.xlu0 %805 }
 0x315   : > { %v4091_v54 = vsel %vm3964_vm4, %v4088_v51, %v20538_v39  ;;  %v16981_v51 = vadd.f32 %v3129_v34, %v2822_v58  ;;  %v20541_v3 = vrot.slane %v16904_v33, 6  ;;  %v16987_v35 = vmul.f32 %v12906_v22, %v811_v63 }
 0x316   : > { %v3131_v30 = vsel %vm2998_vm3, %v3128_v61, %v20539_v13  ;;  %v4262_v46 = vadd.f32 %v4091_v54, %v3786_v40  ;;  %v4565_v31 = vsel %vm4440_vm5, %v20540_v41, %v4564_v8  ;;  %v16992_v19 = vmul.f32 %v12910_v25, %v811_v63 }
 0x317   : > { %v4567_v6 = vsel %vm4440_vm5, %v4564_v8, %v20541_v3  ;;  %v4737_v2 = vadd.f32 %v4565_v31, %v4261_v62  ;;  %v16989_v61 = vadd.f32 %v3131_v30, %v2823_v10  ;;  %v16995_v40 = vmul.f32 %v12912_v28, %v811_v63 }
 0x318   : > { %v4738_v24 = vadd.f32 %v4567_v6, %v4262_v46  ;;  %v20102_v58 = vrot.slane %v16967_v12, 1  ;;  %v17001_v53 = vmul.f32 %v12914_v29, %v811_v63  ;;  %v17004_v48 = vmul.f32 %v16358_v52, %v811_v63 }
 0x319   : > { %4815 = vst.msk [vmem:[#allocation2 + $0x1e8] sm:$0xff] %vm330_vm6, %v4737_v2  ;;  %v999_v39 = vmul.f32 %v12896_v11, %v806_v55  ;;  %v1471_v54 = vmul.f32 %v12898_v17, %v806_v55  ;;  %v917_v13 = vmul.f32 %v12900_v18, %v806_v55  ;;  %v1955_v30 = vmul.f32 %v12904_v21, %v806_v55 }
 0x31a   : > { %4816 = vst.msk [vmem:[#allocation2 + $0x1f0] sm:$0xff] %vm330_vm6, %v4738_v24  ;;  %v2431_v46 = vmul.f32 %v12906_v22, %v806_v55  ;;  %v2907_v8 = vmul.f32 %v12910_v25, %v806_v55  ;;  %v20542_v62 = vrot.slane %v16855_v15, 1  ;;  %v3395_v41 = vmul.f32 %v12912_v28, %v806_v55 }
 0x31b   : > { %v1225_v6 = vrot.slane %v999_v39, 1  ;;  %v1697_v2 = vrot.slane %v1471_v54, 2  ;;  %v2177_v24 = vrot.slane %v1955_v30, 2  ;;  %v3870_v31 = vmul.f32 %v12914_v29, %v806_v55 }
 0x31c   : > { %v2656_v36 = vrot.slane %v2431_v46, 3  ;;  %v20543_v54 = vrot.slane %v16866_v38, 2  ;;  %v20544_v46 = vrot.slane %v16979_v4, 2  ;;  %v20547_v38 = vrot.slane %v16858_v27, 2 }
 0x31d   : > { %v1226_v34 = vsel %vm1085_vm0, %v20542_v62, %v1225_v6  ;;  %v1228_v10 = vsel %vm1085_vm0, %v1225_v6, %v20102_v58  ;;  %v17039_v6 = vmul.f32 %v12900_v18, %v811_v63  ;;  %v3132_v63 = vrot.slane %v2907_v8, 4 }
 0x31e   : > { %v1388_v3 = vadd.f32 %v1226_v34, %v16875_v7  ;;  %v1389_v39 = vadd.f32 %v1228_v10, %v917_v13  ;;  %v2178_v30 = vsel %vm1557_vm1, %v20543_v54, %v2177_v24  ;;  %v2180_v15 = vsel %vm1557_vm1, %v2177_v24, %v20544_v46 }
 0x31f   : > { %v2343_v58 = vadd.f32 %v2178_v30, %v16802_v59  ;;  %v2344_v7 = vadd.f32 %v2180_v15, %v16944_v60  ;;  %v4346_v34 = vmul.f32 %v16358_v52, %v806_v55  ;;  %v1698_v10 = vsel %vm1557_vm1, %v20547_v38, %v1697_v2 }
 0x320   : > { %v17034_v62 = vld [vmem:[#allocation2 + $0x1e4] ss:$2 sm:$0xf]  ;;  %v17036_v0 = vld [vmem:[#allocation2 + $0x1e5] ss:$2 sm:$0xf]  ;;  %v17058_v15 = vadd.f32 %v1698_v10, %v1388_v3  ;;  %v821_v3 = vpop.permute.xlu1 %820 }
 0x321   : > { %20545 = vst [vmem:[#allocation17_spill] sm:$0xff] %v17034_v62  ;;  %20546 = vst [vmem:[#allocation14_spill] sm:$0xff] %v17036_v0  ;;  %v20548_v13 = vrot.slane %v16970_v57, 2  ;;  %v20549_v54 = vrot.slane %v16869_v44, 3  ;;  %v20550_v14 = vrot.slane %v16987_v35, 3  ;;  %v3616_v30 = vrot.slane %v3395_v41, 4 }
 0x322   : > { %v4092_v55 = vrot.slane %v3870_v31, 5  ;;  %v4568_v31 = vrot.slane %v4346_v34, 6  ;;  %v20561_v34 = vrot.slane %v17001_v53, 5 }
 0x323   : > { %v1700_v24 = vsel %vm1557_vm1, %v1697_v2, %v20548_v13  ;;  %v2657_v46 = vsel %vm2522_vm2, %v20549_v54, %v2656_v36  ;;  %v2659_v59 = vsel %vm2522_vm2, %v2656_v36, %v20550_v14  ;;  %v20551_v2 = vld [vmem:[#allocation20_spill] sm:$0xff]  ;;  %v20553_v13 = vld [vmem:[#allocation15_spill] sm:$0xff]  ;;  %v20556_v14 = vrot.slane %v16888_v32, 4 }
 0x324   : > { %v2824_v60 = vadd.f32 %v2657_v46, %v2343_v58  ;;  %v17060_v38 = vadd.f32 %v1700_v24, %v1389_v39  ;;  %v20552_v44 = vmax.f32 %v15880_v47, %v20551_v2  ;;  %v20554_v54 = vld [vmem:[#allocation27_spill] sm:$0xff]  ;;  %v2825_v49 = vadd.f32 %v2659_v59, %v2344_v7  ;;  %v17173_v62 = vpop.permute.xlu1 %830 }
 0x325   : > { %v20555_v8 = vmax.f32 %v20553_v13, %v20554_v54  ;;  %v3617_v36 = vsel %vm2998_vm3, %v20556_v14, %v3616_v30  ;;  %v20557_v58 = vrot.slane %v16995_v40, 4  ;;  %v20558_v39 = vrot.slane %v16878_v20, 4  ;;  %20568 = vst [vmem:[#allocation20_spill] sm:$0xff] %v17173_v62 }
 0x326   : > { %v20559_v47 = vrot.slane %v16992_v19, 4  ;;  %v3787_v7 = vadd.f32 %v3617_v36, %v16880_v45  ;;  %v20560_v59 = vrot.slane %v16898_v43, 5  ;;  %v4095_v20 = vsel %vm3964_vm4, %v4092_v55, %v20561_v34 }
 0x327   : > { %v5027_v1 = vmax.f32 %v20555_v8, %v20552_v44  ;;  %v3619_v41 = vsel %vm2998_vm3, %v3616_v30, %v20557_v58  ;;  %v3133_v10 = vsel %vm2998_vm3, %v20558_v39, %v3132_v63  ;;  %v17095_v45 = vmul.f32 %v12898_v17, %v821_v3 }
 0x328   : > { %v3135_v24 = vsel %vm2998_vm3, %v3132_v63, %v20559_v47  ;;  %v3788_v32 = vadd.f32 %v3619_v41, %v16981_v51  ;;  %v17082_v46 = vadd.f32 %v3133_v10, %v2824_v60  ;;  %v4093_v30 = vsel %vm3964_vm4, %v20560_v59, %v4092_v55  ;;  %v5010_v10 = vld [vmem:[#allocation2 + $0x148] ss:$2 sm:$0xf] }
 0x329   : > { %v5029_v2 = vadd.f32 %v16314_v23, %v5027_v1  ;;  %v4263_v44 = vadd.f32 %v4093_v30, %v3787_v7  ;;  %v17092_v63 = vmul.f32 %v12896_v11, %v821_v3  ;;  %v20563_v51 = vrot.slane %v16904_v33, 6  ;;  %v816_v23 = vpop.permute.xlu0 %815 }
 0x32a   : > { %v4264_v13 = vadd.f32 %v4095_v20, %v3788_v32  ;;  %v20564_v60 = vrot.slane %v17004_v48, 6  ;;  %v17104_v55 = vmul.f32 %v12904_v21, %v821_v3  ;;  %v17107_v36 = vmul.f32 %v12906_v22, %v821_v3 }
 0x32b   : > { %20562 = vst [vmem:[#allocation25_spill] sm:$0xff] %v17092_v63  ;;  %v4569_v43 = vsel %vm4440_vm5, %v20563_v51, %v4568_v31  ;;  %v5031_v8 = vmax.f32 %v5029_v2, 0.0  ;;  %v17110_v58 = vmul.f32 %v12910_v25, %v821_v3  ;;  %v17112_v33 = vadd.f32 %v3135_v24, %v2825_v49 }
 0x32c   : > { %v4571_v54 = vsel %vm4440_vm5, %v4568_v31, %v20564_v60  ;;  %v4739_v1 = vadd.f32 %v4569_v43, %v4263_v44  ;;  %v17116_v41 = vmul.f32 %v12900_v18, %v821_v3  ;;  %v20107_v31 = vrot.slane %v17092_v63, 1  ;;  %v5018_v44 = vld [vmem:[#allocation2 + $0x162] ss:$2 sm:$0xf] }
 0x32d   : > { %v4740_v14 = vadd.f32 %v4571_v54, %v4264_v13  ;;  %5033 = vst.msk [vmem:[#allocation3 + $0x63] sm:$0xff] %vm330_vm6, %v5031_v8  ;;  %v17120_v39 = vmul.f32 %v12912_v28, %v821_v3  ;;  %v17126_v47 = vmul.f32 %v12914_v29, %v821_v3  ;;  %v17129_v49 = vmul.f32 %v16358_v52, %v821_v3  ;;  %v5022_v54 = vld [vmem:[#allocation2 + $0x163] ss:$2 sm:$0xf] }
 0x32e   : > { %20565 = vst [vmem:[#allocation26_spill] sm:$0xff] %v17116_v41  ;;  %4817 = vst.msk [vmem:[#allocation2 + $0x1f8] sm:$0xff] %vm330_vm6, %v4739_v1  ;;  %v17132_v24 = vmul.f32 %v12896_v11, %v816_v23  ;;  %v20109_v7 = vrot.slane %v17104_v55, 2  ;;  %v17136_v32 = vmul.f32 %v12898_v17, %v816_v23  ;;  %v1957_v59 = vmul.f32 %v12904_v21, %v816_v23  ;;  %v5014_v8 = vld [vmem:[#allocation2 + $0x149] ss:$2 sm:$0xf] }
 0x32f   : > { %4818 = vst.msk [vmem:[#allocation2 + $0x200] sm:$0xff] %vm330_vm6, %v4740_v14  ;;  %v2433_v30 = vmul.f32 %v12906_v22, %v816_v23  ;;  %v2909_v3 = vmul.f32 %v12910_v25, %v816_v23  ;;  %v919_v51 = vmul.f32 %v12900_v18, %v816_v23  ;;  %v20566_v13 = vrot.slane %v16979_v4, 2 }
 0x330   : > { %v20108_v2 = vrot.slane %v17132_v24, 1  ;;  %v2181_v43 = vrot.slane %v1957_v59, 2  ;;  %v3397_v1 = vmul.f32 %v12912_v28, %v816_v23  ;;  %v4348_v20 = vmul.f32 %v16358_v52, %v816_v23 }
 0x331   : > { %v2660_v60 = vrot.slane %v2433_v30, 3  ;;  %v3136_v27 = vrot.slane %v2909_v3, 4  ;;  %v17206_v63 = vmul.f32 %v12896_v11, %v17173_v62 }
 0x332   : > { %v1232_v14 = vsel %vm1085_vm0, %v20108_v2, %v20107_v31  ;;  %v2182_v59 = vsel %vm1557_vm1, %v20566_v13, %v2181_v43  ;;  %v2184_v30 = vsel %vm1557_vm1, %v2181_v43, %v20109_v7  ;;  %v3872_v31 = vmul.f32 %v12914_v29, %v816_v23 }
 0x333   : > { %v2345_v0 = vadd.f32 %v2182_v59, %v16946_v37  ;;  %v2346_v3 = vadd.f32 %v2184_v30, %v17058_v15  ;;  %v17168_v13 = vadd.f32 %v1232_v14, %v919_v51  ;;  %v20567_v2 = vrot.slane %v16987_v35, 3 }
 0x334   : > { %v17161_v34 = vld [vmem:[#allocation3 + $0x60] sm:$0xff]  ;;  %v5026_v7 = vmax.f32 %v5018_v44, %v5022_v54  ;;  %v20571_v59 = vrot.slane %v17107_v36, 3  ;;  %v20572_v23 = vrot.slane %v16992_v19, 4  ;;  %v20573_v35 = vrot.slane %v17110_v58, 4 }
 0x335   : > { %v20112_v4 = vrot.slane %v17161_v34, 1  ;;  %v2661_v43 = vsel %vm2522_vm2, %v20567_v2, %v2660_v60  ;;  %v17175_v56 = vld [vmem:[#allocation2 + $0x1ee] ss:$2 sm:$0xff]  ;;  %v17189_v44 = vld [vmem:[#allocation2 + $0x1ef] ss:$2 sm:$0xff]  ;;  %v20576_v14 = vrot.slane %v16798_v26, 1 }
 0x336   : > { %20569 = vst [vmem:[#allocation15_spill] sm:$0xff] %v17175_v56  ;;  %v17177_v37 = vld [vmem:[#allocation2 + $0x1fe] ss:$2 sm:$0xf]  ;;  %v2663_v52 = vsel %vm2522_vm2, %v2660_v60, %v20571_v59  ;;  %v3137_v51 = vsel %vm2998_vm3, %v20572_v23, %v3136_v27  ;;  %v3139_v2 = vsel %vm2998_vm3, %v3136_v27, %v20573_v35  ;;  %20574 = vst [vmem:[#allocation28_spill] sm:$0xff] %v17189_v44  ;;  %v3620_v60 = vrot.slane %v3397_v1, 4 }
 0x337   : > { %20570 = vst [vmem:[#allocation27_spill] sm:$0xff] %v17177_v37  ;;  %v17191_v54 = vld [vmem:[#allocation2 + $0x1ff] ss:$2 sm:$0xf]  ;;  %v5254_v30 = vsel %vm1085_vm0, %v20576_v14, %v20112_v4  ;;  %v2826_v15 = vadd.f32 %v2661_v43, %v2345_v0  ;;  %v5024_v59 = vmax.f32 %v5010_v10, %v5014_v8  ;;  %v20577_v19 = vrot.slane %v17161_v34, 2 }
 0x338   : > { %20575 = vst [vmem:[#allocation29_spill] sm:$0xff] %v17191_v54  ;;  %10647 = vmatmul.mubr.msk.f32.gmra.mrb[22].mxu1 %vm330_vm6, %v5254_v30  ;;  %v20578_v23 = vrot.slane %v16798_v26, 2  ;;  %v2827_v35 = vadd.f32 %v2663_v52, %v2346_v3  ;;  %v4096_v41 = vrot.slane %v3872_v31, 5  ;;  %v20579_v0 = vrot.slane %v16995_v40, 4 }
 0x339   : > { %10649 = vmatprep.mubr.msk.f32.mxu1 %vm12720_vm7, %v20213_v9  ;;  %v20580_v8 = vrot.slane %v17120_v39, 4  ;;  %v4572_v1 = vrot.slane %v4348_v20, 6  ;;  %v5028_v3 = vmax.f32 %v5024_v59, %v5026_v7  ;;  %v20581_v14 = vrot.slane %v17001_v53, 5 }
 0x33a   : > { %v5724_v27 = vsel %vm1557_vm1, %v20578_v23, %v20577_v19  ;;  %v3621_v10 = vsel %vm2998_vm3, %v20579_v0, %v3620_v60  ;;  %v20582_v20 = vrot.slane %v17126_v47, 5  ;;  %v17237_v19 = vld [vmem:[%s19950_s2] ss:$0 sm:$0xff]  ;;  %v17242_v53 = vmul.f32 %v12898_v17, %v17173_v62 }
 0x33b   : > { %10789 = vmatmul.mubr.msk.f32.gmra.mrb[22].mxu0 %vm330_vm6, %v5724_v27  ;;  %v3623_v26 = vsel %vm2998_vm3, %v3620_v60, %v20580_v8  ;;  %v3789_v52 = vadd.f32 %v3621_v10, %v16989_v61  ;;  %v4097_v30 = vsel %vm3964_vm4, %v20581_v14, %v4096_v41  ;;  %v20583_v60 = vrot.slane %v17004_v48, 6  ;;  %v17248_v48 = vpop.permute.xlu0 %825 }
 0x33c   : > { %10791 = vmatprep.mubr.msk.f32.mxu0 %vm12720_vm7, %v20213_v9  ;;  %v3790_v40 = vadd.f32 %v3623_v26, %v17082_v46  ;;  %v4099_v7 = vsel %vm3964_vm4, %v4096_v41, %v20582_v20  ;;  %v5030_v61 = vadd.f32 %v17237_v19, %v5028_v3  ;;  %v17246_v41 = vmul.f32 %v12904_v21, %v17173_v62 }
 0x33d   : > { %v4573_v59 = vsel %vm4440_vm5, %v20583_v60, %v4572_v1  ;;  %v4265_v46 = vadd.f32 %v4097_v30, %v3789_v52  ;;  %v20584_v27 = vrot.slane %v17129_v49, 6  ;;  %v17255_v8 = vmul.f32 %v12906_v22, %v17173_v62 }
 0x33e   : > { %v4266_v23 = vadd.f32 %v4099_v7, %v3790_v40  ;;  %v5032_v10 = vmax.f32 %v5030_v61, 0.0  ;;  %v17259_v26 = vmul.f32 %v12910_v25, %v17173_v62  ;;  %v3302_v3 = vadd.f32 %v3137_v51, %v2826_v15 }
 0x33f   : > { %v4575_v0 = vsel %vm4440_vm5, %v4572_v1, %v20584_v27  ;;  %v4741_v52 = vadd.f32 %v4573_v59, %v4265_v46  ;;  %v17263_v14 = vmul.f32 %v12912_v28, %v17173_v62  ;;  %v17265_v30 = vadd.f32 %v3139_v2, %v2827_v35  ;;  %v17281_v2 = vld [vmem:[%s19949_s1 + $0x8] ss:$0 sm:$0xff]  ;;  %v17314_v43 = vpop.permute.xlu0 %835 }
 0x340   : > { %20585 = vst [vmem:[#allocation30_spill] sm:$0xff] %v17259_v26  ;;  %v4742_v40 = vadd.f32 %v4575_v0, %v4266_v23  ;;  %5034 = vst.msk [vmem:[#allocation3 + $0x6b] sm:$0xf] %vm355_vm8, %v5032_v10  ;;  %v17272_v7 = vmul.f32 %v12914_v29, %v17173_v62  ;;  %v17285_v35 = vmul.f32 %v17281_v2, %v17173_v62  ;;  %v20586_v1 = vrot.slane %v17104_v55, 2 }
 0x341   : > { %4819 = vst.msk [vmem:[#allocation2 + $0x208] sm:$0xff] %vm330_vm6, %v4741_v52  ;;  %v17289_v60 = vmul.f32 %v12904_v21, %v17248_v48  ;;  %v17294_v61 = vmul.f32 %v12906_v22, %v17248_v48  ;;  %v17298_v46 = vmul.f32 %v12910_v25, %v17248_v48  ;;  %v3399_v23 = vmul.f32 %v12912_v28, %v17248_v48 }
 0x342   : > { %4820 = vst.msk [vmem:[#allocation2 + $0x210] sm:$0xff] %vm330_vm6, %v4742_v40  ;;  %v17305_v0 = vmul.f32 %v12896_v11, %v17248_v48  ;;  %v17309_v10 = vmul.f32 %v12898_v17, %v17248_v48  ;;  %v17312_v40 = vpop.permute.xlu1 %840  ;;  %v3874_v20 = vmul.f32 %v12914_v29, %v17248_v48  ;;  %v4350_v54 = vmul.f32 %v17281_v2, %v17248_v48 }
 0x343   : > { %v20114_v52 = vrot.slane %v17289_v60, 2  ;;  %v3624_v51 = vrot.slane %v3399_v23, 4  ;;  %v20587_v23 = vrot.slane %v17120_v39, 4  ;;  %v17335_v15 = vmul.f32 %v12896_v11, %v17312_v40 }
 0x344   : > { %v17339_v55 = vmul.f32 %v12896_v11, %v17314_v43  ;;  %v4576_v39 = vrot.slane %v4350_v54, 6  ;;  %v20590_v44 = vrot.slane %v17294_v61, 3  ;;  %v20591_v56 = vrot.slane %v17107_v36, 3 }
 0x345   : > { %v2186_v4 = vsel %vm1557_vm1, %v20586_v1, %v20114_v52  ;;  %v3625_v59 = vsel %vm2998_vm3, %v20587_v23, %v3624_v51  ;;  %v20589_v52 = vrot.slane %v17263_v14, 4  ;;  %v20592_v26 = vrot.slane %v17298_v46, 4 }
 0x346   : > { %v2347_v31 = vadd.f32 %v2186_v4, %v17060_v38  ;;  %v3791_v38 = vadd.f32 %v3625_v59, %v17112_v33  ;;  %v4100_v4 = vrot.slane %v3874_v20, 5  ;;  %v2665_v11 = vsel %vm2522_vm2, %v20591_v56, %v20590_v44 }
 0x347   : > { %v17341_v1 = vld [vmem:[#allocation3 + $0x68] sm:$0xff]  ;;  %v3627_v27 = vsel %vm2998_vm3, %v3624_v51, %v20589_v52  ;;  %v20593_v51 = vrot.slane %v17110_v58, 4  ;;  %v20594_v54 = vrot.slane %v17126_v47, 5  ;;  %v20595_v59 = vrot.slane %v17272_v7, 5 }
 0x348   : > { %20588 = vst [vmem:[#allocation31_spill] sm:$0xff] %v17341_v1  ;;  %v20124_v23 = vrot.slane %v17341_v1, 1  ;;  %v20123_v37 = vrot.slane %v17341_v1, 2  ;;  %v3792_v17 = vadd.f32 %v3627_v27, %v3302_v3  ;;  %v17354_v62 = vadd.f32 %v2665_v11, %v2347_v31 }
 0x349   : > { %v17361_v33 = vsel %vm2998_vm3, %v20593_v51, %v20592_v26  ;;  %v4101_v20 = vsel %vm3964_vm4, %v20594_v54, %v4100_v4  ;;  %v4103_v36 = vsel %vm3964_vm4, %v4100_v4, %v20595_v59  ;;  %v17369_v52 = vld [vmem:[#allocation2 + $0x208] ss:$2 sm:$0xff]  ;;  %v17371_v56 = vld [vmem:[#allocation2 + $0x209] ss:$2 sm:$0xff]  ;;  %v20596_v44 = vrot.slane %v17161_v34, 1 }
 0x34a   : > { %v20597_v47 = vrot.slane %v17161_v34, 2  ;;  %v4267_v26 = vadd.f32 %v4101_v20, %v3791_v38  ;;  %v4268_v3 = vadd.f32 %v4103_v36, %v3792_v17  ;;  %v20129_v27 = vrot.slane %v17305_v0, 1  ;;  %v1877_v38 = vpop.permute.xlu1 %1876 }
 0x34b   : > { %v5256_v58 = vsel %vm1085_vm0, %v20596_v44, %v20124_v23  ;;  %v20598_v4 = vrot.slane %v17129_v49, 6  ;;  %v20599_v51 = vrot.slane %v17285_v35, 6  ;;  %v17394_v34 = vmul.f32 %v12904_v21, %v17314_v43 }
 0x34c   : > { %v5726_v31 = vsel %vm1557_vm1, %v20597_v47, %v20123_v37  ;;  %10650 = vmatmul.mubr.msk.f32.gmra.mrb[24].mxu1 %vm330_vm6, %v5256_v58  ;;  %v20128_v17 = vrot.slane %v17309_v10, 2  ;;  %v17403_v49 = vmul.f32 %v12906_v22, %v17314_v43  ;;  %v17409_v36 = vmul.f32 %v12910_v25, %v17314_v43 }
 0x34d   : > { %10792 = vmatmul.mubr.msk.f32.gmra.mrb[24].mxu0 %vm330_vm6, %v5726_v31  ;;  %v4577_v11 = vsel %vm4440_vm5, %v20598_v4, %v4576_v39  ;;  %v4579_v54 = vsel %vm4440_vm5, %v4576_v39, %v20599_v51  ;;  %10652 = vmatprep.mubr.msk.f32.mxu1 %vm12720_vm7, %v20213_v9  ;;  %v17413_v44 = vmul.f32 %v12912_v28, %v17314_v43  ;;  %v20603_v23 = vrot.slane %v17272_v7, 5 }
 0x34e   : > { %v4743_v20 = vadd.f32 %v4577_v11, %v4267_v26  ;;  %v4744_v59 = vadd.f32 %v4579_v54, %v4268_v3  ;;  %10794 = vmatprep.mubr.msk.f32.mxu0 %vm12720_vm7, %v20213_v9  ;;  %v17417_v58 = vmul.f32 %v12914_v29, %v17314_v43  ;;  %v17423_v47 = vmul.f32 %v17281_v2, %v17314_v43 }
 0x34f   : > { %v20600_v31 = vmax.f32 %v16224_v16, %v16226_v5  ;;  %v20601_v26 = vmax.f32 %v16149_v42, %v16151_v50  ;;  %v17432_v4 = vmul.f32 %v12904_v21, %v1877_v38  ;;  %v3628_v51 = vrot.slane %v17413_v44, 4 }
 0x350   : > { %4821 = vst.msk [vmem:[#allocation2 + $0x218] sm:$0xff] %vm330_vm6, %v4743_v20  ;;  %4822 = vst.msk [vmem:[#allocation2 + $0x220] sm:$0xff] %vm330_vm6, %v4744_v59  ;;  %v20125_v54 = vrot.slane %v17417_v58, 5  ;;  %v17438_v20 = vmul.f32 %v12906_v22, %v1877_v38  ;;  %v20127_v16 = vrot.slane %v17394_v34, 2  ;;  %v20126_v42 = vrot.slane %v17423_v47, 6 }
 0x351   : > { %v5055_v3 = vmax.f32 %v20601_v26, %v20600_v31  ;;  %v20602_v26 = vrot.slane %v17263_v14, 4  ;;  %v17453_v59 = vmul.f32 %v12910_v25, %v1877_v38  ;;  %v17462_v5 = vmul.f32 %v12912_v28, %v1877_v38 }
 0x352   : > { %v20604_v14 = vrot.slane %v17285_v35, 6  ;;  %v20606_v7 = vrot.slane %v16967_v12, 1  ;;  %v20607_v35 = vrot.slane %v17206_v63, 1  ;;  %v20627_v44 = vrot.slane %v17417_v58, 5  ;;  %v2358_v58 = vpop.permute.xlu1 %2357 }
 0x353   : > { %v5057_v50 = vadd.f32 %v17237_v19, %v5055_v3  ;;  %v3629_v11 = vsel %vm2998_vm3, %v20602_v26, %v3628_v51  ;;  %v4105_v3 = vsel %vm3964_vm4, %v20603_v23, %v20125_v54  ;;  %v17479_v54 = vmul.f32 %v12914_v29, %v1877_v38 }
 0x354   : > { %v3793_v37 = vadd.f32 %v3629_v11, %v17265_v30  ;;  %v4581_v26 = vsel %vm4440_vm5, %v20604_v14, %v20126_v42  ;;  %v921_v30 = vmul.f32 %v12900_v18, %v17248_v48  ;;  %v20605_v11 = vrot.slane %v17132_v24, 1 }
 0x355   : > { %v5059_v31 = vmax.f32 %v5057_v50, 0.0  ;;  %v1236_v14 = vsel %vm1085_vm0, %v20129_v27, %v20607_v35  ;;  %v17488_v24 = vmul.f32 %v17281_v2, %v1877_v38  ;;  %v4353_v27 = vmul.f32 %v17281_v2, %v17312_v40 }
 0x356   : > { %v1230_v23 = vsel %vm1085_vm0, %v20606_v7, %v20605_v11  ;;  %v4269_v50 = vadd.f32 %v4105_v3, %v3793_v37  ;;  %v1393_v12 = vadd.f32 %v1236_v14, %v921_v30  ;;  %v20608_v11 = vrot.slane %v17136_v32, 2 }
 0x357   : > { %5061 = vst.msk [vmem:[#allocation3 + $0x71] sm:$0xff] %vm330_vm6, %v5059_v31  ;;  %v1390_v48 = vadd.f32 %v1230_v23, %v17039_v6  ;;  %v20609_v37 = vrot.slane %v16970_v57, 2  ;;  %v20610_v3 = vrot.slane %v17095_v45, 2  ;;  %v3634_v30 = vrot.slane %v17462_v5, 4 }
 0x358   : > { %v20611_v7 = vmov %v20608_v11  ;;  %v4745_v42 = vadd.f32 %v4581_v26, %v4269_v50  ;;  %v17505_v23 = vmul.f32 %v12904_v21, %v17312_v40  ;;  %v20612_v57 = vrot.slane %v17246_v41, 2 }
 0x359   : > { %v1702_v31 = vsel %vm1557_vm1, %v20609_v37, %v20608_v11  ;;  %v1704_v39 = vsel %vm1557_vm1, %v20611_v7, %v20610_v3  ;;  %v20613_v14 = vrot.slane %v17289_v60, 2  ;;  %v17525_v60 = vmul.f32 %v12906_v22, %v17312_v40 }
 0x35a   : > { %v1862_v6 = vadd.f32 %v1702_v31, %v1390_v48  ;;  %v1863_v38 = vadd.f32 %v1704_v39, %v17168_v13  ;;  %v20614_v26 = vmov %v20612_v57  ;;  %4823 = vst.msk [vmem:[#allocation2 + $0x228] sm:$0xff] %vm330_vm6, %v4745_v42  ;;  %v20615_v13 = vrot.slane %v17242_v53, 2 }
 0x35b   : > { %v2188_v32 = vsel %vm1557_vm1, %v20613_v14, %v20612_v57  ;;  %v2190_v50 = vsel %vm1557_vm1, %v20614_v26, %v20127_v16  ;;  %v20616_v3 = vrot.slane %v17255_v8, 3  ;;  %v20617_v42 = vrot.slane %v17294_v61, 3  ;;  %v20620_v26 = vld [vmem:[#allocation30_spill] sm:$0xff] }
 0x35c   : > { %v1708_v39 = vsel %vm1557_vm1, %v20128_v17, %v20615_v13  ;;  %v2348_v48 = vadd.f32 %v2188_v32, %v1862_v6  ;;  %v2349_v11 = vadd.f32 %v2190_v50, %v1863_v38  ;;  %v20133_v57 = vrot.slane %v17505_v23, 2 }
 0x35d   : > { %v1865_v31 = vadd.f32 %v1708_v39, %v1393_v12  ;;  %v2667_v7 = vsel %vm2522_vm2, %v20617_v42, %v20616_v3  ;;  %v20618_v6 = vrot.slane %v17403_v49, 3  ;;  %v20619_v38 = vmov %v20616_v3  ;;  %v17614_v39 = vld [vmem:[#allocation2 + $0x219] ss:$2 sm:$0xf] }
 0x35e   : > { %v17542_v32 = vmul.f32 %v12910_v25, %v17312_v40  ;;  %v20621_v12 = vrot.slane %v20620_v26, 4  ;;  %v20622_v50 = vrot.slane %v17298_v46, 4  ;;  %v17549_v13 = vld [vmem:[#allocation3 + $0x70] sm:$0xff]  ;;  %v2829_v3 = vadd.f32 %v2667_v7, %v2348_v48 }
 0x35f   : > { %v2669_v14 = vsel %vm2522_vm2, %v20619_v38, %v20618_v6  ;;  %v3402_v8 = vmul.f32 %v12912_v28, %v17312_v40  ;;  %v3877_v42 = vmul.f32 %v12914_v29, %v17312_v40  ;;  %v1872_v6 = vpop.permute.xlu0 %1871  ;;  %v20131_v38 = vrot.slane %v17549_v13, 1 }
 0x360   : > { %v3143_v61 = vsel %vm2998_vm3, %v20622_v50, %v20621_v12  ;;  %v20130_v35 = vrot.slane %v17549_v13, 2  ;;  %v2830_v16 = vadd.f32 %v2669_v14, %v2349_v11  ;;  %v3304_v46 = vadd.f32 %v17361_v33, %v17354_v62 }
 0x361   : > { %v20623_v12 = vrot.slane %v17409_v36, 4  ;;  %v20624_v50 = vrot.slane %v20620_v26, 4  ;;  %v3630_v7 = vrot.slane %v3402_v8, 4  ;;  %v4106_v17 = vrot.slane %v3877_v42, 5 }
 0x362   : > { %v20625_v41 = vrot.slane %v17341_v1, 1  ;;  %v20626_v62 = vrot.slane %v17341_v1, 2  ;;  %v17578_v14 = vmul.f32 %v12904_v21, %v1872_v6  ;;  %v17581_v26 = vmul.f32 %v12906_v22, %v1872_v6 }
 0x363   : > { %v3145_v48 = vsel %vm2998_vm3, %v20624_v50, %v20623_v12  ;;  %v4582_v42 = vrot.slane %v4353_v27, 6  ;;  %v17590_v12 = vmul.f32 %v12910_v25, %v1872_v6 }
 0x364   : > { %v5258_v11 = vsel %vm1085_vm0, %v20625_v41, %v20131_v38  ;;  %v5728_v33 = vsel %vm1557_vm1, %v20626_v62, %v20130_v35  ;;  %v3631_v41 = vsel %vm2998_vm3, %v3628_v51, %v3630_v7  ;;  %v3306_v50 = vadd.f32 %v3145_v48, %v2830_v16 }
 0x365   : > { %10653 = vmatmul.mubr.msk.f32.gmra.mrb[26].mxu1 %vm330_vm6, %v5258_v11  ;;  %10795 = vmatmul.mubr.msk.f32.gmra.mrb[26].mxu0 %vm330_vm6, %v5728_v33  ;;  %v3794_v62 = vadd.f32 %v3631_v41, %v3304_v46  ;;  %v20132_v35 = vrot.slane %v17578_v14, 2  ;;  %v3403_v38 = vmul.f32 %v12912_v28, %v1872_v6  ;;  %v4107_v51 = vsel %vm3964_vm4, %v20627_v44, %v4106_v17  ;;  %v17604_v33 = vld [vmem:[#allocation2 + $0x218] ss:$2 sm:$0xf] }
 0x366   : > { %10655 = vmatprep.mubr.msk.f32.mxu1 %vm12720_vm7, %v20213_v9  ;;  %10797 = vmatprep.mubr.msk.f32.mxu0 %vm12720_vm7, %v20213_v9  ;;  %v3878_v11 = vmul.f32 %v12914_v29, %v1872_v6  ;;  %v4354_v16 = vmul.f32 %v17281_v2, %v1872_v6  ;;  %v3305_v46 = vadd.f32 %v3143_v61, %v2829_v3  ;;  %v20628_v44 = vrot.slane %v17423_v47, 6 }
 0x367   : > { %v4270_v48 = vadd.f32 %v4107_v51, %v3794_v62  ;;  %v2194_v41 = vsel %vm1557_vm1, %v20133_v57, %v20132_v35  ;;  %v3632_v8 = vrot.slane %v3403_v38, 4  ;;  %v20135_v61 = vrot.slane %v17590_v12, 4 }
 0x368   : > { %v4583_v37 = vsel %vm4440_vm5, %v20628_v44, %v4582_v42  ;;  %v2351_v27 = vadd.f32 %v2194_v41, %v1865_v31  ;;  %v4108_v3 = vrot.slane %v3878_v11, 5  ;;  %v4584_v35 = vrot.slane %v4354_v16, 6 }
 0x369   : > { %v4746_v6 = vadd.f32 %v4583_v37, %v4270_v48  ;;  %v3633_v62 = vsel %vm2998_vm3, %v3630_v7, %v3632_v8  ;;  %v3635_v51 = vsel %vm2998_vm3, %v3632_v8, %v3634_v30  ;;  %v20629_v38 = vrot.slane %v17581_v26, 3 }
 0x36a   : > { %v20630_v47 = vrot.slane %v17525_v60, 3  ;;  %v3795_v57 = vadd.f32 %v3633_v62, %v3305_v46  ;;  %v3796_v1 = vadd.f32 %v3635_v51, %v3306_v50  ;;  %v17627_v31 = vmul.f32 %v12906_v22, %v2358_v58 }
 0x36b   : > { %4824 = vst.msk [vmem:[#allocation2 + $0x230] sm:$0xff] %vm330_vm6, %v4746_v6  ;;  %v5136_v37 = vmax.f32 %v17604_v33, %v17614_v39  ;;  %v4109_v8 = vsel %vm3964_vm4, %v4106_v17, %v4108_v3  ;;  %v20631_v11 = vrot.slane %v17479_v54, 5  ;;  %v20632_v46 = vrot.slane %v17542_v32, 4  ;;  %v20655_v33 = vld [vmem:[#allocation10_spill] sm:$0xff] }
 0x36c   : > { %v2673_v44 = vsel %vm2522_vm2, %v20630_v47, %v20629_v38  ;;  %v4271_v48 = vadd.f32 %v4109_v8, %v3795_v57  ;;  %v17642_v6 = vmul.f32 %v12910_v25, %v2358_v58  ;;  %v4585_v62 = vsel %vm4440_vm5, %v4582_v42, %v4584_v35  ;;  %v20635_v38 = vld [vmem:[#allocation25_spill] sm:$0xff]  ;;  %v1882_v42 = vpop.permute.xlu0 %1881  ;;  %v20663_v8 = vld [vmem:[#allocation23_spill] sm:$0xff] }
 0x36d   : > { %v2832_v7 = vadd.f32 %v2673_v44, %v2351_v27  ;;  %v4111_v16 = vsel %vm3964_vm4, %v4108_v3, %v20631_v11  ;;  %v3149_v50 = vsel %vm2998_vm3, %v20632_v46, %v20135_v61  ;;  %v20633_v27 = vrot.slane %v17488_v24, 6  ;;  %v20637_v11 = vld [vmem:[#allocation26_spill] sm:$0xff] }
 0x36e   : > { %v4272_v41 = vadd.f32 %v4111_v16, %v3796_v1  ;;  %v17649_v51 = vmul.f32 %v12912_v28, %v2358_v58  ;;  %v20634_v3 = vrot.slane %v17305_v0, 1  ;;  %v20636_v47 = vrot.slane %v20635_v38, 1 }
 0x36f   : > { %v4587_v17 = vsel %vm4440_vm5, %v4584_v35, %v20633_v27  ;;  %v4747_v57 = vadd.f32 %v4585_v62, %v4271_v48  ;;  %v3308_v46 = vadd.f32 %v3149_v50, %v2832_v7  ;;  %v17659_v61 = vmul.f32 %v12914_v29, %v2358_v58  ;;  %v9702_v48 = vld [vmem:[%s19951_s3 + $0x70] sm:$0xff]  ;;  %v9703_v7 = vld [vmem:[%s19951_s3 + $0x78] sm:$0xff] }
 0x370   : > { %v1234_v44 = vsel %vm1085_vm0, %v20636_v47, %v20634_v3  ;;  %v4748_v1 = vadd.f32 %v4587_v17, %v4272_v41  ;;  %v17662_v35 = vmul.f32 %v17281_v2, %v2358_v58  ;;  %v20638_v0 = vrot.slane %v17309_v10, 2 }
 0x371   : > { %v1392_v16 = vadd.f32 %v1234_v44, %v20637_v11  ;;  %v20639_v27 = vrot.slane %v17095_v45, 2  ;;  %4825 = vst.msk [vmem:[#allocation2 + $0x238] sm:$0xff] %vm330_vm6, %v4747_v57  ;;  %v3638_v10 = vrot.slane %v17649_v51, 4  ;;  %v20640_v45 = vrot.slane %v17505_v23, 2 }
 0x372   : > { %4826 = vst.msk [vmem:[#allocation2 + $0x240] sm:$0xff] %vm330_vm6, %v4748_v1  ;;  %v20641_v41 = vrot.slane %v17394_v34, 2  ;;  %v17685_v17 = vmul.f32 %v12904_v21, %v1882_v42  ;;  %v17688_v38 = vmul.f32 %v12906_v22, %v1882_v42  ;;  %v17691_v47 = vmul.f32 %v12910_v25, %v1882_v42  ;;  %v5128_v57 = vld [vmem:[#allocation2 + $0x222] ss:$2 sm:$0xff]  ;;  %v5132_v1 = vld [vmem:[#allocation2 + $0x223] ss:$2 sm:$0xff] }
 0x373   : > { %v1706_v3 = vsel %vm1557_vm1, %v20639_v27, %v20638_v0  ;;  %v3405_v44 = vmul.f32 %v12912_v28, %v1882_v42  ;;  %v3880_v23 = vmul.f32 %v12914_v29, %v1882_v42  ;;  %v4356_v34 = vmul.f32 %v17281_v2, %v1882_v42 }
 0x374   : > { %v1864_v50 = vadd.f32 %v1706_v3, %v1392_v16  ;;  %v2192_v62 = vsel %vm1557_vm1, %v20641_v41, %v20640_v45  ;;  %v11806_v16 = vpack.c.bf16 %v9703_v7, %v9702_v48  ;;  %v5137_v0 = vmax.f32 %v5128_v57, %v5132_v1  ;;  %v3320_v7 = vpop.permute.xlu1 %3319 }
 0x375   : > { %v4114_v21 = vrot.slane %v17659_v61, 5  ;;  %v4590_v27 = vrot.slane %v17662_v35, 6  ;;  %v20642_v22 = vrot.slane %v17525_v60, 3  ;;  %v20643_v25 = vrot.slane %v17403_v49, 3 }
 0x376   : > { %v2350_v11 = vadd.f32 %v2192_v62, %v1864_v50  ;;  %v20644_v41 = vrot.slane %v17542_v32, 4  ;;  %v20645_v50 = vrot.slane %v17409_v36, 4  ;;  %v3636_v42 = vrot.slane %v3405_v44, 4  ;;  %11807 = vmatpush3.bf16.msra.mxu0 %v11806_v16 }
 0x377   : > { %v2671_v3 = vsel %vm2522_vm2, %v20643_v25, %v20642_v22  ;;  %v4112_v48 = vrot.slane %v3880_v23, 5  ;;  %v20136_v57 = vrot.slane %v17685_v17, 2  ;;  %v2676_v1 = vrot.slane %v17688_v38, 3  ;;  %v20677_v38 = vld [vmem:[#allocation16_spill] sm:$0xff] }
 0x378   : > { %v2831_v45 = vadd.f32 %v2671_v3, %v2350_v11  ;;  %v3147_v62 = vsel %vm2998_vm3, %v20645_v50, %v20644_v41  ;;  %v3152_v60 = vrot.slane %v17691_v47, 4  ;;  %v4588_v49 = vrot.slane %v4356_v34, 6  ;;  %v5130_v16 = vld [vmem:[#allocation2 + $0x232] ss:$2 sm:$0xf] }
 0x379   : > { %v20646_v58 = vmov 0.0|0.0   ;;  %v20647_v32 = vmax.f32 %v17369_v52, %v17371_v56  ;;  %v3637_v44 = vsel %vm2998_vm3, %v3634_v30, %v3636_v42  ;;  %v3639_v23 = vsel %vm2998_vm3, %v3636_v42, %v3638_v10  ;;  %v5134_v22 = vld [vmem:[#allocation2 + $0x233] ss:$2 sm:$0xf]  ;;  %v20650_v42 = vld [vmem:[#allocation20_spill] sm:$0xff] }
 0x37a   : > { %11808 = vmatprep.subr.bf16.mxu0 %v20646_v58  ;;  %v3307_v36 = vadd.f32 %v3147_v62, %v2831_v45  ;;  %v3798_v25 = vadd.f32 %v3639_v23, %v3308_v46  ;;  %v17724_v34 = vmul.f32 %v12912_v28, %v3320_v7  ;;  %v17727_v3 = vmul.f32 %v12914_v29, %v3320_v7 }
 0x37b   : > { %v17715_v11 = vmax.f32 %v20647_v32, %v5137_v0  ;;  %v17730_v52 = vmul.f32 %v17281_v2, %v3320_v7  ;;  %v5138_v56 = vmax.f32 %v5130_v16, %v5134_v22  ;;  %v20648_v30 = vrot.slane %v17479_v54, 5  ;;  %v5038_v16 = vld [vmem:[#allocation2 + $0x17c] ss:$2 sm:$0xf] }
 0x37c   : > { %v3797_v5 = vadd.f32 %v3637_v44, %v3307_v36  ;;  %v4115_v45 = vsel %vm3964_vm4, %v4112_v48, %v4114_v21  ;;  %v20649_v41 = vrot.slane %v17488_v24, 6  ;;  %v4591_v62 = vsel %vm4440_vm5, %v4588_v49, %v4590_v27 }
 0x37d   : > { %v4113_v0 = vsel %vm3964_vm4, %v20648_v30, %v4112_v48  ;;  %v4274_v46 = vadd.f32 %v4115_v45, %v3798_v25  ;;  %v922_v7 = vmul.f32 %v12900_v18, %v20650_v42  ;;  %v5140_v54 = vmax.f32 %v5136_v37, %v5138_v56  ;;  %v5042_v56 = vld [vmem:[#allocation2 + $0x17d] ss:$2 sm:$0xf]  ;;  %v3315_v45 = vpop.permute.xlu0 %3314 }
 0x37e   : > { %v4589_v50 = vsel %vm4440_vm5, %v20649_v41, %v4588_v49  ;;  %v4273_v32 = vadd.f32 %v4113_v0, %v3797_v5  ;;  %v20651_v36 = vrot.slane %v17339_v55, 1  ;;  %v20652_v48 = vrot.slane %v17206_v63, 1  ;;  %v5046_v63 = vld [vmem:[#allocation2 + $0x196] ss:$2 sm:$0xf] }
 0x37f   : > { %v20653_v44 = vrot.slane %v17335_v15, 1  ;;  %v4750_v22 = vadd.f32 %v4591_v62, %v4274_v46  ;;  %v3642_v25 = vrot.slane %v17724_v34, 4  ;;  %v923_v39 = vmul.f32 %v12900_v18, %v17314_v43  ;;  %v5050_v41 = vld [vmem:[#allocation2 + $0x197] ss:$2 sm:$0xf] }
 0x380   : > { %v1238_v24 = vsel %vm1085_vm0, %v20652_v48, %v20651_v36  ;;  %v20654_v23 = vmov %v20651_v36  ;;  %v1477_v37 = vmul.f32 %v20655_v33, %v17314_v43  ;;  %v5142_v5 = vadd.f32 %v17237_v19, %v5140_v54  ;;  %v20665_v62 = vld [vmem:[#allocation18_spill] sm:$0xff] }
 0x381   : > { %v1240_v49 = vsel %vm1085_vm0, %v20654_v23, %v20653_v44  ;;  %v4749_v30 = vadd.f32 %v4589_v50, %v4273_v32  ;;  %v1394_v0 = vadd.f32 %v1238_v24, %v922_v7  ;;  %v1478_v55 = vmul.f32 %v20655_v33, %v17312_v40  ;;  %4828 = vst.msk [vmem:[#allocation2 + $0x250] sm:$0xff] %vm330_vm6, %v4750_v22 }
 0x382   : > { %v4118_v46 = vrot.slane %v17727_v3, 5  ;;  %v1395_v42 = vadd.f32 %v1240_v49, %v923_v39  ;;  %v1709_v36 = vrot.slane %v1477_v37, 2  ;;  %v5144_v43 = vmax.f32 %v5142_v5, 0.0 }
 0x383   : > { %4827 = vst.msk [vmem:[#allocation2 + $0x248] sm:$0xff] %vm330_vm6, %v4749_v30  ;;  %v1711_v48 = vrot.slane %v1478_v55, 2  ;;  %v20656_v50 = vrot.slane %v17432_v4, 2  ;;  %v20657_v7 = vrot.slane %v17578_v14, 2  ;;  %v20659_v44 = vrot.slane %v17242_v53, 2 }
 0x384   : > { %v3407_v49 = vmul.f32 %v12912_v28, %v3315_v45  ;;  %v3882_v22 = vmul.f32 %v12914_v29, %v3315_v45  ;;  %v4358_v39 = vmul.f32 %v17281_v2, %v3315_v45  ;;  %5146 = vst.msk [vmem:[#allocation3 + $0xa3] sm:$0xf] %vm355_vm8, %v5144_v43  ;;  %v5052_v37 = vmax.f32 %v5038_v16, %v5042_v56  ;;  %v20662_v45 = vld [vmem:[#allocation11_spill] sm:$0xff] }
 0x385   : > { %v2196_v54 = vsel %vm1557_vm1, %v20657_v7, %v20656_v50  ;;  %v20658_v32 = vmov %v20656_v50  ;;  %v1710_v23 = vsel %vm1557_vm1, %v20659_v44, %v1709_v36  ;;  %v1712_v14 = vsel %vm1557_vm1, %v1709_v36, %v1711_v48  ;;  %v20666_v36 = vld [vmem:[#allocation19_spill] sm:$0xff] }
 0x386   : > { %v2198_v24 = vsel %vm1557_vm1, %v20658_v32, %v20136_v57  ;;  %v1866_v33 = vadd.f32 %v1710_v23, %v1394_v0  ;;  %v5054_v5 = vmax.f32 %v5046_v63, %v5050_v41  ;;  %v1867_v4 = vadd.f32 %v1712_v14, %v1395_v42  ;;  %v3325_v14 = vpop.permute.xlu0 %3324 }
 0x387   : > { %v20660_v30 = vrot.slane %v17438_v20, 3  ;;  %v20661_v53 = vrot.slane %v17581_v26, 3  ;;  %v3640_v50 = vrot.slane %v3407_v49, 4  ;;  %v4116_v7 = vrot.slane %v3882_v22, 5 }
 0x388   : > { %v2352_v32 = vadd.f32 %v2196_v54, %v1866_v33  ;;  %v4592_v44 = vrot.slane %v4358_v39, 6  ;;  %v5056_v57 = vmax.f32 %v5052_v37, %v5054_v5  ;;  %v20664_v43 = vmax.f32 %v20662_v45, %v20663_v8 }
 0x389   : > { %v2675_v55 = vsel %vm2522_vm2, %v20661_v53, %v20660_v30  ;;  %v20667_v0 = vmax.f32 %v20665_v62, %v20666_v36  ;;  %v2353_v56 = vadd.f32 %v2198_v24, %v1867_v4  ;;  %v20668_v63 = vmov %v20660_v30 }
 0x38a   : > { %v2677_v26 = vsel %vm2522_vm2, %v20668_v63, %v2676_v1  ;;  %v20669_v41 = vrot.slane %v17453_v59, 4  ;;  %v20670_v42 = vrot.slane %v17590_v12, 4  ;;  %v924_v8 = vmul.f32 %v12900_v18, %v17312_v40  ;;  %v20685_v63 = vld [vmem:[#allocation12_spill] sm:$0xff] }
 0x38b   : > { %v5083_v16 = vmax.f32 %v20667_v0, %v20664_v43  ;;  %v2833_v23 = vadd.f32 %v2675_v55, %v2352_v32  ;;  %v3641_v20 = vsel %vm2998_vm3, %v3638_v10, %v3640_v50  ;;  %v3643_v12 = vsel %vm2998_vm3, %v3640_v50, %v3642_v25  ;;  %v20680_v43 = vld [vmem:[#allocation13_spill] sm:$0xff]  ;;  %v20682_v0 = vld [vmem:[#allocation15_spill] sm:$0xff] }
 0x38c   : > { %v3151_v54 = vsel %vm2998_vm3, %v20670_v42, %v20669_v41  ;;  %v20671_v62 = vmov %v20669_v41  ;;  %v2834_v49 = vadd.f32 %v2677_v26, %v2353_v56  ;;  %v5058_v22 = vadd.f32 %v17237_v19, %v5056_v57  ;;  %v20686_v26 = vld [vmem:[#allocation24_spill] sm:$0xff] }
 0x38d   : > { %v3153_v24 = vsel %vm2998_vm3, %v20671_v62, %v3152_v60  ;;  %v5085_v18 = vadd.f32 %v17237_v19, %v5083_v16  ;;  %v20672_v40 = vrot.slane %v17335_v15, 1  ;;  %v3309_v59 = vadd.f32 %v3151_v54, %v2833_v23  ;;  %v20683_v16 = vld [vmem:[#allocation28_spill] sm:$0xff] }
 0x38e   : > { %v4117_v51 = vsel %vm3964_vm4, %v4114_v21, %v4116_v7  ;;  %v4119_v10 = vsel %vm3964_vm4, %v4116_v7, %v4118_v46  ;;  %v4593_v33 = vsel %vm4440_vm5, %v4590_v27, %v4592_v44  ;;  %v3310_v57 = vadd.f32 %v3153_v24, %v2834_v49 }
 0x38f   : > { %v1396_v39 = vadd.f32 %v20672_v40, %v924_v8  ;;  %v5060_v37 = vmax.f32 %v5058_v22, 0.0  ;;  %v5087_v5 = vmax.f32 %v5085_v18, 0.0  ;;  %v3799_v15 = vadd.f32 %v3641_v20, %v3309_v59  ;;  %v20690_v18 = vld [vmem:[#allocation29_spill] sm:$0xff] }
 0x390   : > { %v20673_v30 = vrot.slane %v17730_v52, 6  ;;  %v20674_v61 = vrot.slane %v17627_v31, 3  ;;  %v3409_v55 = vmul.f32 %v12912_v28, %v3325_v14  ;;  %v3800_v35 = vadd.f32 %v3643_v12, %v3310_v57  ;;  %v5200_v12 = vld [vmem:[%s19951_s3] sm:$0xff] }
 0x391   : > { %v1868_v4 = vadd.f32 %v1711_v48, %v1396_v39  ;;  %5062 = vst.msk [vmem:[#allocation3 + $0x79] sm:$0xf] %vm355_vm8, %v5060_v37  ;;  %v20675_v27 = vrot.slane %v17685_v17, 2  ;;  %v3884_v50 = vmul.f32 %v12914_v29, %v3325_v14  ;;  %v4360_v7 = vmul.f32 %v17281_v2, %v3325_v14  ;;  %v20692_v39 = vld [vmem:[#allocation17_spill] sm:$0xff]  ;;  %v20693_v14 = vld [vmem:[#allocation14_spill] sm:$0xff] }
 0x392   : > { %v4595_v53 = vsel %vm4440_vm5, %v4592_v44, %v20673_v30  ;;  %v2679_v21 = vsel %vm2522_vm2, %v2676_v1, %v20674_v61  ;;  %5089 = vst.msk [vmem:[#allocation3 + $0x7f] sm:$0xff] %vm330_vm6, %v5087_v5  ;;  %v4275_v32 = vadd.f32 %v4117_v51, %v3799_v15  ;;  %v3644_v31 = vrot.slane %v3409_v55, 4  ;;  %v20676_v44 = vld [vmem:[#allocation21_spill] sm:$0xff]  ;;  %v20679_v1 = vld [vmem:[#allocation22_spill] sm:$0xff] }
 0x393   : > { %v2354_v48 = vadd.f32 %v20675_v27, %v1868_v4  ;;  %v20678_v45 = vmax.f32 %v20676_v44, %v20677_v38  ;;  %v20681_v28 = vmax.f32 %v20679_v1, %v20680_v43  ;;  %v20684_v56 = vmax.f32 %v20682_v0, %v20683_v16  ;;  %v5202_v37 = vld [vmem:[%s19951_s3 + $0x10] sm:$0xff]  ;;  %v5203_v5 = vld [vmem:[%s19951_s3 + $0x18] sm:$0xff] }
 0x394   : > { %v20687_v17 = vmax.f32 %v20685_v63, %v20686_v26  ;;  %v4276_v42 = vadd.f32 %v4119_v10, %v3800_v35  ;;  %v20688_v2 = vrot.slane %v17642_v6, 4  ;;  %v4120_v8 = vrot.slane %v3884_v50, 5  ;;  %v5201_v6 = vld [vmem:[%s19951_s3 + $0x8] sm:$0xff] }
 0x395   : > { %v5084_v36 = vmax.f32 %v20681_v28, %v20678_v45  ;;  %v2835_v29 = vadd.f32 %v2679_v21, %v2354_v48  ;;  %v4751_v23 = vadd.f32 %v4593_v33, %v4275_v32  ;;  %v3645_v62 = vsel %vm2998_vm3, %v3642_v25, %v3644_v31  ;;  %v20689_v25 = vld [vmem:[#allocation27_spill] sm:$0xff]  ;;  %v5150_v26 = vld [vmem:[#allocation2 + $0x24c] ss:$2 sm:$0xf] }
 0x396   : > { %v5111_v41 = vmax.f32 %v20687_v17, %v20684_v56  ;;  %v3155_v54 = vsel %vm2998_vm3, %v3152_v60, %v20688_v2  ;;  %v4752_v47 = vadd.f32 %v4595_v53, %v4276_v42  ;;  %v4596_v49 = vrot.slane %v4360_v7, 6  ;;  %v5148_v31 = vld [vmem:[#allocation2 + $0x23c] ss:$2 sm:$0xff]  ;;  %v5152_v44 = vld [vmem:[#allocation2 + $0x23d] ss:$2 sm:$0xff] }
 0x397   : > { %v5086_v24 = vadd.f32 %v17237_v19, %v5084_v36  ;;  %v3311_v60 = vadd.f32 %v3155_v54, %v2835_v29  ;;  %4829 = vst.msk [vmem:[#allocation2 + $0x258] sm:$0xff] %vm330_vm6, %v4751_v23  ;;  %v20691_v40 = vmax.f32 %v20689_v25, %v20690_v18  ;;  %v20694_v59 = vmax.f32 %v20692_v39, %v20693_v14  ;;  %v5154_v17 = vld [vmem:[#allocation2 + $0x24d] ss:$2 sm:$0xf] }
 0x398   : > { %v5113_v20 = vadd.f32 %v17237_v19, %v5111_v41  ;;  %v5141_v10 = vadd.f32 %v17237_v19, %v17715_v11  ;;  %4830 = vst.msk [vmem:[#allocation2 + $0x260] sm:$0xff] %vm330_vm6, %v4752_v47  ;;  %v11791_v57 = vpack.c.bf16 %v5201_v6, %v5200_v12  ;;  %v4121_v15 = vsel %vm3964_vm4, %v4118_v46, %v4120_v8 }
 0x399   : > { %v5088_v34 = vmax.f32 %v5086_v24, 0.0  ;;  %v5112_v51 = vmax.f32 %v20694_v59, %v20691_v40  ;;  %v3801_v33 = vadd.f32 %v3645_v62, %v3311_v60  ;;  %v17895_v4 = vld [vmem:[#allocation3 + $0x78] sm:$0xff]  ;;  %v20695_v55 = vrot.slane %v17730_v52, 6 }
 0x39a   : > { %v5115_v22 = vmax.f32 %v5113_v20, 0.0  ;;  %v5143_v30 = vmax.f32 %v5141_v10, 0.0  ;;  %v5259_v53 = vrot.slane %v17895_v4, 1  ;;  %v5729_v61 = vrot.slane %v17895_v4, 2  ;;  %11792 = vmatpush3.bf16.msra.mxu1 %v11791_v57 }
 0x39b   : > { %5090 = vst.msk [vmem:[#allocation3 + $0x87] sm:$0xf] %vm355_vm8, %v5088_v34  ;;  %v5114_v11 = vadd.f32 %v17237_v19, %v5112_v51  ;;  %v4277_v21 = vadd.f32 %v4121_v15, %v3801_v33  ;;  %v4597_v3 = vsel %vm4440_vm5, %v20695_v55, %v4596_v49  ;;  %11793 = vmatprep.subr.bf16.mxu1 %v20646_v58  ;;  %v20696_v27 = vrot.slane %v17549_v13, 1  ;;  %v17993_v15 = vld [vmem:[#allocation3 + $0x10] sm:$0xff]  ;;  %v18006_v55 = vld [vmem:[#allocation3 + $0x18] sm:$0xff] }
 0x39c   : > { %5117 = vst.msk [vmem:[#allocation3 + $0x8d] sm:$0xff] %vm330_vm6, %v5115_v22  ;;  %5145 = vst.msk [vmem:[#allocation3 + $0x9b] sm:$0xff] %vm330_vm6, %v5143_v30  ;;  %v11794_v46 = vpack.c.bf16 %v5203_v5, %v5202_v37  ;;  %v20697_v50 = vrot.slane %v17549_v13, 2  ;;  %v5163_v45 = vmax.f32 %v5148_v31, %v5152_v44  ;;  %v5164_v20 = vmax.f32 %v5150_v26, %v5154_v17  ;;  %v9725_v37 = vld [vmem:[%s19951_s3 + $0x80] sm:$0xff]  ;;  %v9726_v5 = vld [vmem:[%s19951_s3 + $0x88] sm:$0xff] }
 0x39d   : > { %v5116_v35 = vmax.f32 %v5114_v11, 0.0  ;;  %v5260_v48 = vsel %vm1085_vm0, %v20696_v27, %v5259_v53  ;;  %v4753_v32 = vadd.f32 %v4597_v3, %v4277_v21  ;;  %v5982_v11 = vrot.slane %v17993_v15, 6  ;;  %v18002_v30 = vld [vmem:[#allocation3 + $0x8] sm:$0xff]  ;;  %v12635_v27 = vld [vmem:[#allocation3] sm:$0xff] }
 0x39e   : > { %v5730_v7 = vsel %vm1557_vm1, %v20697_v50, %v5729_v61  ;;  %10656 = vmatmul.mubr.msk.f32.gmra.mrb[28].mxu1 %vm330_vm6, %v5260_v48  ;;  %v5984_v3 = vrot.slane %v18006_v55, 6  ;;  %v18036_v44 = vld [vmem:[#allocation3 + $0x28] sm:$0xff] }
 0x39f   : > { %10798 = vmatmul.mubr.msk.f32.gmra.mrb[28].mxu0 %vm330_vm6, %v5730_v7  ;;  %5118 = vst.msk [vmem:[#allocation3 + $0x95] sm:$0xf] %vm355_vm8, %v5116_v35  ;;  %10658 = vmatprep.mubr.msk.f32.mxu1 %vm12720_vm7, %v20213_v9  ;;  %v5156_v52 = vld [vmem:[#allocation2 + $0x256] ss:$2 sm:$0xff]  ;;  %v5160_v38 = vld [vmem:[#allocation2 + $0x257] ss:$2 sm:$0xff] }
 0x3a0   : > { %4832 = vst.msk [vmem:[#allocation2 + $0x268] sm:$0x3f] %vm4831_vm9, %v4753_v32  ;;  %10800 = vmatprep.mubr.msk.f32.mxu0 %vm12720_vm7, %v20213_v9  ;;  %11795 = vmatpush3.bf16.msra.mxu1 %v11794_v46  ;;  %v5165_v1 = vmax.f32 %v5156_v52, %v5160_v38  ;;  %v9727_v35 = vld [vmem:[%s19951_s3 + $0x90] sm:$0xff]  ;;  %v9728_v46 = vld [vmem:[%s19951_s3 + $0x98] sm:$0xff]  ;;  %v5985_v50 = vsel %vm4440_vm5, %v5982_v11, %v5984_v3  ;;  %v5988_v52 = vrot.slane %v18036_v44, 6 }
 0x3a1   : > { %v11812_v48 = vpack.c.bf16 %v9728_v46, %v9727_v35  ;;  %v18023_v7 = vld [vmem:[#allocation3 + $0x20] sm:$0xff] }
 0x3a2   : > { %v17923_v43 = vld [vmem:[#allocation3 + $0x80] sm:$0xff]  ;;  %v5167_v63 = vmax.f32 %v5163_v45, %v5165_v1  ;;  %v5986_v32 = vrot.slane %v18023_v7, 6  ;;  %v18051_v45 = vld [vmem:[#allocation3 + $0x30] sm:$0xff] }
 0x3a3   : > { %v17925_v28 = vld [vmem:[#allocation3 + $0x88] sm:$0xff]  ;;  %v5261_v36 = vrot.slane %v17923_v43, 1  ;;  %v5731_v0 = vrot.slane %v17923_v43, 2  ;;  %v17962_v14 = vld [vmem:[#allocation3 + $0xa0] sm:$0xff]  ;;  %v5990_v1 = vrot.slane %v18051_v45, 6 }
 0x3a4   : > { %v5263_v16 = vrot.slane %v17925_v28, 1  ;;  %v5733_v56 = vrot.slane %v17925_v28, 2  ;;  %v5169_v29 = vadd.f32 %v17237_v19, %v5167_v63  ;;  %v5269_v51 = vrot.slane %v17962_v14, 1  ;;  %v18070_v63 = vld [vmem:[#allocation3 + $0x38] sm:$0xff] }
 0x3a5   : > { %v5262_v41 = vsel %vm1085_vm0, %v5259_v53, %v5261_v36  ;;  %v5732_v42 = vsel %vm1557_vm1, %v5729_v61, %v5731_v0  ;;  %v5739_v10 = vrot.slane %v17962_v14, 2  ;;  %v5981_v53 = vrot.slane %v18002_v30, 6 }
 0x3a6   : > { %10659 = vmatmul.mubr.msk.f32.gmra.mrb[30].mxu1 %vm330_vm6, %v5262_v41  ;;  %10801 = vmatmul.mubr.msk.f32.gmra.mrb[30].mxu0 %vm330_vm6, %v5732_v42  ;;  %v17936_v2 = vld [vmem:[#allocation3 + $0x90] sm:$0xff]  ;;  %v5264_v23 = vsel %vm1085_vm0, %v5261_v36, %v5263_v16  ;;  %v5734_v62 = vsel %vm1557_vm1, %v5731_v0, %v5733_v56  ;;  %v5171_v24 = vmax.f32 %v5169_v29, 0.0  ;;  %v17944_v6 = vld [vmem:[#allocation3 + $0x98] sm:$0xff]  ;;  %v11809_v61 = vpack.c.bf16 %v9726_v5, %v9725_v37  ;;  %v18092_v29 = vld [vmem:[#allocation3 + $0x40] sm:$0xff] }
 0x3a7   : > { %v5158_v54 = vld [vmem:[#allocation2 + $0x266] ss:$2 sm:$0xf]  ;;  %v5162_v8 = vld [vmem:[#allocation2 + $0x267] ss:$2 sm:$0xf]  ;;  %10661 = vmatprep.mubr.msk.f32.mxu1 %vm12720_vm7, %v20213_v9  ;;  %10803 = vmatprep.mubr.msk.f32.mxu0 %vm12720_vm7, %v20213_v9  ;;  %v5983_v21 = vsel %vm4440_vm5, %v5981_v53, %v5982_v11  ;;  %v18034_v31 = vsel %vm4440_vm5, %v5984_v3, %v5986_v32  ;;  %v18049_v38 = vsel %vm4440_vm5, %v5986_v32, %v5988_v52 }
 0x3a8   : > { %v5166_v12 = vmax.f32 %v5158_v54, %v5162_v8  ;;  %v5265_v47 = vrot.slane %v17936_v2, 1  ;;  %v5735_v60 = vrot.slane %v17936_v2, 2  ;;  %5173 = vst.msk [vmem:[#allocation3 + $0xa9] sm:$0xff] %vm330_vm6, %v5171_v24  ;;  %v5267_v34 = vrot.slane %v17944_v6, 1  ;;  %v18064_v0 = vld [vmem:[#allocation3 + $0xb8] sm:$0xff]  ;;  %v18199_v37 = vld [vmem:[#allocation3 + $0x68] sm:$0xff] }
 0x3a9   : > { %v5737_v22 = vrot.slane %v17944_v6, 2  ;;  %v5992_v26 = vrot.slane %v18070_v63, 6  ;;  %v20137_v17 = vrot.slane %v18064_v0, 6  ;;  %v5994_v54 = vrot.slane %v18092_v29, 6  ;;  %v9750_v32 = vld [vmem:[%s19951_s3 + $0xa0] sm:$0xff] }
 0x3aa   : > { %v5168_v49 = vmax.f32 %v5164_v20, %v5166_v12  ;;  %10662 = vmatmul.mubr.msk.f32.gmra.mrb[32].mxu1 %vm330_vm6, %v5264_v23  ;;  %10804 = vmatmul.mubr.msk.f32.gmra.mrb[32].mxu0 %vm330_vm6, %v5734_v62  ;;  %v5266_v18 = vsel %vm1085_vm0, %v5263_v16, %v5265_v47  ;;  %v5736_v40 = vsel %vm1557_vm1, %v5733_v56, %v5735_v60  ;;  %v18106_v23 = vld [vmem:[#allocation3 + $0x48] sm:$0xff]  ;;  %v18120_v20 = vld [vmem:[#allocation3 + $0x50] sm:$0xff]  ;;  %v6012_v11 = vrot.slane %v17925_v28, 6 }
 0x3ab   : > { %10664 = vmatprep.mubr.msk.f32.mxu1 %vm12720_vm7, %v20213_v9  ;;  %10806 = vmatprep.mubr.msk.f32.mxu0 %vm12720_vm7, %v20213_v9  ;;  %v5268_v59 = vsel %vm1085_vm0, %v5265_v47, %v5267_v34  ;;  %v5270_v33 = vsel %vm1085_vm0, %v5267_v34, %v5269_v51  ;;  %v5740_v57 = vsel %vm1557_vm1, %v5737_v22, %v5739_v10  ;;  %v5996_v62 = vrot.slane %v18106_v23, 6 }
 0x3ac   : > { %v5170_v25 = vadd.f32 %v17237_v19, %v5168_v49  ;;  %v5738_v19 = vsel %vm1557_vm1, %v5735_v60, %v5737_v22  ;;  %v18068_v56 = vsel %vm4440_vm5, %v5988_v52, %v5990_v1  ;;  %v18090_v42 = vsel %vm4440_vm5, %v5990_v1, %v5992_v26  ;;  %v18134_v60 = vld [vmem:[#allocation3 + $0x58] sm:$0xff]  ;;  %v18148_v22 = vld [vmem:[#allocation3 + $0x60] sm:$0xff] }
 0x3ad   : > { %v18104_v8 = vsel %vm4440_vm5, %v5992_v26, %v5994_v54  ;;  %v18118_v24 = vsel %vm4440_vm5, %v5994_v54, %v5996_v62  ;;  %v5998_v12 = vrot.slane %v18120_v20, 6  ;;  %v6000_v49 = vrot.slane %v18134_v60, 6  ;;  %v9751_v52 = vld [vmem:[%s19951_s3 + $0xa8] sm:$0xff] }
 0x3ae   : > { %v5172_v39 = vmax.f32 %v5170_v25, 0.0  ;;  %10665 = vmatmul.mubr.msk.f32.gmra.mrb[34].mxu1 %vm330_vm6, %v5266_v18  ;;  %10807 = vmatmul.mubr.msk.f32.gmra.mrb[34].mxu0 %vm330_vm6, %v5736_v40  ;;  %v6002_v25 = vrot.slane %v18148_v22, 6  ;;  %v20698_v40 = vld [vmem:[#allocation31_spill] sm:$0xff]  ;;  %v6018_v35 = vrot.slane %v17962_v14, 6  ;;  %v6264_v26 = vrot.slane %v17993_v15, 7 }
 0x3af   : > { %10667 = vmatprep.mubr.msk.f32.mxu1 %vm12720_vm7, %v20213_v9  ;;  %10809 = vmatprep.mubr.msk.f32.mxu0 %vm12720_vm7, %v20213_v9  ;;  %v18132_v47 = vsel %vm4440_vm5, %v5996_v62, %v5998_v12  ;;  %v18146_v34 = vsel %vm4440_vm5, %v5998_v12, %v6000_v49  ;;  %v18253_v46 = vld [vmem:[#allocation3 + $0xa8] sm:$0xff]  ;;  %v6263_v54 = vrot.slane %v18002_v30, 7  ;;  %v11815_v62 = vpack.c.bf16 %v9751_v52, %v9750_v32 }
 0x3b0   : > { %5174 = vst.msk [vmem:[#allocation3 + $0xb1] sm:$0xf] %vm355_vm8, %v5172_v39  ;;  %v18160_v18 = vsel %vm4440_vm5, %v6000_v49, %v6002_v25  ;;  %v6004_v39 = vrot.slane %v20698_v40, 6  ;;  %v9753_v12 = vld [vmem:[%s19951_s3 + $0xb8] sm:$0xff]  ;;  %v6278_v52 = vrot.slane %v18106_v23, 7 }
 0x3b1   : > { %v6265_v49 = vsel %vm6262_vm10, %v6263_v54, %v6264_v26  ;;  %v6280_v54 = vrot.slane %v18120_v20, 7 }
 0x3b2   : > { %10668 = vmatmul.mubr.msk.f32.gmra.mrb[36].mxu1 %vm330_vm6, %v5268_v59  ;;  %10810 = vmatmul.mubr.msk.f32.gmra.mrb[36].mxu0 %vm330_vm6, %v5738_v19  ;;  %v18172_v59 = vsel %vm4440_vm5, %v6002_v25, %v6004_v39  ;;  %v6006_v19 = vrot.slane %v17549_v13, 6  ;;  %v6266_v25 = vrot.slane %v18006_v55, 7 }
 0x3b3   : > { %10670 = vmatprep.mubr.msk.f32.mxu1 %vm12720_vm7, %v20213_v9  ;;  %10812 = vmatprep.mubr.msk.f32.mxu0 %vm12720_vm7, %v20213_v9 }
 0x3b4   : > { %v6267_v40 = vsel %vm6262_vm10, %v6264_v26, %v6266_v25 }
 0x3b6   : > { %10671 = vmatmul.mubr.msk.f32.gmra.mrb[38].mxu1 %vm330_vm6, %v5270_v33  ;;  %10813 = vmatmul.mubr.msk.f32.gmra.mrb[38].mxu0 %vm330_vm6, %v5740_v57  ;;  %v6010_v57 = vrot.slane %v17923_v43, 6 }
 0x3b7   : > { %10673 = vmatprep.mubr.msk.f32.mxu1 %vm12720_vm7, %v20213_v9  ;;  %10815 = vmatprep.mubr.msk.f32.mxu0 %vm12720_vm7, %v20213_v9  ;;  %v18054_v36 = vld [vmem:[#allocation3 + $0xb0] sm:$0xff] }
 0x3b8   : > { %v6022_v16 = vrot.slane %v18054_v36, 6  ;;  %v18222_v53 = vsel %vm4440_vm5, %v6010_v57, %v6012_v11 }
 0x3ba   : > { %10674 = vmatmul.mubr.msk.f32.gmra.mrb[40].mxu1 %vm330_vm6, %v5269_v51  ;;  %10816 = vmatmul.mubr.msk.f32.gmra.mrb[40].mxu0 %vm330_vm6, %v5739_v10  ;;  %v18087_v41 = vsel %vm4440_vm5, %v6022_v16, %v20137_v17  ;;  %v18184_v51 = vsel %vm4440_vm5, %v6004_v39, %v6006_v19  ;;  %v6008_v10 = vrot.slane %v17895_v4, 6  ;;  %v6268_v39 = vrot.slane %v18023_v7, 7 }
 0x3bb   : > { %10684 = vmatprep.mubr.msk.f32.mxu1 %vm12720_vm7, %v20213_v9  ;;  %10826 = vmatprep.mubr.msk.f32.mxu0 %vm12720_vm7, %v20213_v9 }
 0x3bc   : > { %v18196_v33 = vsel %vm4440_vm5, %v6006_v19, %v6008_v10  ;;  %v18210_v5 = vsel %vm4440_vm5, %v6008_v10, %v6010_v57  ;;  %v6269_v19 = vsel %vm6262_vm10, %v6266_v25, %v6268_v39  ;;  %v6270_v10 = vrot.slane %v18036_v44, 7 }
 0x3be   : > { %10685 = vmatmul.mubr.msk.f32.vlgmr.msra.gmra.mrb[0].mxu1 %vm330_vm6, %v12635_v27  ;;  %10827 = vmatmul.mubr.msk.f32.vlgmr.msra.gmra.mrb[0].mxu0 %vm330_vm6, %v5983_v21  ;;  %v6016_v21 = vrot.slane %v17944_v6, 6  ;;  %v6271_v57 = vsel %vm6262_vm10, %v6268_v39, %v6270_v10  ;;  %v18365_v39 = vld [vmem:[#allocation3 + $0x70] sm:$0xff] }
 0x3bf   : > { %11810 = vmatpush3.bf16.msra.mxu0 %v11809_v61  ;;  %10687 = vmatprep.mubr.msk.f32.mxu1 %vm12720_vm7, %v20213_v9  ;;  %v6014_v61 = vrot.slane %v17936_v2, 6 }
 0x3c0   : > { %10829 = vmatprep.mubr.msk.f32.mxu0 %vm12720_vm7, %v20213_v9  ;;  %11811 = vmatprep.subr.bf16.mxu0 %v20646_v58  ;;  %v18260_v27 = vsel %vm4440_vm5, %v6016_v21, %v6018_v35 }
 0x3c1   : > { %v18246_v3 = vsel %vm4440_vm5, %v6014_v61, %v6016_v21  ;;  %v6274_v21 = vrot.slane %v18070_v63, 7 }
 0x3c2   : > { %10688 = vmatmul.mubr.msk.f32.gmra.mrb[2].mxu1 %vm330_vm6, %v18002_v30  ;;  %10830 = vmatmul.mubr.msk.f32.gmra.mrb[2].mxu0 %vm330_vm6, %v5985_v50 }
 0x3c3   : > { %10690 = vmatprep.mubr.msk.f32.mxu1 %vm12720_vm7, %v20213_v9  ;;  %10832 = vmatprep.mubr.msk.f32.mxu0 %vm12720_vm7, %v20213_v9 }
 0x3c4   : > { %11813 = vmatpush3.bf16.msra.mxu0 %v11812_v48  ;;  %v6020_v48 = vrot.slane %v18253_v46, 6 }
 0x3c5   : > { %11814 = vmatprep.subr.bf16.mxu0 %v20646_v58 }
 0x3c6   : > { %10691 = vmatmul.mubr.msk.f32.gmra.mrb[4].mxu1 %vm330_vm6, %v17993_v15  ;;  %10833 = vmatmul.mubr.msk.f32.gmra.mrb[4].mxu0 %vm330_vm6, %v18034_v31  ;;  %v18272_v50 = vsel %vm4440_vm5, %v6018_v35, %v6020_v48  ;;  %v18291_v1 = vsel %vm4440_vm5, %v6020_v48, %v6022_v16  ;;  %v9752_v16 = vld [vmem:[%s19951_s3 + $0xb0] sm:$0xff]  ;;  %v6276_v48 = vrot.slane %v18092_v29, 7 }
 0x3c7   : > { %10693 = vmatprep.mubr.msk.f32.mxu1 %vm12720_vm7, %v20213_v9  ;;  %10835 = vmatprep.mubr.msk.f32.mxu0 %vm12720_vm7, %v20213_v9  ;;  %v11818_v30 = vpack.c.bf16 %v9753_v12, %v9752_v16  ;;  %v6282_v16 = vrot.slane %v18134_v60, 7 }
 0x3c8   : > { %v6277_v32 = vsel %vm6262_vm10, %v6274_v21, %v6276_v48  ;;  %v6279_v26 = vsel %vm6262_vm10, %v6276_v48, %v6278_v52 }
 0x3c9   : > { %v6283_v12 = vsel %vm6262_vm10, %v6280_v54, %v6282_v16 }
 0x3ca   : > { %10694 = vmatmul.mubr.msk.f32.gmra.mrb[6].mxu1 %vm330_vm6, %v18006_v55  ;;  %10836 = vmatmul.mubr.msk.f32.gmra.mrb[6].mxu0 %vm330_vm6, %v18049_v38 }
 0x3cb   : > { %10696 = vmatprep.mubr.msk.f32.mxu1 %vm12720_vm7, %v20213_v9  ;;  %10838 = vmatprep.mubr.msk.f32.mxu0 %vm12720_vm7, %v20213_v9 }
 0x3ce   : > { %10697 = vmatmul.mubr.msk.f32.gmra.mrb[8].mxu1 %vm330_vm6, %v18023_v7  ;;  %10839 = vmatmul.mubr.msk.f32.gmra.mrb[8].mxu0 %vm330_vm6, %v18068_v56 }
 0x3cf   : > { %10699 = vmatprep.mubr.msk.f32.mxu1 %vm12720_vm7, %v20213_v9  ;;  %10841 = vmatprep.mubr.msk.f32.mxu0 %vm12720_vm7, %v20213_v9 }
 0x3d2   : > { %10700 = vmatmul.mubr.msk.f32.gmra.mrb[10].mxu1 %vm330_vm6, %v18036_v44  ;;  %10842 = vmatmul.mubr.msk.f32.gmra.mrb[10].mxu0 %vm330_vm6, %v18090_v42 }
 0x3d3   : > { %10702 = vmatprep.mubr.msk.f32.mxu1 %vm12720_vm7, %v20213_v9  ;;  %10844 = vmatprep.mubr.msk.f32.mxu0 %vm12720_vm7, %v20213_v9 }
 0x3d6   : > { %10703 = vmatmul.mubr.msk.f32.gmra.mrb[12].mxu1 %vm330_vm6, %v18051_v45  ;;  %10845 = vmatmul.mubr.msk.f32.gmra.mrb[12].mxu0 %vm330_vm6, %v18104_v8 }
 0x3d7   : > { %10705 = vmatprep.mubr.msk.f32.mxu1 %vm12720_vm7, %v20213_v9  ;;  %10847 = vmatprep.mubr.msk.f32.mxu0 %vm12720_vm7, %v20213_v9 }
 0x3da   : > { %10706 = vmatmul.mubr.msk.f32.gmra.mrb[14].mxu1 %vm330_vm6, %v18070_v63  ;;  %10848 = vmatmul.mubr.msk.f32.gmra.mrb[14].mxu0 %vm330_vm6, %v18118_v24 }
 0x3db   : > { %10708 = vmatprep.mubr.msk.f32.mxu1 %vm12720_vm7, %v20213_v9  ;;  %10850 = vmatprep.mubr.msk.f32.mxu0 %vm12720_vm7, %v20213_v9 }
 0x3de   : > { %10709 = vmatmul.mubr.msk.f32.gmra.mrb[16].mxu1 %vm330_vm6, %v18092_v29  ;;  %10851 = vmatmul.mubr.msk.f32.gmra.mrb[16].mxu0 %vm330_vm6, %v18132_v47 }
 0x3df   : > { %10711 = vmatprep.mubr.msk.f32.mxu1 %vm12720_vm7, %v20213_v9  ;;  %10853 = vmatprep.mubr.msk.f32.mxu0 %vm12720_vm7, %v20213_v9 }
 0x3e2   : > { %10712 = vmatmul.mubr.msk.f32.gmra.mrb[18].mxu1 %vm330_vm6, %v18106_v23  ;;  %10854 = vmatmul.mubr.msk.f32.gmra.mrb[18].mxu0 %vm330_vm6, %v18146_v34 }
 0x3e3   : > { %10714 = vmatprep.mubr.msk.f32.mxu1 %vm12720_vm7, %v20213_v9  ;;  %10856 = vmatprep.mubr.msk.f32.mxu0 %vm12720_vm7, %v20213_v9 }
 0x3e6   : > { %10715 = vmatmul.mubr.msk.f32.gmra.mrb[20].mxu1 %vm330_vm6, %v18120_v20  ;;  %10857 = vmatmul.mubr.msk.f32.gmra.mrb[20].mxu0 %vm330_vm6, %v18160_v18 }
 0x3e7   : > { %10717 = vmatprep.mubr.msk.f32.mxu1 %vm12720_vm7, %v20213_v9  ;;  %10859 = vmatprep.mubr.msk.f32.mxu0 %vm12720_vm7, %v20213_v9 }
 0x3ea   : > { %10718 = vmatmul.mubr.msk.f32.gmra.mrb[22].mxu1 %vm330_vm6, %v18134_v60  ;;  %10860 = vmatmul.mubr.msk.f32.gmra.mrb[22].mxu0 %vm330_vm6, %v18172_v59 }
 0x3eb   : > { %10720 = vmatprep.mubr.msk.f32.mxu1 %vm12720_vm7, %v20213_v9  ;;  %10862 = vmatprep.mubr.msk.f32.mxu0 %vm12720_vm7, %v20213_v9 }
 0x3ee   : > { %10721 = vmatmul.mubr.msk.f32.gmra.mrb[24].mxu1 %vm330_vm6, %v18148_v22  ;;  %10863 = vmatmul.mubr.msk.f32.gmra.mrb[24].mxu0 %vm330_vm6, %v18184_v51 }
 0x3ef   : > { %10723 = vmatprep.mubr.msk.f32.mxu1 %vm12720_vm7, %v20213_v9  ;;  %10865 = vmatprep.mubr.msk.f32.mxu0 %vm12720_vm7, %v20213_v9 }
 0x3f2   : > { %10724 = vmatmul.mubr.msk.f32.gmra.mrb[26].mxu1 %vm330_vm6, %v18199_v37  ;;  %10866 = vmatmul.mubr.msk.f32.gmra.mrb[26].mxu0 %vm330_vm6, %v18196_v33 }
 0x3f3   : > { %10726 = vmatprep.mubr.msk.f32.mxu1 %vm12720_vm7, %v20213_v9  ;;  %10868 = vmatprep.mubr.msk.f32.mxu0 %vm12720_vm7, %v20213_v9 }
 0x3f6   : > { %10727 = vmatmul.mubr.msk.f32.gmra.mrb[28].mxu1 %vm330_vm6, %v17549_v13  ;;  %10869 = vmatmul.mubr.msk.f32.gmra.mrb[28].mxu0 %vm330_vm6, %v18210_v5  ;;  %v18234_v13 = vsel %vm4440_vm5, %v6012_v11, %v6014_v61  ;;  %v6272_v11 = vrot.slane %v18051_v45, 7 }
 0x3f7   : > { %10729 = vmatprep.mubr.msk.f32.mxu1 %vm12720_vm7, %v20213_v9  ;;  %10871 = vmatprep.mubr.msk.f32.mxu0 %vm12720_vm7, %v20213_v9 }
 0x3f8   : > { %v6273_v61 = vsel %vm6262_vm10, %v6270_v10, %v6272_v11  ;;  %v6275_v35 = vsel %vm6262_vm10, %v6272_v11, %v6274_v21 }
 0x3fa   : > { %10730 = vmatmul.mubr.msk.f32.gmra.mrb[30].mxu1 %vm330_vm6, %v17895_v4  ;;  %10872 = vmatmul.mubr.msk.f32.gmra.mrb[30].mxu0 %vm330_vm6, %v18222_v53 }
 0x3fb   : > { %10732 = vmatprep.mubr.msk.f32.mxu1 %vm12720_vm7, %v20213_v9  ;;  %10874 = vmatprep.mubr.msk.f32.mxu0 %vm12720_vm7, %v20213_v9 }
 0x3fe   : > { %10733 = vmatmul.mubr.msk.f32.gmra.mrb[32].mxu1 %vm330_vm6, %v17923_v43  ;;  %10875 = vmatmul.mubr.msk.f32.gmra.mrb[32].mxu0 %vm330_vm6, %v18234_v13 }
 0x3ff   : > { %10735 = vmatprep.mubr.msk.f32.mxu1 %vm12720_vm7, %v20213_v9  ;;  %10877 = vmatprep.mubr.msk.f32.mxu0 %vm12720_vm7, %v20213_v9 }
 0x402   : > { %10736 = vmatmul.mubr.msk.f32.gmra.mrb[34].mxu1 %vm330_vm6, %v17925_v28  ;;  %10878 = vmatmul.mubr.msk.f32.gmra.mrb[34].mxu0 %vm330_vm6, %v18246_v3 }
 0x403   : > { %10738 = vmatprep.mubr.msk.f32.mxu1 %vm12720_vm7, %v20213_v9  ;;  %10880 = vmatprep.mubr.msk.f32.mxu0 %vm12720_vm7, %v20213_v9 }
 0x406   : > { %10739 = vmatmul.mubr.msk.f32.gmra.mrb[36].mxu1 %vm330_vm6, %v17936_v2  ;;  %10881 = vmatmul.mubr.msk.f32.gmra.mrb[36].mxu0 %vm330_vm6, %v18260_v27 }
 0x407   : > { %10741 = vmatprep.mubr.msk.f32.mxu1 %vm12720_vm7, %v20213_v9  ;;  %10883 = vmatprep.mubr.msk.f32.mxu0 %vm12720_vm7, %v20213_v9 }
 0x40a   : > { %10742 = vmatmul.mubr.msk.f32.gmra.mrb[38].mxu1 %vm330_vm6, %v17944_v6  ;;  %10884 = vmatmul.mubr.msk.f32.gmra.mrb[38].mxu0 %vm330_vm6, %v18272_v50 }
 0x40b   : > { %10744 = vmatprep.mubr.msk.f32.mxu1 %vm12720_vm7, %v20213_v9  ;;  %10886 = vmatprep.mubr.msk.f32.mxu0 %vm12720_vm7, %v20213_v9 }
 0x40e   : > { %10745 = vmatmul.mubr.msk.f32.gmra.mrb[40].mxu1 %vm330_vm6, %v17962_v14  ;;  %10887 = vmatmul.mubr.msk.f32.gmra.mrb[40].mxu0 %vm330_vm6, %v18291_v1 }
 0x40f   : > { %10897 = vmatprep.mubr.msk.f32.mxu0 %vm12720_vm7, %v20213_v9 }
 0x412   : > { %10898 = vmatmul.mubr.msk.f32.vlgmr.msra.gmra.mrb[0].mxu0 %vm330_vm6, %v6265_v49  ;;  %v6284_v49 = vrot.slane %v18148_v22, 7 }
 0x413   : > { %11816 = vmatpush3.bf16.msra.mxu0 %v11815_v62  ;;  %10900 = vmatprep.mubr.msk.f32.mxu0 %vm12720_vm7, %v20213_v9  ;;  %v6281_v62 = vsel %vm6262_vm10, %v6278_v52, %v6280_v54 }
 0x414   : > { %11817 = vmatprep.subr.bf16.mxu0 %v20646_v58  ;;  %v6285_v25 = vsel %vm6262_vm10, %v6282_v16, %v6284_v49 }
 0x416   : > { %10901 = vmatmul.mubr.msk.f32.gmra.mrb[2].mxu0 %vm330_vm6, %v6267_v40 }
 0x417   : > { %10903 = vmatprep.mubr.msk.f32.mxu0 %vm12720_vm7, %v20213_v9  ;;  %11819 = vmatpush3.bf16.msra.mxu0 %v11818_v30  ;;  %v6286_v30 = vrot.slane %v18199_v37, 7 }
 0x418   : > { %11820 = vmatprep.subr.bf16.mxu0 %v20646_v58 }
 0x419   : > { %v6287_v40 = vsel %vm6262_vm10, %v6284_v49, %v6286_v30 }
 0x41a   : > { %10904 = vmatmul.mubr.msk.f32.gmra.mrb[4].mxu0 %vm330_vm6, %v6269_v19  ;;  %v6288_v19 = vrot.slane %v18365_v39, 7 }
 0x41b   : > { %10906 = vmatprep.mubr.msk.f32.mxu0 %vm12720_vm7, %v20213_v9 }
 0x41c   : > { %v6289_v10 = vsel %vm6262_vm10, %v6286_v30, %v6288_v19  ;;  %v9775_v30 = vld [vmem:[%s19951_s3 + $0xc0] sm:$0xff] }
 0x41e   : > { %10907 = vmatmul.mubr.msk.f32.gmra.mrb[6].mxu0 %vm330_vm6, %v6271_v57  ;;  %v6290_v57 = vrot.slane %v17895_v4, 7 }
 0x41f   : > { %10909 = vmatprep.mubr.msk.f32.mxu0 %vm12720_vm7, %v20213_v9 }
 0x420   : > { %v6291_v11 = vsel %vm6262_vm10, %v6288_v19, %v6290_v57 }
 0x422   : > { %10910 = vmatmul.mubr.msk.f32.gmra.mrb[8].mxu0 %vm330_vm6, %v6273_v61  ;;  %v6292_v61 = vrot.slane %v17923_v43, 7 }
 0x423   : > { %10912 = vmatprep.mubr.msk.f32.mxu0 %vm12720_vm7, %v20213_v9 }
 0x424   : > { %v6293_v21 = vsel %vm6262_vm10, %v6290_v57, %v6292_v61  ;;  %v9777_v57 = vld [vmem:[%s19951_s3 + $0xd0] sm:$0xff] }
 0x426   : > { %10913 = vmatmul.mubr.msk.f32.gmra.mrb[10].mxu0 %vm330_vm6, %v6275_v35  ;;  %v6294_v35 = vrot.slane %v17925_v28, 7 }
 0x427   : > { %10915 = vmatprep.mubr.msk.f32.mxu0 %vm12720_vm7, %v20213_v9 }
 0x428   : > { %v6295_v48 = vsel %vm6262_vm10, %v6292_v61, %v6294_v35 }
 0x42a   : > { %10916 = vmatmul.mubr.msk.f32.gmra.mrb[12].mxu0 %vm330_vm6, %v6277_v32  ;;  %v6296_v32 = vrot.slane %v17936_v2, 7 }
 0x42b   : > { %10918 = vmatprep.mubr.msk.f32.mxu0 %vm12720_vm7, %v20213_v9 }
 0x42c   : > { %v6297_v52 = vsel %vm6262_vm10, %v6294_v35, %v6296_v32 }
 0x42e   : > { %10919 = vmatmul.mubr.msk.f32.gmra.mrb[14].mxu0 %vm330_vm6, %v6279_v26  ;;  %v6298_v26 = vrot.slane %v17944_v6, 7 }
 0x42f   : > { %10921 = vmatprep.mubr.msk.f32.mxu0 %vm12720_vm7, %v20213_v9 }
 0x430   : > { %v6299_v54 = vsel %vm6262_vm10, %v6296_v32, %v6298_v26 }
 0x432   : > { %10922 = vmatmul.mubr.msk.f32.gmra.mrb[16].mxu0 %vm330_vm6, %v6281_v62  ;;  %v6300_v62 = vrot.slane %v17962_v14, 7 }
 0x433   : > { %10924 = vmatprep.mubr.msk.f32.mxu0 %vm12720_vm7, %v20213_v9 }
 0x434   : > { %v6301_v16 = vsel %vm6262_vm10, %v6298_v26, %v6300_v62 }
 0x436   : > { %10925 = vmatmul.mubr.msk.f32.gmra.mrb[18].mxu0 %vm330_vm6, %v6283_v12  ;;  %v6302_v12 = vrot.slane %v18253_v46, 7 }
 0x437   : > { %10927 = vmatprep.mubr.msk.f32.mxu0 %vm12720_vm7, %v20213_v9 }
 0x438   : > { %v6303_v49 = vsel %vm6262_vm10, %v6300_v62, %v6302_v12 }
 0x43a   : > { %10928 = vmatmul.mubr.msk.f32.gmra.mrb[20].mxu0 %vm330_vm6, %v6285_v25  ;;  %v6304_v25 = vrot.slane %v18054_v36, 7 }
 0x43b   : > { %10930 = vmatprep.mubr.msk.f32.mxu0 %vm12720_vm7, %v20213_v9 }
 0x43c   : > { %v6305_v19 = vsel %vm6262_vm10, %v6302_v12, %v6304_v25 }
 0x43e   : > { %10931 = vmatmul.mubr.msk.f32.gmra.mrb[22].mxu0 %vm330_vm6, %v6287_v40  ;;  %v9776_v40 = vld [vmem:[%s19951_s3 + $0xc8] sm:$0xff] }
 0x43f   : > { %10933 = vmatprep.mubr.msk.f32.mxu0 %vm12720_vm7, %v20213_v9 }
 0x442   : > { %10934 = vmatmul.mubr.msk.f32.gmra.mrb[24].mxu0 %vm330_vm6, %v6289_v10  ;;  %v11821_v10 = vpack.c.bf16 %v9776_v40, %v9775_v30 }
 0x443   : > { %10936 = vmatprep.mubr.msk.f32.mxu0 %vm12720_vm7, %v20213_v9 }
 0x446   : > { %10937 = vmatmul.mubr.msk.f32.gmra.mrb[26].mxu0 %vm330_vm6, %v6291_v11  ;;  %v9778_v11 = vld [vmem:[%s19951_s3 + $0xd8] sm:$0xff] }
 0x447   : > { %10939 = vmatprep.mubr.msk.f32.mxu0 %vm12720_vm7, %v20213_v9  ;;  %v11824_v61 = vpack.c.bf16 %v9778_v11, %v9777_v57  ;;  %v9800_v11 = vld [vmem:[%s19951_s3 + $0xe0] sm:$0xff] }
 0x44a   : > { %10940 = vmatmul.mubr.msk.f32.gmra.mrb[28].mxu0 %vm330_vm6, %v6293_v21 }
 0x44b   : > { %10942 = vmatprep.mubr.msk.f32.mxu0 %vm12720_vm7, %v20213_v9 }
 0x44e   : > { %10943 = vmatmul.mubr.msk.f32.gmra.mrb[30].mxu0 %vm330_vm6, %v6295_v48 }
 0x44f   : > { %10945 = vmatprep.mubr.msk.f32.mxu0 %vm12720_vm7, %v20213_v9 }
 0x452   : > { %10946 = vmatmul.mubr.msk.f32.gmra.mrb[32].mxu0 %vm330_vm6, %v6297_v52 }
 0x453   : > { %10948 = vmatprep.mubr.msk.f32.mxu0 %vm12720_vm7, %v20213_v9 }
 0x456   : > { %10949 = vmatmul.mubr.msk.f32.gmra.mrb[34].mxu0 %vm330_vm6, %v6299_v54 }
 0x457   : > { %10951 = vmatprep.mubr.msk.f32.mxu0 %vm12720_vm7, %v20213_v9 }
 0x45a   : > { %10952 = vmatmul.mubr.msk.f32.gmra.mrb[36].mxu0 %vm330_vm6, %v6301_v16 }
 0x45b   : > { %10954 = vmatprep.mubr.msk.f32.mxu0 %vm12720_vm7, %v20213_v9 }
 0x45e   : > { %10955 = vmatmul.mubr.msk.f32.gmra.mrb[38].mxu0 %vm330_vm6, %v6303_v49 }
 0x45f   : > { %10957 = vmatprep.mubr.msk.f32.mxu0 %vm12720_vm7, %v20213_v9 }
 0x462   : > { %10958 = vmatmul.mubr.msk.f32.gmra.mrb[40].mxu0 %vm330_vm6, %v6305_v19 }
 0x463   : > { %10968 = vmatprep.mubr.msk.f32.mxu0 %vm12720_vm7, %v20213_v9 }
 0x466   : > { %10969 = vmatmul.mubr.msk.f32.vlgmr.msra.gmra.mrb[0].mxu0 %vm330_vm6, %v17993_v15 }
 0x467   : > { %11822 = vmatpush3.bf16.msra.mxu0 %v11821_v10  ;;  %10971 = vmatprep.mubr.msk.f32.mxu0 %vm12720_vm7, %v20213_v9 }
 0x468   : > { %11823 = vmatprep.subr.bf16.mxu0 %v20646_v58 }
 0x46a   : > { %10972 = vmatmul.mubr.msk.f32.gmra.mrb[2].mxu0 %vm330_vm6, %v18006_v55 }
 0x46b   : > { %10974 = vmatprep.mubr.msk.f32.mxu0 %vm12720_vm7, %v20213_v9  ;;  %11825 = vmatpush3.bf16.msra.mxu0 %v11824_v61  ;;  %v9801_v61 = vld [vmem:[%s19951_s3 + $0xe8] sm:$0xff] }
 0x46c   : > { %11826 = vmatprep.subr.bf16.mxu0 %v20646_v58 }
 0x46e   : > { %10975 = vmatmul.mubr.msk.f32.gmra.mrb[4].mxu0 %vm330_vm6, %v18023_v7 }
 0x46f   : > { %10977 = vmatprep.mubr.msk.f32.mxu0 %vm12720_vm7, %v20213_v9 }
 0x472   : > { %10978 = vmatmul.mubr.msk.f32.gmra.mrb[6].mxu0 %vm330_vm6, %v18036_v44 }
 0x473   : > { %10980 = vmatprep.mubr.msk.f32.mxu0 %vm12720_vm7, %v20213_v9 }
 0x476   : > { %10981 = vmatmul.mubr.msk.f32.gmra.mrb[8].mxu0 %vm330_vm6, %v18051_v45 }
 0x477   : > { %10983 = vmatprep.mubr.msk.f32.mxu0 %vm12720_vm7, %v20213_v9 }
 0x47a   : > { %10984 = vmatmul.mubr.msk.f32.gmra.mrb[10].mxu0 %vm330_vm6, %v18070_v63 }
 0x47b   : > { %10986 = vmatprep.mubr.msk.f32.mxu0 %vm12720_vm7, %v20213_v9 }
 0x47e   : > { %10987 = vmatmul.mubr.msk.f32.gmra.mrb[12].mxu0 %vm330_vm6, %v18092_v29 }
 0x47f   : > { %10989 = vmatprep.mubr.msk.f32.mxu0 %vm12720_vm7, %v20213_v9 }
 0x482   : > { %10990 = vmatmul.mubr.msk.f32.gmra.mrb[14].mxu0 %vm330_vm6, %v18106_v23 }
 0x483   : > { %10992 = vmatprep.mubr.msk.f32.mxu0 %vm12720_vm7, %v20213_v9 }
 0x486   : > { %10993 = vmatmul.mubr.msk.f32.gmra.mrb[16].mxu0 %vm330_vm6, %v18120_v20 }
 0x487   : > { %10995 = vmatprep.mubr.msk.f32.mxu0 %vm12720_vm7, %v20213_v9 }
 0x48a   : > { %10996 = vmatmul.mubr.msk.f32.gmra.mrb[18].mxu0 %vm330_vm6, %v18134_v60 }
 0x48b   : > { %10998 = vmatprep.mubr.msk.f32.mxu0 %vm12720_vm7, %v20213_v9 }
 0x48e   : > { %10999 = vmatmul.mubr.msk.f32.gmra.mrb[20].mxu0 %vm330_vm6, %v18148_v22 }
 0x48f   : > { %11001 = vmatprep.mubr.msk.f32.mxu0 %vm12720_vm7, %v20213_v9 }
 0x491   : > { %v18473_v15 = vpop.f32.mrb[0].mxu1 }
 0x492   : > { %v10686_v21 = vpop.f32.mrb[1].mxu1  ;;  %11002 = vmatmul.mubr.msk.f32.gmra.mrb[22].mxu0 %vm330_vm6, %v18199_v37 }
 0x493   : > { %11004 = vmatprep.mubr.msk.f32.mxu0 %vm12720_vm7, %v20213_v9 }
 0x495   : > { %v18479_v35 = vpop.f32.mrb[2].mxu1 }
 0x496   : > { %v10689_v48 = vpop.f32.mrb[3].mxu1  ;;  %11005 = vmatmul.mubr.msk.f32.gmra.mrb[24].mxu0 %vm330_vm6, %v18365_v39 }
 0x497   : > { %11007 = vmatprep.mubr.msk.f32.mxu0 %vm12720_vm7, %v20213_v9  ;;  %v6747_v48 = vrot.slane %v18023_v7, 4 }
 0x499   : > { %v18485_v32 = vpop.f32.mrb[4].mxu1 }
 0x49a   : > { %v10692_v52 = vpop.f32.mrb[5].mxu1  ;;  %11008 = vmatmul.mubr.msk.f32.gmra.mrb[26].mxu0 %vm330_vm6, %v17895_v4 }
 0x49b   : > { %11010 = vmatprep.mubr.msk.f32.mxu0 %vm12720_vm7, %v20213_v9 }
 0x49d   : > { %v18491_v26 = vpop.f32.mrb[6].mxu1 }
 0x49e   : > { %v10695_v54 = vpop.f32.mrb[7].mxu1  ;;  %11011 = vmatmul.mubr.msk.f32.gmra.mrb[28].mxu0 %vm330_vm6, %v17923_v43 }
 0x49f   : > { %11013 = vmatprep.mubr.msk.f32.mxu0 %vm12720_vm7, %v20213_v9  ;;  %v6746_v54 = vrot.slane %v18006_v55, 4 }
 0x4a1   : > { %v18497_v62 = vpop.f32.mrb[8].mxu1 }
 0x4a2   : > { %v10698_v16 = vpop.f32.mrb[9].mxu1  ;;  %11014 = vmatmul.mubr.msk.f32.gmra.mrb[30].mxu0 %vm330_vm6, %v17925_v28 }
 0x4a3   : > { %11016 = vmatprep.mubr.msk.f32.mxu0 %vm12720_vm7, %v20213_v9  ;;  %v11827_v16 = vpack.c.bf16 %v9801_v61, %v9800_v11 }
 0x4a5   : > { %v18503_v12 = vpop.f32.mrb[10].mxu1 }
 0x4a6   : > { %v10701_v49 = vpop.f32.mrb[11].mxu1  ;;  %11017 = vmatmul.mubr.msk.f32.gmra.mrb[32].mxu0 %vm330_vm6, %v17936_v2 }
 0x4a7   : > { %11019 = vmatprep.mubr.msk.f32.mxu0 %vm12720_vm7, %v20213_v9  ;;  %v9802_v49 = vld [vmem:[%s19951_s3 + $0xf0] sm:$0xff] }
 0x4a9   : > { %v18509_v25 = vpop.f32.mrb[12].mxu1 }
 0x4aa   : > { %v10704_v30 = vpop.f32.mrb[13].mxu1  ;;  %11020 = vmatmul.mubr.msk.f32.gmra.mrb[34].mxu0 %vm330_vm6, %v17944_v6 }
 0x4ab   : > { %11022 = vmatprep.mubr.msk.f32.mxu0 %vm12720_vm7, %v20213_v9  ;;  %v9803_v30 = vld [vmem:[%s19951_s3 + $0xf8] sm:$0xff] }
 0x4ac   : > { %v11830_v11 = vpack.c.bf16 %v9803_v30, %v9802_v49 }
 0x4ad   : > { %v18515_v40 = vpop.f32.mrb[14].mxu1 }
 0x4ae   : > { %v10707_v19 = vpop.f32.mrb[15].mxu1  ;;  %11023 = vmatmul.mubr.msk.f32.gmra.mrb[36].mxu0 %vm330_vm6, %v17962_v14 }
 0x4af   : > { %11025 = vmatprep.mubr.msk.f32.mxu0 %vm12720_vm7, %v20213_v9 }
 0x4b1   : > { %v18521_v10 = vpop.f32.mrb[16].mxu1 }
 0x4b2   : > { %20699 = vst [vmem:[#allocation30_spill] sm:$0xff] %v18521_v10  ;;  %v10710_v57 = vpop.f32.mrb[17].mxu1  ;;  %11026 = vmatmul.mubr.msk.f32.gmra.mrb[38].mxu0 %vm330_vm6, %v18253_v46 }
 0x4b3   : > { %11028 = vmatprep.mubr.msk.f32.mxu0 %vm12720_vm7, %v20213_v9  ;;  %v6748_v57 = vsel %vm2998_vm3, %v6746_v54, %v6747_v48 }
 0x4b5   : > { %v18533_v21 = vpop.f32.mrb[18].mxu1 }
 0x4b6   : > { %20700 = vst [vmem:[#allocation25_spill] sm:$0xff] %v18533_v21  ;;  %v10713_v52 = vpop.f32.mrb[19].mxu1  ;;  %11029 = vmatmul.mubr.msk.f32.gmra.mrb[40].mxu0 %vm330_vm6, %v18054_v36 }
 0x4b7   : > { %11039 = vmatprep.mubr.msk.f32.mxu0 %vm12720_vm7, %v20213_v9  ;;  %v6749_v52 = vrot.slane %v18036_v44, 4 }
 0x4b9   : > { %v18547_v19 = vpop.f32.mrb[20].mxu1  ;;  %v6750_v21 = vsel %vm2998_vm3, %v6747_v48, %v6749_v52  ;;  %v6755_v48 = vrot.slane %v18092_v29, 4 }
 0x4ba   : > { %20701 = vst [vmem:[#allocation26_spill] sm:$0xff] %v18547_v19  ;;  %v10716_v17 = vpop.f32.mrb[21].mxu1  ;;  %11040 = vmatmul.mubr.msk.f32.vlgmr.msra.gmra.mrb[0].mxu0 %vm330_vm6, %v6748_v57  ;;  %v6751_v19 = vrot.slane %v18051_v45, 4 }
 0x4bb   : > { %11828 = vmatpush3.bf16.msra.mxu0 %v11827_v16  ;;  %11042 = vmatprep.mubr.msk.f32.mxu0 %vm12720_vm7, %v20213_v9  ;;  %v6753_v16 = vrot.slane %v18070_v63, 4 }
 0x4bc   : > { %11829 = vmatprep.subr.bf16.mxu0 %v20646_v58  ;;  %v6752_v54 = vsel %vm2998_vm3, %v6749_v52, %v6751_v19 }
 0x4bd   : > { %v18555_v61 = vpop.f32.mrb[22].mxu1  ;;  %v6756_v52 = vsel %vm2998_vm3, %v6753_v16, %v6755_v48 }
 0x4be   : > { %v10719_v10 = vpop.f32.mrb[23].mxu1  ;;  %11043 = vmatmul.mubr.msk.f32.gmra.mrb[2].mxu0 %vm330_vm6, %v6750_v21  ;;  %v6754_v21 = vsel %vm2998_vm3, %v6751_v19, %v6753_v16 }
 0x4bf   : > { %11045 = vmatprep.mubr.msk.f32.mxu0 %vm12720_vm7, %v20213_v9  ;;  %11831 = vmatpush3.bf16.msra.mxu0 %v11830_v11  ;;  %v6757_v11 = vrot.slane %v18106_v23, 4 }
 0x4c0   : > { %11832 = vmatprep.subr.bf16.mxu0 %v20646_v58 }
 0x4c1   : > { %v18563_v17 = vpop.f32.mrb[24].mxu1 }
 0x4c2   : > { %v10722_v49 = vpop.f32.mrb[25].mxu1  ;;  %11046 = vmatmul.mubr.msk.f32.gmra.mrb[4].mxu0 %vm330_vm6, %v6752_v54 }
 0x4c3   : > { %11048 = vmatprep.mubr.msk.f32.mxu0 %vm12720_vm7, %v20213_v9  ;;  %v6758_v49 = vsel %vm2998_vm3, %v6755_v48, %v6757_v11 }
 0x4c5   : > { %v18570_v10 = vpop.f32.mrb[26].mxu1 }
 0x4c6   : > { %v10725_v30 = vpop.f32.mrb[27].mxu1  ;;  %11049 = vmatmul.mubr.msk.f32.gmra.mrb[6].mxu0 %vm330_vm6, %v6754_v21  ;;  %v6759_v21 = vrot.slane %v18120_v20, 4 }
 0x4c7   : > { %11051 = vmatprep.mubr.msk.f32.mxu0 %vm12720_vm7, %v20213_v9 }
 0x4c9   : > { %v18577_v57 = vpop.f32.mrb[28].mxu1 }
 0x4ca   : > { %20702 = vst [vmem:[#allocation20_spill] sm:$0xff] %v18577_v57  ;;  %v10728_v54 = vpop.f32.mrb[29].mxu1  ;;  %11052 = vmatmul.mubr.msk.f32.gmra.mrb[8].mxu0 %vm330_vm6, %v6756_v52  ;;  %v6761_v52 = vrot.slane %v18134_v60, 4 }
 0x4cb   : > { %11054 = vmatprep.mubr.msk.f32.mxu0 %vm12720_vm7, %v20213_v9  ;;  %v6760_v54 = vsel %vm2998_vm3, %v6757_v11, %v6759_v21 }
 0x4cd   : > { %v18584_v19 = vpop.f32.mrb[30].mxu1 }
 0x4ce   : > { %20703 = vst [vmem:[#allocation10_spill] sm:$0xff] %v18584_v19  ;;  %v10731_v30 = vpop.f32.mrb[31].mxu1  ;;  %11055 = vmatmul.mubr.msk.f32.gmra.mrb[10].mxu0 %vm330_vm6, %v6758_v49  ;;  %v6763_v49 = vrot.slane %v18148_v22, 4 }
 0x4cf   : > { %11057 = vmatprep.mubr.msk.f32.mxu0 %vm12720_vm7, %v20213_v9  ;;  %v6762_v30 = vsel %vm2998_vm3, %v6759_v21, %v6761_v52 }
 0x4d1   : > { %v18591_v16 = vpop.f32.mrb[32].mxu1 }
 0x4d2   : > { %20704 = vst [vmem:[#allocation11_spill] sm:$0xff] %v18591_v16  ;;  %v10734_v57 = vpop.f32.mrb[33].mxu1  ;;  %11058 = vmatmul.mubr.msk.f32.gmra.mrb[12].mxu0 %vm330_vm6, %v6760_v54  ;;  %v6765_v54 = vrot.slane %v18199_v37, 4 }
 0x4d3   : > { %11060 = vmatprep.mubr.msk.f32.mxu0 %vm12720_vm7, %v20213_v9  ;;  %v6764_v57 = vsel %vm2998_vm3, %v6761_v52, %v6763_v49 }
 0x4d5   : > { %v18598_v48 = vpop.f32.mrb[34].mxu1 }
 0x4d6   : > { %20705 = vst [vmem:[#allocation23_spill] sm:$0xff] %v18598_v48  ;;  %v10737_v19 = vpop.f32.mrb[35].mxu1  ;;  %11061 = vmatmul.mubr.msk.f32.gmra.mrb[14].mxu0 %vm330_vm6, %v6762_v30  ;;  %v6767_v30 = vrot.slane %v18365_v39, 4 }
 0x4d7   : > { %11063 = vmatprep.mubr.msk.f32.mxu0 %vm12720_vm7, %v20213_v9  ;;  %v6766_v19 = vsel %vm2998_vm3, %v6763_v49, %v6765_v54 }
 0x4d9   : > { %v18605_v11 = vpop.f32.mrb[36].mxu1 }
 0x4da   : > { %20706 = vst [vmem:[#allocation18_spill] sm:$0xff] %v18605_v11  ;;  %v10740_v16 = vpop.f32.mrb[37].mxu1  ;;  %11064 = vmatmul.mubr.msk.f32.gmra.mrb[16].mxu0 %vm330_vm6, %v6764_v57  ;;  %v6769_v57 = vrot.slane %v17895_v4, 4 }
 0x4db   : > { %11066 = vmatprep.mubr.msk.f32.mxu0 %vm12720_vm7, %v20213_v9  ;;  %v6768_v16 = vsel %vm2998_vm3, %v6765_v54, %v6767_v30  ;;  %v6773_v54 = vrot.slane %v17925_v28, 4 }
 0x4dc   : > { %v6770_v49 = vsel %vm2998_vm3, %v6767_v30, %v6769_v57  ;;  %v6777_v30 = vrot.slane %v17944_v6, 4 }
 0x4dd   : > { %v18612_v21 = vpop.f32.mrb[38].mxu1 }
 0x4de   : > { %v10743_v48 = vpop.f32.mrb[39].mxu1  ;;  %11067 = vmatmul.mubr.msk.f32.gmra.mrb[18].mxu0 %vm330_vm6, %v6766_v19 }
 0x4df   : > { %11069 = vmatprep.mubr.msk.f32.mxu0 %vm12720_vm7, %v20213_v9  ;;  %v6771_v48 = vrot.slane %v17923_v43, 4 }
 0x4e1   : > { %v18619_v52 = vpop.f32.mrb[40].mxu1  ;;  %v6772_v19 = vsel %vm2998_vm3, %v6769_v57, %v6771_v48  ;;  %v6774_v4 = vsel %vm2998_vm3, %v6771_v48, %v6773_v54  ;;  %v6781_v57 = vrot.slane %v18253_v46, 4 }
 0x4e2   : > { %v10746_v11 = vpop.f32.mrb[41].mxu1  ;;  %11070 = vmatmul.mubr.msk.f32.gmra.mrb[20].mxu0 %vm330_vm6, %v6768_v16  ;;  %v6779_v16 = vrot.slane %v17962_v14, 4  ;;  %v18661_v14 = vld [vmem:[#allocation3 + $0xc0] sm:$0xf] }
 0x4e3   : > { %11072 = vmatprep.mubr.msk.f32.mxu0 %vm12720_vm7, %v20213_v9  ;;  %v6775_v11 = vrot.slane %v17936_v2, 4 }
 0x4e4   : > { %v6780_v2 = vsel %vm2998_vm3, %v6777_v30, %v6779_v16  ;;  %v6782_v6 = vsel %vm2998_vm3, %v6779_v16, %v6781_v57  ;;  %v7027_v16 = vrot.slane %v18006_v55, 5 }
 0x4e5   : > { %v6776_v43 = vsel %vm2998_vm3, %v6773_v54, %v6775_v11  ;;  %v6778_v28 = vsel %vm2998_vm3, %v6775_v11, %v6777_v30  ;;  %v6787_v54 = vrot.slane %v18661_v14, 4  ;;  %v9826_v30 = vld [vmem:[%s19951_s3 + $0x108] sm:$0xff] }
 0x4e6   : > { %11073 = vmatmul.mubr.msk.f32.gmra.mrb[22].mxu0 %vm330_vm6, %v6770_v49  ;;  %v6783_v49 = vrot.slane %v18054_v36, 4 }
 0x4e7   : > { %11075 = vmatprep.mubr.msk.f32.mxu0 %vm12720_vm7, %v20213_v9 }
 0x4e8   : > { %v6784_v48 = vsel %vm2998_vm3, %v6781_v57, %v6783_v49  ;;  %v9827_v57 = vld [vmem:[%s19951_s3 + $0x110] sm:$0xff] }
 0x4ea   : > { %11076 = vmatmul.mubr.msk.f32.gmra.mrb[24].mxu0 %vm330_vm6, %v6772_v19  ;;  %v6785_v19 = vrot.slane %v18064_v0, 4 }
 0x4eb   : > { %11078 = vmatprep.mubr.msk.f32.mxu0 %vm12720_vm7, %v20213_v9 }
 0x4ec   : > { %v6788_v11 = vsel %vm2998_vm3, %v6785_v19, %v6787_v54  ;;  %v7034_v54 = vrot.slane %v18070_v63, 5 }
 0x4ee   : > { %11079 = vmatmul.mubr.msk.f32.gmra.mrb[26].mxu0 %vm330_vm6, %v6774_v4  ;;  %v6786_v4 = vsel %vm2998_vm3, %v6783_v49, %v6785_v19  ;;  %v7032_v19 = vrot.slane %v18051_v45, 5 }
 0x4ef   : > { %11081 = vmatprep.mubr.msk.f32.mxu0 %vm12720_vm7, %v20213_v9 }
 0x4f2   : > { %11082 = vmatmul.mubr.msk.f32.gmra.mrb[28].mxu0 %vm330_vm6, %v6776_v43  ;;  %v9825_v43 = vld [vmem:[%s19951_s3 + $0x100] sm:$0xff] }
 0x4f3   : > { %11084 = vmatprep.mubr.msk.f32.mxu0 %vm12720_vm7, %v20213_v9 }
 0x4f6   : > { %11085 = vmatmul.mubr.msk.f32.gmra.mrb[30].mxu0 %vm330_vm6, %v6778_v28  ;;  %v7028_v28 = vrot.slane %v18023_v7, 5  ;;  %v7030_v7 = vrot.slane %v18036_v44, 5 }
 0x4f7   : > { %11087 = vmatprep.mubr.msk.f32.mxu0 %vm12720_vm7, %v20213_v9 }
 0x4f8   : > { %v7029_v49 = vsel %vm3964_vm4, %v7027_v16, %v7028_v28  ;;  %v7033_v44 = vsel %vm3964_vm4, %v7030_v7, %v7032_v19  ;;  %v7044_v16 = vrot.slane %v18148_v22, 5 }
 0x4fa   : > { %11088 = vmatmul.mubr.msk.f32.gmra.mrb[32].mxu0 %vm330_vm6, %v6780_v2  ;;  %v11833_v2 = vpack.c.bf16 %v9826_v30, %v9825_v43  ;;  %v7038_v43 = vrot.slane %v18106_v23, 5  ;;  %v7040_v30 = vrot.slane %v18120_v20, 5 }
 0x4fb   : > { %11090 = vmatprep.mubr.msk.f32.mxu0 %vm12720_vm7, %v20213_v9 }
 0x4fe   : > { %11091 = vmatmul.mubr.msk.f32.gmra.mrb[34].mxu0 %vm330_vm6, %v6782_v6  ;;  %v9828_v6 = vld [vmem:[%s19951_s3 + $0x118] sm:$0xff] }
 0x4ff   : > { %11093 = vmatprep.mubr.msk.f32.mxu0 %vm12720_vm7, %v20213_v9  ;;  %v11836_v55 = vpack.c.bf16 %v9828_v6, %v9827_v57  ;;  %v7048_v57 = vrot.slane %v18365_v39, 5 }
 0x502   : > { %11094 = vmatmul.mubr.msk.f32.gmra.mrb[36].mxu0 %vm330_vm6, %v6784_v48  ;;  %v7031_v48 = vsel %vm3964_vm4, %v7028_v28, %v7030_v7  ;;  %v7042_v28 = vrot.slane %v18134_v60, 5 }
 0x503   : > { %11096 = vmatprep.mubr.msk.f32.mxu0 %vm12720_vm7, %v20213_v9 }
 0x504   : > { %v7043_v23 = vsel %vm3964_vm4, %v7040_v30, %v7042_v28  ;;  %v7045_v20 = vsel %vm3964_vm4, %v7042_v28, %v7044_v16 }
 0x506   : > { %11097 = vmatmul.mubr.msk.f32.gmra.mrb[38].mxu0 %vm330_vm6, %v6786_v4  ;;  %v7035_v4 = vsel %vm3964_vm4, %v7032_v19, %v7034_v54 }
 0x507   : > { %11099 = vmatprep.mubr.msk.f32.mxu0 %vm12720_vm7, %v20213_v9 }
 0x50a   : > { %11100 = vmatmul.mubr.msk.f32.gmra.mrb[40].mxu0 %vm330_vm6, %v6788_v11  ;;  %v7036_v11 = vrot.slane %v18092_v29, 5  ;;  %v7041_v29 = vsel %vm3964_vm4, %v7038_v43, %v7040_v30  ;;  %v12652_v30 = vld [vmem:[#allocation3 + $0xa0] sm:$0xff] }
 0x50b   : > { %11110 = vmatprep.mubr.msk.f32.mxu0 %vm12720_vm7, %v20213_v9 }
 0x50c   : > { %v7037_v45 = vsel %vm3964_vm4, %v7034_v54, %v7036_v11  ;;  %v7039_v63 = vsel %vm3964_vm4, %v7036_v11, %v7038_v43  ;;  %v12650_v54 = vld [vmem:[#allocation3 + $0x90] sm:$0xff] }
 0x50e   : > { %11111 = vmatmul.mubr.msk.f32.vlgmr.msra.gmra.mrb[0].mxu0 %vm330_vm6, %v7029_v49  ;;  %v12648_v49 = vld [vmem:[#allocation3 + $0x80] sm:$0xff] }
 0x50f   : > { %11834 = vmatpush3.bf16.msra.mxu0 %v11833_v2  ;;  %11113 = vmatprep.mubr.msk.f32.mxu0 %vm12720_vm7, %v20213_v9  ;;  %v7046_v2 = vrot.slane %v18199_v37, 5  ;;  %v12647_v37 = vld [vmem:[#allocation3 + $0x78] sm:$0xff]  ;;  %v7052_v7 = vrot.slane %v12648_v49, 5 }
 0x510   : > { %11835 = vmatprep.subr.bf16.mxu0 %v20646_v58  ;;  %v7050_v39 = vrot.slane %v12647_v37, 5 }
 0x511   : > { %v7047_v60 = vsel %vm3964_vm4, %v7044_v16, %v7046_v2  ;;  %v7049_v22 = vsel %vm3964_vm4, %v7046_v2, %v7048_v57 }
 0x512   : > { %11114 = vmatmul.mubr.msk.f32.gmra.mrb[2].mxu0 %vm330_vm6, %v7031_v48  ;;  %v7051_v6 = vsel %vm3964_vm4, %v7048_v57, %v7050_v39  ;;  %v12649_v48 = vld [vmem:[#allocation3 + $0x88] sm:$0xff] }
 0x513   : > { %11116 = vmatprep.mubr.msk.f32.mxu0 %vm12720_vm7, %v20213_v9  ;;  %11837 = vmatpush3.bf16.msra.mxu0 %v11836_v55  ;;  %v7053_v55 = vsel %vm3964_vm4, %v7050_v39, %v7052_v7  ;;  %v7054_v19 = vrot.slane %v12649_v48, 5 }
 0x516   : > { %11117 = vmatmul.mubr.msk.f32.gmra.mrb[4].mxu0 %vm330_vm6, %v7033_v44  ;;  %v7055_v44 = vsel %vm3964_vm4, %v7052_v7, %v7054_v19 }
 0x517   : > { %11119 = vmatprep.mubr.msk.f32.mxu0 %vm12720_vm7, %v20213_v9 }
 0x51a   : > { %11120 = vmatmul.mubr.msk.f32.gmra.mrb[6].mxu0 %vm330_vm6, %v7035_v4  ;;  %v7056_v4 = vrot.slane %v12650_v54, 5 }
 0x51b   : > { %11122 = vmatprep.mubr.msk.f32.mxu0 %vm12720_vm7, %v20213_v9 }
 0x51c   : > { %v7057_v11 = vsel %vm3964_vm4, %v7054_v19, %v7056_v4 }
 0x51e   : > { %11123 = vmatmul.mubr.msk.f32.gmra.mrb[8].mxu0 %vm330_vm6, %v7037_v45  ;;  %v12651_v45 = vld [vmem:[#allocation3 + $0x98] sm:$0xff] }
 0x51f   : > { %11125 = vmatprep.mubr.msk.f32.mxu0 %vm12720_vm7, %v20213_v9  ;;  %v7058_v43 = vrot.slane %v12651_v45, 5 }
 0x522   : > { %11126 = vmatmul.mubr.msk.f32.gmra.mrb[10].mxu0 %vm330_vm6, %v7039_v63  ;;  %v7059_v63 = vsel %vm3964_vm4, %v7056_v4, %v7058_v43 }
 0x523   : > { %11128 = vmatprep.mubr.msk.f32.mxu0 %vm12720_vm7, %v20213_v9 }
 0x526   : > { %11129 = vmatmul.mubr.msk.f32.gmra.mrb[12].mxu0 %vm330_vm6, %v7041_v29  ;;  %v7060_v29 = vrot.slane %v12652_v30, 5 }
 0x527   : > { %11131 = vmatprep.mubr.msk.f32.mxu0 %vm12720_vm7, %v20213_v9 }
 0x528   : > { %v7061_v28 = vsel %vm3964_vm4, %v7058_v43, %v7060_v29 }
 0x52a   : > { %11132 = vmatmul.mubr.msk.f32.gmra.mrb[14].mxu0 %vm330_vm6, %v7043_v23  ;;  %v7062_v23 = vrot.slane %v18253_v46, 5  ;;  %v7068_v46 = vrot.slane %v18661_v14, 5 }
 0x52b   : > { %11134 = vmatprep.mubr.msk.f32.mxu0 %vm12720_vm7, %v20213_v9 }
 0x52c   : > { %v7063_v16 = vsel %vm3964_vm4, %v7060_v29, %v7062_v23 }
 0x52e   : > { %11135 = vmatmul.mubr.msk.f32.gmra.mrb[16].mxu0 %vm330_vm6, %v7045_v20  ;;  %v7064_v20 = vrot.slane %v18054_v36, 5 }
 0x52f   : > { %11137 = vmatprep.mubr.msk.f32.mxu0 %vm12720_vm7, %v20213_v9 }
 0x530   : > { %v7065_v2 = vsel %vm3964_vm4, %v7062_v23, %v7064_v20 }
 0x532   : > { %11138 = vmatmul.mubr.msk.f32.gmra.mrb[18].mxu0 %vm330_vm6, %v7047_v60  ;;  %v7066_v60 = vrot.slane %v18064_v0, 5 }
 0x533   : > { %11140 = vmatprep.mubr.msk.f32.mxu0 %vm12720_vm7, %v20213_v9 }
 0x534   : > { %v7067_v57 = vsel %vm3964_vm4, %v7064_v20, %v7066_v60  ;;  %v7069_v36 = vsel %vm3964_vm4, %v7066_v60, %v7068_v46 }
 0x536   : > { %11141 = vmatmul.mubr.msk.f32.gmra.mrb[20].mxu0 %vm330_vm6, %v7049_v22 }
 0x537   : > { %11143 = vmatprep.mubr.msk.f32.mxu0 %vm12720_vm7, %v20213_v9 }
 0x53a   : > { %11144 = vmatmul.mubr.msk.f32.gmra.mrb[22].mxu0 %vm330_vm6, %v7051_v6 }
 0x53b   : > { %11146 = vmatprep.mubr.msk.f32.mxu0 %vm12720_vm7, %v20213_v9 }
 0x53e   : > { %11147 = vmatmul.mubr.msk.f32.gmra.mrb[24].mxu0 %vm330_vm6, %v7053_v55 }
 0x53f   : > { %11149 = vmatprep.mubr.msk.f32.mxu0 %vm12720_vm7, %v20213_v9 }
 0x542   : > { %11150 = vmatmul.mubr.msk.f32.gmra.mrb[26].mxu0 %vm330_vm6, %v7055_v44 }
 0x543   : > { %11152 = vmatprep.mubr.msk.f32.mxu0 %vm12720_vm7, %v20213_v9 }
 0x546   : > { %11153 = vmatmul.mubr.msk.f32.gmra.mrb[28].mxu0 %vm330_vm6, %v7057_v11 }
 0x547   : > { %11155 = vmatprep.mubr.msk.f32.mxu0 %vm12720_vm7, %v20213_v9 }
 0x54a   : > { %11156 = vmatmul.mubr.msk.f32.gmra.mrb[30].mxu0 %vm330_vm6, %v7059_v63 }
 0x54b   : > { %11158 = vmatprep.mubr.msk.f32.mxu0 %vm12720_vm7, %v20213_v9 }
 0x54e   : > { %11159 = vmatmul.mubr.msk.f32.gmra.mrb[32].mxu0 %vm330_vm6, %v7061_v28 }
 0x54f   : > { %11161 = vmatprep.mubr.msk.f32.mxu0 %vm12720_vm7, %v20213_v9 }
 0x552   : > { %11162 = vmatmul.mubr.msk.f32.gmra.mrb[34].mxu0 %vm330_vm6, %v7063_v16 }
 0x553   : > { %11164 = vmatprep.mubr.msk.f32.mxu0 %vm12720_vm7, %v20213_v9 }
 0x556   : > { %11165 = vmatmul.mubr.msk.f32.gmra.mrb[36].mxu0 %vm330_vm6, %v7065_v2 }
 0x557   : > { %11167 = vmatprep.mubr.msk.f32.mxu0 %vm12720_vm7, %v20213_v9 }
 0x55a   : > { %11168 = vmatmul.mubr.msk.f32.gmra.mrb[38].mxu0 %vm330_vm6, %v7067_v57 }
 0x55b   : > { %11170 = vmatprep.mubr.msk.f32.mxu0 %vm12720_vm7, %v20213_v9 }
 0x55e   : > { %11171 = vmatmul.mubr.msk.f32.gmra.mrb[40].mxu0 %vm330_vm6, %v7069_v36 }
 0x55f   : > { %11181 = vmatprep.mubr.msk.f32.mxu0 %vm12720_vm7, %v20213_v9 }
 0x562   : > { %11182 = vmatmul.mubr.msk.f32.vlgmr.msra.gmra.mrb[0].mxu0 %vm330_vm6, %v18034_v31  ;;  %v7310_v31 = vrot.slane %v18661_v14, 6 }
 0x563   : > { %11184 = vmatprep.mubr.msk.f32.mxu0 %vm12720_vm7, %v20213_v9 }
 0x566   : > { %11185 = vmatmul.mubr.msk.f32.gmra.mrb[2].mxu0 %vm330_vm6, %v18049_v38  ;;  %v20707_v38 = vrot.slane %v18064_v0, 6  ;;  %v9854_v0 = vld [vmem:[%s19953_s5 + $0x58] sm:$0xff] }
 0x567   : > { %11187 = vmatprep.mubr.msk.f32.mxu0 %vm12720_vm7, %v20213_v9 }
 0x56a   : > { %11188 = vmatmul.mubr.msk.f32.gmra.mrb[4].mxu0 %vm330_vm6, %v18068_v56  ;;  %v7311_v56 = vsel %vm4440_vm5, %v20707_v38, %v7310_v31  ;;  %v20708_v31 = vld [vmem:[#allocation30_spill] sm:$0xff] }
 0x56b   : > { %11190 = vmatprep.mubr.msk.f32.mxu0 %vm12720_vm7, %v20213_v9 }
 0x56e   : > { %11191 = vmatmul.mubr.msk.f32.gmra.mrb[6].mxu0 %vm330_vm6, %v18090_v42  ;;  %v9851_v42 = vld [vmem:[%s19953_s5 + $0x40] sm:$0xff] }
 0x56f   : > { %11193 = vmatprep.mubr.msk.f32.mxu0 %vm12720_vm7, %v20213_v9 }
 0x572   : > { %11194 = vmatmul.mubr.msk.f32.gmra.mrb[8].mxu0 %vm330_vm6, %v18104_v8  ;;  %v9852_v8 = vld [vmem:[%s19953_s5 + $0x48] sm:$0xff] }
 0x573   : > { %11196 = vmatprep.mubr.msk.f32.mxu0 %vm12720_vm7, %v20213_v9 }
 0x576   : > { %11197 = vmatmul.mubr.msk.f32.gmra.mrb[10].mxu0 %vm330_vm6, %v18118_v24  ;;  %v11838_v24 = vpack.c.bf16 %v9852_v8, %v9851_v42 }
 0x577   : > { %11199 = vmatprep.mubr.msk.f32.mxu0 %vm12720_vm7, %v20213_v9 }
 0x578   : > { %11839 = vmatprep.subr.bf16.mxu1 %v11838_v24 }
 0x579   : > { %11841 = vmatpush3.bf16.msra.mxu1 %v11838_v24 }
 0x57a   : > { %11200 = vmatmul.mubr.msk.f32.gmra.mrb[12].mxu0 %vm330_vm6, %v18132_v47 }
 0x57b   : > { %11202 = vmatprep.mubr.msk.f32.mxu0 %vm12720_vm7, %v20213_v9 }
 0x57e   : > { %11203 = vmatmul.mubr.msk.f32.gmra.mrb[14].mxu0 %vm330_vm6, %v18146_v34  ;;  %v9855_v34 = vld [vmem:[%s19953_s5 + $0x60] sm:$0xff] }
 0x57f   : > { %11205 = vmatprep.mubr.msk.f32.mxu0 %vm12720_vm7, %v20213_v9 }
 0x582   : > { %11206 = vmatmul.mubr.msk.f32.gmra.mrb[16].mxu0 %vm330_vm6, %v18160_v18  ;;  %v9856_v18 = vld [vmem:[%s19953_s5 + $0x68] sm:$0xff] }
 0x583   : > { %11208 = vmatprep.mubr.msk.f32.mxu0 %vm12720_vm7, %v20213_v9 }
 0x586   : > { %11209 = vmatmul.mubr.msk.f32.gmra.mrb[18].mxu0 %vm330_vm6, %v18172_v59  ;;  %v11846_v59 = vpack.c.bf16 %v9856_v18, %v9855_v34 }
 0x587   : > { %11211 = vmatprep.mubr.msk.f32.mxu0 %vm12720_vm7, %v20213_v9 }
 0x58a   : > { %11212 = vmatmul.mubr.msk.f32.gmra.mrb[20].mxu0 %vm330_vm6, %v18184_v51  ;;  %v9857_v51 = vld [vmem:[%s19953_s5 + $0x70] sm:$0xff] }
 0x58b   : > { %11214 = vmatprep.mubr.msk.f32.mxu0 %vm12720_vm7, %v20213_v9 }
 0x58e   : > { %11215 = vmatmul.mubr.msk.f32.gmra.mrb[22].mxu0 %vm330_vm6, %v18196_v33  ;;  %v9858_v33 = vld [vmem:[%s19953_s5 + $0x78] sm:$0xff] }
 0x58f   : > { %11217 = vmatprep.mubr.msk.f32.mxu0 %vm12720_vm7, %v20213_v9 }
 0x592   : > { %11218 = vmatmul.mubr.msk.f32.gmra.mrb[24].mxu0 %vm330_vm6, %v18210_v5  ;;  %v11850_v5 = vpack.c.bf16 %v9858_v33, %v9857_v51 }
 0x593   : > { %11220 = vmatprep.mubr.msk.f32.mxu0 %vm12720_vm7, %v20213_v9 }
 0x596   : > { %11221 = vmatmul.mubr.msk.f32.gmra.mrb[26].mxu0 %vm330_vm6, %v18222_v53  ;;  %v7627_v53 = vld [vmem:[%s19953_s5] sm:$0xff] }
 0x597   : > { %11223 = vmatprep.mubr.msk.f32.mxu0 %vm12720_vm7, %v20213_v9 }
 0x59a   : > { %11224 = vmatmul.mubr.msk.f32.gmra.mrb[28].mxu0 %vm330_vm6, %v18234_v13  ;;  %v7628_v13 = vld [vmem:[%s19953_s5 + $0x8] sm:$0xff] }
 0x59b   : > { %11226 = vmatprep.mubr.msk.f32.mxu0 %vm12720_vm7, %v20213_v9 }
 0x59e   : > { %11227 = vmatmul.mubr.msk.f32.gmra.mrb[30].mxu0 %vm330_vm6, %v18246_v3  ;;  %v18921_v3 = vpack.c.bf16 %v7628_v13, %v7627_v53 }
 0x59f   : > { %11229 = vmatprep.mubr.msk.f32.mxu0 %vm12720_vm7, %v20213_v9 }
 0x5a2   : > { %11230 = vmatmul.mubr.msk.f32.gmra.mrb[32].mxu0 %vm330_vm6, %v18260_v27 }
 0x5a3   : > { %11232 = vmatprep.mubr.msk.f32.mxu0 %vm12720_vm7, %v20213_v9 }
 0x5a6   : > { %11233 = vmatmul.mubr.msk.f32.gmra.mrb[34].mxu0 %vm330_vm6, %v18272_v50 }
 0x5a7   : > { %11235 = vmatprep.mubr.msk.f32.mxu0 %vm12720_vm7, %v20213_v9 }
 0x5aa   : > { %11236 = vmatmul.mubr.msk.f32.gmra.mrb[36].mxu0 %vm330_vm6, %v18291_v1 }
 0x5ab   : > { %11238 = vmatprep.mubr.msk.f32.mxu0 %vm12720_vm7, %v20213_v9 }
 0x5ae   : > { %11239 = vmatmul.mubr.msk.f32.gmra.mrb[38].mxu0 %vm330_vm6, %v18087_v41  ;;  %v9853_v41 = vld [vmem:[%s19953_s5 + $0x50] sm:$0xff] }
 0x5af   : > { %11241 = vmatprep.mubr.msk.f32.mxu0 %vm12720_vm7, %v20213_v9  ;;  %v11842_v47 = vpack.c.bf16 %v9854_v0, %v9853_v41 }
 0x5b1   : > { %11843 = vmatprep.subr.bf16.mxu1 %v11842_v47 }
 0x5b2   : > { %11242 = vmatmul.mubr.msk.f32.gmra.mrb[40].mxu0 %vm330_vm6, %v7311_v56  ;;  %11845 = vmatpush3.bf16.msra.mxu1 %v11842_v47  ;;  %v18948_v56 = vld [vmem:[#allocation5] sm:$0xff]  ;;  %v20709_v47 = vld [vmem:[#allocation25_spill] sm:$0xff] }
 0x5b3   : > { %11847 = vmatprep.subr.bf16.mxu1 %v11846_v59 }
 0x5b6   : > { %11849 = vmatpush3.bf16.msra.mxu1 %v11846_v59  ;;  %v7650_v59 = vrot.slane %v18948_v56, 1 }
 0x5b7   : > { %11851 = vmatprep.subr.bf16.mxu1 %v11850_v5 }
 0x5ba   : > { %11853 = vmatpush3.bf16.msra.mxu1 %v11850_v5 }
 0x5bb   : > { %11855 = vmatprep.subr.bf16.mxu1 %v18921_v3 }
 0x635   : > { %v7382_v27 = vpop.f32.mrb[0].mxu0 }
 0x636   : > { %v12198_v50 = vadd.f32 %v7382_v27, %v18473_v15  ;;  %v11183_v1 = vpop.f32.mrb[1].mxu0  ;;  %v20710_v27 = vld [vmem:[#allocation26_spill] sm:$0xff] }
 0x638   : > { %7507 = vst.msk [vmem:[#allocation4] sm:$0xff] %vm357_vm11, %v12198_v50 }
 0x639   : > { %v7387_v14 = vpop.f32.mrb[2].mxu0 }
 0x63a   : > { %v12199_v22 = vadd.f32 %v7387_v14, %v18479_v35  ;;  %v11186_v37 = vpop.f32.mrb[3].mxu0 }
 0x63c   : > { %7508 = vst.msk [vmem:[#allocation4 + $0x8] sm:$0xff] %vm357_vm11, %v12199_v22 }
 0x63d   : > { %v7392_v39 = vpop.f32.mrb[4].mxu0 }
 0x63e   : > { %v12200_v6 = vadd.f32 %v7392_v39, %v18485_v32  ;;  %v11189_v49 = vpop.f32.mrb[5].mxu0 }
 0x640   : > { %7509 = vst.msk [vmem:[#allocation4 + $0x10] sm:$0xff] %vm357_vm11, %v12200_v6 }
 0x641   : > { %v7397_v7 = vpop.f32.mrb[6].mxu0 }
 0x642   : > { %v12201_v55 = vadd.f32 %v7397_v7, %v18491_v26  ;;  %v11192_v48 = vpop.f32.mrb[7].mxu0  ;;  %v18939_v26 = vld [vmem:[%s19952_s4] ss:$0 sm:$0xff] }
 0x643   : > { %v7530_v35 = vld [vmem:[#allocation4] ss:$2 sm:$0x3f]  ;;  %v7532_v54 = vld [vmem:[#allocation4 + $0x1] ss:$2 sm:$0x3f] }
 0x644   : > { %7510 = vst.msk [vmem:[#allocation4 + $0x18] sm:$0xff] %vm357_vm11, %v12201_v55  ;;  %v7537_v63 = vmax.f32 %v7530_v35, %v7532_v54 }
 0x645   : > { %v7402_v15 = vpop.f32.mrb[8].mxu0 }
 0x646   : > { %v12202_v19 = vadd.f32 %v7402_v15, %v18497_v62  ;;  %v11195_v44 = vpop.f32.mrb[9].mxu0  ;;  %v7629_v15 = vld [vmem:[%s19953_s5 + $0x10] sm:$0xff] }
 0x648   : > { %7511 = vst.msk [vmem:[#allocation4 + $0x20] sm:$0xff] %vm357_vm11, %v12202_v19  ;;  %v7630_v19 = vld [vmem:[%s19953_s5 + $0x18] sm:$0xff] }
 0x649   : > { %v7407_v4 = vpop.f32.mrb[10].mxu0 }
 0x64a   : > { %v12203_v32 = vadd.f32 %v7407_v4, %v18503_v12  ;;  %v11198_v11 = vpop.f32.mrb[11].mxu0 }
 0x64b   : > { %v7534_v45 = vld [vmem:[#allocation4 + $0xe] ss:$2 sm:$0x3f]  ;;  %v7536_v43 = vld [vmem:[#allocation4 + $0xf] ss:$2 sm:$0x3f] }
 0x64c   : > { %v7538_v30 = vmax.f32 %v7534_v45, %v7536_v43  ;;  %7512 = vst.msk [vmem:[#allocation4 + $0x28] sm:$0xff] %vm357_vm11, %v12203_v32 }
 0x64d   : > { %v7412_v62 = vpop.f32.mrb[12].mxu0 }
 0x64e   : > { %v7539_v29 = vmax.f32 %v7537_v63, %v7538_v30  ;;  %v12204_v28 = vadd.f32 %v7412_v62, %v18509_v25  ;;  %v11201_v23 = vpop.f32.mrb[13].mxu0  ;;  %v11858_v63 = vpack.c.bf16 %v7630_v19, %v7629_v15  ;;  %v7631_v62 = vld [vmem:[%s19953_s5 + $0x20] sm:$0xff] }
 0x64f   : > { %v7550_v46 = vld [vmem:[#allocation4 + $0x1c] ss:$2 sm:$0x3f]  ;;  %v7552_v57 = vld [vmem:[#allocation4 + $0x1d] ss:$2 sm:$0x3f] }
 0x650   : > { %v7546_v16 = vadd.f32 %v18939_v26, %v7539_v29  ;;  %7513 = vst.msk [vmem:[#allocation4 + $0x30] sm:$0xff] %vm357_vm11, %v12204_v28  ;;  %v7557_v24 = vmax.f32 %v7550_v46, %v7552_v57  ;;  %v7632_v29 = vld [vmem:[%s19953_s5 + $0x28] sm:$0xff]  ;;  %v7634_v46 = vld [vmem:[%s19953_s5 + $0x38] sm:$0xff] }
 0x651   : > { %v7417_v12 = vpop.f32.mrb[14].mxu0 }
 0x652   : > { %v7547_v20 = vmax.f32 %v7546_v16, 0.0  ;;  %v12205_v2 = vadd.f32 %v7417_v12, %v18515_v40  ;;  %v11204_v60 = vpop.f32.mrb[15].mxu0  ;;  %v20711_v16 = vld [vmem:[#allocation20_spill] sm:$0xff] }
 0x653   : > { %v7633_v60 = vld [vmem:[%s19953_s5 + $0x30] sm:$0xff] }
 0x654   : > { %7548 = vst.msk [vmem:[#allocation5 + $0x9] sm:$0x3f] %vm7527_vm12, %v7547_v20 }
 0x655   : > { %7514 = vst.msk [vmem:[#allocation4 + $0x38] sm:$0xff] %vm357_vm11, %v12205_v2  ;;  %v7422_v36 = vpop.f32.mrb[16].mxu0  ;;  %v11862_v2 = vpack.c.bf16 %v7632_v29, %v7631_v62 }
 0x656   : > { %v12206_v25 = vadd.f32 %v7422_v36, %v20708_v31  ;;  %v11207_v38 = vpop.f32.mrb[17].mxu0  ;;  %v20712_v31 = vld [vmem:[#allocation10_spill] sm:$0xff] }
 0x657   : > { %v7554_v42 = vld [vmem:[#allocation4 + $0x2a] ss:$2 sm:$0x3f]  ;;  %v7556_v8 = vld [vmem:[#allocation4 + $0x2b] ss:$2 sm:$0x3f] }
 0x658   : > { %v7558_v41 = vmax.f32 %v7554_v42, %v7556_v8  ;;  %7515 = vst.msk [vmem:[#allocation4 + $0x40] sm:$0xff] %vm357_vm11, %v12206_v25  ;;  %v11866_v42 = vpack.c.bf16 %v7634_v46, %v7633_v60  ;;  %v9871_v8 = vld [vmem:[%s19953_s5 + $0x80] sm:$0xff] }
 0x659   : > { %v7427_v40 = vpop.f32.mrb[18].mxu0 }
 0x65a   : > { %v7559_v0 = vmax.f32 %v7557_v24, %v7558_v41  ;;  %v12207_v34 = vadd.f32 %v7427_v40, %v20709_v47  ;;  %v11210_v18 = vpop.f32.mrb[19].mxu0  ;;  %v9872_v24 = vld [vmem:[%s19953_s5 + $0x88] sm:$0xff] }
 0x65b   : > { %v18953_v51 = vld [vmem:[#allocation5 + $0x8] sm:$0xff] }
 0x65c   : > { %v7560_v33 = vadd.f32 %v18939_v26, %v7559_v0  ;;  %7516 = vst.msk [vmem:[#allocation4 + $0x48] sm:$0xff] %vm357_vm11, %v12207_v34  ;;  %v7651_v5 = vrot.slane %v18953_v51, 1 }
 0x65d   : > { %v7432_v53 = vpop.f32.mrb[20].mxu0 }
 0x65e   : > { %v7561_v13 = vmax.f32 %v7560_v33, 0.0  ;;  %v12208_v50 = vadd.f32 %v7432_v53, %v20710_v27  ;;  %v11213_v1 = vpop.f32.mrb[21].mxu0  ;;  %v7652_v14 = vsel %vm1085_vm0, %v7650_v59, %v7651_v5  ;;  %v20713_v59 = vld [vmem:[#allocation11_spill] sm:$0xff]  ;;  %v19009_v53 = vpack.c.bf16 %v9872_v24, %v9871_v8  ;;  %v9876_v24 = vld [vmem:[%s19953_s5 + $0xa8] sm:$0xff] }
 0x65f   : > { %11260 = vmatprep.mubr.msk.f32.mxu1 %vm357_vm11, %v7652_v14  ;;  %v7564_v6 = vld [vmem:[#allocation4 + $0x38] ss:$2 sm:$0x3f]  ;;  %v7566_v49 = vld [vmem:[#allocation4 + $0x39] ss:$2 sm:$0x3f] }
 0x660   : > { %7562 = vst.msk [vmem:[#allocation5 + $0x11] sm:$0x3f] %vm7527_vm12, %v7561_v13  ;;  %v9875_v8 = vld [vmem:[%s19953_s5 + $0xa0] sm:$0xff] }
 0x661   : > { %7517 = vst.msk [vmem:[#allocation4 + $0x50] sm:$0xff] %vm357_vm11, %v12208_v50  ;;  %v7437_v22 = vpop.f32.mrb[22].mxu0 }
 0x662   : > { %v12209_v37 = vadd.f32 %v7437_v22, %v18555_v61  ;;  %v11216_v39 = vpop.f32.mrb[23].mxu0  ;;  %v7571_v61 = vmax.f32 %v7564_v6, %v7566_v49  ;;  %v20714_v22 = vld [vmem:[#allocation23_spill] sm:$0xff] }
 0x664   : > { %7518 = vst.msk [vmem:[#allocation4 + $0x58] sm:$0xff] %vm357_vm11, %v12209_v37 }
 0x665   : > { %v7442_v7 = vpop.f32.mrb[24].mxu0 }
 0x666   : > { %v12210_v55 = vadd.f32 %v7442_v7, %v18563_v17  ;;  %v11219_v48 = vpop.f32.mrb[25].mxu0  ;;  %v20715_v7 = vld [vmem:[#allocation18_spill] sm:$0xff] }
 0x667   : > { %v18973_v4 = vld [vmem:[#allocation5 + $0x10] sm:$0xff] }
 0x668   : > { %v7568_v44 = vld [vmem:[#allocation4 + $0x46] ss:$2 sm:$0x3f]  ;;  %v7570_v35 = vld [vmem:[#allocation4 + $0x47] ss:$2 sm:$0x3f] }
 0x669   : > { %v7572_v54 = vmax.f32 %v7568_v44, %v7570_v35  ;;  %7519 = vst.msk [vmem:[#allocation4 + $0x60] sm:$0xff] %vm357_vm11, %v12210_v55  ;;  %v7447_v32 = vpop.f32.mrb[26].mxu0  ;;  %v7653_v17 = vrot.slane %v18973_v4, 1 }
 0x66a   : > { %v12211_v45 = vadd.f32 %v7447_v32, %v18570_v10  ;;  %v11222_v43 = vpop.f32.mrb[27].mxu0 }
 0x66b   : > { %v7573_v11 = vmax.f32 %v7571_v61, %v7572_v54  ;;  %v18978_v30 = vsel %vm1085_vm0, %v7651_v5, %v7653_v17  ;;  %v7578_v57 = vld [vmem:[#allocation4 + $0x54] ss:$2 sm:$0x3f] }
 0x66c   : > { %7520 = vst.msk [vmem:[#allocation4 + $0x68] sm:$0xff] %vm357_vm11, %v12211_v45  ;;  %11261 = vmatmul.mubr.msk.f32.vlgmr.msra.gmra.mrb[42].mxu1 %vm357_vm11, %v18978_v30 }
 0x66d   : > { %v7574_v28 = vadd.f32 %v18939_v26, %v7573_v11  ;;  %v7452_v10 = vpop.f32.mrb[28].mxu0  ;;  %11857 = vmatpush3.bf16.msra.mxu1 %v18921_v3  ;;  %v7580_v3 = vld [vmem:[#allocation4 + $0x55] ss:$2 sm:$0x3f] }
 0x66e   : > { %v12212_v12 = vadd.f32 %v7452_v10, %v20711_v16  ;;  %v11225_v20 = vpop.f32.mrb[29].mxu0  ;;  %11859 = vmatprep.subr.bf16.mxu1 %v11858_v63  ;;  %v7585_v0 = vmax.f32 %v7578_v57, %v7580_v3 }
 0x66f   : > { %v7575_v23 = vmax.f32 %v7574_v28, 0.0 }
 0x670   : > { %7521 = vst.msk [vmem:[#allocation4 + $0x70] sm:$0xff] %vm357_vm11, %v12212_v12 }
 0x671   : > { %7576 = vst.msk [vmem:[#allocation5 + $0x19] sm:$0x3f] %vm7527_vm12, %v7575_v23  ;;  %v7457_v36 = vpop.f32.mrb[30].mxu0  ;;  %11861 = vmatpush3.bf16.msra.mxu1 %v11858_v63 }
 0x672   : > { %v12213_v25 = vadd.f32 %v7457_v36, %v20712_v31  ;;  %v11228_v38 = vpop.f32.mrb[31].mxu0  ;;  %11863 = vmatprep.subr.bf16.mxu1 %v11862_v2 }
 0x673   : > { %v7582_v41 = vld [vmem:[#allocation4 + $0x62] ss:$2 sm:$0x3f]  ;;  %v7584_v40 = vld [vmem:[#allocation4 + $0x63] ss:$2 sm:$0x3f] }
 0x674   : > { %v7586_v47 = vmax.f32 %v7582_v41, %v7584_v40  ;;  %7522 = vst.msk [vmem:[#allocation4 + $0x78] sm:$0xff] %vm357_vm11, %v12213_v25  ;;  %v9873_v38 = vld [vmem:[%s19953_s5 + $0x90] sm:$0xff]  ;;  %v11878_v41 = vpack.c.bf16 %v9876_v24, %v9875_v8 }
 0x675   : > { %v7462_v34 = vpop.f32.mrb[32].mxu0  ;;  %11865 = vmatpush3.bf16.msra.mxu1 %v11862_v2  ;;  %v9877_v40 = vld [vmem:[%s19953_s5 + $0xb0] sm:$0xff] }
 0x676   : > { %v7587_v18 = vmax.f32 %v7585_v0, %v7586_v47  ;;  %v12214_v33 = vadd.f32 %v7462_v34, %v20713_v59  ;;  %v11231_v5 = vpop.f32.mrb[33].mxu0  ;;  %11867 = vmatprep.subr.bf16.mxu1 %v11866_v42  ;;  %v9878_v0 = vld [vmem:[%s19953_s5 + $0xb8] sm:$0xff]  ;;  %v7884_v47 = vrot.slane %v18948_v56, 2  ;;  %v7885_v34 = vrot.slane %v18953_v51, 2  ;;  %v9885_v59 = vld [vmem:[%s19953_s5 + $0xc0] sm:$0xff] }
 0x678   : > { %v19011_v13 = vld [vmem:[#allocation5 + $0x18] sm:$0xff]  ;;  %v7588_v27 = vadd.f32 %v18939_v26, %v7587_v18  ;;  %7523 = vst.msk [vmem:[#allocation4 + $0x80] sm:$0xff] %vm357_vm11, %v12214_v33  ;;  %v11882_v18 = vpack.c.bf16 %v9878_v0, %v9877_v40  ;;  %v9886_v33 = vld [vmem:[%s19953_s5 + $0xc8] sm:$0xff]  ;;  %v9929_v0 = vld [vmem:[%s19953_s5 + $0x190] sm:$0xff] }
 0x679   : > { %v7655_v50 = vrot.slane %v19011_v13, 1  ;;  %v7467_v1 = vpop.f32.mrb[34].mxu0  ;;  %11869 = vmatpush3.bf16.msra.mxu1 %v11866_v42  ;;  %v9874_v42 = vld [vmem:[%s19953_s5 + $0x98] sm:$0xff]  ;;  %v11886_v5 = vpack.c.bf16 %v9886_v33, %v9885_v59  ;;  %v9928_v40 = vld [vmem:[%s19953_s5 + $0x188] sm:$0xff] }
 0x67a   : > { %v7589_v14 = vmax.f32 %v7588_v27, 0.0  ;;  %v12215_v37 = vadd.f32 %v7467_v1, %v20714_v22  ;;  %v11234_v39 = vpop.f32.mrb[35].mxu0  ;;  %11871 = vmatprep.subr.bf16.mxu1 %v19009_v53  ;;  %v9887_v27 = vld [vmem:[%s19953_s5 + $0xd0] sm:$0xff]  ;;  %v7889_v1 = vrot.slane %v19011_v13, 2  ;;  %v9932_v59 = vld [vmem:[%s19953_s5 + $0x1a8] sm:$0xff] }
 0x67b   : > { %v19018_v6 = vsel %vm1085_vm0, %v7653_v17, %v7655_v50  ;;  %v7592_v15 = vld [vmem:[#allocation4 + $0x70] ss:$2 sm:$0x3f]  ;;  %v7594_v19 = vld [vmem:[#allocation4 + $0x71] ss:$2 sm:$0x3f] }
 0x67c   : > { %11263 = vmatprep.mubr.msk.f32.mxu1 %vm357_vm11, %v19018_v6  ;;  %7590 = vst.msk [vmem:[#allocation5 + $0x21] sm:$0x3f] %vm7527_vm12, %v7589_v14  ;;  %v7599_v17 = vmax.f32 %v7592_v15, %v7594_v19  ;;  %v9889_v39 = vld [vmem:[%s19953_s5 + $0xe0] sm:$0xff]  ;;  %v9891_v19 = vld [vmem:[%s19953_s5 + $0xf0] sm:$0xff] }
 0x67d   : > { %7524 = vst.msk [vmem:[#allocation4 + $0x88] sm:$0xff] %vm357_vm11, %v12215_v37  ;;  %v7472_v49 = vpop.f32.mrb[36].mxu0 }
 0x67e   : > { %v12216_v55 = vadd.f32 %v7472_v49, %v20715_v7  ;;  %v11237_v48 = vpop.f32.mrb[37].mxu0  ;;  %v9890_v49 = vld [vmem:[%s19953_s5 + $0xe8] sm:$0xff] }
 0x67f   : > { %v11894_v48 = vpack.c.bf16 %v9890_v49, %v9889_v39  ;;  %v9944_v39 = vld [vmem:[%s19953_s5 + $0x1d8] sm:$0xff] }
 0x680   : > { %7525 = vst.msk [vmem:[#allocation4 + $0x90] sm:$0xff] %vm357_vm11, %v12216_v55 }
 0x681   : > { %v7477_v44 = vpop.f32.mrb[38].mxu0 }
 0x682   : > { %v12217_v35 = vadd.f32 %v7477_v44, %v18612_v21  ;;  %v11240_v61 = vpop.f32.mrb[39].mxu0  ;;  %v9892_v44 = vld [vmem:[%s19953_s5 + $0xf8] sm:$0xff] }
 0x683   : > { %v19029_v45 = vld [vmem:[#allocation5 + $0x20] sm:$0xff]  ;;  %v11898_v61 = vpack.c.bf16 %v9892_v44, %v9891_v19  ;;  %v9947_v19 = vld [vmem:[%s19953_s5 + $0x1f0] sm:$0xff]  ;;  %v9948_v44 = vld [vmem:[%s19953_s5 + $0x1f8] sm:$0xff] }
 0x684   : > { %v7596_v54 = vld [vmem:[#allocation4 + $0x7e] ss:$2 sm:$0x3f]  ;;  %v7598_v32 = vld [vmem:[#allocation4 + $0x7f] ss:$2 sm:$0x3f] }
 0x685   : > { %v7600_v11 = vmax.f32 %v7596_v54, %v7598_v32  ;;  %7526 = vst.msk [vmem:[#allocation4 + $0x98] sm:$0xff] %vm357_vm11, %v12217_v35  ;;  %v7482_v43 = vpop.f32.mrb[40].mxu0  ;;  %v7657_v63 = vrot.slane %v19029_v45, 1  ;;  %v7891_v37 = vrot.slane %v19029_v45, 2  ;;  %v9899_v54 = vld [vmem:[%s19953_s5 + $0x100] sm:$0xff]  ;;  %v9900_v32 = vld [vmem:[%s19953_s5 + $0x108] sm:$0xff] }
 0x686   : > { %v12218_v29 = vadd.f32 %v7482_v43, %v18619_v52  ;;  %v11243_v28 = vpop.f32.mrb[41].mxu0  ;;  %v9902_v43 = vld [vmem:[%s19953_s5 + $0x118] sm:$0xff] }
 0x687   : > { %v7601_v62 = vmax.f32 %v7599_v17, %v7600_v11  ;;  %v19034_v10 = vsel %vm1085_vm0, %v7655_v50, %v7657_v63  ;;  %v7606_v16 = vld [vmem:[#allocation4 + $0x8c] ss:$2 sm:$0x3f]  ;;  %v7608_v12 = vld [vmem:[#allocation4 + $0x8d] ss:$2 sm:$0x3f]  ;;  %v19126_v15 = vsel %vm1557_vm1, %v7889_v1, %v7891_v37  ;;  %v11902_v17 = vpack.c.bf16 %v9900_v32, %v9899_v54 }
 0x688   : > { %7528 = vst.msk [vmem:[#allocation4 + $0xa0] sm:$0x3f] %vm7527_vm12, %v12218_v29  ;;  %11264 = vmatmul.mubr.msk.f32.gmra.mrb[44].mxu1 %vm357_vm11, %v19034_v10  ;;  %v7613_v60 = vmax.f32 %v7606_v16, %v7608_v12  ;;  %v9888_v50 = vld [vmem:[%s19953_s5 + $0xd8] sm:$0xff]  ;;  %v9901_v11 = vld [vmem:[%s19953_s5 + $0x110] sm:$0xff]  ;;  %v9913_v12 = vld [vmem:[%s19953_s5 + $0x140] sm:$0xff] }
 0x689   : > { %v7602_v21 = vadd.f32 %v18939_v26, %v7601_v62  ;;  %v11890_v14 = vpack.c.bf16 %v9888_v50, %v9887_v27  ;;  %v9903_v62 = vld [vmem:[%s19953_s5 + $0x120] sm:$0xff]  ;;  %v9905_v28 = vld [vmem:[%s19953_s5 + $0x130] sm:$0xff]  ;;  %v9956_v54 = vld [vmem:[%s19953_s5 + $0x208] sm:$0xff] }
 0x68a   : > { %v9957_v32 = vld [vmem:[%s19953_s5 + $0x210] sm:$0xff] }
 0x68b   : > { %v7603_v23 = vmax.f32 %v7602_v21, 0.0  ;;  %v9906_v21 = vld [vmem:[%s19953_s5 + $0x138] sm:$0xff] }
 0x68d   : > { %7604 = vst.msk [vmem:[#allocation5 + $0x29] sm:$0x3f] %vm7527_vm12, %v7603_v23  ;;  %v11914_v23 = vpack.c.bf16 %v9906_v21, %v9905_v28  ;;  %v8723_v28 = vld [vmem:[%s19955_s7] sm:$0xff]  ;;  %v8724_v21 = vld [vmem:[%s19955_s7 + $0x8] sm:$0xff] }
 0x68f   : > { %v7610_v20 = vld [vmem:[#allocation4 + $0x9a] ss:$2 sm:$0x3f]  ;;  %v7612_v2 = vld [vmem:[#allocation4 + $0x9b] ss:$2 sm:$0x3f] }
 0x690   : > { %v7614_v52 = vmax.f32 %v7610_v20, %v7612_v2  ;;  %v9914_v20 = vld [vmem:[%s19953_s5 + $0x148] sm:$0xff] }
 0x691   : > { %v11918_v2 = vpack.c.bf16 %v9914_v20, %v9913_v12 }
 0x692   : > { %v7615_v46 = vmax.f32 %v7613_v60, %v7614_v52  ;;  %v9915_v60 = vld [vmem:[%s19953_s5 + $0x150] sm:$0xff]  ;;  %v9916_v52 = vld [vmem:[%s19953_s5 + $0x158] sm:$0xff] }
 0x694   : > { %v19041_v57 = vld [vmem:[#allocation5 + $0x28] sm:$0xff]  ;;  %v7616_v3 = vadd.f32 %v18939_v26, %v7615_v46  ;;  %v11874_v26 = vpack.c.bf16 %v9874_v42, %v9873_v38  ;;  %v11922_v46 = vpack.c.bf16 %v9916_v52, %v9915_v60  ;;  %v9919_v42 = vld [vmem:[%s19953_s5 + $0x170] sm:$0xff] }
 0x695   : > { %v19045_v36 = vrot.slane %v19041_v57, 1  ;;  %v19121_v55 = vrot.slane %v19041_v57, 2  ;;  %v8728_v60 = vld [vmem:[%s19955_s7 + $0x28] sm:$0xff]  ;;  %v8729_v52 = vld [vmem:[%s19955_s7 + $0x30] sm:$0xff] }
 0x696   : > { %v7617_v25 = vmax.f32 %v7616_v3, 0.0  ;;  %v9917_v3 = vld [vmem:[%s19953_s5 + $0x160] sm:$0xff] }
 0x697   : > { %v19049_v31 = vsel %vm1085_vm0, %v7657_v63, %v19045_v36  ;;  %v19138_v35 = vsel %vm1557_vm1, %v7891_v37, %v19121_v55  ;;  %v11906_v63 = vpack.c.bf16 %v9902_v43, %v9901_v11  ;;  %v9943_v37 = vld [vmem:[%s19953_s5 + $0x1d0] sm:$0xff]  ;;  %v9959_v43 = vld [vmem:[%s19953_s5 + $0x220] sm:$0xff] }
 0x698   : > { %11266 = vmatprep.mubr.msk.f32.mxu1 %vm357_vm11, %v19049_v31  ;;  %7618 = vst.msk [vmem:[#allocation5 + $0x31] sm:$0x3f] %vm7527_vm12, %v7617_v25  ;;  %v11954_v49 = vpack.c.bf16 %v9944_v39, %v9943_v37  ;;  %v9970_v37 = vld [vmem:[%s19955_s7 + $0x80] sm:$0xff]  ;;  %v9971_v39 = vld [vmem:[%s19955_s7 + $0x88] sm:$0xff] }
 0x699   : > { %11267 = vmatmul.mubr.msk.f32.gmra.mrb[46].mxu1 %vm357_vm11, %v19045_v36 }
 0x69a   : > { %11285 = vmatprep.mubr.msk.f32.mxu1 %vm357_vm11, %v18948_v56  ;;  %v7886_v56 = vsel %vm1557_vm1, %v7884_v47, %v7885_v34  ;;  %v9930_v47 = vld [vmem:[%s19953_s5 + $0x198] sm:$0xff] }
 0x69d   : > { %11286 = vmatmul.mubr.msk.f32.vlgmr.msra.gmra.mrb[42].mxu1 %vm357_vm11, %v18953_v51 }
 0x69e   : > { %11873 = vmatpush3.bf16.msra.mxu1 %v19009_v53  ;;  %11288 = vmatprep.mubr.msk.f32.mxu1 %vm357_vm11, %v18973_v4  ;;  %v7887_v53 = vrot.slane %v18973_v4, 2 }
 0x69f   : > { %11875 = vmatprep.subr.bf16.mxu1 %v11874_v26  ;;  %v19178_v16 = vld [vmem:[#allocation5 + $0x30] sm:$0xff] }
 0x6a0   : > { %v19106_v22 = vsel %vm1557_vm1, %v7885_v34, %v7887_v53  ;;  %v19118_v7 = vsel %vm1557_vm1, %v7887_v53, %v7889_v1  ;;  %v19203_v25 = vrot.slane %v19178_v16, 1  ;;  %v11938_v34 = vpack.c.bf16 %v9930_v47, %v9929_v0  ;;  %v9934_v53 = vld [vmem:[%s19953_s5 + $0x1b8] sm:$0xff]  ;;  %v9941_v1 = vld [vmem:[%s19953_s5 + $0x1c0] sm:$0xff] }
 0x6a1   : > { %11289 = vmatmul.mubr.msk.f32.gmra.mrb[44].mxu1 %vm357_vm11, %v19011_v13  ;;  %v19247_v33 = vrot.slane %v19178_v16, 2  ;;  %v8738_v0 = vld [vmem:[%s19955_s7 + $0x78] sm:$0xff] }
 0x6a2   : > { %11877 = vmatpush3.bf16.msra.mxu1 %v11874_v26  ;;  %11291 = vmatprep.mubr.msk.f32.mxu1 %vm357_vm11, %v19029_v45  ;;  %v9920_v26 = vld [vmem:[%s19953_s5 + $0x178] sm:$0xff]  ;;  %v19220_v8 = vsel %vm1085_vm0, %v19045_v36, %v19203_v25 }
 0x6a3   : > { %11879 = vmatprep.subr.bf16.mxu1 %v11878_v41  ;;  %v11930_v24 = vpack.c.bf16 %v9920_v26, %v9919_v42  ;;  %v19264_v27 = vsel %vm1557_vm1, %v19121_v55, %v19247_v33  ;;  %v8733_v42 = vld [vmem:[%s19955_s7 + $0x50] sm:$0xff]  ;;  %v8734_v26 = vld [vmem:[%s19955_s7 + $0x58] sm:$0xff] }
 0x6a5   : > { %11292 = vmatmul.mubr.msk.f32.gmra.mrb[46].mxu1 %vm357_vm11, %v19041_v57 }
 0x6a6   : > { %11881 = vmatpush3.bf16.msra.mxu1 %v11878_v41  ;;  %11310 = vmatprep.mubr.msk.f32.mxu1 %vm357_vm11, %v7886_v56  ;;  %v9927_v41 = vld [vmem:[%s19953_s5 + $0x180] sm:$0xff] }
 0x6a7   : > { %11883 = vmatprep.subr.bf16.mxu1 %v11882_v18  ;;  %v11934_v36 = vpack.c.bf16 %v9928_v40, %v9927_v41  ;;  %v8736_v41 = vld [vmem:[%s19955_s7 + $0x68] sm:$0xff] }
 0x6aa   : > { %11885 = vmatpush3.bf16.msra.mxu1 %v11882_v18  ;;  %v9931_v18 = vld [vmem:[%s19953_s5 + $0x1a0] sm:$0xff] }
 0x6ab   : > { %11887 = vmatprep.subr.bf16.mxu1 %v11886_v5  ;;  %v11942_v56 = vpack.c.bf16 %v9932_v59, %v9931_v18 }
 0x6ad   : > { %11311 = vmatmul.mubr.msk.f32.vlgmr.msra.gmra.mrb[42].mxu1 %vm357_vm11, %v19106_v22 }
 0x6ae   : > { %11313 = vmatprep.mubr.msk.f32.mxu1 %vm357_vm11, %v19118_v7  ;;  %11889 = vmatpush3.bf16.msra.mxu1 %v11886_v5  ;;  %v9933_v5 = vld [vmem:[%s19953_s5 + $0x1b0] sm:$0xff] }
 0x6af   : > { %11891 = vmatprep.subr.bf16.mxu1 %v11890_v14  ;;  %v11946_v50 = vpack.c.bf16 %v9934_v53, %v9933_v5 }
 0x6b1   : > { %11314 = vmatmul.mubr.msk.f32.gmra.mrb[44].mxu1 %vm357_vm11, %v19126_v15 }
 0x6b2   : > { %11316 = vmatprep.mubr.msk.f32.mxu1 %vm357_vm11, %v19138_v35  ;;  %11893 = vmatpush3.bf16.msra.mxu1 %v11890_v14  ;;  %v9942_v14 = vld [vmem:[%s19953_s5 + $0x1c8] sm:$0xff] }
 0x6b3   : > { %11895 = vmatprep.subr.bf16.mxu1 %v11894_v48 }
 0x6b5   : > { %11317 = vmatmul.mubr.msk.f32.gmra.mrb[46].mxu1 %vm357_vm11, %v19121_v55  ;;  %v9945_v55 = vld [vmem:[%s19953_s5 + $0x1e0] sm:$0xff] }
 0x6b6   : > { %11897 = vmatpush3.bf16.msra.mxu1 %v11894_v48  ;;  %11335 = vmatprep.mubr.msk.f32.mxu1 %vm357_vm11, %v18953_v51  ;;  %v9904_v51 = vld [vmem:[%s19953_s5 + $0x128] sm:$0xff] }
 0x6b7   : > { %11899 = vmatprep.subr.bf16.mxu1 %v11898_v61  ;;  %v11910_v29 = vpack.c.bf16 %v9904_v51, %v9903_v62  ;;  %v9961_v51 = vld [vmem:[%s19953_s5 + $0x230] sm:$0xff] }
 0x6ba   : > { %11901 = vmatpush3.bf16.msra.mxu1 %v11898_v61  ;;  %v9955_v61 = vld [vmem:[%s19953_s5 + $0x200] sm:$0xff] }
 0x6bb   : > { %11903 = vmatprep.subr.bf16.mxu1 %v11902_v17 }
 0x6bd   : > { %11336 = vmatmul.mubr.msk.f32.vlgmr.msra.gmra.mrb[42].mxu1 %vm357_vm11, %v18973_v4 }
 0x6be   : > { %11338 = vmatprep.mubr.msk.f32.mxu1 %vm357_vm11, %v19011_v13  ;;  %11905 = vmatpush3.bf16.msra.mxu1 %v11902_v17  ;;  %v9958_v17 = vld [vmem:[%s19953_s5 + $0x218] sm:$0xff] }
 0x6bf   : > { %11907 = vmatprep.subr.bf16.mxu1 %v11906_v63  ;;  %v11970_v11 = vpack.c.bf16 %v9958_v17, %v9957_v32  ;;  %v9977_v32 = vld [vmem:[%s19955_s7 + $0xb8] sm:$0xff] }
 0x6c1   : > { %11339 = vmatmul.mubr.msk.f32.gmra.mrb[44].mxu1 %vm357_vm11, %v19029_v45 }
 0x6c2   : > { %11341 = vmatprep.mubr.msk.f32.mxu1 %vm357_vm11, %v19041_v57  ;;  %11909 = vmatpush3.bf16.msra.mxu1 %v11906_v63 }
 0x6c3   : > { %11911 = vmatprep.subr.bf16.mxu1 %v11910_v29 }
 0x6c5   : > { %11342 = vmatmul.mubr.msk.f32.gmra.mrb[46].mxu1 %vm357_vm11, %v19178_v16 }
 0x6c6   : > { %11913 = vmatpush3.bf16.msra.mxu1 %v11910_v29  ;;  %11360 = vmatprep.mubr.msk.f32.mxu1 %vm357_vm11, %v18978_v30  ;;  %v9918_v30 = vld [vmem:[%s19953_s5 + $0x168] sm:$0xff]  ;;  %v9962_v29 = vld [vmem:[%s19953_s5 + $0x238] sm:$0xff] }
 0x6c7   : > { %11915 = vmatprep.subr.bf16.mxu1 %v11914_v23  ;;  %v11926_v38 = vpack.c.bf16 %v9918_v30, %v9917_v3  ;;  %v8731_v30 = vld [vmem:[%s19955_s7 + $0x40] sm:$0xff] }
 0x6ca   : > { %11917 = vmatpush3.bf16.msra.mxu1 %v11914_v23  ;;  %v11983_v23 = vpack.c.bf16 %v8724_v21, %v8723_v28  ;;  %v9984_v28 = vld [vmem:[%s19955_s7 + $0xf0] sm:$0xff]  ;;  %v9985_v21 = vld [vmem:[%s19955_s7 + $0xf8] sm:$0xff] }
 0x6cb   : > { %11919 = vmatprep.subr.bf16.mxu1 %v11918_v2 }
 0x6cd   : > { %11361 = vmatmul.mubr.msk.f32.vlgmr.msra.gmra.mrb[42].mxu1 %vm357_vm11, %v19018_v6 }
 0x6ce   : > { %11363 = vmatprep.mubr.msk.f32.mxu1 %vm357_vm11, %v19034_v10  ;;  %11921 = vmatpush3.bf16.msra.mxu1 %v11918_v2  ;;  %v8727_v2 = vld [vmem:[%s19955_s7 + $0x20] sm:$0xff] }
 0x6cf   : > { %11923 = vmatprep.subr.bf16.mxu1 %v11922_v46 }
 0x6d1   : > { %11364 = vmatmul.mubr.msk.f32.gmra.mrb[44].mxu1 %vm357_vm11, %v19049_v31 }
 0x6d2   : > { %11366 = vmatprep.mubr.msk.f32.mxu1 %vm357_vm11, %v19220_v8  ;;  %11925 = vmatpush3.bf16.msra.mxu1 %v11922_v46  ;;  %v8730_v46 = vld [vmem:[%s19955_s7 + $0x38] sm:$0xff] }
 0x6d3   : > { %11927 = vmatprep.subr.bf16.mxu1 %v11926_v38  ;;  %v11992_v3 = vpack.c.bf16 %v8730_v46, %v8729_v52  ;;  %v9991_v52 = vld [vmem:[%s19955_s7 + $0x128] sm:$0xff] }
 0x6d5   : > { %11367 = vmatmul.mubr.msk.f32.gmra.mrb[46].mxu1 %vm357_vm11, %v19203_v25 }
 0x6d6   : > { %11929 = vmatpush3.bf16.msra.mxu1 %v11926_v38  ;;  %11385 = vmatprep.mubr.msk.f32.mxu1 %vm357_vm11, %v19106_v22  ;;  %v11950_v22 = vpack.c.bf16 %v9942_v14, %v9941_v1 }
 0x6d7   : > { %11931 = vmatprep.subr.bf16.mxu1 %v11930_v24 }
 0x6da   : > { %11933 = vmatpush3.bf16.msra.mxu1 %v11930_v24  ;;  %v8735_v24 = vld [vmem:[%s19955_s7 + $0x60] sm:$0xff] }
 0x6db   : > { %11935 = vmatprep.subr.bf16.mxu1 %v11934_v36  ;;  %v12001_v40 = vpack.c.bf16 %v8736_v41, %v8735_v24  ;;  %v9997_v24 = vld [vmem:[%s19955_s7 + $0x158] sm:$0xff] }
 0x6dd   : > { %11386 = vmatmul.mubr.msk.f32.vlgmr.msra.gmra.mrb[42].mxu1 %vm357_vm11, %v19118_v7 }
 0x6de   : > { %11388 = vmatprep.mubr.msk.f32.mxu1 %vm357_vm11, %v19126_v15  ;;  %11937 = vmatpush3.bf16.msra.mxu1 %v11934_v36  ;;  %v8737_v36 = vld [vmem:[%s19955_s7 + $0x70] sm:$0xff] }
 0x6df   : > { %11939 = vmatprep.subr.bf16.mxu1 %v11938_v34  ;;  %v12004_v47 = vpack.c.bf16 %v8738_v0, %v8737_v36  ;;  %v9999_v36 = vld [vmem:[%s19955_s7 + $0x168] sm:$0xff] }
 0x6e1   : > { %11389 = vmatmul.mubr.msk.f32.gmra.mrb[44].mxu1 %vm357_vm11, %v19138_v35 }
 0x6e2   : > { %11391 = vmatprep.mubr.msk.f32.mxu1 %vm357_vm11, %v19264_v27  ;;  %11941 = vmatpush3.bf16.msra.mxu1 %v11938_v34 }
 0x6e3   : > { %11943 = vmatprep.subr.bf16.mxu1 %v11942_v56 }
 0x6e5   : > { %11392 = vmatmul.mubr.msk.f32.gmra.mrb[46].mxu1 %vm357_vm11, %v19247_v33 }
 0x6e6   : > { %11945 = vmatpush3.bf16.msra.mxu1 %v11942_v56  ;;  %11410 = vmatprep.mubr.msk.f32.mxu1 %vm357_vm11, %v18973_v4  ;;  %v9946_v4 = vld [vmem:[%s19953_s5 + $0x1e8] sm:$0xff] }
 0x6e7   : > { %11947 = vmatprep.subr.bf16.mxu1 %v11946_v50  ;;  %v11958_v48 = vpack.c.bf16 %v9946_v4, %v9945_v55  ;;  %v12007_v4 = vpack.c.bf16 %v9971_v39, %v9970_v37  ;;  %v10008_v37 = vld [vmem:[%s19955_s7 + $0x1b0] sm:$0xff]  ;;  %v10009_v39 = vld [vmem:[%s19955_s7 + $0x1b8] sm:$0xff] }
 0x6ea   : > { %11949 = vmatpush3.bf16.msra.mxu1 %v11946_v50 }
 0x6eb   : > { %11951 = vmatprep.subr.bf16.mxu1 %v11950_v22 }
 0x6ed   : > { %11411 = vmatmul.mubr.msk.f32.vlgmr.msra.gmra.mrb[42].mxu1 %vm357_vm11, %v19011_v13  ;;  %v11962_v13 = vpack.c.bf16 %v9948_v44, %v9947_v19  ;;  %v9972_v19 = vld [vmem:[%s19955_s7 + $0x90] sm:$0xff]  ;;  %v9973_v44 = vld [vmem:[%s19955_s7 + $0x98] sm:$0xff] }
 0x6ee   : > { %11413 = vmatprep.mubr.msk.f32.mxu1 %vm357_vm11, %v19029_v45  ;;  %11953 = vmatpush3.bf16.msra.mxu1 %v11950_v22  ;;  %v7626_v45 = vld [vmem:[#allocation5 + $0x38] sm:$0xff] }
 0x6ef   : > { %11955 = vmatprep.subr.bf16.mxu1 %v11954_v49  ;;  %v8475_v63 = vrot.slane %v7626_v45, 1  ;;  %v8591_v12 = vrot.slane %v7626_v45, 2 }
 0x6f1   : > { %11414 = vmatmul.mubr.msk.f32.gmra.mrb[44].mxu1 %vm357_vm11, %v19041_v57  ;;  %v11966_v57 = vpack.c.bf16 %v9956_v54, %v9955_v61  ;;  %v9975_v61 = vld [vmem:[%s19955_s7 + $0xa8] sm:$0xff] }
 0x6f2   : > { %11416 = vmatprep.mubr.msk.f32.mxu1 %vm357_vm11, %v19178_v16  ;;  %11957 = vmatpush3.bf16.msra.mxu1 %v11954_v49  ;;  %v8725_v16 = vld [vmem:[%s19955_s7 + $0x10] sm:$0xff]  ;;  %v19421_v49 = vld [vmem:[%s19954_s6] ss:$0 sm:$0xff] }
 0x6f3   : > { %11959 = vmatprep.subr.bf16.mxu1 %v11958_v48 }
 0x6f5   : > { %11417 = vmatmul.mubr.msk.f32.gmra.mrb[46].mxu1 %vm357_vm11, %v7626_v45  ;;  %v9974_v45 = vld [vmem:[%s19955_s7 + $0xa0] sm:$0xff] }
 0x6f6   : > { %11961 = vmatpush3.bf16.msra.mxu1 %v11958_v48  ;;  %11435 = vmatprep.mubr.msk.f32.mxu1 %vm357_vm11, %v19018_v6  ;;  %v9960_v6 = vld [vmem:[%s19953_s5 + $0x228] sm:$0xff]  ;;  %v12013_v54 = vpack.c.bf16 %v9975_v61, %v9974_v45  ;;  %v10014_v61 = vld [vmem:[%s19955_s7 + $0x1e0] sm:$0xff] }
 0x6f7   : > { %11963 = vmatprep.subr.bf16.mxu1 %v11962_v13  ;;  %v11974_v62 = vpack.c.bf16 %v9960_v6, %v9959_v43  ;;  %v9979_v43 = vld [vmem:[%s19955_s7 + $0xc8] sm:$0xff] }
 0x6fa   : > { %11965 = vmatpush3.bf16.msra.mxu1 %v11962_v13  ;;  %v12010_v13 = vpack.c.bf16 %v9973_v44, %v9972_v19  ;;  %v10012_v44 = vld [vmem:[%s19955_s7 + $0x1d0] sm:$0xff] }
 0x6fb   : > { %11967 = vmatprep.subr.bf16.mxu1 %v11966_v57 }
 0x6fd   : > { %11436 = vmatmul.mubr.msk.f32.vlgmr.msra.gmra.mrb[42].mxu1 %vm357_vm11, %v19034_v10  ;;  %v8476_v10 = vsel %vm1085_vm0, %v19203_v25, %v8475_v63  ;;  %v8732_v25 = vld [vmem:[%s19955_s7 + $0x48] sm:$0xff] }
 0x6fe   : > { %11438 = vmatprep.mubr.msk.f32.mxu1 %vm357_vm11, %v19049_v31  ;;  %11969 = vmatpush3.bf16.msra.mxu1 %v11966_v57  ;;  %v11978_v31 = vpack.c.bf16 %v9962_v29, %v9961_v51  ;;  %v11995_v38 = vpack.c.bf16 %v8732_v25, %v8731_v30  ;;  %v9976_v57 = vld [vmem:[%s19955_s7 + $0xb0] sm:$0xff]  ;;  %v9982_v29 = vld [vmem:[%s19955_s7 + $0xe0] sm:$0xff]  ;;  %v9993_v30 = vld [vmem:[%s19955_s7 + $0x138] sm:$0xff] }
 0x6ff   : > { %11971 = vmatprep.subr.bf16.mxu1 %v11970_v11  ;;  %v12016_v17 = vpack.c.bf16 %v9977_v32, %v9976_v57 }
 0x701   : > { %11439 = vmatmul.mubr.msk.f32.gmra.mrb[44].mxu1 %vm357_vm11, %v19220_v8  ;;  %v11998_v8 = vpack.c.bf16 %v8734_v26, %v8733_v42  ;;  %v9995_v42 = vld [vmem:[%s19955_s7 + $0x148] sm:$0xff] }
 0x702   : > { %11441 = vmatprep.mubr.msk.f32.mxu1 %vm357_vm11, %v8476_v10  ;;  %11973 = vmatpush3.bf16.msra.mxu1 %v11970_v11  ;;  %v9978_v11 = vld [vmem:[%s19955_s7 + $0xc0] sm:$0xff]  ;;  %v9983_v10 = vld [vmem:[%s19955_s7 + $0xe8] sm:$0xff] }
 0x703   : > { %11975 = vmatprep.subr.bf16.mxu1 %v11974_v62  ;;  %v12019_v6 = vpack.c.bf16 %v9979_v43, %v9978_v11 }
 0x705   : > { %11442 = vmatmul.mubr.msk.f32.gmra.mrb[46].mxu1 %vm357_vm11, %v8475_v63  ;;  %v9980_v63 = vld [vmem:[%s19955_s7 + $0xd0] sm:$0xff] }
 0x706   : > { %11977 = vmatpush3.bf16.msra.mxu1 %v11974_v62  ;;  %11460 = vmatprep.mubr.msk.f32.mxu1 %vm357_vm11, %v19118_v7  ;;  %v8726_v7 = vld [vmem:[%s19955_s7 + $0x18] sm:$0xff] }
 0x707   : > { %11979 = vmatprep.subr.bf16.mxu1 %v11978_v31  ;;  %v11986_v20 = vpack.c.bf16 %v8726_v7, %v8725_v16  ;;  %v9981_v62 = vld [vmem:[%s19955_s7 + $0xd8] sm:$0xff]  ;;  %v9986_v16 = vld [vmem:[%s19955_s7 + $0x100] sm:$0xff]  ;;  %v9987_v7 = vld [vmem:[%s19955_s7 + $0x108] sm:$0xff] }
 0x708   : > { %v12022_v51 = vpack.c.bf16 %v9981_v62, %v9980_v63  ;;  %v10017_v63 = vld [vmem:[%s19955_s7 + $0x1f8] sm:$0xff] }
 0x70a   : > { %11981 = vmatpush3.bf16.msra.mxu1 %v11978_v31  ;;  %v12025_v31 = vpack.c.bf16 %v9983_v10, %v9982_v29 }
 0x70b   : > { %11982 = vmatprep.subr.bf16.mxu1 %v20646_v58 }
 0x70d   : > { %11461 = vmatmul.mubr.msk.f32.vlgmr.msra.gmra.mrb[42].mxu1 %vm357_vm11, %v19126_v15  ;;  %v8592_v15 = vsel %vm1557_vm1, %v19247_v33, %v8591_v12 }
 0x70e   : > { %11463 = vmatprep.mubr.msk.f32.mxu1 %vm357_vm11, %v19138_v35  ;;  %11984 = vmatpush3.bf16.msra.mxu1 %v11983_v23  ;;  %v11989_v35 = vpack.c.bf16 %v8728_v60, %v8727_v2  ;;  %v12028_v23 = vpack.c.bf16 %v9985_v21, %v9984_v28  ;;  %v9988_v2 = vld [vmem:[%s19955_s7 + $0x110] sm:$0xff]  ;;  %v9989_v60 = vld [vmem:[%s19955_s7 + $0x118] sm:$0xff]  ;;  %v10019_v28 = vld [vmem:[%s19955_s7 + $0x208] sm:$0xff] }
 0x70f   : > { %11985 = vmatprep.subr.bf16.mxu1 %v20646_v58 }
 0x711   : > { %11464 = vmatmul.mubr.msk.f32.gmra.mrb[44].mxu1 %vm357_vm11, %v19264_v27 }
 0x712   : > { %11466 = vmatprep.mubr.msk.f32.mxu1 %vm357_vm11, %v8592_v15  ;;  %11987 = vmatpush3.bf16.msra.mxu1 %v11986_v20  ;;  %v12034_v15 = vpack.c.bf16 %v9989_v60, %v9988_v2  ;;  %v10023_v2 = vld [vmem:[%s19955_s7 + $0x228] sm:$0xff] }
 0x713   : > { %11988 = vmatprep.subr.bf16.mxu1 %v20646_v58 }
 0x715   : > { %11467 = vmatmul.mubr.msk.f32.gmra.mrb[46].mxu1 %vm357_vm11, %v8591_v12  ;;  %v12031_v12 = vpack.c.bf16 %v9987_v7, %v9986_v16  ;;  %v10020_v16 = vld [vmem:[%s19955_s7 + $0x210] sm:$0xff]  ;;  %v10021_v7 = vld [vmem:[%s19955_s7 + $0x218] sm:$0xff] }
 0x716   : > { %11990 = vmatpush3.bf16.msra.mxu1 %v11989_v35  ;;  %11501 = vmatprep.mubr.msk.f32.mxu1 %vm12720_vm7, %v20213_v9  ;;  %v9990_v35 = vld [vmem:[%s19955_s7 + $0x120] sm:$0xff] }
 0x717   : > { %11991 = vmatprep.subr.bf16.mxu1 %v20646_v58  ;;  %v12037_v46 = vpack.c.bf16 %v9991_v52, %v9990_v35  ;;  %v10025_v35 = vld [vmem:[%s19955_s7 + $0x238] sm:$0xff] }
 0x71a   : > { %11993 = vmatpush3.bf16.msra.mxu1 %v11992_v3  ;;  %v9992_v3 = vld [vmem:[%s19955_s7 + $0x130] sm:$0xff] }
 0x71b   : > { %11994 = vmatprep.subr.bf16.mxu1 %v20646_v58  ;;  %v12040_v25 = vpack.c.bf16 %v9993_v30, %v9992_v3  ;;  %v10027_v3 = vld [vmem:[%s19955_s7 + $0x248] sm:$0xff] }
 0x71e   : > { %11996 = vmatpush3.bf16.msra.mxu1 %v11995_v38  ;;  %v9994_v38 = vld [vmem:[%s19955_s7 + $0x140] sm:$0xff] }
 0x71f   : > { %11997 = vmatprep.subr.bf16.mxu1 %v20646_v58  ;;  %v12043_v26 = vpack.c.bf16 %v9995_v42, %v9994_v38  ;;  %v10029_v38 = vld [vmem:[%s19955_s7 + $0x258] sm:$0xff] }
 0x722   : > { %11999 = vmatpush3.bf16.msra.mxu1 %v11998_v8  ;;  %v9996_v8 = vld [vmem:[%s19955_s7 + $0x150] sm:$0xff] }
 0x723   : > { %12000 = vmatprep.subr.bf16.mxu1 %v20646_v58  ;;  %v12046_v41 = vpack.c.bf16 %v9997_v24, %v9996_v8  ;;  %v10031_v8 = vld [vmem:[%s19955_s7 + $0x268] sm:$0xff] }
 0x726   : > { %12002 = vmatpush3.bf16.msra.mxu1 %v12001_v40  ;;  %v9998_v40 = vld [vmem:[%s19955_s7 + $0x160] sm:$0xff] }
 0x727   : > { %12003 = vmatprep.subr.bf16.mxu1 %v20646_v58  ;;  %v12049_v0 = vpack.c.bf16 %v9999_v36, %v9998_v40  ;;  %v10033_v40 = vld [vmem:[%s19955_s7 + $0x278] sm:$0xff] }
 0x72a   : > { %12005 = vmatpush3.bf16.msra.mxu1 %v12004_v47  ;;  %v10000_v47 = vld [vmem:[%s19955_s7 + $0x170] sm:$0xff] }
 0x72b   : > { %12006 = vmatprep.subr.bf16.mxu1 %v20646_v58 }
 0x7e0   : > { %v11462_v34 = vpop.f32.mrb[42].mxu1 }
 0x7e1   : > { %8699 = vst [vmem:[#allocation6 + $0x8] sm:$0xff] %v11462_v34  ;;  %v8663_v18 = vpop.f32.mrb[43].mxu1  ;;  %v10001_v34 = vld [vmem:[%s19955_s7 + $0x178] sm:$0xff] }
 0x7e2   : > { %8698 = vst [vmem:[#allocation6] sm:$0xff] %v8663_v18  ;;  %v12052_v18 = vpack.c.bf16 %v10001_v34, %v10000_v47  ;;  %v10035_v47 = vld [vmem:[%s19955_s7 + $0x288] sm:$0xff] }
 0x7e4   : > { %v11465_v59 = vpop.f32.mrb[44].mxu1 }
 0x7e5   : > { %8701 = vst [vmem:[#allocation6 + $0x18] sm:$0xff] %v11465_v59  ;;  %v8673_v33 = vpop.f32.mrb[45].mxu1  ;;  %v10002_v59 = vld [vmem:[%s19955_s7 + $0x180] sm:$0xff] }
 0x7e6   : > { %8700 = vst [vmem:[#allocation6 + $0x10] sm:$0xff] %v8673_v33  ;;  %v10003_v33 = vld [vmem:[%s19955_s7 + $0x188] sm:$0xff] }
 0x7e8   : > { %v11468_v56 = vpop.f32.mrb[46].mxu1  ;;  %v8710_v5 = vld [vmem:[#allocation6 + $0x8] ss:$2 sm:$0x7] }
 0x7e9   : > { %8703 = vst [vmem:[#allocation6 + $0x28] sm:$0x3f] %v11468_v56  ;;  %v8683_v53 = vpop.f32.mrb[47].mxu1  ;;  %v8706_v27 = vld [vmem:[#allocation6] ss:$2 sm:$0x7]  ;;  %v12055_v56 = vpack.c.bf16 %v10003_v33, %v10002_v59 }
 0x7ea   : > { %8702 = vst [vmem:[#allocation6 + $0x20] sm:$0xff] %v8683_v53  ;;  %v8708_v50 = vld [vmem:[#allocation6 + $0x1] ss:$2 sm:$0x7]  ;;  %v10004_v53 = vld [vmem:[%s19955_s7 + $0x190] sm:$0xff]  ;;  %v10037_v33 = vld [vmem:[%s19955_s7 + $0x298] sm:$0xff] }
 0x7eb   : > { %v8712_v1 = vld [vmem:[#allocation6 + $0x9] ss:$2 sm:$0x7]  ;;  %v8713_v14 = vmax.f32 %v8706_v27, %v8708_v50  ;;  %v10005_v27 = vld [vmem:[%s19955_s7 + $0x198] sm:$0xff]  ;;  %v10036_v59 = vld [vmem:[%s19955_s7 + $0x290] sm:$0xff] }
 0x7ec   : > { %v8714_v22 = vmax.f32 %v8710_v5, %v8712_v1  ;;  %v12058_v50 = vpack.c.bf16 %v10005_v27, %v10004_v53  ;;  %v10006_v1 = vld [vmem:[%s19955_s7 + $0x1a0] sm:$0xff]  ;;  %v8996_v57 = vld [vmem:[#allocation6 + $0x18] ss:$2 sm:$0x7]  ;;  %v10039_v53 = vld [vmem:[%s19955_s7 + $0x2a8] sm:$0xff] }
 0x7ed   : > { %v8998_v32 = vld [vmem:[#allocation6 + $0x19] ss:$2 sm:$0x7]  ;;  %v8994_v11 = vld [vmem:[#allocation6 + $0x11] ss:$2 sm:$0x7] }
 0x7ee   : > { %v8715_v55 = vmax.f32 %v8713_v14, %v8714_v22  ;;  %v10007_v14 = vld [vmem:[%s19955_s7 + $0x1a8] sm:$0xff] }
 0x7ef   : > { %v12061_v22 = vpack.c.bf16 %v10007_v14, %v10006_v1  ;;  %v10041_v1 = vld [vmem:[%s19955_s7 + $0x2b8] sm:$0xff] }
 0x7f0   : > { %v19424_v48 = vadd.f32 %v19421_v49, %v8715_v55  ;;  %v12064_v55 = vpack.c.bf16 %v10009_v39, %v10008_v37  ;;  %v10043_v37 = vld [vmem:[%s19955_s7 + $0x2c8] sm:$0xff] }
 0x7f2   : > { %11502 = vmatmul.mubr.f32.vlgmr.msra.gmra.mrb[48].mxu1 %v19424_v48  ;;  %v8828_v20 = vrot.slane %v19424_v48, 1  ;;  %v8918_v5 = vrot.slane %v19424_v48, 2  ;;  %v10011_v48 = vld [vmem:[%s19955_s7 + $0x1c8] sm:$0xff] }
 0x7f3   : > { %12008 = vmatpush3.bf16.msra.mxu1 %v12007_v4  ;;  %11536 = vmatprep.mubr.msk.f32.mxu1 %vm12720_vm7, %v20213_v9  ;;  %v10010_v4 = vld [vmem:[%s19955_s7 + $0x1c0] sm:$0xff] }
 0x7f4   : > { %12009 = vmatprep.subr.bf16.mxu1 %v20646_v58  ;;  %v12067_v19 = vpack.c.bf16 %v10011_v48, %v10010_v4  ;;  %v10045_v4 = vld [vmem:[%s19955_s7 + $0x2d8] sm:$0xff] }
 0x7f7   : > { %12011 = vmatpush3.bf16.msra.mxu1 %v12010_v13  ;;  %v10013_v13 = vld [vmem:[%s19955_s7 + $0x1d8] sm:$0xff] }
 0x7f8   : > { %12012 = vmatprep.subr.bf16.mxu1 %v20646_v58  ;;  %v12070_v45 = vpack.c.bf16 %v10013_v13, %v10012_v44  ;;  %v10047_v44 = vld [vmem:[%s19955_s7 + $0x2e8] sm:$0xff] }
 0x7fb   : > { %12014 = vmatpush3.bf16.msra.mxu1 %v12013_v54  ;;  %v10015_v54 = vld [vmem:[%s19955_s7 + $0x1e8] sm:$0xff] }
 0x7fc   : > { %12015 = vmatprep.subr.bf16.mxu1 %v20646_v58  ;;  %v12073_v43 = vpack.c.bf16 %v10015_v54, %v10014_v61  ;;  %v10049_v61 = vld [vmem:[%s19955_s7 + $0x2f8] sm:$0xff] }
 0x7ff   : > { %12017 = vmatpush3.bf16.msra.mxu1 %v12016_v17  ;;  %v8992_v17 = vld [vmem:[#allocation6 + $0x10] ss:$2 sm:$0x7] }
 0x800   : > { %12018 = vmatprep.subr.bf16.mxu1 %v20646_v58  ;;  %v8999_v62 = vmax.f32 %v8992_v17, %v8994_v11 }
 0x803   : > { %12020 = vmatpush3.bf16.msra.mxu1 %v12019_v6  ;;  %v10016_v6 = vld [vmem:[%s19955_s7 + $0x1f0] sm:$0xff] }
 0x804   : > { %12021 = vmatprep.subr.bf16.mxu1 %v20646_v58  ;;  %v12076_v29 = vpack.c.bf16 %v10017_v63, %v10016_v6  ;;  %v10053_v6 = vld [vmem:[%s19955_s7 + $0x318] sm:$0xff] }
 0x807   : > { %12023 = vmatpush3.bf16.msra.mxu1 %v12022_v51  ;;  %v9000_v51 = vmax.f32 %v8996_v57, %v8998_v32  ;;  %v10050_v57 = vld [vmem:[%s19955_s7 + $0x300] sm:$0xff]  ;;  %v10051_v32 = vld [vmem:[%s19955_s7 + $0x308] sm:$0xff] }
 0x808   : > { %12024 = vmatprep.subr.bf16.mxu1 %v20646_v58  ;;  %v12127_v17 = vpack.c.bf16 %v10051_v32, %v10050_v57  ;;  %v10085_v57 = vld [vmem:[%s19955_s7 + $0x418] sm:$0xff] }
 0x809   : > { %v9001_v10 = vmax.f32 %v8999_v62, %v9000_v51  ;;  %v10054_v62 = vld [vmem:[%s19955_s7 + $0x320] sm:$0xff]  ;;  %v10055_v51 = vld [vmem:[%s19955_s7 + $0x328] sm:$0xff] }
 0x80b   : > { %12026 = vmatpush3.bf16.msra.mxu1 %v12025_v31  ;;  %v10018_v31 = vld [vmem:[%s19955_s7 + $0x200] sm:$0xff] }
 0x80c   : > { %12027 = vmatprep.subr.bf16.mxu1 %v20646_v58  ;;  %v12079_v21 = vpack.c.bf16 %v10019_v28, %v10018_v31  ;;  %v10057_v31 = vld [vmem:[%s19955_s7 + $0x338] sm:$0xff] }
 0x80f   : > { %12029 = vmatpush3.bf16.msra.mxu1 %v12028_v23  ;;  %v19603_v23 = vadd.f32 %v19421_v49, %v9001_v10  ;;  %v10056_v10 = vld [vmem:[%s19955_s7 + $0x330] sm:$0xff] }
 0x810   : > { %12030 = vmatprep.subr.bf16.mxu1 %v20646_v58  ;;  %v12136_v28 = vpack.c.bf16 %v10057_v31, %v10056_v10  ;;  %v10092_v10 = vld [vmem:[%s19955_s7 + $0x450] sm:$0xff]  ;;  %v10093_v31 = vld [vmem:[%s19955_s7 + $0x458] sm:$0xff] }
 0x811   : > { %v9199_v11 = vrot.slane %v19603_v23, 2 }
 0x812   : > { %11537 = vmatmul.mubr.f32.vlgmr.msra.gmra.mrb[48].mxu1 %v8828_v20  ;;  %v10022_v20 = vld [vmem:[%s19955_s7 + $0x220] sm:$0xff] }
 0x813   : > { %12032 = vmatpush3.bf16.msra.mxu1 %v12031_v12  ;;  %11571 = vmatprep.mubr.msk.f32.mxu1 %vm12720_vm7, %v20213_v9  ;;  %v12082_v12 = vpack.c.bf16 %v10021_v7, %v10020_v16  ;;  %v12085_v60 = vpack.c.bf16 %v10023_v2, %v10022_v20  ;;  %v10060_v7 = vld [vmem:[%s19955_s7 + $0x350] sm:$0xff]  ;;  %v9277_v2 = vld [vmem:[#allocation6 + $0x28] ss:$2 sm:$0x7] }
 0x814   : > { %12033 = vmatprep.subr.bf16.mxu1 %v20646_v58 }
 0x817   : > { %12035 = vmatpush3.bf16.msra.mxu1 %v12034_v15  ;;  %v10024_v15 = vld [vmem:[%s19955_s7 + $0x230] sm:$0xff] }
 0x818   : > { %12036 = vmatprep.subr.bf16.mxu1 %v20646_v58  ;;  %v12088_v52 = vpack.c.bf16 %v10025_v35, %v10024_v15  ;;  %v10063_v15 = vld [vmem:[%s19955_s7 + $0x368] sm:$0xff] }
 0x819   : > { %v9279_v35 = vld [vmem:[#allocation6 + $0x29] ss:$2 sm:$0x7] }
 0x81b   : > { %12038 = vmatpush3.bf16.msra.mxu1 %v12037_v46  ;;  %v10026_v46 = vld [vmem:[%s19955_s7 + $0x240] sm:$0xff] }
 0x81c   : > { %12039 = vmatprep.subr.bf16.mxu1 %v20646_v58  ;;  %v12091_v30 = vpack.c.bf16 %v10027_v3, %v10026_v46  ;;  %v9275_v46 = vld [vmem:[#allocation6 + $0x21] ss:$2 sm:$0x7] }
 0x81f   : > { %12041 = vmatpush3.bf16.msra.mxu1 %v12040_v25  ;;  %v10028_v25 = vld [vmem:[%s19955_s7 + $0x250] sm:$0xff] }
 0x820   : > { %12042 = vmatprep.subr.bf16.mxu1 %v20646_v58  ;;  %v12094_v42 = vpack.c.bf16 %v10029_v38, %v10028_v25  ;;  %v10065_v25 = vld [vmem:[%s19955_s7 + $0x378] sm:$0xff] }
 0x823   : > { %12044 = vmatpush3.bf16.msra.mxu1 %v12043_v26  ;;  %v10030_v26 = vld [vmem:[%s19955_s7 + $0x260] sm:$0xff] }
 0x824   : > { %12045 = vmatprep.subr.bf16.mxu1 %v20646_v58  ;;  %v12097_v24 = vpack.c.bf16 %v10031_v8, %v10030_v26 }
 0x827   : > { %12047 = vmatpush3.bf16.msra.mxu1 %v12046_v41  ;;  %v10032_v41 = vld [vmem:[%s19955_s7 + $0x270] sm:$0xff] }
 0x828   : > { %12048 = vmatprep.subr.bf16.mxu1 %v20646_v58  ;;  %v12100_v36 = vpack.c.bf16 %v10033_v40, %v10032_v41  ;;  %v10067_v41 = vld [vmem:[%s19955_s7 + $0x388] sm:$0xff] }
 0x82b   : > { %12050 = vmatpush3.bf16.msra.mxu1 %v12049_v0  ;;  %v10034_v0 = vld [vmem:[%s19955_s7 + $0x280] sm:$0xff] }
 0x82c   : > { %12051 = vmatprep.subr.bf16.mxu1 %v20646_v58  ;;  %v12103_v34 = vpack.c.bf16 %v10035_v47, %v10034_v0  ;;  %v10068_v0 = vld [vmem:[%s19955_s7 + $0x390] sm:$0xff]  ;;  %v10069_v47 = vld [vmem:[%s19955_s7 + $0x398] sm:$0xff] }
 0x82f   : > { %12053 = vmatpush3.bf16.msra.mxu1 %v12052_v18  ;;  %v9109_v18 = vrot.slane %v19603_v23, 1 }
 0x830   : > { %12054 = vmatprep.subr.bf16.mxu1 %v20646_v58 }
 0x832   : > { %11572 = vmatmul.mubr.f32.vlgmr.msra.gmra.mrb[48].mxu1 %v8918_v5  ;;  %v10038_v5 = vld [vmem:[%s19955_s7 + $0x2a0] sm:$0xff] }
 0x833   : > { %12056 = vmatpush3.bf16.msra.mxu1 %v12055_v56  ;;  %11606 = vmatprep.mubr.msk.f32.mxu1 %vm12720_vm7, %v20213_v9  ;;  %v12106_v56 = vpack.c.bf16 %v10037_v33, %v10036_v59  ;;  %v12109_v27 = vpack.c.bf16 %v10039_v53, %v10038_v5  ;;  %v10072_v33 = vld [vmem:[%s19955_s7 + $0x3b0] sm:$0xff]  ;;  %v10074_v53 = vld [vmem:[%s19955_s7 + $0x3c0] sm:$0xff] }
 0x834   : > { %12057 = vmatprep.subr.bf16.mxu1 %v20646_v58 }
 0x837   : > { %12059 = vmatpush3.bf16.msra.mxu1 %v12058_v50  ;;  %v10040_v50 = vld [vmem:[%s19955_s7 + $0x2b0] sm:$0xff] }
 0x838   : > { %12060 = vmatprep.subr.bf16.mxu1 %v20646_v58  ;;  %v12112_v14 = vpack.c.bf16 %v10041_v1, %v10040_v50  ;;  %v10076_v1 = vld [vmem:[%s19955_s7 + $0x3d0] sm:$0xff] }
 0x83b   : > { %12062 = vmatpush3.bf16.msra.mxu1 %v12061_v22  ;;  %v10042_v22 = vld [vmem:[%s19955_s7 + $0x2c0] sm:$0xff] }
 0x83c   : > { %12063 = vmatprep.subr.bf16.mxu1 %v20646_v58  ;;  %v12115_v39 = vpack.c.bf16 %v10043_v37, %v10042_v22  ;;  %v10078_v37 = vld [vmem:[%s19955_s7 + $0x3e0] sm:$0xff] }
 0x83f   : > { %12065 = vmatpush3.bf16.msra.mxu1 %v12064_v55  ;;  %v10044_v55 = vld [vmem:[%s19955_s7 + $0x2d0] sm:$0xff] }
 0x840   : > { %12066 = vmatprep.subr.bf16.mxu1 %v20646_v58  ;;  %v12118_v48 = vpack.c.bf16 %v10045_v4, %v10044_v55  ;;  %v10080_v4 = vld [vmem:[%s19955_s7 + $0x3f0] sm:$0xff] }
 0x843   : > { %12068 = vmatpush3.bf16.msra.mxu1 %v12067_v19  ;;  %v10046_v19 = vld [vmem:[%s19955_s7 + $0x2e0] sm:$0xff] }
 0x844   : > { %12069 = vmatprep.subr.bf16.mxu1 %v20646_v58  ;;  %v12121_v13 = vpack.c.bf16 %v10047_v44, %v10046_v19  ;;  %v10082_v44 = vld [vmem:[%s19955_s7 + $0x400] sm:$0xff] }
 0x847   : > { %12071 = vmatpush3.bf16.msra.mxu1 %v12070_v45  ;;  %v10048_v45 = vld [vmem:[%s19955_s7 + $0x2f0] sm:$0xff] }
 0x848   : > { %12072 = vmatprep.subr.bf16.mxu1 %v20646_v58  ;;  %v12124_v54 = vpack.c.bf16 %v10049_v61, %v10048_v45 }
 0x84b   : > { %12074 = vmatpush3.bf16.msra.mxu1 %v12073_v43  ;;  %v10052_v43 = vld [vmem:[%s19955_s7 + $0x310] sm:$0xff] }
 0x84c   : > { %12075 = vmatprep.subr.bf16.mxu1 %v20646_v58  ;;  %v12130_v63 = vpack.c.bf16 %v10053_v6, %v10052_v43  ;;  %v10088_v6 = vld [vmem:[%s19955_s7 + $0x430] sm:$0xff] }
 0x84f   : > { %12077 = vmatpush3.bf16.msra.mxu1 %v12076_v29  ;;  %v12133_v29 = vpack.c.bf16 %v10055_v51, %v10054_v62  ;;  %v10090_v62 = vld [vmem:[%s19955_s7 + $0x440] sm:$0xff]  ;;  %v10091_v51 = vld [vmem:[%s19955_s7 + $0x448] sm:$0xff] }
 0x850   : > { %12078 = vmatprep.subr.bf16.mxu1 %v20646_v58 }
 0x852   : > { %11607 = vmatmul.mubr.f32.vlgmr.msra.gmra.mrb[48].mxu1 %v19603_v23  ;;  %v10059_v23 = vld [vmem:[%s19955_s7 + $0x348] sm:$0xff] }
 0x853   : > { %12080 = vmatpush3.bf16.msra.mxu1 %v12079_v21  ;;  %11641 = vmatprep.mubr.msk.f32.mxu1 %vm12720_vm7, %v20213_v9  ;;  %v10058_v21 = vld [vmem:[%s19955_s7 + $0x340] sm:$0xff] }
 0x854   : > { %12081 = vmatprep.subr.bf16.mxu1 %v20646_v58  ;;  %v12139_v16 = vpack.c.bf16 %v10059_v23, %v10058_v21  ;;  %v10094_v21 = vld [vmem:[%s19955_s7 + $0x460] sm:$0xff]  ;;  %v10095_v23 = vld [vmem:[%s19955_s7 + $0x468] sm:$0xff] }
 0x857   : > { %12083 = vmatpush3.bf16.msra.mxu1 %v12082_v12  ;;  %v10061_v12 = vld [vmem:[%s19955_s7 + $0x358] sm:$0xff] }
 0x858   : > { %12084 = vmatprep.subr.bf16.mxu1 %v20646_v58  ;;  %v12142_v20 = vpack.c.bf16 %v10061_v12, %v10060_v7  ;;  %v10096_v7 = vld [vmem:[%s19955_s7 + $0x470] sm:$0xff]  ;;  %v10097_v12 = vld [vmem:[%s19955_s7 + $0x478] sm:$0xff] }
 0x85b   : > { %12086 = vmatpush3.bf16.msra.mxu1 %v12085_v60  ;;  %v10062_v60 = vld [vmem:[%s19955_s7 + $0x360] sm:$0xff] }
 0x85c   : > { %12087 = vmatprep.subr.bf16.mxu1 %v20646_v58  ;;  %v12145_v3 = vpack.c.bf16 %v10063_v15, %v10062_v60  ;;  %v8705_v60 = vld [vmem:[%s19956_s8] sm:$0x1] }
 0x85f   : > { %12089 = vmatpush3.bf16.msra.mxu1 %v12088_v52  ;;  %v9273_v52 = vld [vmem:[#allocation6 + $0x20] ss:$2 sm:$0x7] }
 0x860   : > { %12090 = vmatprep.subr.bf16.mxu1 %v20646_v58  ;;  %v9280_v38 = vmax.f32 %v9273_v52, %v9275_v46 }
 0x863   : > { %12092 = vmatpush3.bf16.msra.mxu1 %v12091_v30  ;;  %v10064_v30 = vld [vmem:[%s19955_s7 + $0x370] sm:$0xff] }
 0x864   : > { %12093 = vmatprep.subr.bf16.mxu1 %v20646_v58  ;;  %v12148_v26 = vpack.c.bf16 %v10065_v25, %v10064_v30 }
 0x867   : > { %12095 = vmatpush3.bf16.msra.mxu1 %v12094_v42  ;;  %v9281_v42 = vmax.f32 %v9277_v2, %v9279_v35 }
 0x868   : > { %12096 = vmatprep.subr.bf16.mxu1 %v20646_v58 }
 0x869   : > { %v9282_v8 = vmax.f32 %v9280_v38, %v9281_v42 }
 0x86b   : > { %12098 = vmatpush3.bf16.msra.mxu1 %v12097_v24  ;;  %v10066_v24 = vld [vmem:[%s19955_s7 + $0x380] sm:$0xff] }
 0x86c   : > { %12099 = vmatprep.subr.bf16.mxu1 %v20646_v58  ;;  %v12151_v40 = vpack.c.bf16 %v10067_v41, %v10066_v24 }
 0x86f   : > { %12101 = vmatpush3.bf16.msra.mxu1 %v12100_v36  ;;  %v19783_v36 = vadd.f32 %v19421_v49, %v9282_v8  ;;  %v10070_v49 = vld [vmem:[%s19955_s7 + $0x3a0] sm:$0xff] }
 0x870   : > { %12102 = vmatprep.subr.bf16.mxu1 %v20646_v58 }
 0x871   : > { %v9390_v61 = vrot.slane %v19783_v36, 1  ;;  %v9480_v2 = vrot.slane %v19783_v36, 2 }
 0x872   : > { %11642 = vmatmul.mubr.f32.vlgmr.msra.gmra.mrb[48].mxu1 %v9109_v18  ;;  %v10071_v18 = vld [vmem:[%s19955_s7 + $0x3a8] sm:$0xff] }
 0x873   : > { %12104 = vmatpush3.bf16.msra.mxu1 %v12103_v34  ;;  %11676 = vmatprep.mubr.msk.f32.mxu1 %vm12720_vm7, %v20213_v9  ;;  %v12154_v34 = vpack.c.bf16 %v10069_v47, %v10068_v0  ;;  %v12157_v59 = vpack.c.bf16 %v10071_v18, %v10070_v49 }
 0x874   : > { %12105 = vmatprep.subr.bf16.mxu1 %v20646_v58 }
 0x877   : > { %12107 = vmatpush3.bf16.msra.mxu1 %v12106_v56  ;;  %v10073_v56 = vld [vmem:[%s19955_s7 + $0x3b8] sm:$0xff] }
 0x878   : > { %12108 = vmatprep.subr.bf16.mxu1 %v20646_v58  ;;  %v12160_v5 = vpack.c.bf16 %v10073_v56, %v10072_v33 }
 0x87b   : > { %12110 = vmatpush3.bf16.msra.mxu1 %v12109_v27  ;;  %v10075_v27 = vld [vmem:[%s19955_s7 + $0x3c8] sm:$0xff] }
 0x87c   : > { %12111 = vmatprep.subr.bf16.mxu1 %v20646_v58  ;;  %v12163_v50 = vpack.c.bf16 %v10075_v27, %v10074_v53 }
 0x87f   : > { %12113 = vmatpush3.bf16.msra.mxu1 %v12112_v14  ;;  %v10077_v14 = vld [vmem:[%s19955_s7 + $0x3d8] sm:$0xff] }
 0x880   : > { %12114 = vmatprep.subr.bf16.mxu1 %v20646_v58  ;;  %v12166_v22 = vpack.c.bf16 %v10077_v14, %v10076_v1 }
 0x883   : > { %12116 = vmatpush3.bf16.msra.mxu1 %v12115_v39  ;;  %v10079_v39 = vld [vmem:[%s19955_s7 + $0x3e8] sm:$0xff] }
 0x884   : > { %12117 = vmatprep.subr.bf16.mxu1 %v20646_v58  ;;  %v12169_v55 = vpack.c.bf16 %v10079_v39, %v10078_v37 }
 0x887   : > { %12119 = vmatpush3.bf16.msra.mxu1 %v12118_v48  ;;  %v10081_v48 = vld [vmem:[%s19955_s7 + $0x3f8] sm:$0xff] }
 0x888   : > { %12120 = vmatprep.subr.bf16.mxu1 %v20646_v58  ;;  %v12172_v19 = vpack.c.bf16 %v10081_v48, %v10080_v4 }
 0x88b   : > { %12122 = vmatpush3.bf16.msra.mxu1 %v12121_v13  ;;  %v10083_v13 = vld [vmem:[%s19955_s7 + $0x408] sm:$0xff] }
 0x88c   : > { %12123 = vmatprep.subr.bf16.mxu1 %v20646_v58  ;;  %v12175_v45 = vpack.c.bf16 %v10083_v13, %v10082_v44 }
 0x88f   : > { %12125 = vmatpush3.bf16.msra.mxu1 %v12124_v54  ;;  %v10084_v54 = vld [vmem:[%s19955_s7 + $0x410] sm:$0xff] }
 0x890   : > { %12126 = vmatprep.subr.bf16.mxu1 %v20646_v58  ;;  %v12178_v32 = vpack.c.bf16 %v10085_v57, %v10084_v54 }
 0x892   : > { %11677 = vmatmul.mubr.f32.vlgmr.msra.gmra.mrb[48].mxu1 %v9199_v11  ;;  %v10087_v11 = vld [vmem:[%s19955_s7 + $0x428] sm:$0xff] }
 0x893   : > { %12128 = vmatpush3.bf16.msra.mxu1 %v12127_v17  ;;  %11711 = vmatprep.mubr.msk.f32.mxu1 %vm12720_vm7, %v20213_v9  ;;  %v10086_v17 = vld [vmem:[%s19955_s7 + $0x420] sm:$0xff] }
 0x894   : > { %12129 = vmatprep.subr.bf16.mxu1 %v20646_v58  ;;  %v12181_v43 = vpack.c.bf16 %v10087_v11, %v10086_v17 }
 0x897   : > { %12131 = vmatpush3.bf16.msra.mxu1 %v12130_v63 }
 0x898   : > { %12132 = vmatprep.subr.bf16.mxu1 %v20646_v58 }
 0x89b   : > { %12134 = vmatpush3.bf16.msra.mxu1 %v12133_v29  ;;  %v12187_v29 = vpack.c.bf16 %v10091_v51, %v10090_v62 }
 0x89c   : > { %12135 = vmatprep.subr.bf16.mxu1 %v20646_v58 }
 0x89f   : > { %12137 = vmatpush3.bf16.msra.mxu1 %v12136_v28  ;;  %v12190_v28 = vpack.c.bf16 %v10093_v31, %v10092_v10 }
 0x8a0   : > { %12138 = vmatprep.subr.bf16.mxu1 %v20646_v58 }
 0x8a3   : > { %12140 = vmatpush3.bf16.msra.mxu1 %v12139_v16  ;;  %v12193_v16 = vpack.c.bf16 %v10095_v23, %v10094_v21 }
 0x8a4   : > { %12141 = vmatprep.subr.bf16.mxu1 %v20646_v58 }
 0x8a7   : > { %12143 = vmatpush3.bf16.msra.mxu1 %v12142_v20  ;;  %v12196_v20 = vpack.c.bf16 %v10097_v12, %v10096_v7 }
 0x8a8   : > { %12144 = vmatprep.subr.bf16.mxu1 %v20646_v58 }
 0x8ab   : > { %12146 = vmatpush3.bf16.msra.mxu1 %v12145_v3 }
 0x8ac   : > { %12147 = vmatprep.subr.bf16.mxu1 %v20646_v58 }
 0x8af   : > { %12149 = vmatpush3.bf16.msra.mxu1 %v12148_v26 }
 0x8b0   : > { %12150 = vmatprep.subr.bf16.mxu1 %v20646_v58 }
 0x8b2   : > { %11712 = vmatmul.mubr.f32.vlgmr.msra.gmra.mrb[48].mxu1 %v19783_v36 }
 0x8b3   : > { %12152 = vmatpush3.bf16.msra.mxu1 %v12151_v40  ;;  %11746 = vmatprep.mubr.msk.f32.mxu1 %vm12720_vm7, %v20213_v9 }
 0x8b4   : > { %12153 = vmatprep.subr.bf16.mxu1 %v20646_v58 }
 0x8b7   : > { %12155 = vmatpush3.bf16.msra.mxu1 %v12154_v34 }
 0x8b8   : > { %12156 = vmatprep.subr.bf16.mxu1 %v20646_v58 }
 0x8bb   : > { %12158 = vmatpush3.bf16.msra.mxu1 %v12157_v59 }
 0x8bc   : > { %12159 = vmatprep.subr.bf16.mxu1 %v20646_v58 }
 0x8bf   : > { %12161 = vmatpush3.bf16.msra.mxu1 %v12160_v5 }
 0x8c0   : > { %12162 = vmatprep.subr.bf16.mxu1 %v20646_v58 }
 0x8c3   : > { %12164 = vmatpush3.bf16.msra.mxu1 %v12163_v50 }
 0x8c4   : > { %12165 = vmatprep.subr.bf16.mxu1 %v20646_v58 }
 0x8c7   : > { %12167 = vmatpush3.bf16.msra.mxu1 %v12166_v22 }
 0x8c8   : > { %12168 = vmatprep.subr.bf16.mxu1 %v20646_v58 }
 0x8cb   : > { %12170 = vmatpush3.bf16.msra.mxu1 %v12169_v55 }
 0x8cc   : > { %12171 = vmatprep.subr.bf16.mxu1 %v20646_v58 }
 0x8cf   : > { %12173 = vmatpush3.bf16.msra.mxu1 %v12172_v19 }
 0x8d0   : > { %12174 = vmatprep.subr.bf16.mxu1 %v20646_v58 }
 0x8d2   : > { %11747 = vmatmul.mubr.f32.vlgmr.msra.gmra.mrb[48].mxu1 %v9390_v61 }
 0x8d3   : > { %12176 = vmatpush3.bf16.msra.mxu1 %v12175_v45  ;;  %11781 = vmatprep.mubr.msk.f32.mxu1 %vm12720_vm7, %v20213_v9  ;;  %v10089_v9 = vld [vmem:[%s19955_s7 + $0x438] sm:$0xff] }
 0x8d4   : > { %12177 = vmatprep.subr.bf16.mxu1 %v20646_v58  ;;  %v12184_v63 = vpack.c.bf16 %v10089_v9, %v10088_v6 }
 0x8d7   : > { %12179 = vmatpush3.bf16.msra.mxu1 %v12178_v32 }
 0x8d8   : > { %12180 = vmatprep.subr.bf16.mxu1 %v20646_v58 }
 0x8db   : > { %12182 = vmatpush3.bf16.msra.mxu1 %v12181_v43 }
 0x8dc   : > { %12183 = vmatprep.subr.bf16.mxu1 %v20646_v58 }
 0x8df   : > { %12185 = vmatpush3.bf16.msra.mxu1 %v12184_v63 }
 0x8e0   : > { %12186 = vmatprep.subr.bf16.mxu1 %v20646_v58 }
 0x8e3   : > { %12188 = vmatpush3.bf16.msra.mxu1 %v12187_v29 }
 0x8e4   : > { %12189 = vmatprep.subr.bf16.mxu1 %v20646_v58 }
 0x8e7   : > { %12191 = vmatpush3.bf16.msra.mxu1 %v12190_v28 }
 0x8e8   : > { %12192 = vmatprep.subr.bf16.mxu1 %v20646_v58 }
 0x8eb   : > { %12194 = vmatpush3.bf16.msra.mxu1 %v12193_v16 }
 0x8ec   : > { %12195 = vmatprep.subr.bf16.mxu1 %v20646_v58 }
 0x8ef   : > { %12197 = vmatpush3.bf16.msra.mxu1 %v12196_v20 }
 0x8f2   : > { %11782 = vmatmul.mubr.f32.vlgmr.msra.gmra.mrb[48].mxu1 %v9480_v2 }
 0x9c5   : > { %v9548_v15 = vpop.f32.mrb[48].mxu1 }
 0x9c6   : > { %v12219_v35 = vadd.f32 %v9548_v15, %v8705_v60  ;;  %v11783_v52 = vpop.f32.mrb[49].mxu1 }
 0x9c8   : > { %9553 = vst [vmem:[%s324_s17] sm:$0x1] %v12219_v35 }
 0x9c9   : > { %12666 = shalt.err (!%p12663_p3)
}
 0x9ca   : > { %s12667_s28 = scalar_lea.hbm %s19906_s24, 16  ;;  %s12671_s17 = scalar_lea.hbm %s19957_s9, 32 }
 0x9cb   : > { %p12668_p4 = scmp.ne.s32.totalorder %s19906_s24, %s12667_s28  ;;  %p12672_p9 = scmp.lt.u32.totalorder %s19906_s24, %s19957_s9 }
 0x9cc   : > { %p12673_p10 = scmp.lt.u32.totalorder %s12671_s17, %s12667_s28  ;;  %p12675_p12 = scmp.lt.u32.totalorder %s12667_s28, %s19906_s24 }
 0x9cd   : > { %p12669_p7 = pnand %p12668_p4, %p12810_p5 }
 0x9ce   : > { %p12674_p11 = por %p12673_p10, %p12672_p9 }
 0x9cf   : > { %p12670_p8 = pneg %p12669_p7 }
 0x9d0   : > { %p12676_p13 = por %p12675_p12, %p12674_p11 }
 0x9d2   : > { %p12677_p0 = pnand %p12676_p13, %p12670_p8 }
 0x9d4   : > { %12680 = shalt.err (!%p12677_p0)
}
 0x9d5   : > { %12579 = dma.vmem_to_hbm [thread:$0]  (%p12810_p5), %s19908_s21, 16, %s19906_s24, %s9555_s25  }
 0x9d6 PF: > { %p12585_p1 = scmp.ge.s32.totalorder %s12715_s12, 2  ;;  %s9579_s26 = sand.u32 1, %s12703_s30  }
 0x9d7   : > { %s9580_s13 = scalar_lea.sflag [#allocation8], %s9579_s26 }
 0x9d8   : > { %p12582_p2 = pnand %p12585_p1, %p12814_p6 }
 0x9da   : > { %12698 = dma.done.wait (!%p12582_p2), %s9580_s13, 16  }
 0x9db   : > { %12700 = vsyncadd (!%p12582_p2), %s9580_s13, 4294967280  ;;  %p19_p3 = scmp.ge.s32.totalorder %s12797_s15, 4   ;;  %s20716_s30 = smov %s12707_s10 }
 0x9dc   : > { %s20717_s10 = smov %s12711_s11  ;;  %s20718_s11 = smov %s12808_s18 }
 0x9dd   : > { %s20719_s12 = smov %s12797_s15  ;;  %21 = sbr.rel (!%p19_p3) target bundleno = 3 (0x3), region = 244 }
 0x9e4   :  { %9584 = vsyncpa [#allocation8], 1 }
 0x9e5   :  { %9586 = vsyncpa [#allocation8 + $0x1], 1 }

</bundles_post_ra>
